<compile_context>
chip_gen: v7x
topology: tpu7x:2x2x1
jax: 0.10.0
libtpu: 0.0.40
codegen_flags: <defaults>
</compile_context>

<pallas_src>
import functools
import numpy as np

import jax
import jax.numpy as jnp
from jax.experimental import pallas as pl
from jax.experimental.pallas import tpu as pltpu


def _round_up(x, m):
    return (x + m - 1) // m * m


# ----------------------------------------------------------------------------
# Fused-MLP kernel: one M tile, all layers chained through VMEM scratch.
# refs layout: x, (w0, b0), ..., (w_{L-1}, b_{L-1}), out, h0, ..., h_{L-2}
# ----------------------------------------------------------------------------
def _fused_mlp_kernel(*refs, n_layers):
    x_ref = refs[0]
    o_ref = refs[1 + 2 * n_layers]
    h_refs = refs[2 + 2 * n_layers:]

    h = x_ref[...]                                   # (tm, Kp0) bf16
    for i in range(n_layers):
        w_ref = refs[1 + 2 * i]                      # (Kp_i, Np_i) bf16
        b_ref = refs[2 + 2 * i]                      # (1, Np_i)   f32
        acc = jnp.dot(h, w_ref[...],
                      preferred_element_type=jnp.float32) + b_ref[...]
        if i < n_layers - 1:
            h_refs[i][...] = jnp.maximum(acc, 0.0).astype(h_refs[i].dtype)
            h = h_refs[i][...]                       # bf16 feed to next MXU pass
        else:
            o_ref[...] = acc.astype(o_ref.dtype)     # final layer: no ReLU


# ----------------------------------------------------------------------------
# One-time parameter preparation + fused forward builder
# ----------------------------------------------------------------------------
def build_fused_mlp(params, *, tm_target=None, out_dtype=jnp.float32):
    """Pad / transpose / bf16-cast all Linear layers once; return forward fn."""
    ws, bs = params['ws'], params['bs']
    n_layers = len(ws)
    in_dim = ws[0].shape[1]
    out_dim = ws[-1].shape[0]

    kp = _round_up(in_dim, 128)
    kp0 = kp
    wps, bps, dims = [], [], []
    for w, b in zip(ws, bs):
        N, K = w.shape                               # torch-style (out, in)
        assert _round_up(K, 128) == kp, (K, kp)
        np_ = _round_up(N, 128)
        wps.append(jnp.pad(jnp.asarray(w).T,
                           ((0, kp - K), (0, np_ - N))).astype(jnp.bfloat16))
        bps.append(jnp.pad(jnp.asarray(b, jnp.float32),
                           (0, np_ - N)).reshape(1, np_))
        dims.append((kp, np_))
        kp = np_                                     # next layer's padded K
    np_last = dims[-1][1]

    weight_bytes = sum(int(w.size) * 2 for w in wps) + sum(int(b.size) * 4
                                                           for b in bps)

    def forward(x):
        lead = x.shape[:-1]
        M = int(np.prod(lead)) if lead else 1
        xf = x.reshape(M, in_dim)

        Mp = _round_up(M, 16)                        # bf16 sublane packing
        if tm_target is not None:
            tm = min(tm_target, Mp)
        else:
            tm = 512 if Mp >= 2048 else min(256, Mp) # >=2 tiles at test size
        Mp = _round_up(Mp, tm)

        xp = jnp.pad(xf.astype(jnp.bfloat16), ((0, Mp - M), (0, kp0 - in_dim)))

        in_specs = [pl.BlockSpec((tm, kp0), lambda m: (m, 0))]
        inputs = [xp]
        for (kpd, npd), wp, bp in zip(dims, wps, bps):
            in_specs.append(pl.BlockSpec((kpd, npd), lambda m: (0, 0)))
            in_specs.append(pl.BlockSpec((1, npd), lambda m: (0, 0)))
            inputs.extend([wp, bp])

        scratch = [pltpu.VMEM((tm, dims[i][1]), jnp.bfloat16)
                   for i in range(n_layers - 1)]

        flops = 2 * Mp * sum(k * n for k, n in dims)
        bytes_accessed = (int(xp.size) * 2 + weight_bytes
                          + Mp * np_last * jnp.dtype(out_dtype).itemsize)

        out = pl.pallas_call(
            functools.partial(_fused_mlp_kernel, n_layers=n_layers),
            out_shape=jax.ShapeDtypeStruct((Mp, np_last), out_dtype),
            grid_spec=pltpu.PrefetchScalarGridSpec(
                num_scalar_prefetch=0,
                grid=(Mp // tm,),
                in_specs=in_specs,
                out_specs=pl.BlockSpec((tm, np_last), lambda m: (m, 0)),
                scratch_shapes=scratch),
            compiler_params=pltpu.CompilerParams(
                dimension_semantics=("parallel",)),
            cost_estimate=pl.CostEstimate(flops=flops, transcendentals=0,
                                          bytes_accessed=bytes_accessed),
        )(*inputs)

        return out[:M, :out_dim].reshape(*lead, out_dim)

    return forward


# ----------------------------------------------------------------------------
# Parameters + pure-JAX reference
# ----------------------------------------------------------------------------
def make_mlp_params(key, in_dim, out_dim, hidden_list):
    """Deterministic torch-style parameters (weights stored as (out, in))."""
    ws, bs = [], []
    last = in_dim
    for hdim in list(hidden_list) + [out_dim]:
        key, k1, k2 = jax.random.split(key, 3)
        bound = 1.0 / np.sqrt(last)
        ws.append(jax.random.uniform(k1, (hdim, last), jnp.float32,
                                     -bound, bound))
        bs.append(jax.random.uniform(k2, (hdim,), jnp.float32, -bound, bound))
        last = hdim
    return {'ws': ws, 'bs': bs}


def mlp_reference(params, x):
    """Pure-JAX f32 reference of the torch MLP forward."""
    lead = x.shape[:-1]
    y = x.reshape(-1, x.shape[-1])
    n = len(params['ws'])
    for i, (w, b) in enumerate(zip(params['ws'], params['bs'])):
        y = y @ w.T + b
        if i < n - 1:
            y = jnp.maximum(y, 0.0)
    return y.reshape(*lead, -1)


# ----------------------------------------------------------------------------
if __name__ == "__main__":
    # GPGD imnet-style configuration: in = FEAT(128) + 2*GUIDE(128) + 2 = 386
    in_dim, out_dim = 386, 2
    hidden_list = [1024, 512, 256, 128]

    key = jax.random.PRNGKey(0)
    kp, kx = jax.random.split(key)
    params = make_mlp_params(kp, in_dim, out_dim, hidden_list)

    fwd = jax.jit(build_fused_mlp(params))   # one-time pad/transpose/bf16 cast

    B, N = 2, 256                            # (batch, query points) -> M = 512
    x = jax.random.normal(kx, (B, N, in_dim), jnp.float32)

    out = jax.block_until_ready(fwd(x))

    assert out.shape == (B, N, out_dim), out.shape
    assert bool(jnp.isfinite(out).all())

    ref = mlp_reference(params, x)
    err = float(jnp.max(jnp.abs(out - ref)) / (jnp.max(jnp.abs(ref)) + 1e-6))
    assert err < 0.1, f"max relative error too high: {err}"

    print("KERNEL_OK")
</pallas_src>

<mosaic_0001>
module attributes {stable_mosaic.version = 11 : i64} {
  func.func @_fused_mlp_kernel(%arg0: i32, %arg1: memref<256x512xbf16, #tpu.memory_space<vmem>>, %arg2: memref<512x1024xbf16, #tpu.memory_space<vmem>>, %arg3: memref<1x1024xf32, #tpu.memory_space<vmem>>, %arg4: memref<1024x512xbf16, #tpu.memory_space<vmem>>, %arg5: memref<1x512xf32, #tpu.memory_space<vmem>>, %arg6: memref<512x256xbf16, #tpu.memory_space<vmem>>, %arg7: memref<1x256xf32, #tpu.memory_space<vmem>>, %arg8: memref<256x128xbf16, #tpu.memory_space<vmem>>, %arg9: memref<1x128xf32, #tpu.memory_space<vmem>>, %arg10: memref<128x128xbf16, #tpu.memory_space<vmem>>, %arg11: memref<1x128xf32, #tpu.memory_space<vmem>>, %arg12: memref<256x128xf32, #tpu.memory_space<vmem>>, %arg13: memref<256x1024xbf16, #tpu.memory_space<vmem>>, %arg14: memref<256x512xbf16, #tpu.memory_space<vmem>>, %arg15: memref<256x256xbf16, #tpu.memory_space<vmem>>, %arg16: memref<256x128xbf16, #tpu.memory_space<vmem>>) attributes {dimension_semantics = [#tpu.dimension_semantics<parallel>], iteration_bounds = array<i64: 2>, scalar_prefetch = 0 : i64, scratch_operands = 4 : i64, tpu.core_type = #tpu.core_type<tc>, window_params = [{transform_indices = @transform_0, window_bounds = array<i64: 256, 512>}, {pipeline_mode = #tpu.pipeline_mode<synchronous>, transform_indices = @transform_1, window_bounds = array<i64: 512, 1024>}, {pipeline_mode = #tpu.pipeline_mode<synchronous>, transform_indices = @transform_2, window_bounds = array<i64: 1, 1024>}, {pipeline_mode = #tpu.pipeline_mode<synchronous>, transform_indices = @transform_3, window_bounds = array<i64: 1024, 512>}, {pipeline_mode = #tpu.pipeline_mode<synchronous>, transform_indices = @transform_4, window_bounds = array<i64: 1, 512>}, {pipeline_mode = #tpu.pipeline_mode<synchronous>, transform_indices = @transform_5, window_bounds = array<i64: 512, 256>}, {pipeline_mode = #tpu.pipeline_mode<synchronous>, transform_indices = @transform_6, window_bounds = array<i64: 1, 256>}, {pipeline_mode = #tpu.pipeline_mode<synchronous>, transform_indices = @transform_7, window_bounds = array<i64: 256, 128>}, {pipeline_mode = #tpu.pipeline_mode<synchronous>, transform_indices = @transform_8, window_bounds = array<i64: 1, 128>}, {pipeline_mode = #tpu.pipeline_mode<synchronous>, transform_indices = @transform_9, window_bounds = array<i64: 128, 128>}, {pipeline_mode = #tpu.pipeline_mode<synchronous>, transform_indices = @transform_10, window_bounds = array<i64: 1, 128>}, {transform_indices = @transform_11, window_bounds = array<i64: 256, 128>}]} {
    %c0 = arith.constant 0 : index
    %c0_0 = arith.constant 0 : index
    %0 = vector.load %arg1[%c0, %c0_0] : memref<256x512xbf16, #tpu.memory_space<vmem>>, vector<256x512xbf16>
    %c0_1 = arith.constant 0 : index
    %c0_2 = arith.constant 0 : index
    %1 = vector.load %arg2[%c0_1, %c0_2] : memref<512x1024xbf16, #tpu.memory_space<vmem>>, vector<512x1024xbf16>
    %cst = arith.constant dense<0.000000e+00> : vector<256x1024xf32>
    %2 = tpu.matmul %0, %1, %cst {dimension_numbers = #tpu.dot_dimension_numbers<[1], [0], [0], [1], [0, 0, 1, 1], [], []>} : vector<256x512xbf16>, vector<512x1024xbf16>, vector<256x1024xf32> -> vector<256x1024xf32>
    %c0_3 = arith.constant 0 : index
    %c0_4 = arith.constant 0 : index
    %3 = vector.load %arg3[%c0_3, %c0_4] : memref<1x1024xf32, #tpu.memory_space<vmem>>, vector<1x1024xf32>
    %4 = vector.broadcast %3 : vector<1x1024xf32> to vector<256x1024xf32>
    %5 = arith.addf %2, %4 : vector<256x1024xf32>
    %cst_5 = arith.constant 0.000000e+00 : f32
    %6 = vector.broadcast %cst_5 : f32 to vector<256x1024xf32>
    %7 = arith.maximumf %5, %6 : vector<256x1024xf32>
    %8 = arith.truncf %7 : vector<256x1024xf32> to vector<256x1024xbf16>
    %c0_6 = arith.constant 0 : index
    %c0_7 = arith.constant 0 : index
    %9 = vector.load %arg13[%c0_6, %c0_7] : memref<256x1024xbf16, #tpu.memory_space<vmem>>, vector<256x1024xbf16>
    tpu.vector_store %arg13[%c0_6, %c0_7], %8 {strides = array<i32>} : memref<256x1024xbf16, #tpu.memory_space<vmem>>, vector<256x1024xbf16>,
    %c0_8 = arith.constant 0 : index
    %c0_9 = arith.constant 0 : index
    %10 = vector.load %arg13[%c0_8, %c0_9] : memref<256x1024xbf16, #tpu.memory_space<vmem>>, vector<256x1024xbf16>
    %c0_10 = arith.constant 0 : index
    %c0_11 = arith.constant 0 : index
    %11 = vector.load %arg4[%c0_10, %c0_11] : memref<1024x512xbf16, #tpu.memory_space<vmem>>, vector<1024x512xbf16>
    %cst_12 = arith.constant dense<0.000000e+00> : vector<256x512xf32>
    %12 = tpu.matmul %10, %11, %cst_12 {dimension_numbers = #tpu.dot_dimension_numbers<[1], [0], [0], [1], [0, 0, 1, 1], [], []>} : vector<256x1024xbf16>, vector<1024x512xbf16>, vector<256x512xf32> -> vector<256x512xf32>
    %c0_13 = arith.constant 0 : index
    %c0_14 = arith.constant 0 : index
    %13 = vector.load %arg5[%c0_13, %c0_14] : memref<1x512xf32, #tpu.memory_space<vmem>>, vector<1x512xf32>
    %14 = vector.broadcast %13 : vector<1x512xf32> to vector<256x512xf32>
    %15 = arith.addf %12, %14 : vector<256x512xf32>
    %cst_15 = arith.constant 0.000000e+00 : f32
    %16 = vector.broadcast %cst_15 : f32 to vector<256x512xf32>
    %17 = arith.maximumf %15, %16 : vector<256x512xf32>
    %18 = arith.truncf %17 : vector<256x512xf32> to vector<256x512xbf16>
    %c0_16 = arith.constant 0 : index
    %c0_17 = arith.constant 0 : index
    %19 = vector.load %arg14[%c0_16, %c0_17] : memref<256x512xbf16, #tpu.memory_space<vmem>>, vector<256x512xbf16>
    tpu.vector_store %arg14[%c0_16, %c0_17], %18 {strides = array<i32>} : memref<256x512xbf16, #tpu.memory_space<vmem>>, vector<256x512xbf16>,
    %c0_18 = arith.constant 0 : index
    %c0_19 = arith.constant 0 : index
    %20 = vector.load %arg14[%c0_18, %c0_19] : memref<256x512xbf16, #tpu.memory_space<vmem>>, vector<256x512xbf16>
    %c0_20 = arith.constant 0 : index
    %c0_21 = arith.constant 0 : index
    %21 = vector.load %arg6[%c0_20, %c0_21] : memref<512x256xbf16, #tpu.memory_space<vmem>>, vector<512x256xbf16>
    %cst_22 = arith.constant dense<0.000000e+00> : vector<256x256xf32>
    %22 = tpu.matmul %20, %21, %cst_22 {dimension_numbers = #tpu.dot_dimension_numbers<[1], [0], [0], [1], [0, 0, 1, 1], [], []>} : vector<256x512xbf16>, vector<512x256xbf16>, vector<256x256xf32> -> vector<256x256xf32>
    %c0_23 = arith.constant 0 : index
    %c0_24 = arith.constant 0 : index
    %23 = vector.load %arg7[%c0_23, %c0_24] : memref<1x256xf32, #tpu.memory_space<vmem>>, vector<1x256xf32>
    %24 = vector.broadcast %23 : vector<1x256xf32> to vector<256x256xf32>
    %25 = arith.addf %22, %24 : vector<256x256xf32>
    %cst_25 = arith.constant 0.000000e+00 : f32
    %26 = vector.broadcast %cst_25 : f32 to vector<256x256xf32>
    %27 = arith.maximumf %25, %26 : vector<256x256xf32>
    %28 = arith.truncf %27 : vector<256x256xf32> to vector<256x256xbf16>
    %c0_26 = arith.constant 0 : index
    %c0_27 = arith.constant 0 : index
    %29 = vector.load %arg15[%c0_26, %c0_27] : memref<256x256xbf16, #tpu.memory_space<vmem>>, vector<256x256xbf16>
    tpu.vector_store %arg15[%c0_26, %c0_27], %28 {strides = array<i32>} : memref<256x256xbf16, #tpu.memory_space<vmem>>, vector<256x256xbf16>,
    %c0_28 = arith.constant 0 : index
    %c0_29 = arith.constant 0 : index
    %30 = vector.load %arg15[%c0_28, %c0_29] : memref<256x256xbf16, #tpu.memory_space<vmem>>, vector<256x256xbf16>
    %c0_30 = arith.constant 0 : index
    %c0_31 = arith.constant 0 : index
    %31 = vector.load %arg8[%c0_30, %c0_31] : memref<256x128xbf16, #tpu.memory_space<vmem>>, vector<256x128xbf16>
    %cst_32 = arith.constant dense<0.000000e+00> : vector<256x128xf32>
    %32 = tpu.matmul %30, %31, %cst_32 {dimension_numbers = #tpu.dot_dimension_numbers<[1], [0], [0], [1], [0, 0, 1, 1], [], []>} : vector<256x256xbf16>, vector<256x128xbf16>, vector<256x128xf32> -> vector<256x128xf32>
    %c0_33 = arith.constant 0 : index
    %c0_34 = arith.constant 0 : index
    %33 = vector.load %arg9[%c0_33, %c0_34] : memref<1x128xf32, #tpu.memory_space<vmem>>, vector<1x128xf32>
    %34 = vector.broadcast %33 : vector<1x128xf32> to vector<256x128xf32>
    %35 = arith.addf %32, %34 : vector<256x128xf32>
    %cst_35 = arith.constant 0.000000e+00 : f32
    %36 = vector.broadcast %cst_35 : f32 to vector<256x128xf32>
    %37 = arith.maximumf %35, %36 : vector<256x128xf32>
    %38 = arith.truncf %37 : vector<256x128xf32> to vector<256x128xbf16>
    %c0_36 = arith.constant 0 : index
    %c0_37 = arith.constant 0 : index
    %39 = vector.load %arg16[%c0_36, %c0_37] : memref<256x128xbf16, #tpu.memory_space<vmem>>, vector<256x128xbf16>
    tpu.vector_store %arg16[%c0_36, %c0_37], %38 {strides = array<i32>} : memref<256x128xbf16, #tpu.memory_space<vmem>>, vector<256x128xbf16>,
    %c0_38 = arith.constant 0 : index
    %c0_39 = arith.constant 0 : index
    %40 = vector.load %arg16[%c0_38, %c0_39] : memref<256x128xbf16, #tpu.memory_space<vmem>>, vector<256x128xbf16>
    %c0_40 = arith.constant 0 : index
    %c0_41 = arith.constant 0 : index
    %41 = vector.load %arg10[%c0_40, %c0_41] : memref<128x128xbf16, #tpu.memory_space<vmem>>, vector<128x128xbf16>
    %cst_42 = arith.constant dense<0.000000e+00> : vector<256x128xf32>
    %42 = tpu.matmul %40, %41, %cst_42 {dimension_numbers = #tpu.dot_dimension_numbers<[1], [0], [0], [1], [0, 0, 1, 1], [], []>} : vector<256x128xbf16>, vector<128x128xbf16>, vector<256x128xf32> -> vector<256x128xf32>
    %c0_43 = arith.constant 0 : index
    %c0_44 = arith.constant 0 : index
    %43 = vector.load %arg11[%c0_43, %c0_44] : memref<1x128xf32, #tpu.memory_space<vmem>>, vector<1x128xf32>
    %44 = vector.broadcast %43 : vector<1x128xf32> to vector<256x128xf32>
    %45 = arith.addf %42, %44 : vector<256x128xf32>
    %c0_45 = arith.constant 0 : index
    %c0_46 = arith.constant 0 : index
    %46 = vector.load %arg12[%c0_45, %c0_46] : memref<256x128xf32, #tpu.memory_space<vmem>>, vector<256x128xf32>
    tpu.vector_store %arg12[%c0_45, %c0_46], %45 {strides = array<i32>} : memref<256x128xf32, #tpu.memory_space<vmem>>, vector<256x128xf32>,
    return
  }
  func.func @transform_0(%arg0: i32) -> (i32, i32) {
    %c0_i32 = arith.constant 0 : i32
    %c0_i32_0 = arith.constant 0 : i32
    return %arg0, %c0_i32 : i32, i32
  }
  func.func @transform_1(%arg0: i32) -> (i32, i32) {
    %c0_i32 = arith.constant 0 : i32
    %c0_i32_0 = arith.constant 0 : i32
    %c0_i32_1 = arith.constant 0 : i32
    return %c0_i32, %c0_i32_0 : i32, i32
  }
  func.func @transform_2(%arg0: i32) -> (i32, i32) {
    %c0_i32 = arith.constant 0 : i32
    %c0_i32_0 = arith.constant 0 : i32
    %c0_i32_1 = arith.constant 0 : i32
    return %c0_i32, %c0_i32_0 : i32, i32
  }
  func.func @transform_3(%arg0: i32) -> (i32, i32) {
    %c0_i32 = arith.constant 0 : i32
    %c0_i32_0 = arith.constant 0 : i32
    %c0_i32_1 = arith.constant 0 : i32
    return %c0_i32, %c0_i32_0 : i32, i32
  }
  func.func @transform_4(%arg0: i32) -> (i32, i32) {
    %c0_i32 = arith.constant 0 : i32
    %c0_i32_0 = arith.constant 0 : i32
    %c0_i32_1 = arith.constant 0 : i32
    return %c0_i32, %c0_i32_0 : i32, i32
  }
  func.func @transform_5(%arg0: i32) -> (i32, i32) {
    %c0_i32 = arith.constant 0 : i32
    %c0_i32_0 = arith.constant 0 : i32
    %c0_i32_1 = arith.constant 0 : i32
    return %c0_i32, %c0_i32_0 : i32, i32
  }
  func.func @transform_6(%arg0: i32) -> (i32, i32) {
    %c0_i32 = arith.constant 0 : i32
    %c0_i32_0 = arith.constant 0 : i32
    %c0_i32_1 = arith.constant 0 : i32
    return %c0_i32, %c0_i32_0 : i32, i32
  }
  func.func @transform_7(%arg0: i32) -> (i32, i32) {
    %c0_i32 = arith.constant 0 : i32
    %c0_i32_0 = arith.constant 0 : i32
    %c0_i32_1 = arith.constant 0 : i32
    return %c0_i32, %c0_i32_0 : i32, i32
  }
  func.func @transform_8(%arg0: i32) -> (i32, i32) {
    %c0_i32 = arith.constant 0 : i32
    %c0_i32_0 = arith.constant 0 : i32
    %c0_i32_1 = arith.constant 0 : i32
    return %c0_i32, %c0_i32_0 : i32, i32
  }
  func.func @transform_9(%arg0: i32) -> (i32, i32) {
    %c0_i32 = arith.constant 0 : i32
    %c0_i32_0 = arith.constant 0 : i32
    %c0_i32_1 = arith.constant 0 : i32
    return %c0_i32, %c0_i32_0 : i32, i32
  }
  func.func @transform_10(%arg0: i32) -> (i32, i32) {
    %c0_i32 = arith.constant 0 : i32
    %c0_i32_0 = arith.constant 0 : i32
    %c0_i32_1 = arith.constant 0 : i32
    return %c0_i32, %c0_i32_0 : i32, i32
  }
  func.func @transform_11(%arg0: i32) -> (i32, i32) {
    %c0_i32 = arith.constant 0 : i32
    %c0_i32_0 = arith.constant 0 : i32
    return %arg0, %c0_i32 : i32, i32
  }
}

</mosaic_0001>

<bundles_post_ra>
// kernel: forward.1
= control target key start
LH: loop header
LB: loop body
LE: loop exit
PB: predicated region body
PF: predicated region fallthrough
CT: control target
= control target key end

     0   :  { %s12388_s17 = smov 0   ;;  %s15659_s0 = inlined_call_operand.vmem [shape: bf16[512,512], index: 0, kind: input, shape index: {}]   ;;  %s15660_s1 = inlined_call_operand.vmem [shape: bf16[512,1024], index: 1, kind: input, shape index: {}]   ;;  %s15661_s2 = inlined_call_operand.vmem [shape: f32[1,1024], index: 2, kind: input, shape index: {}]   ;;  %s15662_s3 = inlined_call_operand.vmem [shape: bf16[1024,512], index: 3, kind: input, shape index: {}]   ;;  %s15663_s4 = inlined_call_operand.vmem [shape: f32[1,512], index: 4, kind: input, shape index: {}]   ;;  %s15664_s5 = inlined_call_operand.vmem [shape: bf16[512,256], index: 5, kind: input, shape index: {}]   ;;  %s15665_s6 = inlined_call_operand.vmem [shape: f32[1,256], index: 6, kind: input, shape index: {}]   ;;  %s15666_s7 = inlined_call_operand.vmem [shape: bf16[256,128], index: 7, kind: input, shape index: {}]   ;;  %s15667_s8 = inlined_call_operand.vmem [shape: f32[1,128], index: 8, kind: input, shape index: {}]   ;;  %s15668_s9 = inlined_call_operand.vmem [shape: bf16[128,128], index: 9, kind: input, shape index: {}]   ;;  %s15669_s10 = inlined_call_operand.vmem [shape: f32[1,128], index: 10, kind: input, shape index: {}]   ;;  %s15670_s11 = inlined_call_operand.vmem [shape: f32[512,128], index: 11, kind: output, shape index: {}]  }
   0x1 LB: > { %s9600_s18 = sadd.s32 4294967295, %s12326_s17   ;;  %p9604_p0 = scmp.ge.s32.totalorder %s12326_s17, 1  ;;  %s12326_s17 = sphi %s12388_s17, %s21_s17  }
   0x2   : > { %p339_p1 = scmp.lt.s32.totalorder %s12326_s17, 3 }
   0x4   : > { %p340_p2 = pnand %p9604_p0, %p339_p1 }
   0x6   : > { %343 = sbr.rel (%p340_p2) target bundleno = 2078 (0x81e), region = 64 }
   0xd   : > { %v458_v0 = vld [vmem:[%s15660_s1] sm:$0xff]  ;;  %v459_v2 = vld [vmem:[%s15660_s1 + $0x8] sm:$0xff]  ;;  %s9605_s26 = sshll.u32 %s9600_s18, 5 }
   0xe   : > { %v462_v1 = vld [vmem:[%s15660_s1 + $0x20] sm:$0xff]  ;;  %v463_v4 = vld [vmem:[%s15660_s1 + $0x28] sm:$0xff]  ;;  %p381_p3 = scmp.lt.s32.totalorder %s9605_s26, 63 }
   0xf   : > { %v9675_v3 = vcombine.high %v458_v0, %v462_v1  ;;  %v9674_v5 = vcombine.low %v458_v0, %v462_v1  ;;  %v466_v6 = vld [vmem:[%s15660_s1 + $0x40] sm:$0xff]  ;;  %v9677_v8 = vcombine.high %v459_v2, %v463_v4  ;;  %v9676_v9 = vcombine.low %v459_v2, %v463_v4  ;;  %v467_v11 = vld [vmem:[%s15660_s1 + $0x48] sm:$0xff] }
  0x10   : > { %v470_v7 = vld [vmem:[%s15660_s1 + $0x60] sm:$0xff]  ;;  %v471_v12 = vld [vmem:[%s15660_s1 + $0x68] sm:$0xff]  ;;  %s15814_s26 = smov (!%p381_p3, %s9605_s26), 63 }
  0x11   : > { %v9683_v10 = vcombine.high %v466_v6, %v470_v7  ;;  %v474_v13 = vld [vmem:[%s15660_s1 + $0x80] sm:$0xff]  ;;  %2356 = vmatprep.subr.bf16.mxu0 %v9675_v3  ;;  %v9685_v14 = vcombine.high %v467_v11, %v471_v12  ;;  %v475_v16 = vld [vmem:[%s15660_s1 + $0x88] sm:$0xff]  ;;  %2742 = vmatprep.subr.bf16.mxu1 %v9677_v8  ;;  %v9682_v18 = vcombine.low %v466_v6, %v470_v7  ;;  %s10278_s15 = sshll.u32 %s15814_s26, 4  ;;  %s9609_s30 = sshll.u32 %s15814_s26, 3 }
  0x12   : > { %v478_v15 = vld [vmem:[%s15660_s1 + $0xa0] sm:$0xff]  ;;  %v479_v17 = vld [vmem:[%s15660_s1 + $0xa8] sm:$0xff]  ;;  %2357 = vmatpush1.bf16.msra.mxu0 %v9674_v5  ;;  %2743 = vmatpush1.bf16.msra.mxu1 %v9676_v9  ;;  %v9684_v19 = vcombine.low %v467_v11, %v471_v12  ;;  %s12488_s28 = scalar_lea.vmem %s15659_s0, %s10278_s15  ;;  %s15590_s15 = scalar_lea.vmem %s15670_s11, %s9609_s30 }
  0x13   : > { %2358 = vmatprep.subr.bf16.mxu0 %v9683_v10  ;;  %v9691_v20 = vcombine.high %v474_v13, %v478_v15  ;;  %2744 = vmatprep.subr.bf16.mxu1 %v9685_v14  ;;  %v9693_v21 = vcombine.high %v475_v16, %v479_v17  ;;  %v482_v22 = vld [vmem:[%s15660_s1 + $0xc0] sm:$0xff]  ;;  %v483_v24 = vld [vmem:[%s15660_s1 + $0xc8] sm:$0xff]  ;;  %v9690_v26 = vcombine.low %v474_v13, %v478_v15 }
  0x14   : > { %v486_v23 = vld [vmem:[%s15660_s1 + $0xe0] sm:$0xff]  ;;  %v487_v25 = vld [vmem:[%s15660_s1 + $0xe8] sm:$0xff]  ;;  %v9692_v27 = vcombine.low %v475_v16, %v479_v17 }
  0x15   : > { %v9699_v28 = vcombine.high %v482_v22, %v486_v23  ;;  %v9701_v29 = vcombine.high %v483_v24, %v487_v25  ;;  %v490_v30 = vld [vmem:[%s15660_s1 + $0x100] sm:$0xff]  ;;  %v491_v32 = vld [vmem:[%s15660_s1 + $0x108] sm:$0xff]  ;;  %v9698_v34 = vcombine.low %v482_v22, %v486_v23  ;;  %v9700_v35 = vcombine.low %v483_v24, %v487_v25 }
  0x16   : > { %2359 = vmatpush1.bf16.msra.mxu0 %v9682_v18  ;;  %2745 = vmatpush1.bf16.msra.mxu1 %v9684_v19  ;;  %v494_v31 = vld [vmem:[%s15660_s1 + $0x120] sm:$0xff]  ;;  %v495_v33 = vld [vmem:[%s15660_s1 + $0x128] sm:$0xff] }
  0x17   : > { %2360 = vmatprep.subr.bf16.mxu0 %v9691_v20  ;;  %2746 = vmatprep.subr.bf16.mxu1 %v9693_v21  ;;  %v9707_v36 = vcombine.high %v490_v30, %v494_v31  ;;  %v9709_v37 = vcombine.high %v491_v32, %v495_v33  ;;  %v498_v38 = vld [vmem:[%s15660_s1 + $0x140] sm:$0xff]  ;;  %v499_v40 = vld [vmem:[%s15660_s1 + $0x148] sm:$0xff]  ;;  %v9706_v42 = vcombine.low %v490_v30, %v494_v31 }
  0x18   : > { %v502_v39 = vld [vmem:[%s15660_s1 + $0x160] sm:$0xff]  ;;  %v503_v41 = vld [vmem:[%s15660_s1 + $0x168] sm:$0xff]  ;;  %v9708_v43 = vcombine.low %v491_v32, %v495_v33 }
  0x19   : > { %v9715_v44 = vcombine.high %v498_v38, %v502_v39  ;;  %v9717_v45 = vcombine.high %v499_v40, %v503_v41  ;;  %v506_v46 = vld [vmem:[%s15660_s1 + $0x180] sm:$0xff]  ;;  %v507_v48 = vld [vmem:[%s15660_s1 + $0x188] sm:$0xff]  ;;  %v9714_v50 = vcombine.low %v498_v38, %v502_v39  ;;  %v9716_v51 = vcombine.low %v499_v40, %v503_v41 }
  0x1a   : > { %2361 = vmatpush1.bf16.msra.mxu0 %v9690_v26  ;;  %2747 = vmatpush1.bf16.msra.mxu1 %v9692_v27  ;;  %v510_v47 = vld [vmem:[%s15660_s1 + $0x1a0] sm:$0xff]  ;;  %v511_v49 = vld [vmem:[%s15660_s1 + $0x1a8] sm:$0xff] }
  0x1b   : > { %2362 = vmatprep.subr.bf16.mxu0 %v9699_v28  ;;  %2748 = vmatprep.subr.bf16.mxu1 %v9701_v29  ;;  %v9723_v52 = vcombine.high %v506_v46, %v510_v47  ;;  %v514_v53 = vld [vmem:[%s15660_s1 + $0x1c0] sm:$0xff]  ;;  %v9725_v54 = vcombine.high %v507_v48, %v511_v49  ;;  %v515_v56 = vld [vmem:[%s15660_s1 + $0x1c8] sm:$0xff]  ;;  %v9722_v59 = vcombine.low %v506_v46, %v510_v47 }
  0x1c   : > { %v518_v55 = vld [vmem:[%s15660_s1 + $0x1e0] sm:$0xff]  ;;  %v519_v58 = vld [vmem:[%s15660_s1 + $0x1e8] sm:$0xff]  ;;  %v9724_v60 = vcombine.low %v507_v48, %v511_v49 }
  0x1d   : > { %v11655_v57 = vld [vmem:[%s12488_s28 + $0x4] ss:$16 sps:$4 sm:$0xff]   ;;  %v9731_v61 = vcombine.high %v514_v53, %v518_v55  ;;  %v9733_v62 = vcombine.high %v515_v56, %v519_v58  ;;  %v523_v1 = vld [vmem:[%s15660_s1 + $0x208] sm:$0xff]  ;;  %v9730_v3 = vcombine.low %v514_v53, %v518_v55  ;;  %v9732_v4 = vcombine.low %v515_v56, %v519_v58 }
  0x1e   : > { %2363 = vmatpush1.bf16.msra.mxu0 %v9698_v34  ;;  %2749 = vmatpush1.bf16.msra.mxu1 %v9700_v35  ;;  %v522_v63 = vld [vmem:[%s15660_s1 + $0x200] sm:$0xff]  ;;  %v527_v2 = vld [vmem:[%s15660_s1 + $0x228] sm:$0xff] }
  0x1f   : > { %2364 = vmatprep.subr.bf16.mxu0 %v9707_v36  ;;  %2750 = vmatprep.subr.bf16.mxu1 %v9709_v37  ;;  %v526_v0 = vld [vmem:[%s15660_s1 + $0x220] sm:$0xff]  ;;  %v9741_v6 = vcombine.high %v523_v1, %v527_v2  ;;  %v531_v9 = vld [vmem:[%s15660_s1 + $0x248] sm:$0xff]  ;;  %v9740_v12 = vcombine.low %v523_v1, %v527_v2 }
  0x20   : > { %2388 = vmatprep.mubr.bf16.mxu0 %v11655_v57  ;;  %2774 = vmatprep.mubr.bf16.mxu1 %v11655_v57  ;;  %v9739_v5 = vcombine.high %v522_v63, %v526_v0  ;;  %v530_v7 = vld [vmem:[%s15660_s1 + $0x240] sm:$0xff]  ;;  %v535_v10 = vld [vmem:[%s15660_s1 + $0x268] sm:$0xff]  ;;  %v9738_v11 = vcombine.low %v522_v63, %v526_v0 }
  0x21   : > { %v534_v8 = vld [vmem:[%s15660_s1 + $0x260] sm:$0xff]  ;;  %v9749_v14 = vcombine.high %v531_v9, %v535_v10  ;;  %v539_v17 = vld [vmem:[%s15660_s1 + $0x288] sm:$0xff]  ;;  %v9748_v20 = vcombine.low %v531_v9, %v535_v10 }
  0x22   : > { %2365 = vmatpush1.bf16.msra.mxu0 %v9706_v42  ;;  %2751 = vmatpush1.bf16.msra.mxu1 %v9708_v43  ;;  %v9747_v13 = vcombine.high %v530_v7, %v534_v8  ;;  %v538_v15 = vld [vmem:[%s15660_s1 + $0x280] sm:$0xff]  ;;  %v543_v18 = vld [vmem:[%s15660_s1 + $0x2a8] sm:$0xff]  ;;  %v9746_v19 = vcombine.low %v530_v7, %v534_v8 }
  0x23   : > { %2366 = vmatprep.subr.bf16.mxu0 %v9715_v44  ;;  %2752 = vmatprep.subr.bf16.mxu1 %v9717_v45  ;;  %v542_v16 = vld [vmem:[%s15660_s1 + $0x2a0] sm:$0xff]  ;;  %v9757_v22 = vcombine.high %v539_v17, %v543_v18  ;;  %v547_v25 = vld [vmem:[%s15660_s1 + $0x2c8] sm:$0xff]  ;;  %v9756_v28 = vcombine.low %v539_v17, %v543_v18 }
  0x24   : > { %v9755_v21 = vcombine.high %v538_v15, %v542_v16  ;;  %v546_v23 = vld [vmem:[%s15660_s1 + $0x2c0] sm:$0xff]  ;;  %v551_v26 = vld [vmem:[%s15660_s1 + $0x2e8] sm:$0xff]  ;;  %v9754_v27 = vcombine.low %v538_v15, %v542_v16 }
  0x25   : > { %v550_v24 = vld [vmem:[%s15660_s1 + $0x2e0] sm:$0xff]  ;;  %v9765_v30 = vcombine.high %v547_v25, %v551_v26  ;;  %v555_v33 = vld [vmem:[%s15660_s1 + $0x308] sm:$0xff]  ;;  %v9764_v36 = vcombine.low %v547_v25, %v551_v26 }
  0x26   : > { %2367 = vmatpush1.bf16.msra.mxu0 %v9714_v50  ;;  %2753 = vmatpush1.bf16.msra.mxu1 %v9716_v51  ;;  %v9763_v29 = vcombine.high %v546_v23, %v550_v24  ;;  %v554_v31 = vld [vmem:[%s15660_s1 + $0x300] sm:$0xff]  ;;  %v559_v34 = vld [vmem:[%s15660_s1 + $0x328] sm:$0xff]  ;;  %v9762_v35 = vcombine.low %v546_v23, %v550_v24  ;;  %v12645_v23 = vld [vmem:[%s15660_s1 + $0x30] sm:$0xff] }
  0x27   : > { %2368 = vmatprep.subr.bf16.mxu0 %v9723_v52  ;;  %2754 = vmatprep.subr.bf16.mxu1 %v9725_v54  ;;  %v558_v32 = vld [vmem:[%s15660_s1 + $0x320] sm:$0xff]  ;;  %v9773_v38 = vcombine.high %v555_v33, %v559_v34  ;;  %v563_v41 = vld [vmem:[%s15660_s1 + $0x348] sm:$0xff]  ;;  %v9772_v44 = vcombine.low %v555_v33, %v559_v34 }
  0x28   : > { %v9771_v37 = vcombine.high %v554_v31, %v558_v32  ;;  %v562_v39 = vld [vmem:[%s15660_s1 + $0x340] sm:$0xff]  ;;  %v567_v42 = vld [vmem:[%s15660_s1 + $0x368] sm:$0xff]  ;;  %v9770_v43 = vcombine.low %v554_v31, %v558_v32 }
  0x29   : > { %v566_v40 = vld [vmem:[%s15660_s1 + $0x360] sm:$0xff]  ;;  %v9781_v46 = vcombine.high %v563_v41, %v567_v42  ;;  %v571_v49 = vld [vmem:[%s15660_s1 + $0x388] sm:$0xff]  ;;  %v9780_v52 = vcombine.low %v563_v41, %v567_v42 }
  0x2a   : > { %2369 = vmatpush1.bf16.msra.mxu0 %v9722_v59  ;;  %2755 = vmatpush1.bf16.msra.mxu1 %v9724_v60  ;;  %v9779_v45 = vcombine.high %v562_v39, %v566_v40  ;;  %v570_v47 = vld [vmem:[%s15660_s1 + $0x380] sm:$0xff]  ;;  %v575_v50 = vld [vmem:[%s15660_s1 + $0x3a8] sm:$0xff]  ;;  %v9778_v51 = vcombine.low %v562_v39, %v566_v40 }
  0x2b   : > { %2370 = vmatprep.subr.bf16.mxu0 %v9731_v61  ;;  %2756 = vmatprep.subr.bf16.mxu1 %v9733_v62  ;;  %v574_v48 = vld [vmem:[%s15660_s1 + $0x3a0] sm:$0xff]  ;;  %v9789_v55 = vcombine.high %v571_v49, %v575_v50  ;;  %v579_v57 = vld [vmem:[%s15660_s1 + $0x3c8] sm:$0xff]  ;;  %v9788_v60 = vcombine.low %v571_v49, %v575_v50 }
  0x2c   : > { %v9787_v53 = vcombine.high %v570_v47, %v574_v48  ;;  %v578_v54 = vld [vmem:[%s15660_s1 + $0x3c0] sm:$0xff]  ;;  %v583_v58 = vld [vmem:[%s15660_s1 + $0x3e8] sm:$0xff]  ;;  %v9786_v59 = vcombine.low %v570_v47, %v574_v48 }
  0x2d   : > { %v582_v56 = vld [vmem:[%s15660_s1 + $0x3e0] sm:$0xff]  ;;  %v9797_v62 = vcombine.high %v579_v57, %v583_v58  ;;  %v587_v1 = vld [vmem:[%s15660_s1 + $0x408] sm:$0xff] }
  0x2e   : > { %2371 = vmatpush1.bf16.msra.mxu0 %v9730_v3  ;;  %2757 = vmatpush1.bf16.msra.mxu1 %v9732_v4  ;;  %v9795_v61 = vcombine.high %v578_v54, %v582_v56  ;;  %v586_v63 = vld [vmem:[%s15660_s1 + $0x400] sm:$0xff]  ;;  %v591_v2 = vld [vmem:[%s15660_s1 + $0x428] sm:$0xff]  ;;  %v9794_v3 = vcombine.low %v578_v54, %v582_v56  ;;  %v9796_v4 = vcombine.low %v579_v57, %v583_v58 }
  0x2f   : > { %2372 = vmatprep.subr.bf16.mxu0 %v9739_v5  ;;  %2758 = vmatprep.subr.bf16.mxu1 %v9741_v6  ;;  %v590_v0 = vld [vmem:[%s15660_s1 + $0x420] sm:$0xff]  ;;  %v9805_v7 = vcombine.high %v587_v1, %v591_v2  ;;  %v9804_v17 = vcombine.low %v587_v1, %v591_v2  ;;  %v603_v18 = vld [vmem:[%s15660_s1 + $0x488] sm:$0xff] }
  0x30   : > { %v9803_v5 = vcombine.high %v586_v63, %v590_v0  ;;  %v11657_v6 = vld [vmem:[%s12488_s28] ss:$16 sps:$4 sm:$0xff]   ;;  %v11658_v8 = vld [vmem:[%s12488_s28 + $0x24] ss:$16 sps:$4 sm:$0xff]   ;;  %v611_v31 = vld [vmem:[%s15660_s1 + $0x4c8] sm:$0xff] }
  0x31   : > { %v594_v9 = vld [vmem:[%s15660_s1 + $0x440] sm:$0xff]  ;;  %v615_v32 = vld [vmem:[%s15660_s1 + $0x4e8] sm:$0xff] }
  0x32   : > { %2373 = vmatpush1.bf16.msra.mxu0 %v9738_v11  ;;  %2759 = vmatpush1.bf16.msra.mxu1 %v9740_v12  ;;  %v598_v10 = vld [vmem:[%s15660_s1 + $0x460] sm:$0xff]  ;;  %v595_v11 = vld [vmem:[%s15660_s1 + $0x448] sm:$0xff]  ;;  %v9802_v12 = vcombine.low %v586_v63, %v590_v0  ;;  %v9829_v39 = vcombine.high %v611_v31, %v615_v32  ;;  %v9828_v48 = vcombine.low %v611_v31, %v615_v32 }
  0x33   : > { %2374 = vmatprep.subr.bf16.mxu0 %v9747_v13  ;;  %2760 = vmatprep.subr.bf16.mxu1 %v9749_v14  ;;  %v602_v13 = vld [vmem:[%s15660_s1 + $0x480] sm:$0xff]  ;;  %v599_v14 = vld [vmem:[%s15660_s1 + $0x468] sm:$0xff]  ;;  %v9811_v16 = vcombine.high %v594_v9, %v598_v10 }
  0x34   : > { %v606_v15 = vld [vmem:[%s15660_s1 + $0x4a0] sm:$0xff]  ;;  %v619_v40 = vld [vmem:[%s15660_s1 + $0x508] sm:$0xff] }
  0x35   : > { %v11660_v24 = vld [vmem:[%s12488_s28 + $0x20] ss:$16 sps:$4 sm:$0xff]   ;;  %v9819_v25 = vcombine.high %v602_v13, %v606_v15  ;;  %v9818_v34 = vcombine.low %v602_v13, %v606_v15  ;;  %v623_v41 = vld [vmem:[%s15660_s1 + $0x528] sm:$0xff]  ;;  %v11667_v0 = vld [vmem:[%s12488_s28 + $0x84] ss:$16 sps:$4 sm:$0xff]  }
  0x36   : > { %2375 = vmatpush1.bf16.msra.mxu0 %v9746_v19  ;;  %2761 = vmatpush1.bf16.msra.mxu1 %v9748_v20  ;;  %v9813_v19 = vcombine.high %v595_v11, %v599_v14  ;;  %v9810_v20 = vcombine.low %v594_v9, %v598_v10  ;;  %v610_v26 = vld [vmem:[%s15660_s1 + $0x4c0] sm:$0xff]  ;;  %v627_v49 = vld [vmem:[%s15660_s1 + $0x548] sm:$0xff]  ;;  %v9836_v56 = vcombine.low %v619_v40, %v623_v41 }
  0x37   : > { %2376 = vmatprep.subr.bf16.mxu0 %v9755_v21  ;;  %2762 = vmatprep.subr.bf16.mxu1 %v9757_v22  ;;  %v607_v21 = vld [vmem:[%s15660_s1 + $0x4a8] sm:$0xff]  ;;  %v12640_v22 = vld [vmem:[%s15660_s1 + $0x10] sm:$0xff]  ;;  %v638_v54 = vld [vmem:[%s15660_s1 + $0x5a0] sm:$0xff] }
  0x38   : > { %v9821_v33 = vcombine.high %v603_v18, %v607_v21  ;;  %v11663_v42 = vld [vmem:[%s12488_s28 + $0x40] ss:$16 sps:$4 sm:$0xff]   ;;  %v631_v50 = vld [vmem:[%s15660_s1 + $0x568] sm:$0xff] }
  0x39   : > { %v9845_v57 = vcombine.high %v627_v49, %v631_v50  ;;  %v635_v58 = vld [vmem:[%s15660_s1 + $0x588] sm:$0xff]  ;;  %v646_v63 = vld [vmem:[%s15660_s1 + $0x5e0] sm:$0xff]  ;;  %v9844_v2 = vcombine.low %v627_v49, %v631_v50 }
  0x3a   : > { %2377 = vmatpush1.bf16.msra.mxu0 %v9754_v27  ;;  %2763 = vmatpush1.bf16.msra.mxu1 %v9756_v28  ;;  %v614_v27 = vld [vmem:[%s15660_s1 + $0x4e0] sm:$0xff]  ;;  %v9678_v28 = vcombine.low %v12640_v22, %v12645_v23  ;;  %v655_v13 = vld [vmem:[%s15660_s1 + $0x628] sm:$0xff] }
  0x3b   : > { %2378 = vmatprep.subr.bf16.mxu0 %v9763_v29  ;;  %2764 = vmatprep.subr.bf16.mxu1 %v9765_v30  ;;  %v11661_v29 = vld [vmem:[%s12488_s28 + $0x44] ss:$16 sps:$4 sm:$0xff]   ;;  %v9812_v30 = vcombine.low %v595_v11, %v599_v14  ;;  %v11669_v14 = vld [vmem:[%s12488_s28 + $0x80] ss:$16 sps:$4 sm:$0xff]  }
  0x3e   : > { %2379 = vmatpush1.bf16.msra.mxu0 %v9762_v35  ;;  %2765 = vmatpush1.bf16.msra.mxu1 %v9764_v36  ;;  %v618_v35 = vld [vmem:[%s15660_s1 + $0x500] sm:$0xff] }
  0x3f   : > { %2380 = vmatprep.subr.bf16.mxu0 %v9771_v37  ;;  %2766 = vmatprep.subr.bf16.mxu1 %v9773_v38  ;;  %v622_v36 = vld [vmem:[%s15660_s1 + $0x520] sm:$0xff]  ;;  %v9827_v37 = vcombine.high %v610_v26, %v614_v27  ;;  %v9820_v38 = vcombine.low %v603_v18, %v607_v21  ;;  %v659_v21 = vld [vmem:[%s15660_s1 + $0x648] sm:$0xff] }
  0x40   : > { %v9835_v47 = vcombine.high %v618_v35, %v622_v36  ;;  %v11670_v18 = vld [vmem:[%s12488_s28 + $0xa4] ss:$16 sps:$4 sm:$0xff]  }
  0x42   : > { %2381 = vmatpush1.bf16.msra.mxu0 %v9770_v43  ;;  %2767 = vmatpush1.bf16.msra.mxu1 %v9772_v44  ;;  %v9826_v43 = vcombine.low %v610_v26, %v614_v27  ;;  %v626_v44 = vld [vmem:[%s15660_s1 + $0x540] sm:$0xff] }
  0x43   : > { %2382 = vmatprep.subr.bf16.mxu0 %v9779_v45  ;;  %2768 = vmatprep.subr.bf16.mxu1 %v9781_v46  ;;  %v630_v45 = vld [vmem:[%s15660_s1 + $0x560] sm:$0xff] }
  0x44   : > { %v11664_v46 = vld [vmem:[%s12488_s28 + $0x64] ss:$16 sps:$4 sm:$0xff]  }
  0x45   : > { %v666_v27 = vld [vmem:[%s15660_s1 + $0x680] sm:$0xff] }
  0x46   : > { %2383 = vmatpush1.bf16.msra.mxu0 %v9778_v51  ;;  %2769 = vmatpush1.bf16.msra.mxu1 %v9780_v52  ;;  %v9837_v51 = vcombine.high %v619_v40, %v623_v41  ;;  %v9834_v52 = vcombine.low %v618_v35, %v622_v36  ;;  %v11672_v35 = vld [vmem:[%s12488_s28 + $0xa0] ss:$16 sps:$4 sm:$0xff]  }
  0x47   : > { %2384 = vmatprep.subr.bf16.mxu0 %v9787_v53  ;;  %2770 = vmatprep.subr.bf16.mxu1 %v9789_v55  ;;  %v634_v53 = vld [vmem:[%s15660_s1 + $0x580] sm:$0xff]  ;;  %v9843_v55 = vcombine.high %v626_v44, %v630_v45 }
  0x48   : > { %v9851_v1 = vcombine.high %v634_v53, %v638_v54 }
  0x4a   : > { %2385 = vmatpush1.bf16.msra.mxu0 %v9786_v59  ;;  %2771 = vmatpush1.bf16.msra.mxu1 %v9788_v60  ;;  %v639_v59 = vld [vmem:[%s15660_s1 + $0x5a8] sm:$0xff]  ;;  %v11666_v60 = vld [vmem:[%s12488_s28 + $0x60] ss:$16 sps:$4 sm:$0xff]  }
  0x4b   : > { %2386 = vmatprep.subr.bf16.mxu0 %v9795_v61  ;;  %2772 = vmatprep.subr.bf16.mxu1 %v9797_v62  ;;  %v9842_v61 = vcombine.low %v626_v44, %v630_v45  ;;  %v642_v62 = vld [vmem:[%s15660_s1 + $0x5c0] sm:$0xff]  ;;  %v9852_v10 = vcombine.low %v635_v58, %v639_v59 }
  0x4c   : > { %v9859_v9 = vcombine.high %v642_v62, %v646_v63  ;;  %v9858_v15 = vcombine.low %v642_v62, %v646_v63 }
  0x4e   : > { %2387 = vmatpush1.bf16.msra.mxu0 %v9794_v3  ;;  %2773 = vmatpush1.bf16.msra.mxu1 %v9796_v4  ;;  %v643_v3 = vld [vmem:[%s15660_s1 + $0x5c8] sm:$0xff] }
  0x4f   : > { %2549 = vmatprep.subr.bf16.mxu0 %v9803_v5  ;;  %2935 = vmatprep.subr.bf16.mxu1 %v9805_v7  ;;  %v647_v4 = vld [vmem:[%s15660_s1 + $0x5e8] sm:$0xff]  ;;  %v9853_v5 = vcombine.high %v635_v58, %v639_v59  ;;  %v650_v7 = vld [vmem:[%s15660_s1 + $0x600] sm:$0xff] }
  0x50   : > { %v9861_v11 = vcombine.high %v643_v3, %v647_v4 }
  0x51   : > { %2389 = vmatmul.mubr.bf16.vlgmr.msra.gmra.mrb[0].mxu0 %v11657_v6  ;;  %2775 = vmatmul.mubr.bf16.vlgmr.msra.gmra.mrb[0].mxu1 %v11657_v6  ;;  %v9850_v6 = vcombine.low %v634_v53, %v638_v54  ;;  %v11675_v53 = vld [vmem:[%s12488_s28 + $0xc0] ss:$16 sps:$4 sm:$0xff]  }
  0x52   : > { %2550 = vmatpush1.bf16.msra.mxu0 %v9802_v12  ;;  %2398 = vmatprep.mubr.bf16.mxu0 %v11658_v8  ;;  %v651_v12 = vld [vmem:[%s15660_s1 + $0x608] sm:$0xff] }
  0x53   : > { %2784 = vmatprep.mubr.bf16.mxu1 %v11658_v8  ;;  %2551 = vmatprep.subr.bf16.mxu0 %v9811_v16  ;;  %v654_v8 = vld [vmem:[%s15660_s1 + $0x620] sm:$0xff]  ;;  %v9868_v31 = vcombine.low %v651_v12, %v655_v13 }
  0x54   : > { %2936 = vmatpush1.bf16.msra.mxu1 %v9804_v17  ;;  %v658_v16 = vld [vmem:[%s15660_s1 + $0x640] sm:$0xff]  ;;  %v9866_v26 = vcombine.low %v650_v7, %v654_v8 }
  0x55   : > { %2937 = vmatprep.subr.bf16.mxu1 %v9813_v19  ;;  %v662_v17 = vld [vmem:[%s15660_s1 + $0x660] sm:$0xff]  ;;  %v9867_v19 = vcombine.high %v650_v7, %v654_v8 }
  0x56   : > { %2552 = vmatpush1.bf16.msra.mxu0 %v9810_v20  ;;  %v9860_v20 = vcombine.low %v643_v3, %v647_v4  ;;  %v9874_v36 = vcombine.low %v658_v16, %v662_v17  ;;  %v11678_v7 = vld [vmem:[%s12488_s28 + $0xe0] ss:$16 sps:$4 sm:$0xff]  }
  0x57   : > { %2553 = vmatprep.subr.bf16.mxu0 %v9819_v25  ;;  %v9869_v25 = vcombine.high %v651_v12, %v655_v13 }
  0x58   : > { %2938 = vmatpush1.bf16.msra.mxu1 %v9812_v30  ;;  %v9875_v30 = vcombine.high %v658_v16, %v662_v17 }
  0x59   : > { %2399 = vmatmul.mubr.bf16.gmra.mrb[4].mxu0 %v11660_v24  ;;  %2939 = vmatprep.subr.bf16.mxu1 %v9821_v33  ;;  %v667_v33 = vld [vmem:[%s15660_s1 + $0x688] sm:$0xff] }
  0x5a   : > { %2785 = vmatmul.mubr.bf16.gmra.mrb[4].mxu1 %v11660_v24  ;;  %2408 = vmatprep.mubr.bf16.mxu0 %v11661_v29  ;;  %v663_v24 = vld [vmem:[%s15660_s1 + $0x668] sm:$0xff] }
  0x5b   : > { %2794 = vmatprep.mubr.bf16.mxu1 %v11661_v29  ;;  %2554 = vmatpush1.bf16.msra.mxu0 %v9818_v34  ;;  %v670_v29 = vld [vmem:[%s15660_s1 + $0x6a0] sm:$0xff]  ;;  %v9877_v32 = vcombine.high %v659_v21, %v663_v24  ;;  %v671_v34 = vld [vmem:[%s15660_s1 + $0x6a8] sm:$0xff]  ;;  %v9876_v41 = vcombine.low %v659_v21, %v663_v24 }
  0x5c   : > { %2555 = vmatprep.subr.bf16.mxu0 %v9827_v37  ;;  %2940 = vmatpush1.bf16.msra.mxu1 %v9820_v38  ;;  %v674_v37 = vld [vmem:[%s15660_s1 + $0x6c0] sm:$0xff]  ;;  %v9883_v40 = vcombine.high %v666_v27, %v670_v29  ;;  %v9885_v44 = vcombine.high %v667_v33, %v671_v34  ;;  %v9882_v45 = vcombine.low %v666_v27, %v670_v29  ;;  %v12826_v29 = vld [vmem:[%s15660_s1 + $0x18] sm:$0xff] }
  0x5d   : > { %2941 = vmatprep.subr.bf16.mxu1 %v9829_v39  ;;  %v678_v38 = vld [vmem:[%s15660_s1 + $0x6e0] sm:$0xff]  ;;  %v9884_v49 = vcombine.low %v667_v33, %v671_v34  ;;  %v9679_v27 = vcombine.high %v12640_v22, %v12645_v23  ;;  %v485_v23 = vld [vmem:[%s15660_s1 + $0xd8] sm:$0xff] }
  0x5e   : > { %v11673_v39 = vld [vmem:[%s12488_s28 + $0xc4] ss:$16 sps:$4 sm:$0xff]   ;;  %v9890_v54 = vcombine.low %v674_v37, %v678_v38  ;;  %v11681_v21 = vld [vmem:[%s12488_s28 + $0x100] ss:$16 sps:$4 sm:$0xff]  }
  0x5f   : > { %2556 = vmatpush1.bf16.msra.mxu0 %v9826_v43  ;;  %v679_v43 = vld [vmem:[%s15660_s1 + $0x6e8] sm:$0xff]  ;;  %v11684_v33 = vld [vmem:[%s12488_s28 + $0x120] ss:$16 sps:$4 sm:$0xff]   ;;  %v11685_v34 = vld [vmem:[%s12488_s28 + $0x144] ss:$16 sps:$4 sm:$0xff]  }
  0x60   : > { %2557 = vmatprep.subr.bf16.mxu0 %v9835_v47  ;;  %2942 = vmatpush1.bf16.msra.mxu1 %v9828_v48  ;;  %v686_v47 = vld [vmem:[%s15660_s1 + $0x720] sm:$0xff]  ;;  %v9891_v48 = vcombine.high %v674_v37, %v678_v38 }
  0x61   : > { %2409 = vmatmul.mubr.bf16.gmra.mrb[8].mxu0 %v11663_v42  ;;  %2943 = vmatprep.subr.bf16.mxu1 %v9837_v51  ;;  %v683_v51 = vld [vmem:[%s15660_s1 + $0x708] sm:$0xff]  ;;  %v11690_v37 = vld [vmem:[%s12488_s28 + $0x160] ss:$16 sps:$4 sm:$0xff]   ;;  %v11691_v38 = vld [vmem:[%s12488_s28 + $0x184] ss:$16 sps:$4 sm:$0xff]  }
  0x62   : > { %2795 = vmatmul.mubr.bf16.gmra.mrb[8].mxu1 %v11663_v42  ;;  %2418 = vmatprep.mubr.bf16.mxu0 %v11664_v46  ;;  %v675_v42 = vld [vmem:[%s15660_s1 + $0x6c8] sm:$0xff] }
  0x63   : > { %2804 = vmatprep.mubr.bf16.mxu1 %v11664_v46  ;;  %2558 = vmatpush1.bf16.msra.mxu0 %v9834_v52  ;;  %v682_v46 = vld [vmem:[%s15660_s1 + $0x700] sm:$0xff]  ;;  %v9893_v50 = vcombine.high %v675_v42, %v679_v43  ;;  %v687_v52 = vld [vmem:[%s15660_s1 + $0x728] sm:$0xff]  ;;  %v9892_v59 = vcombine.low %v675_v42, %v679_v43 }
  0x64   : > { %2559 = vmatprep.subr.bf16.mxu0 %v9843_v55  ;;  %2944 = vmatpush1.bf16.msra.mxu1 %v9836_v56  ;;  %v690_v55 = vld [vmem:[%s15660_s1 + $0x740] sm:$0xff]  ;;  %v9899_v58 = vcombine.high %v682_v46, %v686_v47  ;;  %v9901_v62 = vcombine.high %v683_v51, %v687_v52  ;;  %v9898_v63 = vcombine.low %v682_v46, %v686_v47  ;;  %v11705_v46 = vld [vmem:[%s12488_s28 + $0xc] ss:$16 sps:$4 sm:$0xff]   ;;  %v11703_v47 = vld [vmem:[%s12488_s28 + $0x8] ss:$16 sps:$4 sm:$0xff]  }
  0x65   : > { %2945 = vmatprep.subr.bf16.mxu1 %v9845_v57  ;;  %v694_v56 = vld [vmem:[%s15660_s1 + $0x760] sm:$0xff]  ;;  %v9900_v3 = vcombine.low %v683_v51, %v687_v52  ;;  %v473_v51 = vld [vmem:[%s15660_s1 + $0x78] sm:$0xff] }
  0x66   : > { %v11676_v57 = vld [vmem:[%s12488_s28 + $0xe4] ss:$16 sps:$4 sm:$0xff]   ;;  %v9906_v8 = vcombine.low %v690_v55, %v694_v56  ;;  %v11699_v43 = vld [vmem:[%s12488_s28 + $0x1c0] ss:$16 sps:$4 sm:$0xff]   ;;  %v11706_v52 = vld [vmem:[%s12488_s28 + $0x2c] ss:$16 sps:$4 sm:$0xff]  }
  0x67   : > { %2560 = vmatpush1.bf16.msra.mxu0 %v9842_v61  ;;  %v695_v61 = vld [vmem:[%s15660_s1 + $0x768] sm:$0xff]  ;;  %v11697_v42 = vld [vmem:[%s12488_s28 + $0x1c4] ss:$16 sps:$4 sm:$0xff]  }
  0x68   : > { %2561 = vmatprep.subr.bf16.mxu0 %v9851_v1  ;;  %2946 = vmatpush1.bf16.msra.mxu1 %v9844_v2  ;;  %v702_v1 = vld [vmem:[%s15660_s1 + $0x7a0] sm:$0xff]  ;;  %v9907_v2 = vcombine.high %v690_v55, %v694_v56  ;;  %v477_v56 = vld [vmem:[%s15660_s1 + $0x98] sm:$0xff] }
  0x69   : > { %2419 = vmatmul.mubr.bf16.gmra.mrb[12].mxu0 %v11666_v60  ;;  %2947 = vmatprep.subr.bf16.mxu1 %v9853_v5  ;;  %v699_v5 = vld [vmem:[%s15660_s1 + $0x788] sm:$0xff] }
  0x6a   : > { %2805 = vmatmul.mubr.bf16.gmra.mrb[12].mxu1 %v11666_v60  ;;  %2428 = vmatprep.mubr.bf16.mxu0 %v11667_v0  ;;  %v691_v60 = vld [vmem:[%s15660_s1 + $0x748] sm:$0xff] }
  0x6b   : > { %2814 = vmatprep.mubr.bf16.mxu1 %v11667_v0  ;;  %2562 = vmatpush1.bf16.msra.mxu0 %v9850_v6  ;;  %v698_v0 = vld [vmem:[%s15660_s1 + $0x780] sm:$0xff]  ;;  %v9909_v4 = vcombine.high %v691_v60, %v695_v61  ;;  %v703_v6 = vld [vmem:[%s15660_s1 + $0x7a8] sm:$0xff]  ;;  %v9908_v13 = vcombine.low %v691_v60, %v695_v61  ;;  %v12885_v60 = vld [vmem:[%s15660_s1 + $0x430] sm:$0xff] }
  0x6c   : > { %2563 = vmatprep.subr.bf16.mxu0 %v9859_v9  ;;  %2948 = vmatpush1.bf16.msra.mxu1 %v9852_v10  ;;  %v706_v9 = vld [vmem:[%s15660_s1 + $0x7c0] sm:$0xff]  ;;  %v9915_v12 = vcombine.high %v698_v0, %v702_v1  ;;  %v9917_v16 = vcombine.high %v699_v5, %v703_v6  ;;  %v9914_v17 = vcombine.low %v698_v0, %v702_v1  ;;  %v484_v1 = vld [vmem:[%s15660_s1 + $0xd0] sm:$0xff] }
  0x6d   : > { %2949 = vmatprep.subr.bf16.mxu1 %v9861_v11  ;;  %v710_v10 = vld [vmem:[%s15660_s1 + $0x7e0] sm:$0xff] }
  0x6e   : > { %v11679_v11 = vld [vmem:[%s12488_s28 + $0x104] ss:$16 sps:$4 sm:$0xff]   ;;  %v9922_v24 = vcombine.low %v706_v9, %v710_v10 }
  0x6f   : > { %2564 = vmatpush1.bf16.msra.mxu0 %v9858_v15  ;;  %v711_v15 = vld [vmem:[%s15660_s1 + $0x7e8] sm:$0xff] }
  0x70   : > { %2565 = vmatprep.subr.bf16.mxu0 %v9867_v19  ;;  %2950 = vmatpush1.bf16.msra.mxu1 %v9860_v20  ;;  %v9916_v19 = vcombine.low %v699_v5, %v703_v6  ;;  %v492_v6 = vld [vmem:[%s15660_s1 + $0x110] sm:$0xff] }
  0x71   : > { %2429 = vmatmul.mubr.bf16.gmra.mrb[16].mxu0 %v11669_v14  ;;  %2951 = vmatprep.subr.bf16.mxu1 %v9869_v25  ;;  %v11682_v25 = vld [vmem:[%s12488_s28 + $0x124] ss:$16 sps:$4 sm:$0xff]  }
  0x72   : > { %2815 = vmatmul.mubr.bf16.gmra.mrb[16].mxu1 %v11669_v14  ;;  %2438 = vmatprep.mubr.bf16.mxu0 %v11670_v18  ;;  %v707_v14 = vld [vmem:[%s15660_s1 + $0x7c8] sm:$0xff] }
  0x73   : > { %2824 = vmatprep.mubr.bf16.mxu1 %v11670_v18  ;;  %2566 = vmatpush1.bf16.msra.mxu0 %v9866_v26  ;;  %v9923_v18 = vcombine.high %v706_v9, %v710_v10  ;;  %v9925_v20 = vcombine.high %v707_v14, %v711_v15  ;;  %v9924_v26 = vcombine.low %v707_v14, %v711_v15  ;;  %v500_v15 = vld [vmem:[%s15660_s1 + $0x150] sm:$0xff] }
  0x74   : > { %2567 = vmatprep.subr.bf16.mxu0 %v9875_v30  ;;  %2952 = vmatpush1.bf16.msra.mxu1 %v9868_v31  ;;  %v12831_v30 = vld [vmem:[%s15660_s1 + $0x38] sm:$0xff] }
  0x75   : > { %2953 = vmatprep.subr.bf16.mxu1 %v9877_v32  ;;  %v9681_v31 = vcombine.high %v12826_v29, %v12831_v30  ;;  %v9680_v32 = vcombine.low %v12826_v29, %v12831_v30 }
  0x77   : > { %2568 = vmatpush1.bf16.msra.mxu0 %v9874_v36  ;;  %v11688_v36 = vld [vmem:[%s12488_s28 + $0x164] ss:$16 sps:$4 sm:$0xff]  }
  0x78   : > { %2569 = vmatprep.subr.bf16.mxu0 %v9883_v40  ;;  %2954 = vmatpush1.bf16.msra.mxu1 %v9876_v41  ;;  %v11694_v40 = vld [vmem:[%s12488_s28 + $0x1a4] ss:$16 sps:$4 sm:$0xff]   ;;  %v11696_v41 = vld [vmem:[%s12488_s28 + $0x1a0] ss:$16 sps:$4 sm:$0xff]  }
  0x79   : > { %2439 = vmatmul.mubr.bf16.gmra.mrb[20].mxu0 %v11672_v35  ;;  %2955 = vmatprep.subr.bf16.mxu1 %v9885_v44  ;;  %v11700_v44 = vld [vmem:[%s12488_s28 + $0x1e4] ss:$16 sps:$4 sm:$0xff]  }
  0x7a   : > { %2825 = vmatmul.mubr.bf16.gmra.mrb[20].mxu1 %v11672_v35  ;;  %2448 = vmatprep.mubr.bf16.mxu0 %v11673_v39  ;;  %v11687_v35 = vld [vmem:[%s12488_s28 + $0x140] ss:$16 sps:$4 sm:$0xff]  }
  0x7b   : > { %2834 = vmatprep.mubr.bf16.mxu1 %v11673_v39  ;;  %2570 = vmatpush1.bf16.msra.mxu0 %v9882_v45  ;;  %v11693_v39 = vld [vmem:[%s12488_s28 + $0x180] ss:$16 sps:$4 sm:$0xff]  }
  0x7c   : > { %2571 = vmatprep.subr.bf16.mxu0 %v9891_v48  ;;  %2956 = vmatpush1.bf16.msra.mxu1 %v9884_v49  ;;  %v11702_v45 = vld [vmem:[%s12488_s28 + $0x1e0] ss:$16 sps:$4 sm:$0xff]  }
  0x7d   : > { %2957 = vmatprep.subr.bf16.mxu1 %v9893_v50  ;;  %v468_v48 = vld [vmem:[%s15660_s1 + $0x50] sm:$0xff]  ;;  %v469_v50 = vld [vmem:[%s15660_s1 + $0x58] sm:$0xff] }
  0x7e   : > { %v472_v49 = vld [vmem:[%s15660_s1 + $0x70] sm:$0xff]  ;;  %v9688_v22 = vcombine.low %v469_v50, %v473_v51 }
  0x7f   : > { %2572 = vmatpush1.bf16.msra.mxu0 %v9890_v54  ;;  %v480_v54 = vld [vmem:[%s15660_s1 + $0xb0] sm:$0xff]  ;;  %v9687_v55 = vcombine.high %v468_v48, %v472_v49  ;;  %v9686_v61 = vcombine.low %v468_v48, %v472_v49 }
  0x80   : > { %2573 = vmatprep.subr.bf16.mxu0 %v9899_v58  ;;  %2958 = vmatpush1.bf16.msra.mxu1 %v9892_v59  ;;  %v9689_v58 = vcombine.high %v469_v50, %v473_v51  ;;  %v12880_v59 = vld [vmem:[%s15660_s1 + $0x410] sm:$0xff]  ;;  %v525_v50 = vld [vmem:[%s15660_s1 + $0x218] sm:$0xff] }
  0x81   : > { %2449 = vmatmul.mubr.bf16.gmra.mrb[24].mxu0 %v11675_v53  ;;  %2959 = vmatprep.subr.bf16.mxu1 %v9901_v62  ;;  %v9806_v62 = vcombine.low %v12880_v59, %v12885_v60  ;;  %v529_v51 = vld [vmem:[%s15660_s1 + $0x238] sm:$0xff] }
  0x82   : > { %2835 = vmatmul.mubr.bf16.gmra.mrb[24].mxu1 %v11675_v53  ;;  %2458 = vmatprep.mubr.bf16.mxu0 %v11676_v57  ;;  %v476_v53 = vld [vmem:[%s15660_s1 + $0x90] sm:$0xff] }
  0x83   : > { %2844 = vmatprep.mubr.bf16.mxu1 %v11676_v57  ;;  %2574 = vmatpush1.bf16.msra.mxu0 %v9898_v63  ;;  %v481_v57 = vld [vmem:[%s15660_s1 + $0xb8] sm:$0xff]  ;;  %v9695_v0 = vcombine.high %v476_v53, %v480_v54  ;;  %v9694_v5 = vcombine.low %v476_v53, %v480_v54  ;;  %v532_v54 = vld [vmem:[%s15660_s1 + $0x250] sm:$0xff] }
  0x84   : > { %2575 = vmatprep.subr.bf16.mxu0 %v9907_v2  ;;  %2960 = vmatpush1.bf16.msra.mxu1 %v9900_v3  ;;  %v11708_v63 = vld [vmem:[%s12488_s28 + $0x28] ss:$16 sps:$4 sm:$0xff]   ;;  %v488_v2 = vld [vmem:[%s15660_s1 + $0xf0] sm:$0xff]  ;;  %v11709_v3 = vld [vmem:[%s12488_s28 + $0x4c] ss:$16 sps:$4 sm:$0xff]   ;;  %v9696_v9 = vcombine.low %v477_v56, %v481_v57 }
  0x85   : > { %2961 = vmatprep.subr.bf16.mxu1 %v9909_v4  ;;  %v9697_v4 = vcombine.high %v477_v56, %v481_v57  ;;  %v9702_v14 = vcombine.low %v484_v1, %v488_v2  ;;  %v11718_v56 = vld [vmem:[%s12488_s28 + $0xac] ss:$16 sps:$4 sm:$0xff]  }
  0x87   : > { %2576 = vmatpush1.bf16.msra.mxu0 %v9906_v8  ;;  %v9703_v8 = vcombine.high %v484_v1, %v488_v2  ;;  %v540_v2 = vld [vmem:[%s15660_s1 + $0x290] sm:$0xff] }
  0x88   : > { %2577 = vmatprep.subr.bf16.mxu0 %v9915_v12  ;;  %2962 = vmatpush1.bf16.msra.mxu1 %v9908_v13  ;;  %v497_v12 = vld [vmem:[%s15660_s1 + $0x138] sm:$0xff] }
  0x89   : > { %2459 = vmatmul.mubr.bf16.gmra.mrb[28].mxu0 %v11678_v7  ;;  %2963 = vmatprep.subr.bf16.mxu1 %v9917_v16  ;;  %v11711_v13 = vld [vmem:[%s12488_s28 + $0x48] ss:$16 sps:$4 sm:$0xff]   ;;  %v504_v16 = vld [vmem:[%s15660_s1 + $0x170] sm:$0xff] }
  0x8a   : > { %2845 = vmatmul.mubr.bf16.gmra.mrb[28].mxu1 %v11678_v7  ;;  %2468 = vmatprep.mubr.bf16.mxu0 %v11679_v11  ;;  %v496_v7 = vld [vmem:[%s15660_s1 + $0x130] sm:$0xff]  ;;  %v9719_v29 = vcombine.high %v500_v15, %v504_v16 }
  0x8b   : > { %2854 = vmatprep.mubr.bf16.mxu1 %v11679_v11  ;;  %2578 = vmatpush1.bf16.msra.mxu0 %v9914_v17  ;;  %v493_v11 = vld [vmem:[%s15660_s1 + $0x118] sm:$0xff] }
  0x8c   : > { %2579 = vmatprep.subr.bf16.mxu0 %v9923_v18  ;;  %2964 = vmatpush1.bf16.msra.mxu1 %v9916_v19  ;;  %v11712_v17 = vld [vmem:[%s12488_s28 + $0x6c] ss:$16 sps:$4 sm:$0xff]   ;;  %v9711_v18 = vcombine.high %v492_v6, %v496_v7  ;;  %v9712_v30 = vcombine.low %v493_v11, %v497_v12 }
  0x8d   : > { %2965 = vmatprep.subr.bf16.mxu1 %v9925_v20  ;;  %v501_v20 = vld [vmem:[%s15660_s1 + $0x158] sm:$0xff] }
  0x8f   : > { %2580 = vmatpush1.bf16.msra.mxu0 %v9922_v24  ;;  %v9713_v24 = vcombine.high %v493_v11, %v497_v12 }
  0x90   : > { %2966 = vmatpush1.bf16.msra.mxu1 %v9924_v26  ;;  %3128 = vmatprep.subr.bf16.mxu0 %v9679_v27  ;;  %v508_v26 = vld [vmem:[%s15660_s1 + $0x190] sm:$0xff] }
  0x91   : > { %2469 = vmatmul.mubr.bf16.gmra.mrb[32].mxu0 %v11681_v21  ;;  %3514 = vmatprep.subr.bf16.mxu1 %v9681_v31  ;;  %v512_v27 = vld [vmem:[%s15660_s1 + $0x1b0] sm:$0xff] }
  0x92   : > { %2855 = vmatmul.mubr.bf16.gmra.mrb[32].mxu1 %v11681_v21  ;;  %2478 = vmatprep.mubr.bf16.mxu0 %v11682_v25  ;;  %v505_v21 = vld [vmem:[%s15660_s1 + $0x178] sm:$0xff] }
  0x93   : > { %2864 = vmatprep.mubr.bf16.mxu1 %v11682_v25  ;;  %v9710_v25 = vcombine.low %v492_v6, %v496_v7  ;;  %v9721_v31 = vcombine.high %v501_v20, %v505_v21  ;;  %v11720_v6 = vld [vmem:[%s12488_s28 + $0xa8] ss:$16 sps:$4 sm:$0xff]  }
  0x99   : > { %2479 = vmatmul.mubr.bf16.gmra.mrb[36].mxu0 %v11684_v33 }
  0x9a   : > { %2865 = vmatmul.mubr.bf16.gmra.mrb[36].mxu1 %v11684_v33  ;;  %2488 = vmatprep.mubr.bf16.mxu0 %v11685_v34  ;;  %v513_v33 = vld [vmem:[%s15660_s1 + $0x1b8] sm:$0xff] }
  0x9b   : > { %2874 = vmatprep.mubr.bf16.mxu1 %v11685_v34  ;;  %v11714_v34 = vld [vmem:[%s12488_s28 + $0x68] ss:$16 sps:$4 sm:$0xff]  }
  0xa1   : > { %2489 = vmatmul.mubr.bf16.gmra.mrb[40].mxu0 %v11687_v35 }
  0xa2   : > { %2875 = vmatmul.mubr.bf16.gmra.mrb[40].mxu1 %v11687_v35  ;;  %2498 = vmatprep.mubr.bf16.mxu0 %v11688_v36  ;;  %v9718_v35 = vcombine.low %v500_v15, %v504_v16  ;;  %v553_v15 = vld [vmem:[%s15660_s1 + $0x2f8] sm:$0xff] }
  0xa3   : > { %2884 = vmatprep.mubr.bf16.mxu1 %v11688_v36  ;;  %v516_v36 = vld [vmem:[%s15660_s1 + $0x1d0] sm:$0xff] }
  0xa9   : > { %2499 = vmatmul.mubr.bf16.gmra.mrb[44].mxu0 %v11690_v37 }
  0xaa   : > { %2885 = vmatmul.mubr.bf16.gmra.mrb[44].mxu1 %v11690_v37  ;;  %2508 = vmatprep.mubr.bf16.mxu0 %v11691_v38  ;;  %v520_v37 = vld [vmem:[%s15660_s1 + $0x1f0] sm:$0xff] }
  0xab   : > { %2894 = vmatprep.mubr.bf16.mxu1 %v11691_v38  ;;  %v11715_v38 = vld [vmem:[%s12488_s28 + $0x8c] ss:$16 sps:$4 sm:$0xff]   ;;  %v9734_v53 = vcombine.low %v516_v36, %v520_v37 }
  0xb1   : > { %2509 = vmatmul.mubr.bf16.gmra.mrb[48].mxu0 %v11693_v39 }
  0xb2   : > { %2895 = vmatmul.mubr.bf16.gmra.mrb[48].mxu1 %v11693_v39  ;;  %2518 = vmatprep.mubr.bf16.mxu0 %v11694_v40  ;;  %v9727_v39 = vcombine.high %v508_v26, %v512_v27 }
  0xb3   : > { %2904 = vmatprep.mubr.bf16.mxu1 %v11694_v40  ;;  %v9720_v40 = vcombine.low %v501_v20, %v505_v21  ;;  %v560_v20 = vld [vmem:[%s15660_s1 + $0x330] sm:$0xff] }
  0xb9   : > { %2519 = vmatmul.mubr.bf16.gmra.mrb[52].mxu0 %v11696_v41 }
  0xba   : > { %2905 = vmatmul.mubr.bf16.gmra.mrb[52].mxu1 %v11696_v41  ;;  %2528 = vmatprep.mubr.bf16.mxu0 %v11697_v42  ;;  %v517_v41 = vld [vmem:[%s15660_s1 + $0x1d8] sm:$0xff] }
  0xbb   : > { %2914 = vmatprep.mubr.bf16.mxu1 %v11697_v42  ;;  %v521_v42 = vld [vmem:[%s15660_s1 + $0x1f8] sm:$0xff] }
  0xbc   : > { %v9737_v49 = vcombine.high %v517_v41, %v521_v42 }
  0xc1   : > { %2529 = vmatmul.mubr.bf16.gmra.mrb[56].mxu0 %v11699_v43 }
  0xc2   : > { %2915 = vmatmul.mubr.bf16.gmra.mrb[56].mxu1 %v11699_v43  ;;  %2538 = vmatprep.mubr.bf16.mxu0 %v11700_v44 }
  0xc3   : > { %2924 = vmatprep.mubr.bf16.mxu1 %v11700_v44  ;;  %v9726_v44 = vcombine.low %v508_v26, %v512_v27 }
  0xc9   : > { %2539 = vmatmul.mubr.bf16.gmra.mrb[60].mxu0 %v11702_v45 }
  0xca   : > { %2925 = vmatmul.mubr.bf16.gmra.mrb[60].mxu1 %v11702_v45  ;;  %2581 = vmatprep.mubr.bf16.mxu0 %v11705_v46  ;;  %v524_v45 = vld [vmem:[%s15660_s1 + $0x210] sm:$0xff] }
  0xcb   : > { %2967 = vmatprep.mubr.bf16.mxu1 %v11705_v46  ;;  %v528_v46 = vld [vmem:[%s15660_s1 + $0x230] sm:$0xff] }
  0xcc   : > { %v9743_v57 = vcombine.high %v524_v45, %v528_v46  ;;  %v9742_v1 = vcombine.low %v524_v45, %v528_v46 }
  0xd1   : > { %2582 = vmatmul.mubr.bf16.vlgmr.msra.gmra.mrb[0].mxu0 %v11703_v47 }
  0xd2   : > { %2968 = vmatmul.mubr.bf16.vlgmr.msra.gmra.mrb[0].mxu1 %v11703_v47  ;;  %3129 = vmatpush1.bf16.msra.mxu0 %v9678_v28  ;;  %v489_v28 = vld [vmem:[%s15660_s1 + $0xf8] sm:$0xff]  ;;  %v9735_v47 = vcombine.high %v516_v36, %v520_v37 }
  0xd3   : > { %2591 = vmatprep.mubr.bf16.mxu0 %v11706_v52  ;;  %2977 = vmatprep.mubr.bf16.mxu1 %v11706_v52  ;;  %v9705_v10 = vcombine.high %v485_v23, %v489_v28  ;;  %v9704_v19 = vcombine.low %v485_v23, %v489_v28  ;;  %v11717_v52 = vld [vmem:[%s12488_s28 + $0x88] ss:$16 sps:$4 sm:$0xff]   ;;  %v9744_v23 = vcombine.low %v525_v50, %v529_v51 }
  0xd4   : > { %3130 = vmatprep.subr.bf16.mxu0 %v9687_v55  ;;  %3515 = vmatpush1.bf16.msra.mxu1 %v9680_v32  ;;  %v509_v32 = vld [vmem:[%s15660_s1 + $0x198] sm:$0xff]  ;;  %v536_v55 = vld [vmem:[%s15660_s1 + $0x270] sm:$0xff] }
  0xd5   : > { %3516 = vmatprep.subr.bf16.mxu1 %v9689_v58  ;;  %v9729_v43 = vcombine.high %v509_v32, %v513_v33  ;;  %v9728_v48 = vcombine.low %v509_v32, %v513_v33  ;;  %v9736_v58 = vcombine.low %v517_v41, %v521_v42  ;;  %v9750_v7 = vcombine.low %v532_v54, %v536_v55  ;;  %v568_v32 = vld [vmem:[%s15660_s1 + $0x370] sm:$0xff]  ;;  %v569_v36 = vld [vmem:[%s15660_s1 + $0x378] sm:$0xff] }
  0xd6   : > { %3131 = vmatpush1.bf16.msra.mxu0 %v9686_v61  ;;  %v533_v61 = vld [vmem:[%s15660_s1 + $0x258] sm:$0xff]  ;;  %v576_v41 = vld [vmem:[%s15660_s1 + $0x3b0] sm:$0xff] }
  0xd7   : > { %3132 = vmatprep.subr.bf16.mxu0 %v9695_v0  ;;  %v9745_v0 = vcombine.high %v525_v50, %v529_v51  ;;  %v584_v50 = vld [vmem:[%s15660_s1 + $0x3f0] sm:$0xff] }
  0xd8   : > { %3517 = vmatpush1.bf16.msra.mxu1 %v9688_v22  ;;  %v9751_v22 = vcombine.high %v532_v54, %v536_v55  ;;  %v585_v54 = vld [vmem:[%s15660_s1 + $0x3f8] sm:$0xff] }
  0xd9   : > { %2592 = vmatmul.mubr.bf16.gmra.mrb[4].mxu0 %v11708_v63  ;;  %3518 = vmatprep.subr.bf16.mxu1 %v9697_v4  ;;  %v541_v4 = vld [vmem:[%s15660_s1 + $0x298] sm:$0xff] }
  0xda   : > { %2978 = vmatmul.mubr.bf16.gmra.mrb[4].mxu1 %v11708_v63  ;;  %2601 = vmatprep.mubr.bf16.mxu0 %v11709_v3  ;;  %v537_v63 = vld [vmem:[%s15660_s1 + $0x278] sm:$0xff] }
  0xdb   : > { %2987 = vmatprep.mubr.bf16.mxu1 %v11709_v3  ;;  %3133 = vmatpush1.bf16.msra.mxu0 %v9694_v5  ;;  %v544_v3 = vld [vmem:[%s15660_s1 + $0x2b0] sm:$0xff]  ;;  %v9753_v28 = vcombine.high %v533_v61, %v537_v63  ;;  %v545_v5 = vld [vmem:[%s15660_s1 + $0x2b8] sm:$0xff]  ;;  %v9752_v12 = vcombine.low %v533_v61, %v537_v63 }
  0xdc   : > { %3134 = vmatprep.subr.bf16.mxu0 %v9703_v8  ;;  %3519 = vmatpush1.bf16.msra.mxu1 %v9696_v9  ;;  %v548_v8 = vld [vmem:[%s15660_s1 + $0x2d0] sm:$0xff]  ;;  %v9759_v11 = vcombine.high %v540_v2, %v544_v3  ;;  %v9758_v16 = vcombine.low %v540_v2, %v544_v3  ;;  %v11730_v2 = vld [vmem:[%s12488_s28 + $0x12c] ss:$16 sps:$4 sm:$0xff]  }
  0xdd   : > { %3520 = vmatprep.subr.bf16.mxu1 %v9705_v10  ;;  %v552_v9 = vld [vmem:[%s15660_s1 + $0x2f0] sm:$0xff]  ;;  %v11721_v10 = vld [vmem:[%s12488_s28 + $0xcc] ss:$16 sps:$4 sm:$0xff]  }
  0xde   : > { %v9766_v26 = vcombine.low %v548_v8, %v552_v9  ;;  %v13072_v3 = vld [vmem:[%s15660_s1 + $0x418] sm:$0xff] }
  0xdf   : > { %3135 = vmatpush1.bf16.msra.mxu0 %v9702_v14  ;;  %v9761_v14 = vcombine.high %v541_v4, %v545_v5 }
  0xe0   : > { %3136 = vmatprep.subr.bf16.mxu0 %v9711_v18  ;;  %3521 = vmatpush1.bf16.msra.mxu1 %v9704_v19  ;;  %v9760_v18 = vcombine.low %v541_v4, %v545_v5  ;;  %v556_v19 = vld [vmem:[%s15660_s1 + $0x310] sm:$0xff]  ;;  %v11732_v4 = vld [vmem:[%s12488_s28 + $0x128] ss:$16 sps:$4 sm:$0xff]   ;;  %v11733_v5 = vld [vmem:[%s12488_s28 + $0x14c] ss:$16 sps:$4 sm:$0xff]  }
  0xe1   : > { %2602 = vmatmul.mubr.bf16.gmra.mrb[8].mxu0 %v11711_v13  ;;  %3522 = vmatprep.subr.bf16.mxu1 %v9713_v24  ;;  %v557_v24 = vld [vmem:[%s15660_s1 + $0x318] sm:$0xff]  ;;  %v9775_v27 = vcombine.high %v556_v19, %v560_v20  ;;  %v9774_v37 = vcombine.low %v556_v19, %v560_v20  ;;  %v600_v19 = vld [vmem:[%s15660_s1 + $0x470] sm:$0xff] }
  0xe2   : > { %2988 = vmatmul.mubr.bf16.gmra.mrb[8].mxu1 %v11711_v13  ;;  %2611 = vmatprep.mubr.bf16.mxu0 %v11712_v17  ;;  %v549_v13 = vld [vmem:[%s15660_s1 + $0x2d8] sm:$0xff] }
  0xe3   : > { %2997 = vmatprep.mubr.bf16.mxu1 %v11712_v17  ;;  %3137 = vmatpush1.bf16.msra.mxu0 %v9710_v25  ;;  %v9767_v17 = vcombine.high %v548_v8, %v552_v9  ;;  %v9769_v21 = vcombine.high %v549_v13, %v553_v15  ;;  %v561_v25 = vld [vmem:[%s15660_s1 + $0x338] sm:$0xff] }
  0xe4   : > { %3138 = vmatprep.subr.bf16.mxu0 %v9719_v29  ;;  %3523 = vmatpush1.bf16.msra.mxu1 %v9712_v30  ;;  %v9768_v29 = vcombine.low %v549_v13, %v553_v15  ;;  %v11723_v30 = vld [vmem:[%s12488_s28 + $0xc8] ss:$16 sps:$4 sm:$0xff]   ;;  %v9777_v33 = vcombine.high %v557_v24, %v561_v25  ;;  %v11739_v9 = vld [vmem:[%s12488_s28 + $0x18c] ss:$16 sps:$4 sm:$0xff]  }
  0xe5   : > { %3524 = vmatprep.subr.bf16.mxu1 %v9721_v31  ;;  %v564_v31 = vld [vmem:[%s15660_s1 + $0x350] sm:$0xff]  ;;  %v11738_v8 = vld [vmem:[%s12488_s28 + $0x168] ss:$16 sps:$4 sm:$0xff]   ;;  %v11745_v13 = vld [vmem:[%s12488_s28 + $0x1cc] ss:$16 sps:$4 sm:$0xff]  }
  0xe6   : > { %v9782_v45 = vcombine.low %v564_v31, %v568_v32  ;;  %v11748_v15 = vld [vmem:[%s12488_s28 + $0x1ec] ss:$16 sps:$4 sm:$0xff]  }
  0xe7   : > { %3139 = vmatpush1.bf16.msra.mxu0 %v9718_v35  ;;  %v565_v35 = vld [vmem:[%s15660_s1 + $0x358] sm:$0xff] }
  0xe8   : > { %3140 = vmatprep.subr.bf16.mxu0 %v9727_v39  ;;  %3525 = vmatpush1.bf16.msra.mxu1 %v9720_v40  ;;  %v9776_v39 = vcombine.low %v557_v24, %v561_v25  ;;  %v572_v40 = vld [vmem:[%s15660_s1 + $0x390] sm:$0xff]  ;;  %v9785_v42 = vcombine.high %v565_v35, %v569_v36  ;;  %v597_v20 = vld [vmem:[%s15660_s1 + $0x458] sm:$0xff] }
  0xe9   : > { %2612 = vmatmul.mubr.bf16.gmra.mrb[12].mxu0 %v11714_v34  ;;  %3526 = vmatprep.subr.bf16.mxu1 %v9729_v43  ;;  %v573_v43 = vld [vmem:[%s15660_s1 + $0x398] sm:$0xff]  ;;  %v9791_v46 = vcombine.high %v572_v40, %v576_v41  ;;  %v9790_v55 = vcombine.low %v572_v40, %v576_v41  ;;  %v604_v25 = vld [vmem:[%s15660_s1 + $0x490] sm:$0xff] }
  0xea   : > { %2998 = vmatmul.mubr.bf16.gmra.mrb[12].mxu1 %v11714_v34  ;;  %2621 = vmatprep.mubr.bf16.mxu0 %v11715_v38  ;;  %v11724_v34 = vld [vmem:[%s12488_s28 + $0xec] ss:$16 sps:$4 sm:$0xff]   ;;  %v12258_v41 = vld [vmem:[%s12488_s28 + $0x20] ss:$16 sps:$4 sm:$0xff]  }
  0xeb   : > { %3007 = vmatprep.mubr.bf16.mxu1 %v11715_v38  ;;  %3141 = vmatpush1.bf16.msra.mxu0 %v9726_v44  ;;  %v9783_v38 = vcombine.high %v564_v31, %v568_v32  ;;  %v577_v44 = vld [vmem:[%s15660_s1 + $0x3b8] sm:$0xff] }
  0xec   : > { %3142 = vmatprep.subr.bf16.mxu0 %v9735_v47  ;;  %3527 = vmatpush1.bf16.msra.mxu1 %v9728_v48  ;;  %v9784_v47 = vcombine.low %v565_v35, %v569_v36  ;;  %v11726_v48 = vld [vmem:[%s12488_s28 + $0xe8] ss:$16 sps:$4 sm:$0xff]   ;;  %v9793_v51 = vcombine.high %v573_v43, %v577_v44 }
  0xed   : > { %3528 = vmatprep.subr.bf16.mxu1 %v9737_v49  ;;  %v580_v49 = vld [vmem:[%s15660_s1 + $0x3d0] sm:$0xff]  ;;  %v605_v31 = vld [vmem:[%s15660_s1 + $0x498] sm:$0xff] }
  0xee   : > { %v9798_v61 = vcombine.low %v580_v49, %v584_v50  ;;  %v609_v32 = vld [vmem:[%s15660_s1 + $0x4b8] sm:$0xff] }
  0xef   : > { %3143 = vmatpush1.bf16.msra.mxu0 %v9734_v53  ;;  %v581_v53 = vld [vmem:[%s15660_s1 + $0x3d8] sm:$0xff]  ;;  %v9825_v35 = vcombine.high %v605_v31, %v609_v32  ;;  %v9824_v40 = vcombine.low %v605_v31, %v609_v32 }
  0xf0   : > { %3144 = vmatprep.subr.bf16.mxu0 %v9743_v57  ;;  %3529 = vmatpush1.bf16.msra.mxu1 %v9736_v58  ;;  %v9792_v57 = vcombine.low %v573_v43, %v577_v44  ;;  %v9801_v58 = vcombine.high %v581_v53, %v585_v54  ;;  %v9800_v63 = vcombine.low %v581_v53, %v585_v54  ;;  %v613_v36 = vld [vmem:[%s15660_s1 + $0x4d8] sm:$0xff]  ;;  %v624_v43 = vld [vmem:[%s15660_s1 + $0x530] sm:$0xff] }
  0xf1   : > { %2622 = vmatmul.mubr.bf16.gmra.mrb[16].mxu0 %v11717_v52  ;;  %3530 = vmatprep.subr.bf16.mxu1 %v9745_v0  ;;  %v9807_v0 = vcombine.high %v12880_v59, %v12885_v60  ;;  %v612_v60 = vld [vmem:[%s15660_s1 + $0x4d0] sm:$0xff]  ;;  %v629_v54 = vld [vmem:[%s15660_s1 + $0x558] sm:$0xff] }
  0xf2   : > { %3008 = vmatmul.mubr.bf16.gmra.mrb[16].mxu1 %v11717_v52  ;;  %2631 = vmatprep.mubr.bf16.mxu0 %v11718_v56  ;;  %v11727_v52 = vld [vmem:[%s12488_s28 + $0x10c] ss:$16 sps:$4 sm:$0xff]  }
  0xf3   : > { %3017 = vmatprep.mubr.bf16.mxu1 %v11718_v56  ;;  %3145 = vmatpush1.bf16.msra.mxu0 %v9742_v1  ;;  %v9799_v56 = vcombine.high %v580_v49, %v584_v50  ;;  %v11729_v1 = vld [vmem:[%s12488_s28 + $0x108] ss:$16 sps:$4 sm:$0xff]  }
  0xf4   : > { %3146 = vmatprep.subr.bf16.mxu0 %v9751_v22  ;;  %3531 = vmatpush1.bf16.msra.mxu1 %v9744_v23  ;;  %v13077_v22 = vld [vmem:[%s15660_s1 + $0x438] sm:$0xff] }
  0xf5   : > { %3532 = vmatprep.subr.bf16.mxu1 %v9753_v28  ;;  %v9809_v23 = vcombine.high %v13072_v3, %v13077_v22  ;;  %v9808_v28 = vcombine.low %v13072_v3, %v13077_v22  ;;  %v637_v3 = vld [vmem:[%s15660_s1 + $0x598] sm:$0xff] }
  0xf6   : > { %v641_v22 = vld [vmem:[%s15660_s1 + $0x5b8] sm:$0xff] }
  0xf7   : > { %3147 = vmatpush1.bf16.msra.mxu0 %v9750_v7  ;;  %v11736_v7 = vld [vmem:[%s12488_s28 + $0x16c] ss:$16 sps:$4 sm:$0xff]  }
  0xf8   : > { %3148 = vmatprep.subr.bf16.mxu0 %v9759_v11  ;;  %3533 = vmatpush1.bf16.msra.mxu1 %v9752_v12  ;;  %v11742_v11 = vld [vmem:[%s12488_s28 + $0x1ac] ss:$16 sps:$4 sm:$0xff]   ;;  %v11744_v12 = vld [vmem:[%s12488_s28 + $0x1a8] ss:$16 sps:$4 sm:$0xff]  }
  0xf9   : > { %2632 = vmatmul.mubr.bf16.gmra.mrb[20].mxu0 %v11720_v6  ;;  %3534 = vmatprep.subr.bf16.mxu1 %v9761_v14  ;;  %v11747_v14 = vld [vmem:[%s12488_s28 + $0x1c8] ss:$16 sps:$4 sm:$0xff]  }
  0xfa   : > { %3018 = vmatmul.mubr.bf16.gmra.mrb[20].mxu1 %v11720_v6  ;;  %2641 = vmatprep.mubr.bf16.mxu0 %v11721_v10  ;;  %v11735_v6 = vld [vmem:[%s12488_s28 + $0x148] ss:$16 sps:$4 sm:$0xff]  }
  0xfb   : > { %3027 = vmatprep.mubr.bf16.mxu1 %v11721_v10  ;;  %3149 = vmatpush1.bf16.msra.mxu0 %v9758_v16  ;;  %v11741_v10 = vld [vmem:[%s12488_s28 + $0x188] ss:$16 sps:$4 sm:$0xff]  }
  0xfc   : > { %3150 = vmatprep.subr.bf16.mxu0 %v9767_v17  ;;  %3535 = vmatpush1.bf16.msra.mxu1 %v9760_v18  ;;  %v11750_v16 = vld [vmem:[%s12488_s28 + $0x1e8] ss:$16 sps:$4 sm:$0xff]   ;;  %v12255_v17 = vld [vmem:[%s12488_s28 + $0x4] ss:$16 sps:$4 sm:$0xff]  }
  0xfd   : > { %3536 = vmatprep.subr.bf16.mxu1 %v9769_v21  ;;  %v596_v18 = vld [vmem:[%s15660_s1 + $0x450] sm:$0xff]  ;;  %v601_v21 = vld [vmem:[%s15660_s1 + $0x478] sm:$0xff] }
  0xfe   : > { %v9815_v24 = vcombine.high %v596_v18, %v600_v19  ;;  %v9816_v59 = vcombine.low %v597_v20, %v601_v21 }
  0xff   : > { %3151 = vmatpush1.bf16.msra.mxu0 %v9766_v26  ;;  %v608_v26 = vld [vmem:[%s15660_s1 + $0x4b0] sm:$0xff] }
 0x100   : > { %3152 = vmatprep.subr.bf16.mxu0 %v9775_v27  ;;  %3537 = vmatpush1.bf16.msra.mxu1 %v9768_v29  ;;  %v12256_v27 = vld [vmem:[%s12488_s28] ss:$16 sps:$4 sm:$0xff]   ;;  %v9817_v29 = vcombine.high %v597_v20, %v601_v21 }
 0x101   : > { %2642 = vmatmul.mubr.bf16.gmra.mrb[24].mxu0 %v11723_v30  ;;  %3538 = vmatprep.subr.bf16.mxu1 %v9777_v33  ;;  %v12257_v33 = vld [vmem:[%s12488_s28 + $0x24] ss:$16 sps:$4 sm:$0xff]  }
 0x102   : > { %3028 = vmatmul.mubr.bf16.gmra.mrb[24].mxu1 %v11723_v30  ;;  %2651 = vmatprep.mubr.bf16.mxu0 %v11724_v34  ;;  %v9814_v30 = vcombine.low %v596_v18, %v600_v19  ;;  %v653_v18 = vld [vmem:[%s15660_s1 + $0x618] sm:$0xff] }
 0x103   : > { %3037 = vmatprep.mubr.bf16.mxu1 %v11724_v34  ;;  %3153 = vmatpush1.bf16.msra.mxu0 %v9774_v37  ;;  %v9823_v34 = vcombine.high %v604_v25, %v608_v26  ;;  %v617_v37 = vld [vmem:[%s15660_s1 + $0x4f8] sm:$0xff] }
 0x104   : > { %3154 = vmatprep.subr.bf16.mxu0 %v9783_v38  ;;  %3539 = vmatpush1.bf16.msra.mxu1 %v9776_v39  ;;  %v9822_v38 = vcombine.low %v604_v25, %v608_v26  ;;  %v9833_v44 = vcombine.high %v613_v36, %v617_v37  ;;  %v9832_v50 = vcombine.low %v613_v36, %v617_v37  ;;  %v657_v19 = vld [vmem:[%s15660_s1 + $0x638] sm:$0xff]  ;;  %v660_v25 = vld [vmem:[%s15660_s1 + $0x650] sm:$0xff] }
 0x105   : > { %3540 = vmatprep.subr.bf16.mxu1 %v9785_v42  ;;  %v620_v42 = vld [vmem:[%s15660_s1 + $0x510] sm:$0xff]  ;;  %v669_v36 = vld [vmem:[%s15660_s1 + $0x698] sm:$0xff] }
 0x106   : > { %v9839_v49 = vcombine.high %v620_v42, %v624_v43  ;;  %v664_v26 = vld [vmem:[%s15660_s1 + $0x670] sm:$0xff]  ;;  %v673_v37 = vld [vmem:[%s15660_s1 + $0x6b8] sm:$0xff] }
 0x107   : > { %3155 = vmatpush1.bf16.msra.mxu0 %v9782_v45  ;;  %v12259_v45 = vld [vmem:[%s12488_s28 + $0x44] ss:$16 sps:$4 sm:$0xff]   ;;  %v9879_v32 = vcombine.high %v660_v25, %v664_v26 }
 0x108   : > { %3156 = vmatprep.subr.bf16.mxu0 %v9791_v46  ;;  %3541 = vmatpush1.bf16.msra.mxu1 %v9784_v47  ;;  %v621_v46 = vld [vmem:[%s15660_s1 + $0x518] sm:$0xff] }
 0x109   : > { %2652 = vmatmul.mubr.bf16.gmra.mrb[28].mxu0 %v11726_v48  ;;  %3542 = vmatprep.subr.bf16.mxu1 %v9793_v51  ;;  %v625_v47 = vld [vmem:[%s15660_s1 + $0x538] sm:$0xff]  ;;  %v628_v51 = vld [vmem:[%s15660_s1 + $0x550] sm:$0xff] }
 0x10a   : > { %3038 = vmatmul.mubr.bf16.gmra.mrb[28].mxu1 %v11726_v48  ;;  %2661 = vmatprep.mubr.bf16.mxu0 %v11727_v52  ;;  %v9841_v53 = vcombine.high %v621_v46, %v625_v47 }
 0x10b   : > { %3047 = vmatprep.mubr.bf16.mxu1 %v11727_v52  ;;  %3157 = vmatpush1.bf16.msra.mxu0 %v9790_v55  ;;  %v632_v52 = vld [vmem:[%s15660_s1 + $0x570] sm:$0xff]  ;;  %v633_v55 = vld [vmem:[%s15660_s1 + $0x578] sm:$0xff] }
 0x10c   : > { %3158 = vmatprep.subr.bf16.mxu0 %v9799_v56  ;;  %3543 = vmatpush1.bf16.msra.mxu1 %v9792_v57  ;;  %v9838_v56 = vcombine.low %v620_v42, %v624_v43  ;;  %v9847_v57 = vcombine.high %v628_v51, %v632_v52  ;;  %v680_v42 = vld [vmem:[%s15660_s1 + $0x6f0] sm:$0xff]  ;;  %v9889_v43 = vcombine.high %v669_v36, %v673_v37 }
 0x10d   : > { %3544 = vmatprep.subr.bf16.mxu1 %v9801_v58  ;;  %v9840_v58 = vcombine.low %v621_v46, %v625_v47 }
 0x10f   : > { %3159 = vmatpush1.bf16.msra.mxu0 %v9798_v61  ;;  %v12260_v61 = vld [vmem:[%s12488_s28 + $0x40] ss:$16 sps:$4 sm:$0xff]  }
 0x110   : > { %3545 = vmatpush1.bf16.msra.mxu1 %v9800_v63  ;;  %3321 = vmatprep.subr.bf16.mxu0 %v9807_v0  ;;  %v636_v63 = vld [vmem:[%s15660_s1 + $0x590] sm:$0xff] }
 0x111   : > { %2662 = vmatmul.mubr.bf16.gmra.mrb[32].mxu0 %v11729_v1  ;;  %3707 = vmatprep.subr.bf16.mxu1 %v9809_v23  ;;  %v640_v0 = vld [vmem:[%s15660_s1 + $0x5b0] sm:$0xff]  ;;  %v9846_v23 = vcombine.low %v628_v51, %v632_v52 }
 0x112   : > { %3048 = vmatmul.mubr.bf16.gmra.mrb[32].mxu1 %v11729_v1  ;;  %2671 = vmatprep.mubr.bf16.mxu0 %v11730_v2  ;;  %v9849_v1 = vcombine.high %v629_v54, %v633_v55  ;;  %v688_v51 = vld [vmem:[%s15660_s1 + $0x730] sm:$0xff] }
 0x113   : > { %3057 = vmatprep.mubr.bf16.mxu1 %v11730_v2  ;;  %v12261_v2 = vld [vmem:[%s12488_s28 + $0x64] ss:$16 sps:$4 sm:$0xff]  }
 0x119   : > { %2672 = vmatmul.mubr.bf16.gmra.mrb[36].mxu0 %v11732_v4 }
 0x11a   : > { %3058 = vmatmul.mubr.bf16.gmra.mrb[36].mxu1 %v11732_v4  ;;  %2681 = vmatprep.mubr.bf16.mxu0 %v11733_v5  ;;  %v9848_v4 = vcombine.low %v629_v54, %v633_v55  ;;  %v685_v54 = vld [vmem:[%s15660_s1 + $0x718] sm:$0xff] }
 0x11b   : > { %3067 = vmatprep.mubr.bf16.mxu1 %v11733_v5  ;;  %v644_v5 = vld [vmem:[%s15660_s1 + $0x5d0] sm:$0xff]  ;;  %v689_v55 = vld [vmem:[%s15660_s1 + $0x738] sm:$0xff] }
 0x121   : > { %2682 = vmatmul.mubr.bf16.gmra.mrb[40].mxu0 %v11735_v6 }
 0x122   : > { %3068 = vmatmul.mubr.bf16.gmra.mrb[40].mxu1 %v11735_v6  ;;  %2691 = vmatprep.mubr.bf16.mxu0 %v11736_v7  ;;  %v648_v6 = vld [vmem:[%s15660_s1 + $0x5f0] sm:$0xff] }
 0x123   : > { %3077 = vmatprep.mubr.bf16.mxu1 %v11736_v7  ;;  %v9857_v7 = vcombine.high %v637_v3, %v641_v22  ;;  %v9862_v20 = vcombine.low %v644_v5, %v648_v6 }
 0x129   : > { %2692 = vmatmul.mubr.bf16.gmra.mrb[44].mxu0 %v11738_v8 }
 0x12a   : > { %3078 = vmatmul.mubr.bf16.gmra.mrb[44].mxu1 %v11738_v8  ;;  %2701 = vmatprep.mubr.bf16.mxu0 %v11739_v9  ;;  %v645_v8 = vld [vmem:[%s15660_s1 + $0x5d8] sm:$0xff] }
 0x12b   : > { %3087 = vmatprep.mubr.bf16.mxu1 %v11739_v9  ;;  %v649_v9 = vld [vmem:[%s15660_s1 + $0x5f8] sm:$0xff] }
 0x131   : > { %2702 = vmatmul.mubr.bf16.gmra.mrb[48].mxu0 %v11741_v10 }
 0x132   : > { %3088 = vmatmul.mubr.bf16.gmra.mrb[48].mxu1 %v11741_v10  ;;  %2711 = vmatprep.mubr.bf16.mxu0 %v11742_v11  ;;  %v9854_v10 = vcombine.low %v636_v63, %v640_v0 }
 0x133   : > { %3097 = vmatprep.mubr.bf16.mxu1 %v11742_v11  ;;  %v9863_v11 = vcombine.high %v644_v5, %v648_v6  ;;  %v704_v5 = vld [vmem:[%s15660_s1 + $0x7b0] sm:$0xff] }
 0x139   : > { %2712 = vmatmul.mubr.bf16.gmra.mrb[52].mxu0 %v11744_v12 }
 0x13a   : > { %3098 = vmatmul.mubr.bf16.gmra.mrb[52].mxu1 %v11744_v12  ;;  %2721 = vmatprep.mubr.bf16.mxu0 %v11745_v13  ;;  %v9856_v12 = vcombine.low %v637_v3, %v641_v22 }
 0x13b   : > { %3107 = vmatprep.mubr.bf16.mxu1 %v11745_v13  ;;  %v12262_v13 = vld [vmem:[%s12488_s28 + $0x60] ss:$16 sps:$4 sm:$0xff]  }
 0x141   : > { %2722 = vmatmul.mubr.bf16.gmra.mrb[56].mxu0 %v11747_v14 }
 0x142   : > { %3108 = vmatmul.mubr.bf16.gmra.mrb[56].mxu1 %v11747_v14  ;;  %2731 = vmatprep.mubr.bf16.mxu0 %v11748_v15  ;;  %v652_v14 = vld [vmem:[%s15660_s1 + $0x610] sm:$0xff] }
 0x143   : > { %3117 = vmatprep.mubr.bf16.mxu1 %v11748_v15  ;;  %v656_v15 = vld [vmem:[%s15660_s1 + $0x630] sm:$0xff] }
 0x144   : > { %v9871_v21 = vcombine.high %v652_v14, %v656_v15  ;;  %v9870_v31 = vcombine.low %v652_v14, %v656_v15  ;;  %v712_v14 = vld [vmem:[%s15660_s1 + $0x7f0] sm:$0xff] }
 0x149   : > { %2732 = vmatmul.mubr.bf16.gmra.mrb[60].mxu0 %v11750_v16 }
 0x14a   : > { %3118 = vmatmul.mubr.bf16.gmra.mrb[60].mxu1 %v11750_v16  ;;  %3160 = vmatprep.mubr.bf16.mxu0 %v12255_v17  ;;  %v9865_v16 = vcombine.high %v645_v8, %v649_v9 }
 0x14b   : > { %3546 = vmatprep.mubr.bf16.mxu1 %v12255_v17  ;;  %v12263_v17 = vld [vmem:[%s12488_s28 + $0x84] ss:$16 sps:$4 sm:$0xff]  }
 0x151   : > { %3161 = vmatmul.mubr.bf16.vlgmr.msra.gmra.mrb[64].mxu0 %v12256_v27 }
 0x152   : > { %3547 = vmatmul.mubr.bf16.vlgmr.msra.gmra.mrb[64].mxu1 %v12256_v27  ;;  %3322 = vmatpush1.bf16.msra.mxu0 %v9806_v62  ;;  %v616_v62 = vld [vmem:[%s15660_s1 + $0x4f0] sm:$0xff]  ;;  %v9873_v27 = vcombine.high %v653_v18, %v657_v19 }
 0x153   : > { %3170 = vmatprep.mubr.bf16.mxu0 %v12257_v33  ;;  %3556 = vmatprep.mubr.bf16.mxu1 %v12257_v33  ;;  %v9831_v39 = vcombine.high %v612_v60, %v616_v62  ;;  %v9830_v48 = vcombine.low %v612_v60, %v616_v62  ;;  %v9872_v33 = vcombine.low %v653_v18, %v657_v19  ;;  %v672_v60 = vld [vmem:[%s15660_s1 + $0x6b0] sm:$0xff] }
 0x154   : > { %3323 = vmatprep.subr.bf16.mxu0 %v9815_v24  ;;  %3708 = vmatpush1.bf16.msra.mxu1 %v9808_v28  ;;  %v9855_v28 = vcombine.high %v636_v63, %v640_v0  ;;  %v9864_v24 = vcombine.low %v645_v8, %v649_v9  ;;  %v696_v63 = vld [vmem:[%s15660_s1 + $0x770] sm:$0xff]  ;;  %v9905_v0 = vcombine.high %v685_v54, %v689_v55  ;;  %v701_v8 = vld [vmem:[%s15660_s1 + $0x798] sm:$0xff] }
 0x155   : > { %3709 = vmatprep.subr.bf16.mxu1 %v9817_v29  ;;  %v661_v29 = vld [vmem:[%s15660_s1 + $0x658] sm:$0xff] }
 0x156   : > { %3324 = vmatpush1.bf16.msra.mxu0 %v9814_v30  ;;  %v665_v30 = vld [vmem:[%s15660_s1 + $0x678] sm:$0xff] }
 0x157   : > { %3325 = vmatprep.subr.bf16.mxu0 %v9823_v34  ;;  %v12264_v34 = vld [vmem:[%s12488_s28 + $0x80] ss:$16 sps:$4 sm:$0xff]   ;;  %v9881_v62 = vcombine.high %v661_v29, %v665_v30  ;;  %v705_v9 = vld [vmem:[%s15660_s1 + $0x7b8] sm:$0xff] }
 0x158   : > { %3710 = vmatpush1.bf16.msra.mxu1 %v9816_v59  ;;  %v668_v59 = vld [vmem:[%s15660_s1 + $0x690] sm:$0xff]  ;;  %v9921_v15 = vcombine.high %v701_v8, %v705_v9 }
 0x159   : > { %3171 = vmatmul.mubr.bf16.gmra.mrb[68].mxu0 %v12258_v41  ;;  %3711 = vmatprep.subr.bf16.mxu1 %v9825_v35  ;;  %v12265_v35 = vld [vmem:[%s12488_s28 + $0xa4] ss:$16 sps:$4 sm:$0xff]   ;;  %v9886_v46 = vcombine.low %v668_v59, %v672_v60 }
 0x15a   : > { %3557 = vmatmul.mubr.bf16.gmra.mrb[68].mxu1 %v12258_v41  ;;  %3180 = vmatprep.mubr.bf16.mxu0 %v12259_v45  ;;  %v676_v41 = vld [vmem:[%s15660_s1 + $0x6d0] sm:$0xff] }
 0x15b   : > { %3566 = vmatprep.mubr.bf16.mxu1 %v12259_v45  ;;  %3326 = vmatpush1.bf16.msra.mxu0 %v9822_v38  ;;  %v9878_v38 = vcombine.low %v660_v25, %v664_v26  ;;  %v681_v45 = vld [vmem:[%s15660_s1 + $0x6f8] sm:$0xff]  ;;  %v9895_v47 = vcombine.high %v676_v41, %v680_v42  ;;  %v12271_v25 = vld [vmem:[%s12488_s28 + $0x104] ss:$16 sps:$4 sm:$0xff]  }
 0x15c   : > { %3327 = vmatprep.subr.bf16.mxu0 %v9831_v39  ;;  %3712 = vmatpush1.bf16.msra.mxu1 %v9824_v40  ;;  %v9887_v39 = vcombine.high %v668_v59, %v672_v60  ;;  %v9880_v40 = vcombine.low %v661_v29, %v665_v30  ;;  %v11753_v29 = vld [vmem:[%s15662_s3 + $0x4] ss:$16 sps:$4 sm:$0xff]   ;;  %v11780_v30 = vld [vmem:[%s15662_s3 + $0xc] ss:$16 sps:$4 sm:$0xff]  }
 0x15d   : > { %3713 = vmatprep.subr.bf16.mxu1 %v9833_v44  ;;  %v677_v44 = vld [vmem:[%s15660_s1 + $0x6d8] sm:$0xff]  ;;  %v12275_v60 = vld [vmem:[%s12488_s28 + $0x144] ss:$16 sps:$4 sm:$0xff]  }
 0x15e   : > { %v9897_v52 = vcombine.high %v677_v44, %v681_v45 }
 0x15f   : > { %3328 = vmatpush1.bf16.msra.mxu0 %v9830_v48  ;;  %v9888_v48 = vcombine.low %v669_v36, %v673_v37 }
 0x160   : > { %3329 = vmatprep.subr.bf16.mxu0 %v9839_v49  ;;  %3714 = vmatpush1.bf16.msra.mxu1 %v9832_v50  ;;  %v12266_v49 = vld [vmem:[%s12488_s28 + $0xa0] ss:$16 sps:$4 sm:$0xff]  }
 0x161   : > { %3181 = vmatmul.mubr.bf16.gmra.mrb[72].mxu0 %v12260_v61  ;;  %3715 = vmatprep.subr.bf16.mxu1 %v9841_v53  ;;  %v684_v50 = vld [vmem:[%s15660_s1 + $0x710] sm:$0xff] }
 0x162   : > { %3567 = vmatmul.mubr.bf16.gmra.mrb[72].mxu1 %v12260_v61  ;;  %3190 = vmatprep.mubr.bf16.mxu0 %v12261_v2  ;;  %v12267_v53 = vld [vmem:[%s12488_s28 + $0xc4] ss:$16 sps:$4 sm:$0xff]   ;;  %v9902_v3 = vcombine.low %v684_v50, %v688_v51 }
 0x163   : > { %3576 = vmatprep.mubr.bf16.mxu1 %v12261_v2  ;;  %3330 = vmatpush1.bf16.msra.mxu0 %v9838_v56  ;;  %v9894_v56 = vcombine.low %v676_v41, %v680_v42  ;;  %v692_v61 = vld [vmem:[%s15660_s1 + $0x750] sm:$0xff]  ;;  %v697_v2 = vld [vmem:[%s15660_s1 + $0x778] sm:$0xff] }
 0x164   : > { %3331 = vmatprep.subr.bf16.mxu0 %v9847_v57  ;;  %3716 = vmatpush1.bf16.msra.mxu1 %v9840_v58  ;;  %v9903_v57 = vcombine.high %v684_v50, %v688_v51  ;;  %v9896_v58 = vcombine.low %v677_v44, %v681_v45  ;;  %v9911_v22 = vcombine.high %v692_v61, %v696_v63 }
 0x165   : > { %3717 = vmatprep.subr.bf16.mxu1 %v9849_v1  ;;  %v693_v1 = vld [vmem:[%s15660_s1 + $0x758] sm:$0xff] }
 0x166   : > { %v9913_v6 = vcombine.high %v693_v1, %v697_v2 }
 0x167   : > { %3332 = vmatpush1.bf16.msra.mxu0 %v9846_v23  ;;  %v9904_v23 = vcombine.low %v685_v54, %v689_v55 }
 0x168   : > { %3333 = vmatprep.subr.bf16.mxu0 %v9855_v28  ;;  %3718 = vmatpush1.bf16.msra.mxu1 %v9848_v4  ;;  %v12268_v28 = vld [vmem:[%s12488_s28 + $0xc0] ss:$16 sps:$4 sm:$0xff]  }
 0x169   : > { %3191 = vmatmul.mubr.bf16.gmra.mrb[76].mxu0 %v12262_v13  ;;  %3719 = vmatprep.subr.bf16.mxu1 %v9857_v7  ;;  %v700_v4 = vld [vmem:[%s15660_s1 + $0x790] sm:$0xff] }
 0x16a   : > { %3577 = vmatmul.mubr.bf16.gmra.mrb[76].mxu1 %v12262_v13  ;;  %3200 = vmatprep.mubr.bf16.mxu0 %v12263_v17  ;;  %v12269_v7 = vld [vmem:[%s12488_s28 + $0xe4] ss:$16 sps:$4 sm:$0xff]   ;;  %v9918_v18 = vcombine.low %v700_v4, %v704_v5 }
 0x16b   : > { %3586 = vmatprep.mubr.bf16.mxu1 %v12263_v17  ;;  %3334 = vmatpush1.bf16.msra.mxu0 %v9854_v10  ;;  %v9910_v10 = vcombine.low %v692_v61, %v696_v63  ;;  %v708_v13 = vld [vmem:[%s15660_s1 + $0x7d0] sm:$0xff]  ;;  %v713_v17 = vld [vmem:[%s15660_s1 + $0x7f8] sm:$0xff] }
 0x16c   : > { %3335 = vmatprep.subr.bf16.mxu0 %v9863_v11  ;;  %3720 = vmatpush1.bf16.msra.mxu1 %v9856_v12  ;;  %v9919_v11 = vcombine.high %v700_v4, %v704_v5  ;;  %v9912_v12 = vcombine.low %v693_v1, %v697_v2  ;;  %v9927_v19 = vcombine.high %v708_v13, %v712_v14  ;;  %v12278_v2 = vld [vmem:[%s12488_s28 + $0x160] ss:$16 sps:$4 sm:$0xff]   ;;  %v12279_v4 = vld [vmem:[%s12488_s28 + $0x184] ss:$16 sps:$4 sm:$0xff]  }
 0x16d   : > { %3721 = vmatprep.subr.bf16.mxu1 %v9865_v16  ;;  %v709_v16 = vld [vmem:[%s15660_s1 + $0x7d8] sm:$0xff]  ;;  %v9926_v26 = vcombine.low %v708_v13, %v712_v14 }
 0x16f   : > { %3336 = vmatpush1.bf16.msra.mxu0 %v9862_v20  ;;  %v9920_v20 = vcombine.low %v701_v8, %v705_v9 }
 0x170   : > { %3337 = vmatprep.subr.bf16.mxu0 %v9871_v21  ;;  %3722 = vmatpush1.bf16.msra.mxu1 %v9864_v24  ;;  %v12270_v21 = vld [vmem:[%s12488_s28 + $0xe0] ss:$16 sps:$4 sm:$0xff]   ;;  %v9929_v24 = vcombine.high %v709_v16, %v713_v17 }
 0x171   : > { %3201 = vmatmul.mubr.bf16.gmra.mrb[80].mxu0 %v12264_v34  ;;  %3723 = vmatprep.subr.bf16.mxu1 %v9873_v27  ;;  %v9928_v27 = vcombine.low %v709_v16, %v713_v17 }
 0x172   : > { %3587 = vmatmul.mubr.bf16.gmra.mrb[80].mxu1 %v12264_v34  ;;  %3210 = vmatprep.mubr.bf16.mxu0 %v12265_v35  ;;  %v12274_v34 = vld [vmem:[%s12488_s28 + $0x120] ss:$16 sps:$4 sm:$0xff]  }
 0x173   : > { %3596 = vmatprep.mubr.bf16.mxu1 %v12265_v35  ;;  %3338 = vmatpush1.bf16.msra.mxu0 %v9870_v31  ;;  %v12272_v31 = vld [vmem:[%s12488_s28 + $0x100] ss:$16 sps:$4 sm:$0xff]  }
 0x174   : > { %3339 = vmatprep.subr.bf16.mxu0 %v9879_v32  ;;  %3724 = vmatpush1.bf16.msra.mxu1 %v9872_v33  ;;  %v12273_v32 = vld [vmem:[%s12488_s28 + $0x124] ss:$16 sps:$4 sm:$0xff]   ;;  %v716_v33 = vlaneseq }
 0x175   : > { %3725 = vmatprep.subr.bf16.mxu1 %v9881_v62  ;;  %v714_v35 = vld [vmem:[%s15661_s2] sm:$0xff] }
 0x176   : > { %v13308_v59 = vshrl.u32 %v716_v33, 7 }
 0x177   : > { %3340 = vmatpush1.bf16.msra.mxu0 %v9878_v38 }
 0x178   : > { %3341 = vmatprep.subr.bf16.mxu0 %v9887_v39  ;;  %3726 = vmatpush1.bf16.msra.mxu1 %v9880_v40  ;;  %15721 = vst [vmem:[#allocation6_spill] sm:$0xff] %v13308_v59  ;;  %v13312_v62 = vsub.s32 0, %v13308_v59  ;;  %v15672_v36 = vsub.s32 2, %v13308_v59  ;;  %v13319_v37 = vsub.s32 1, %v13308_v59  ;;  %v15671_v38 = vsub.s32 3, %v13308_v59 }
 0x179   : > { %3211 = vmatmul.mubr.bf16.gmra.mrb[84].mxu0 %v12266_v49  ;;  %3727 = vmatprep.subr.bf16.mxu1 %v9889_v43  ;;  %v12276_v39 = vld [vmem:[%s12488_s28 + $0x140] ss:$16 sps:$4 sm:$0xff]   ;;  %v12277_v43 = vld [vmem:[%s12488_s28 + $0x164] ss:$16 sps:$4 sm:$0xff]  }
 0x17a   : > { %3597 = vmatmul.mubr.bf16.gmra.mrb[84].mxu1 %v12266_v49  ;;  %3220 = vmatprep.mubr.bf16.mxu0 %v12267_v53  ;;  %15722 = vst [vmem:[#allocation7_spill] sm:$0xff] %v13312_v62  ;;  %15723 = vst [vmem:[#allocation8_spill] sm:$0xff] %v13319_v37  ;;  %v13324_v40 = vrot.slane %v714_v35, %v13312_v62  ;;  %v13328_v41 = vrot.slane %v714_v35, %v15672_v36 }
 0x17b   : > { %3606 = vmatprep.mubr.bf16.mxu1 %v12267_v53  ;;  %3342 = vmatpush1.bf16.msra.mxu0 %v9886_v46  ;;  %v13331_v42 = vrot.slane %v714_v35, %v13319_v37  ;;  %v13336_v44 = vrot.slane %v714_v35, %v15671_v38 }
 0x17c   : > { %3343 = vmatprep.subr.bf16.mxu0 %v9895_v47  ;;  %3728 = vmatpush1.bf16.msra.mxu1 %v9888_v48 }
 0x17d   : > { %3729 = vmatprep.subr.bf16.mxu1 %v9897_v52 }
 0x17f   : > { %3344 = vmatpush1.bf16.msra.mxu0 %v9894_v56 }
 0x180   : > { %3345 = vmatprep.subr.bf16.mxu0 %v9903_v57  ;;  %3730 = vmatpush1.bf16.msra.mxu1 %v9896_v58 }
 0x181   : > { %3221 = vmatmul.mubr.bf16.gmra.mrb[88].mxu0 %v12268_v28  ;;  %3731 = vmatprep.subr.bf16.mxu1 %v9905_v0 }
 0x182   : > { %3607 = vmatmul.mubr.bf16.gmra.mrb[88].mxu1 %v12268_v28  ;;  %3230 = vmatprep.mubr.bf16.mxu0 %v12269_v7 }
 0x183   : > { %3616 = vmatprep.mubr.bf16.mxu1 %v12269_v7  ;;  %3346 = vmatpush1.bf16.msra.mxu0 %v9902_v3 }
 0x184   : > { %3347 = vmatprep.subr.bf16.mxu0 %v9911_v22  ;;  %3732 = vmatpush1.bf16.msra.mxu1 %v9904_v23 }
 0x185   : > { %3733 = vmatprep.subr.bf16.mxu1 %v9913_v6 }
 0x187   : > { %3348 = vmatpush1.bf16.msra.mxu0 %v9910_v10 }
 0x188   : > { %3349 = vmatprep.subr.bf16.mxu0 %v9919_v11  ;;  %3734 = vmatpush1.bf16.msra.mxu1 %v9912_v12 }
 0x189   : > { %3231 = vmatmul.mubr.bf16.gmra.mrb[92].mxu0 %v12270_v21  ;;  %3735 = vmatprep.subr.bf16.mxu1 %v9921_v15 }
 0x18a   : > { %3617 = vmatmul.mubr.bf16.gmra.mrb[92].mxu1 %v12270_v21  ;;  %3240 = vmatprep.mubr.bf16.mxu0 %v12271_v25 }
 0x18b   : > { %3626 = vmatprep.mubr.bf16.mxu1 %v12271_v25  ;;  %3350 = vmatpush1.bf16.msra.mxu0 %v9918_v18 }
 0x18c   : > { %3351 = vmatprep.subr.bf16.mxu0 %v9927_v19  ;;  %3736 = vmatpush1.bf16.msra.mxu1 %v9920_v20 }
 0x18d   : > { %3737 = vmatprep.subr.bf16.mxu1 %v9929_v24 }
 0x18f   : > { %3352 = vmatpush1.bf16.msra.mxu0 %v9926_v26 }
 0x190   : > { %3738 = vmatpush1.bf16.msra.mxu1 %v9928_v27  ;;  %6098 = vmatprep.subr.bf16.mxu0 %v11753_v29 }
 0x191   : > { %3241 = vmatmul.mubr.bf16.gmra.mrb[96].mxu0 %v12272_v31  ;;  %6870 = vmatprep.subr.bf16.mxu1 %v11780_v30 }
 0x192   : > { %3627 = vmatmul.mubr.bf16.gmra.mrb[96].mxu1 %v12272_v31  ;;  %3250 = vmatprep.mubr.bf16.mxu0 %v12273_v32 }
 0x193   : > { %3636 = vmatprep.mubr.bf16.mxu1 %v12273_v32  ;;  %v12280_v32 = vld [vmem:[%s12488_s28 + $0x180] ss:$16 sps:$4 sm:$0xff]  }
 0x199   : > { %3251 = vmatmul.mubr.bf16.gmra.mrb[100].mxu0 %v12274_v34 }
 0x19a   : > { %3637 = vmatmul.mubr.bf16.gmra.mrb[100].mxu1 %v12274_v34  ;;  %3260 = vmatprep.mubr.bf16.mxu0 %v12275_v60 }
 0x19b   : > { %3646 = vmatprep.mubr.bf16.mxu1 %v12275_v60 }
 0x1a1   : > { %3261 = vmatmul.mubr.bf16.gmra.mrb[104].mxu0 %v12276_v39 }
 0x1a2   : > { %3647 = vmatmul.mubr.bf16.gmra.mrb[104].mxu1 %v12276_v39  ;;  %3270 = vmatprep.mubr.bf16.mxu0 %v12277_v43  ;;  %v12281_v39 = vld [vmem:[%s12488_s28 + $0x1a4] ss:$16 sps:$4 sm:$0xff]  }
 0x1a3   : > { %3656 = vmatprep.mubr.bf16.mxu1 %v12277_v43 }
 0x1a4   : > { %v2583_v45 = vpop.f32.mrb[0].mxu0 }
 0x1a5   : > { %v10495_v46 = vadd.f32 %v2583_v45, %v13324_v40  ;;  %v2969_v47 = vpop.f32.mrb[0].mxu1  ;;  %v2585_v48 = vpop.f32.mrb[1].mxu0 }
 0x1a6   : > { %v10559_v49 = vadd.f32 %v2969_v47, %v13328_v41  ;;  %v10496_v50 = vadd.f32 %v2585_v48, %v13331_v42  ;;  %v2971_v51 = vpop.f32.mrb[1].mxu1  ;;  %v2587_v52 = vpop.f32.mrb[2].mxu0 }
 0x1a7   : > { %v10560_v53 = vadd.f32 %v2971_v51, %v13336_v44  ;;  %v10497_v54 = vadd.f32 %v2587_v52, %v13324_v40  ;;  %v2973_v55 = vpop.f32.mrb[2].mxu1  ;;  %v2589_v56 = vpop.f32.mrb[3].mxu0  ;;  %v3900_v63 = vmax.f32 %v10495_v46, 0.0 }
 0x1a8   : > { %v10561_v57 = vadd.f32 %v2973_v55, %v13328_v41  ;;  %v10498_v58 = vadd.f32 %v2589_v56, %v13331_v42  ;;  %v2975_v61 = vpop.f32.mrb[3].mxu1  ;;  %v3902_v3 = vmax.f32 %v10559_v49, 0.0  ;;  %v3901_v22 = vmax.f32 %v10496_v50, 0.0 }
 0x1a9   : > { %v3908_v0 = vmax.f32 %v10497_v54, 0.0  ;;  %v10562_v1 = vadd.f32 %v2975_v61, %v13336_v44  ;;  %3271 = vmatmul.mubr.bf16.gmra.mrb[108].mxu0 %v12278_v2  ;;  %v3903_v5 = vmax.f32 %v10560_v53, 0.0 }
 0x1aa   : > { %v3910_v23 = vmax.f32 %v10561_v57, 0.0  ;;  %v3909_v28 = vmax.f32 %v10498_v58, 0.0  ;;  %3657 = vmatmul.mubr.bf16.gmra.mrb[108].mxu1 %v12278_v2  ;;  %3280 = vmatprep.mubr.bf16.mxu0 %v12279_v4 }
 0x1ab   : > { %v13348_v6 = vpack.c.bf16 %v3908_v0, %v3900_v63  ;;  %v3911_v7 = vmax.f32 %v10562_v1, 0.0  ;;  %3666 = vmatprep.mubr.bf16.mxu1 %v12279_v4  ;;  %v12282_v4 = vld [vmem:[%s12488_s28 + $0x1a0] ss:$16 sps:$4 sm:$0xff]  }
 0x1ac   : > { %v13350_v8 = vpack.c.bf16 %v3910_v23, %v3902_v3  ;;  %v13352_v9 = vpack.c.bf16 %v3909_v28, %v3901_v22  ;;  %v2593_v10 = vpop.f32.mrb[4].mxu0 }
 0x1ad   : > { %v10499_v11 = vadd.f32 %v2593_v10, %v13324_v40  ;;  %v2979_v12 = vpop.f32.mrb[4].mxu1  ;;  %v2595_v13 = vpop.f32.mrb[5].mxu0  ;;  %v13355_v14 = vpack.c.bf16 %v3911_v7, %v3903_v5 }
 0x1ae   : > { %v10563_v15 = vadd.f32 %v2979_v12, %v13328_v41  ;;  %v10500_v16 = vadd.f32 %v2595_v13, %v13331_v42  ;;  %v2981_v17 = vpop.f32.mrb[5].mxu1  ;;  %v2597_v18 = vpop.f32.mrb[6].mxu0  ;;  %v12283_v12 = vld [vmem:[%s12488_s28 + $0x1c4] ss:$16 sps:$4 sm:$0xff]  }
 0x1af   : > { %v10564_v19 = vadd.f32 %v2981_v17, %v13336_v44  ;;  %v10501_v20 = vadd.f32 %v2597_v18, %v13324_v40  ;;  %v2983_v21 = vpop.f32.mrb[6].mxu1  ;;  %v2599_v24 = vpop.f32.mrb[7].mxu0  ;;  %v3916_v29 = vmax.f32 %v10499_v11, 0.0 }
 0x1b0   : > { %v10565_v25 = vadd.f32 %v2983_v21, %v13328_v41  ;;  %v10502_v26 = vadd.f32 %v2599_v24, %v13331_v42  ;;  %v2985_v27 = vpop.f32.mrb[7].mxu1  ;;  %v3918_v33 = vmax.f32 %v10563_v15, 0.0  ;;  %v3917_v34 = vmax.f32 %v10500_v16, 0.0 }
 0x1b1   : > { %v3924_v30 = vmax.f32 %v10501_v20, 0.0  ;;  %v10566_v31 = vadd.f32 %v2985_v27, %v13336_v44  ;;  %3281 = vmatmul.mubr.bf16.gmra.mrb[112].mxu0 %v12280_v32  ;;  %v3919_v43 = vmax.f32 %v10564_v19, 0.0 }
 0x1b2   : > { %v3926_v60 = vmax.f32 %v10565_v25, 0.0  ;;  %v3925_v35 = vmax.f32 %v10502_v26, 0.0  ;;  %3667 = vmatmul.mubr.bf16.gmra.mrb[112].mxu1 %v12280_v32  ;;  %3290 = vmatprep.mubr.bf16.mxu0 %v12281_v39 }
 0x1b3   : > { %v13366_v45 = vpack.c.bf16 %v3924_v30, %v3916_v29  ;;  %v3927_v46 = vmax.f32 %v10566_v31, 0.0  ;;  %3676 = vmatprep.mubr.bf16.mxu1 %v12281_v39 }
 0x1b4   : > { %v13368_v47 = vpack.c.bf16 %v3925_v35, %v3917_v34  ;;  %v2603_v48 = vpop.f32.mrb[8].mxu0  ;;  %v13370_v49 = vpack.c.bf16 %v3926_v60, %v3918_v33 }
 0x1b5   : > { %v10503_v50 = vadd.f32 %v2603_v48, %v13324_v40  ;;  %v2989_v51 = vpop.f32.mrb[8].mxu1  ;;  %v2605_v52 = vpop.f32.mrb[9].mxu0  ;;  %v13373_v53 = vpack.c.bf16 %v3927_v46, %v3919_v43 }
 0x1b6   : > { %v10567_v54 = vadd.f32 %v2989_v51, %v13328_v41  ;;  %v10504_v55 = vadd.f32 %v2605_v52, %v13331_v42  ;;  %v2991_v56 = vpop.f32.mrb[9].mxu1  ;;  %v2607_v57 = vpop.f32.mrb[10].mxu0 }
 0x1b7   : > { %v10568_v58 = vadd.f32 %v2991_v56, %v13336_v44  ;;  %v10505_v61 = vadd.f32 %v2607_v57, %v13324_v40  ;;  %v2993_v63 = vpop.f32.mrb[10].mxu1  ;;  %v2609_v0 = vpop.f32.mrb[11].mxu0  ;;  %v3932_v22 = vmax.f32 %v10503_v50, 0.0  ;;  %v12284_v50 = vld [vmem:[%s12488_s28 + $0x1c0] ss:$16 sps:$4 sm:$0xff]  }
 0x1b8   : > { %v10569_v1 = vadd.f32 %v2993_v63, %v13328_v41  ;;  %v10506_v2 = vadd.f32 %v2609_v0, %v13331_v42  ;;  %v2995_v3 = vpop.f32.mrb[11].mxu1  ;;  %v3934_v5 = vmax.f32 %v10567_v54, 0.0  ;;  %v3933_v7 = vmax.f32 %v10504_v55, 0.0  ;;  %v12285_v56 = vld [vmem:[%s12488_s28 + $0x1e4] ss:$16 sps:$4 sm:$0xff]  }
 0x1b9   : > { %v3940_v23 = vmax.f32 %v10505_v61, 0.0  ;;  %v10570_v28 = vadd.f32 %v2995_v3, %v13336_v44  ;;  %3291 = vmatmul.mubr.bf16.gmra.mrb[116].mxu0 %v12282_v4  ;;  %v3935_v13 = vmax.f32 %v10568_v58, 0.0 }
 0x1ba   : > { %v3942_v10 = vmax.f32 %v10569_v1, 0.0  ;;  %v3941_v11 = vmax.f32 %v10506_v2, 0.0  ;;  %3677 = vmatmul.mubr.bf16.gmra.mrb[116].mxu1 %v12282_v4  ;;  %3300 = vmatprep.mubr.bf16.mxu0 %v12283_v12 }
 0x1bb   : > { %v13384_v15 = vpack.c.bf16 %v3940_v23, %v3932_v22  ;;  %v3943_v16 = vmax.f32 %v10570_v28, 0.0  ;;  %3686 = vmatprep.mubr.bf16.mxu1 %v12283_v12 }
 0x1bc   : > { %v13386_v17 = vpack.c.bf16 %v3941_v11, %v3933_v7  ;;  %v2613_v18 = vpop.f32.mrb[12].mxu0  ;;  %v13388_v19 = vpack.c.bf16 %v3942_v10, %v3934_v5 }
 0x1bd   : > { %v10507_v20 = vadd.f32 %v2613_v18, %v13324_v40  ;;  %v2999_v21 = vpop.f32.mrb[12].mxu1  ;;  %v2615_v24 = vpop.f32.mrb[13].mxu0  ;;  %v13391_v25 = vpack.c.bf16 %v3943_v16, %v3935_v13 }
 0x1be   : > { %v10571_v26 = vadd.f32 %v2999_v21, %v13328_v41  ;;  %v10508_v27 = vadd.f32 %v2615_v24, %v13331_v42  ;;  %v3001_v29 = vpop.f32.mrb[13].mxu1  ;;  %v2617_v30 = vpop.f32.mrb[14].mxu0 }
 0x1bf   : > { %v10572_v31 = vadd.f32 %v3001_v29, %v13336_v44  ;;  %v10509_v32 = vadd.f32 %v2617_v30, %v13324_v40  ;;  %v3003_v33 = vpop.f32.mrb[14].mxu1  ;;  %v2619_v34 = vpop.f32.mrb[15].mxu0  ;;  %v3948_v43 = vmax.f32 %v10507_v20, 0.0 }
 0x1c0   : > { %v10573_v60 = vadd.f32 %v3003_v33, %v13328_v41  ;;  %v10510_v35 = vadd.f32 %v2619_v34, %v13331_v42  ;;  %v3005_v39 = vpop.f32.mrb[15].mxu1  ;;  %v3950_v51 = vmax.f32 %v10571_v26, 0.0  ;;  %v3949_v52 = vmax.f32 %v10508_v27, 0.0  ;;  %v12286_v27 = vld [vmem:[%s12488_s28 + $0x1e0] ss:$16 sps:$4 sm:$0xff]  }
 0x1c1   : > { %v3956_v46 = vmax.f32 %v10509_v32, 0.0  ;;  %v10574_v48 = vadd.f32 %v3005_v39, %v13336_v44  ;;  %3301 = vmatmul.mubr.bf16.gmra.mrb[120].mxu0 %v12284_v50  ;;  %v3951_v57 = vmax.f32 %v10572_v31, 0.0  ;;  %v12287_v33 = vld [vmem:[%s12488_s28 + $0xc] ss:$16 sps:$4 sm:$0xff]  }
 0x1c2   : > { %v3958_v54 = vmax.f32 %v10573_v60, 0.0  ;;  %v3957_v55 = vmax.f32 %v10510_v35, 0.0  ;;  %3687 = vmatmul.mubr.bf16.gmra.mrb[120].mxu1 %v12284_v50  ;;  %3310 = vmatprep.mubr.bf16.mxu0 %v12285_v56 }
 0x1c3   : > { %v13402_v58 = vpack.c.bf16 %v3956_v46, %v3948_v43  ;;  %v3959_v61 = vmax.f32 %v10574_v48, 0.0  ;;  %3696 = vmatprep.mubr.bf16.mxu1 %v12285_v56 }
 0x1c4   : > { %v13404_v63 = vpack.c.bf16 %v3957_v55, %v3949_v52  ;;  %v2623_v0 = vpop.f32.mrb[16].mxu0  ;;  %v13406_v1 = vpack.c.bf16 %v3958_v54, %v3950_v51 }
 0x1c5   : > { %v10511_v2 = vadd.f32 %v2623_v0, %v13324_v40  ;;  %v3009_v3 = vpop.f32.mrb[16].mxu1  ;;  %v2625_v22 = vpop.f32.mrb[17].mxu0  ;;  %v13409_v23 = vpack.c.bf16 %v3959_v61, %v3951_v57  ;;  %v11751_v61 = vld [vmem:[%s15662_s3] ss:$16 sps:$4 sm:$0xff]  }
 0x1c6   : > { %v10575_v28 = vadd.f32 %v3009_v3, %v13328_v41  ;;  %v10512_v4 = vadd.f32 %v2625_v22, %v13331_v42  ;;  %v3011_v5 = vpop.f32.mrb[17].mxu1  ;;  %v2627_v7 = vpop.f32.mrb[18].mxu0 }
 0x1c7   : > { %v10576_v10 = vadd.f32 %v3011_v5, %v13336_v44  ;;  %v10513_v11 = vadd.f32 %v2627_v7, %v13324_v40  ;;  %v3013_v12 = vpop.f32.mrb[18].mxu1  ;;  %v2629_v13 = vpop.f32.mrb[19].mxu0  ;;  %v3964_v21 = vmax.f32 %v10511_v2, 0.0  ;;  %v11756_v7 = vld [vmem:[%s15662_s3 + $0x24] ss:$16 sps:$4 sm:$0xff]  }
 0x1c8   : > { %v10577_v16 = vadd.f32 %v3013_v12, %v13328_v41  ;;  %v10514_v18 = vadd.f32 %v2629_v13, %v13331_v42  ;;  %v3015_v20 = vpop.f32.mrb[19].mxu1  ;;  %v3966_v29 = vmax.f32 %v10575_v28, 0.0  ;;  %v3965_v30 = vmax.f32 %v10512_v4, 0.0 }
 0x1c9   : > { %v3972_v24 = vmax.f32 %v10513_v11, 0.0  ;;  %v10578_v26 = vadd.f32 %v3015_v20, %v13336_v44  ;;  %3311 = vmatmul.mubr.bf16.gmra.mrb[124].mxu0 %v12286_v27  ;;  %v3967_v34 = vmax.f32 %v10576_v10, 0.0  ;;  %v11778_v10 = vld [vmem:[%s15662_s3 + $0x8] ss:$16 sps:$4 sm:$0xff]  }
 0x1ca   : > { %v3974_v31 = vmax.f32 %v10577_v16, 0.0  ;;  %v3973_v32 = vmax.f32 %v10514_v18, 0.0  ;;  %3697 = vmatmul.mubr.bf16.gmra.mrb[124].mxu1 %v12286_v27  ;;  %3353 = vmatprep.mubr.bf16.mxu0 %v12287_v33  ;;  %v12288_v16 = vld [vmem:[%s12488_s28 + $0x8] ss:$16 sps:$4 sm:$0xff]   ;;  %v11783_v18 = vld [vmem:[%s15662_s3 + $0x2c] ss:$16 sps:$4 sm:$0xff]  }
 0x1cb   : > { %v13420_v60 = vpack.c.bf16 %v3972_v24, %v3964_v21  ;;  %v3975_v35 = vmax.f32 %v10578_v26, 0.0  ;;  %3739 = vmatprep.mubr.bf16.mxu1 %v12287_v33  ;;  %v11754_v27 = vld [vmem:[%s15662_s3 + $0x20] ss:$16 sps:$4 sm:$0xff]   ;;  %v11759_v33 = vld [vmem:[%s15662_s3 + $0x44] ss:$16 sps:$4 sm:$0xff]  }
 0x1cc   : > { %v13422_v39 = vpack.c.bf16 %v3973_v32, %v3965_v30  ;;  %v2633_v43 = vpop.f32.mrb[20].mxu0  ;;  %v13424_v46 = vpack.c.bf16 %v3974_v31, %v3966_v29  ;;  %v12289_v32 = vld [vmem:[%s12488_s28 + $0x2c] ss:$16 sps:$4 sm:$0xff]  }
 0x1cd   : > { %v10515_v48 = vadd.f32 %v2633_v43, %v13324_v40  ;;  %v3019_v50 = vpop.f32.mrb[20].mxu1  ;;  %v2635_v51 = vpop.f32.mrb[21].mxu0  ;;  %v13427_v52 = vpack.c.bf16 %v3975_v35, %v3967_v34  ;;  %v11781_v43 = vld [vmem:[%s15662_s3 + $0x28] ss:$16 sps:$4 sm:$0xff]  }
 0x1ce   : > { %v10579_v54 = vadd.f32 %v3019_v50, %v13328_v41  ;;  %v10516_v55 = vadd.f32 %v2635_v51, %v13331_v42  ;;  %v3021_v56 = vpop.f32.mrb[21].mxu1  ;;  %v2637_v57 = vpop.f32.mrb[22].mxu0 }
 0x1cf   : > { %v10580_v0 = vadd.f32 %v3021_v56, %v13336_v44  ;;  %v10517_v2 = vadd.f32 %v2637_v57, %v13324_v40  ;;  %v3023_v3 = vpop.f32.mrb[22].mxu1  ;;  %v2639_v22 = vpop.f32.mrb[23].mxu0  ;;  %v3980_v11 = vmax.f32 %v10515_v48, 0.0 }
 0x1d0   : > { %v10581_v28 = vadd.f32 %v3023_v3, %v13328_v41  ;;  %v10518_v4 = vadd.f32 %v2639_v22, %v13331_v42  ;;  %v3025_v5 = vpop.f32.mrb[23].mxu1  ;;  %v3982_v20 = vmax.f32 %v10579_v54, 0.0  ;;  %v3981_v21 = vmax.f32 %v10516_v55, 0.0  ;;  %v11789_v55 = vld [vmem:[%s15662_s3 + $0x4c] ss:$16 sps:$4 sm:$0xff]  }
 0x1d1   : > { %v3988_v12 = vmax.f32 %v10517_v2, 0.0  ;;  %v10582_v13 = vadd.f32 %v3025_v5, %v13336_v44  ;;  %3354 = vmatmul.mubr.bf16.vlgmr.msra.gmra.mrb[64].mxu0 %v12288_v16  ;;  %v3983_v29 = vmax.f32 %v10580_v0, 0.0  ;;  %v11757_v5 = vld [vmem:[%s15662_s3 + $0x40] ss:$16 sps:$4 sm:$0xff]  }
 0x1d2   : > { %v3990_v24 = vmax.f32 %v10581_v28, 0.0  ;;  %v3989_v26 = vmax.f32 %v10518_v4, 0.0  ;;  %3740 = vmatmul.mubr.bf16.vlgmr.msra.gmra.mrb[64].mxu1 %v12288_v16  ;;  %6099 = vmatpush1.bf16.msra.mxu0 %v11751_v61 }
 0x1d3   : > { %v13452_v30 = vpack.c.bf16 %v3988_v12, %v3980_v11  ;;  %v3991_v31 = vmax.f32 %v10582_v13, 0.0  ;;  %3363 = vmatprep.mubr.bf16.mxu0 %v12289_v32  ;;  %3749 = vmatprep.mubr.bf16.mxu1 %v12289_v32  ;;  %v11762_v12 = vld [vmem:[%s15662_s3 + $0x64] ss:$16 sps:$4 sm:$0xff]   ;;  %v11787_v13 = vld [vmem:[%s15662_s3 + $0x48] ss:$16 sps:$4 sm:$0xff]  }
 0x1d4   : > { %v13458_v34 = vpack.c.bf16 %v3989_v26, %v3981_v21  ;;  %v2643_v35 = vpop.f32.mrb[24].mxu0  ;;  %6100 = vmatprep.subr.bf16.mxu0 %v11756_v7  ;;  %6871 = vmatpush1.bf16.msra.mxu1 %v11778_v10  ;;  %v13463_v48 = vpack.c.bf16 %v3990_v24, %v3982_v20  ;;  %v12290_v21 = vld [vmem:[%s12488_s28 + $0x28] ss:$16 sps:$4 sm:$0xff]   ;;  %v11792_v24 = vld [vmem:[%s15662_s3 + $0x6c] ss:$16 sps:$4 sm:$0xff]  }
 0x1d5   : > { %v10519_v50 = vadd.f32 %v2643_v35, %v13324_v40  ;;  %v3029_v51 = vpop.f32.mrb[24].mxu1  ;;  %v2645_v54 = vpop.f32.mrb[25].mxu0  ;;  %6872 = vmatprep.subr.bf16.mxu1 %v11783_v18  ;;  %v13469_v56 = vpack.c.bf16 %v3991_v31, %v3983_v29  ;;  %v12291_v32 = vld [vmem:[%s12488_s28 + $0x4c] ss:$16 sps:$4 sm:$0xff]  }
 0x1d6   : > { %15724 = vst [vmem:[#allocation9_spill] sm:$0xff] %v13463_v48  ;;  %v10583_v57 = vadd.f32 %v3029_v51, %v13328_v41  ;;  %v10520_v61 = vadd.f32 %v2645_v54, %v13331_v42  ;;  %v3031_v0 = vpop.f32.mrb[25].mxu1  ;;  %v2647_v2 = vpop.f32.mrb[26].mxu0  ;;  %6101 = vmatpush1.bf16.msra.mxu0 %v11754_v27 }
 0x1d7   : > { %15725 = vst [vmem:[#allocation10_spill] sm:$0xff] %v13469_v56  ;;  %v10584_v3 = vadd.f32 %v3031_v0, %v13336_v44  ;;  %v10521_v22 = vadd.f32 %v2647_v2, %v13324_v40  ;;  %v3033_v28 = vpop.f32.mrb[26].mxu1  ;;  %v2649_v4 = vpop.f32.mrb[27].mxu0  ;;  %6102 = vmatprep.subr.bf16.mxu0 %v11759_v33  ;;  %v3996_v16 = vmax.f32 %v10519_v50, 0.0  ;;  %v11760_v50 = vld [vmem:[%s15662_s3 + $0x60] ss:$16 sps:$4 sm:$0xff]  }
 0x1d8   : > { %v10585_v7 = vadd.f32 %v3033_v28, %v13328_v41  ;;  %v10522_v10 = vadd.f32 %v2649_v4, %v13331_v42  ;;  %v3035_v11 = vpop.f32.mrb[27].mxu1  ;;  %6873 = vmatpush1.bf16.msra.mxu1 %v11781_v43  ;;  %v3998_v26 = vmax.f32 %v10583_v57, 0.0  ;;  %v3997_v27 = vmax.f32 %v10520_v61, 0.0  ;;  %v11790_v57 = vld [vmem:[%s15662_s3 + $0x68] ss:$16 sps:$4 sm:$0xff]  }
 0x1d9   : > { %v4004_v18 = vmax.f32 %v10521_v22, 0.0  ;;  %v10586_v20 = vadd.f32 %v3035_v11, %v13336_v44  ;;  %3364 = vmatmul.mubr.bf16.gmra.mrb[68].mxu0 %v12290_v21  ;;  %6874 = vmatprep.subr.bf16.mxu1 %v11789_v55  ;;  %v3999_v33 = vmax.f32 %v10584_v3, 0.0  ;;  %v11765_v55 = vld [vmem:[%s15662_s3 + $0x84] ss:$16 sps:$4 sm:$0xff]   ;;  %v11798_v22 = vld [vmem:[%s15662_s3 + $0x8c] ss:$16 sps:$4 sm:$0xff]  }
 0x1da   : > { %v4006_v29 = vmax.f32 %v10585_v7, 0.0  ;;  %v4005_v31 = vmax.f32 %v10522_v10, 0.0  ;;  %3750 = vmatmul.mubr.bf16.gmra.mrb[68].mxu1 %v12290_v21  ;;  %3373 = vmatprep.mubr.bf16.mxu0 %v12291_v32 }
 0x1db   : > { %v13492_v35 = vpack.c.bf16 %v4004_v18, %v3996_v16  ;;  %v4007_v43 = vmax.f32 %v10586_v20, 0.0  ;;  %3759 = vmatprep.mubr.bf16.mxu1 %v12291_v32  ;;  %6103 = vmatpush1.bf16.msra.mxu0 %v11757_v5  ;;  %v11763_v18 = vld [vmem:[%s15662_s3 + $0x80] ss:$16 sps:$4 sm:$0xff]  }
 0x1dc   : > { %v13497_v51 = vpack.c.bf16 %v4005_v31, %v3997_v27  ;;  %v2653_v54 = vpop.f32.mrb[28].mxu0  ;;  %6104 = vmatprep.subr.bf16.mxu0 %v11762_v12  ;;  %6875 = vmatpush1.bf16.msra.mxu1 %v11787_v13  ;;  %v13505_v61 = vpack.c.bf16 %v4006_v29, %v3998_v26  ;;  %v11768_v26 = vld [vmem:[%s15662_s3 + $0xa4] ss:$16 sps:$4 sm:$0xff]   ;;  %v11796_v27 = vld [vmem:[%s15662_s3 + $0x88] ss:$16 sps:$4 sm:$0xff]  }
 0x1dd   : > { %v10523_v0 = vadd.f32 %v2653_v54, %v13324_v40  ;;  %v3039_v2 = vpop.f32.mrb[28].mxu1  ;;  %v2655_v3 = vpop.f32.mrb[29].mxu0  ;;  %6876 = vmatprep.subr.bf16.mxu1 %v11792_v24  ;;  %v13511_v28 = vpack.c.bf16 %v4007_v43, %v3999_v33  ;;  %v12292_v33 = vld [vmem:[%s12488_s28 + $0x48] ss:$16 sps:$4 sm:$0xff]   ;;  %v11801_v43 = vld [vmem:[%s15662_s3 + $0xac] ss:$16 sps:$4 sm:$0xff]  }
 0x1de   : > { %15726 = vst [vmem:[#allocation11_spill] sm:$0xff] %v13505_v61  ;;  %v10587_v4 = vadd.f32 %v3039_v2, %v13328_v41  ;;  %v10524_v5 = vadd.f32 %v2655_v3, %v13331_v42  ;;  %v3041_v7 = vpop.f32.mrb[29].mxu1  ;;  %v2657_v10 = vpop.f32.mrb[30].mxu0 }
 0x1df   : > { %15727 = vst [vmem:[#allocation12_spill] sm:$0xff] %v13511_v28  ;;  %v10588_v11 = vadd.f32 %v3041_v7, %v13336_v44  ;;  %v10525_v12 = vadd.f32 %v2657_v10, %v13324_v40  ;;  %v3043_v13 = vpop.f32.mrb[30].mxu1  ;;  %v2659_v16 = vpop.f32.mrb[31].mxu0  ;;  %6105 = vmatpush1.bf16.msra.mxu0 %v11760_v50  ;;  %v4012_v29 = vmax.f32 %v10523_v0, 0.0 }
 0x1e0   : > { %v10589_v20 = vadd.f32 %v3043_v13, %v13328_v41  ;;  %v10526_v21 = vadd.f32 %v2659_v16, %v13331_v42  ;;  %v3045_v24 = vpop.f32.mrb[31].mxu1  ;;  %6106 = vmatprep.subr.bf16.mxu0 %v11765_v55  ;;  %6877 = vmatpush1.bf16.msra.mxu1 %v11790_v57  ;;  %v4014_v50 = vmax.f32 %v10587_v4, 0.0  ;;  %v4013_v54 = vmax.f32 %v10524_v5, 0.0  ;;  %v12293_v57 = vld [vmem:[%s12488_s28 + $0x6c] ss:$16 sps:$4 sm:$0xff]  }
 0x1e1   : > { %v4020_v31 = vmax.f32 %v10525_v12, 0.0  ;;  %v10590_v32 = vadd.f32 %v3045_v24, %v13336_v44  ;;  %3374 = vmatmul.mubr.bf16.gmra.mrb[72].mxu0 %v12292_v33  ;;  %6878 = vmatprep.subr.bf16.mxu1 %v11798_v22  ;;  %v4015_v3 = vmax.f32 %v10588_v11, 0.0  ;;  %v11766_v22 = vld [vmem:[%s15662_s3 + $0xa0] ss:$16 sps:$4 sm:$0xff]   ;;  %v11771_v4 = vld [vmem:[%s15662_s3 + $0xc4] ss:$16 sps:$4 sm:$0xff]  }
 0x1e2   : > { %v4022_v55 = vmax.f32 %v10589_v20, 0.0  ;;  %v4021_v2 = vmax.f32 %v10526_v21, 0.0  ;;  %3760 = vmatmul.mubr.bf16.gmra.mrb[72].mxu1 %v12292_v33  ;;  %3383 = vmatprep.mubr.bf16.mxu0 %v12293_v57  ;;  %v11799_v5 = vld [vmem:[%s15662_s3 + $0xa8] ss:$16 sps:$4 sm:$0xff]   ;;  %v11807_v20 = vld [vmem:[%s15662_s3 + $0xcc] ss:$16 sps:$4 sm:$0xff]  }
 0x1e3   : > { %v13534_v7 = vpack.c.bf16 %v4020_v31, %v4012_v29  ;;  %v4023_v0 = vmax.f32 %v10590_v32, 0.0  ;;  %3769 = vmatprep.mubr.bf16.mxu1 %v12293_v57  ;;  %6107 = vmatpush1.bf16.msra.mxu0 %v11763_v18  ;;  %v11774_v57 = vld [vmem:[%s15662_s3 + $0xe4] ss:$16 sps:$4 sm:$0xff]  }
 0x1e4   : > { %v13539_v10 = vpack.c.bf16 %v4021_v2, %v4013_v54  ;;  %v2663_v12 = vpop.f32.mrb[32].mxu0  ;;  %6108 = vmatprep.subr.bf16.mxu0 %v11768_v26  ;;  %6879 = vmatpush1.bf16.msra.mxu1 %v11796_v27  ;;  %v13547_v11 = vpack.c.bf16 %v4022_v55, %v4014_v50 }
 0x1e5   : > { %v10527_v13 = vadd.f32 %v2663_v12, %v13324_v40  ;;  %v3049_v16 = vpop.f32.mrb[32].mxu1  ;;  %v2665_v18 = vpop.f32.mrb[33].mxu0  ;;  %6880 = vmatprep.subr.bf16.mxu1 %v11801_v43  ;;  %v13553_v21 = vpack.c.bf16 %v4023_v0, %v4015_v3  ;;  %v11769_v43 = vld [vmem:[%s15662_s3 + $0xc0] ss:$16 sps:$4 sm:$0xff]   ;;  %v11805_v3 = vld [vmem:[%s15662_s3 + $0xc8] ss:$16 sps:$4 sm:$0xff]  }
 0x1e6   : > { %15728 = vst [vmem:[#allocation13_spill] sm:$0xff] %v13547_v11  ;;  %v10591_v24 = vadd.f32 %v3049_v16, %v13328_v41  ;;  %v10528_v26 = vadd.f32 %v2665_v18, %v13331_v42  ;;  %v3051_v27 = vpop.f32.mrb[33].mxu1  ;;  %v2667_v29 = vpop.f32.mrb[34].mxu0  ;;  %v12294_v16 = vld [vmem:[%s12488_s28 + $0x68] ss:$16 sps:$4 sm:$0xff]  }
 0x1e7   : > { %15729 = vst [vmem:[#allocation14_spill] sm:$0xff] %v13553_v21  ;;  %v10592_v31 = vadd.f32 %v3051_v27, %v13336_v44  ;;  %v10529_v32 = vadd.f32 %v2667_v29, %v13324_v40  ;;  %v3053_v33 = vpop.f32.mrb[34].mxu1  ;;  %v2669_v50 = vpop.f32.mrb[35].mxu0  ;;  %6109 = vmatpush1.bf16.msra.mxu0 %v11766_v22  ;;  %v4028_v0 = vmax.f32 %v10527_v13, 0.0 }
 0x1e8   : > { %v10593_v54 = vadd.f32 %v3053_v33, %v13328_v41  ;;  %v10530_v55 = vadd.f32 %v2669_v50, %v13331_v42  ;;  %v3055_v2 = vpop.f32.mrb[35].mxu1  ;;  %6110 = vmatprep.subr.bf16.mxu0 %v11771_v4  ;;  %6881 = vmatpush1.bf16.msra.mxu1 %v11799_v5  ;;  %v11810_v4 = vld [vmem:[%s15662_s3 + $0xec] ss:$16 sps:$4 sm:$0xff]   ;;  %v4030_v18 = vmax.f32 %v10591_v24, 0.0  ;;  %v4029_v27 = vmax.f32 %v10528_v26, 0.0 }
 0x1e9   : > { %v4036_v22 = vmax.f32 %v10529_v32, 0.0  ;;  %v10594_v12 = vadd.f32 %v3055_v2, %v13336_v44  ;;  %3384 = vmatmul.mubr.bf16.gmra.mrb[76].mxu0 %v12294_v16  ;;  %6882 = vmatprep.subr.bf16.mxu1 %v11807_v20  ;;  %v12295_v5 = vld [vmem:[%s12488_s28 + $0x8c] ss:$16 sps:$4 sm:$0xff]   ;;  %v4031_v50 = vmax.f32 %v10592_v31, 0.0  ;;  %v11772_v20 = vld [vmem:[%s15662_s3 + $0xe0] ss:$16 sps:$4 sm:$0xff]  }
 0x1ea   : > { %v4038_v29 = vmax.f32 %v10593_v54, 0.0  ;;  %v4037_v33 = vmax.f32 %v10530_v55, 0.0  ;;  %3770 = vmatmul.mubr.bf16.gmra.mrb[76].mxu1 %v12294_v16  ;;  %3393 = vmatprep.mubr.bf16.mxu0 %v12295_v5  ;;  %v11777_v24 = vld [vmem:[%s15662_s3 + $0x104] ss:$16 sps:$4 sm:$0xff]   ;;  %v11808_v26 = vld [vmem:[%s15662_s3 + $0xe8] ss:$16 sps:$4 sm:$0xff]  }
 0x1eb   : > { %v13576_v38 = vpack.c.bf16 %v4036_v22, %v4028_v0  ;;  %v4039_v13 = vmax.f32 %v10594_v12, 0.0  ;;  %3779 = vmatprep.mubr.bf16.mxu1 %v12295_v5  ;;  %6111 = vmatpush1.bf16.msra.mxu0 %v11769_v43 }
 0x1ec   : > { %v13581_v32 = vpack.c.bf16 %v4037_v33, %v4029_v27  ;;  %v2673_v2 = vpop.f32.mrb[36].mxu0  ;;  %6112 = vmatprep.subr.bf16.mxu0 %v11774_v57  ;;  %6883 = vmatpush1.bf16.msra.mxu1 %v11805_v3  ;;  %v13589_v31 = vpack.c.bf16 %v4038_v29, %v4030_v18  ;;  %v11816_v57 = vld [vmem:[%s15662_s3 + $0x10c] ss:$16 sps:$4 sm:$0xff]  }
 0x1ed   : > { %v10531_v43 = vadd.f32 %v2673_v2, %v13324_v40  ;;  %v3059_v54 = vpop.f32.mrb[36].mxu1  ;;  %v2675_v55 = vpop.f32.mrb[37].mxu0  ;;  %6884 = vmatprep.subr.bf16.mxu1 %v11810_v4  ;;  %v13595_v0 = vpack.c.bf16 %v4039_v13, %v4031_v50  ;;  %v11775_v4 = vld [vmem:[%s15662_s3 + $0x100] ss:$16 sps:$4 sm:$0xff]   ;;  %v11786_v2 = vld [vmem:[%s15662_s3 + $0x124] ss:$16 sps:$4 sm:$0xff]  }
 0x1ee   : > { %15730 = vst [vmem:[#allocation15_spill] sm:$0xff] %v13589_v31  ;;  %v10595_v22 = vadd.f32 %v3059_v54, %v13328_v41  ;;  %v10532_v3 = vadd.f32 %v2675_v55, %v13331_v42  ;;  %v3061_v12 = vpop.f32.mrb[37].mxu1  ;;  %v2677_v16 = vpop.f32.mrb[38].mxu0 }
 0x1ef   : > { %15731 = vst [vmem:[#allocation16_spill] sm:$0xff] %v13595_v0  ;;  %v10596_v18 = vadd.f32 %v3061_v12, %v13336_v44  ;;  %v10533_v27 = vadd.f32 %v2677_v16, %v13324_v40  ;;  %v3063_v29 = vpop.f32.mrb[38].mxu1  ;;  %v2679_v33 = vpop.f32.mrb[39].mxu0  ;;  %6113 = vmatpush1.bf16.msra.mxu0 %v11772_v20  ;;  %v11814_v20 = vld [vmem:[%s15662_s3 + $0x108] ss:$16 sps:$4 sm:$0xff]   ;;  %v4044_v54 = vmax.f32 %v10531_v43, 0.0 }
 0x1f0   : > { %v10597_v5 = vadd.f32 %v3063_v29, %v13328_v41  ;;  %v10534_v50 = vadd.f32 %v2679_v33, %v13331_v42  ;;  %v3065_v13 = vpop.f32.mrb[39].mxu1  ;;  %6114 = vmatprep.subr.bf16.mxu0 %v11777_v24  ;;  %6885 = vmatpush1.bf16.msra.mxu1 %v11808_v26  ;;  %v12296_v16 = vld [vmem:[%s12488_s28 + $0x88] ss:$16 sps:$4 sm:$0xff]   ;;  %v11819_v24 = vld [vmem:[%s15662_s3 + $0x12c] ss:$16 sps:$4 sm:$0xff]   ;;  %v4046_v29 = vmax.f32 %v10595_v22, 0.0 }
 0x1f1   : > { %v4052_v55 = vmax.f32 %v10533_v27, 0.0  ;;  %v10598_v12 = vadd.f32 %v3065_v13, %v13336_v44  ;;  %3394 = vmatmul.mubr.bf16.gmra.mrb[80].mxu0 %v12296_v16  ;;  %6886 = vmatprep.subr.bf16.mxu1 %v11816_v57  ;;  %v4045_v33 = vmax.f32 %v10532_v3, 0.0  ;;  %v12297_v26 = vld [vmem:[%s12488_s28 + $0xac] ss:$16 sps:$4 sm:$0xff]   ;;  %v4047_v62 = vmax.f32 %v10596_v18, 0.0 }
 0x1f2   : > { %v4054_v36 = vmax.f32 %v10597_v5, 0.0  ;;  %v4053_v37 = vmax.f32 %v10534_v50, 0.0  ;;  %3780 = vmatmul.mubr.bf16.gmra.mrb[80].mxu1 %v12296_v16  ;;  %3403 = vmatprep.mubr.bf16.mxu0 %v12297_v26  ;;  %v11784_v57 = vld [vmem:[%s15662_s3 + $0x120] ss:$16 sps:$4 sm:$0xff]   ;;  %v11795_v22 = vld [vmem:[%s15662_s3 + $0x144] ss:$16 sps:$4 sm:$0xff]  }
 0x1f3   : > { %v13618_v31 = vpack.c.bf16 %v4052_v55, %v4044_v54  ;;  %v4055_v43 = vmax.f32 %v10598_v12, 0.0  ;;  %3789 = vmatprep.mubr.bf16.mxu1 %v12297_v26  ;;  %6115 = vmatpush1.bf16.msra.mxu0 %v11775_v4  ;;  %v11817_v3 = vld [vmem:[%s15662_s3 + $0x128] ss:$16 sps:$4 sm:$0xff]  }
 0x1f4   : > { %v13623_v27 = vpack.c.bf16 %v4053_v37, %v4045_v33  ;;  %v2683_v13 = vpop.f32.mrb[40].mxu0  ;;  %6116 = vmatprep.subr.bf16.mxu0 %v11786_v2  ;;  %6887 = vmatpush1.bf16.msra.mxu1 %v11814_v20  ;;  %v13631_v18 = vpack.c.bf16 %v4054_v36, %v4046_v29  ;;  %v11825_v37 = vld [vmem:[%s15662_s3 + $0x14c] ss:$16 sps:$4 sm:$0xff]  }
 0x1f5   : > { %v10535_v4 = vadd.f32 %v2683_v13, %v13324_v40  ;;  %v3069_v5 = vpop.f32.mrb[40].mxu1  ;;  %v2685_v50 = vpop.f32.mrb[41].mxu0  ;;  %6888 = vmatprep.subr.bf16.mxu1 %v11819_v24  ;;  %v13637_v2 = vpack.c.bf16 %v4055_v43, %v4047_v62  ;;  %v11793_v24 = vld [vmem:[%s15662_s3 + $0x140] ss:$16 sps:$4 sm:$0xff]   ;;  %v11804_v13 = vld [vmem:[%s15662_s3 + $0x164] ss:$16 sps:$4 sm:$0xff]  }
 0x1f6   : > { %15732 = vst [vmem:[#allocation17_spill] sm:$0xff] %v13631_v18  ;;  %v10599_v54 = vadd.f32 %v3069_v5, %v13328_v41  ;;  %v10536_v20 = vadd.f32 %v2685_v50, %v13331_v42  ;;  %v3071_v55 = vpop.f32.mrb[41].mxu1  ;;  %v2687_v12 = vpop.f32.mrb[42].mxu0 }
 0x1f7   : > { %15733 = vst [vmem:[#allocation18_spill] sm:$0xff] %v13637_v2  ;;  %v10600_v36 = vadd.f32 %v3071_v55, %v13336_v44  ;;  %v10537_v16 = vadd.f32 %v2687_v12, %v13324_v40  ;;  %v3073_v29 = vpop.f32.mrb[42].mxu1  ;;  %v2689_v33 = vpop.f32.mrb[43].mxu0  ;;  %6117 = vmatpush1.bf16.msra.mxu0 %v11784_v57  ;;  %v11823_v57 = vld [vmem:[%s15662_s3 + $0x148] ss:$16 sps:$4 sm:$0xff]   ;;  %v4060_v5 = vmax.f32 %v10535_v4, 0.0 }
 0x1f8   : > { %v10601_v62 = vadd.f32 %v3073_v29, %v13328_v41  ;;  %v10538_v26 = vadd.f32 %v2689_v33, %v13331_v42  ;;  %v3075_v43 = vpop.f32.mrb[43].mxu1  ;;  %6118 = vmatprep.subr.bf16.mxu0 %v11795_v22  ;;  %6889 = vmatpush1.bf16.msra.mxu1 %v11817_v3  ;;  %v12298_v12 = vld [vmem:[%s12488_s28 + $0xa8] ss:$16 sps:$4 sm:$0xff]   ;;  %v11828_v22 = vld [vmem:[%s15662_s3 + $0x16c] ss:$16 sps:$4 sm:$0xff]   ;;  %v4062_v29 = vmax.f32 %v10599_v54, 0.0 }
 0x1f9   : > { %v4068_v50 = vmax.f32 %v10537_v16, 0.0  ;;  %v10602_v55 = vadd.f32 %v3075_v43, %v13336_v44  ;;  %3404 = vmatmul.mubr.bf16.gmra.mrb[84].mxu0 %v12298_v12  ;;  %6890 = vmatprep.subr.bf16.mxu1 %v11825_v37  ;;  %v4061_v33 = vmax.f32 %v10536_v20, 0.0  ;;  %v12299_v3 = vld [vmem:[%s12488_s28 + $0xcc] ss:$16 sps:$4 sm:$0xff]   ;;  %v4063_v0 = vmax.f32 %v10600_v36, 0.0 }
 0x1fa   : > { %v4070_v18 = vmax.f32 %v10601_v62, 0.0  ;;  %v4069_v2 = vmax.f32 %v10538_v26, 0.0  ;;  %3790 = vmatmul.mubr.bf16.gmra.mrb[84].mxu1 %v12298_v12  ;;  %3413 = vmatprep.mubr.bf16.mxu0 %v12299_v3  ;;  %v11802_v37 = vld [vmem:[%s15662_s3 + $0x160] ss:$16 sps:$4 sm:$0xff]   ;;  %v11813_v54 = vld [vmem:[%s15662_s3 + $0x184] ss:$16 sps:$4 sm:$0xff]  }
 0x1fb   : > { %v13660_v11 = vpack.c.bf16 %v4068_v50, %v4060_v5  ;;  %v4071_v4 = vmax.f32 %v10602_v55, 0.0  ;;  %3799 = vmatprep.mubr.bf16.mxu1 %v12299_v3  ;;  %6119 = vmatpush1.bf16.msra.mxu0 %v11793_v24  ;;  %v11826_v20 = vld [vmem:[%s15662_s3 + $0x168] ss:$16 sps:$4 sm:$0xff]  }
 0x1fc   : > { %v13665_v16 = vpack.c.bf16 %v4069_v2, %v4061_v33  ;;  %v2693_v43 = vpop.f32.mrb[44].mxu0  ;;  %6120 = vmatprep.subr.bf16.mxu0 %v11804_v13  ;;  %6891 = vmatpush1.bf16.msra.mxu1 %v11823_v57  ;;  %v13673_v36 = vpack.c.bf16 %v4070_v18, %v4062_v29  ;;  %v11834_v2 = vld [vmem:[%s15662_s3 + $0x18c] ss:$16 sps:$4 sm:$0xff]  }
 0x1fd   : > { %v10539_v24 = vadd.f32 %v2693_v43, %v13324_v40  ;;  %v3079_v62 = vpop.f32.mrb[44].mxu1  ;;  %v2695_v26 = vpop.f32.mrb[45].mxu0  ;;  %6892 = vmatprep.subr.bf16.mxu1 %v11828_v22  ;;  %v13679_v13 = vpack.c.bf16 %v4071_v4, %v4063_v0  ;;  %v11811_v22 = vld [vmem:[%s15662_s3 + $0x180] ss:$16 sps:$4 sm:$0xff]   ;;  %v11822_v43 = vld [vmem:[%s15662_s3 + $0x1a4] ss:$16 sps:$4 sm:$0xff]  }
 0x1fe   : > { %15734 = vst [vmem:[#allocation19_spill] sm:$0xff] %v13673_v36  ;;  %v10603_v5 = vadd.f32 %v3079_v62, %v13328_v41  ;;  %v10540_v57 = vadd.f32 %v2695_v26, %v13331_v42  ;;  %v3081_v50 = vpop.f32.mrb[45].mxu1  ;;  %v2697_v55 = vpop.f32.mrb[46].mxu0 }
 0x1ff   : > { %15735 = vst [vmem:[#allocation20_spill] sm:$0xff] %v13679_v13  ;;  %v10604_v18 = vadd.f32 %v3081_v50, %v13336_v44  ;;  %v10541_v12 = vadd.f32 %v2697_v55, %v13324_v40  ;;  %v3083_v29 = vpop.f32.mrb[46].mxu1  ;;  %v2699_v33 = vpop.f32.mrb[47].mxu0  ;;  %6121 = vmatpush1.bf16.msra.mxu0 %v11802_v37  ;;  %v11832_v37 = vld [vmem:[%s15662_s3 + $0x188] ss:$16 sps:$4 sm:$0xff]   ;;  %v4076_v62 = vmax.f32 %v10539_v24, 0.0 }
 0x200   : > { %v10605_v0 = vadd.f32 %v3083_v29, %v13328_v41  ;;  %v10542_v3 = vadd.f32 %v2699_v33, %v13331_v42  ;;  %v3085_v4 = vpop.f32.mrb[47].mxu1  ;;  %6122 = vmatprep.subr.bf16.mxu0 %v11813_v54  ;;  %6893 = vmatpush1.bf16.msra.mxu1 %v11826_v20  ;;  %v12300_v55 = vld [vmem:[%s12488_s28 + $0xc8] ss:$16 sps:$4 sm:$0xff]   ;;  %v11837_v54 = vld [vmem:[%s15662_s3 + $0x1ac] ss:$16 sps:$4 sm:$0xff]   ;;  %v4078_v29 = vmax.f32 %v10603_v5, 0.0 }
 0x201   : > { %v4084_v26 = vmax.f32 %v10541_v12, 0.0  ;;  %v10606_v50 = vadd.f32 %v3085_v4, %v13336_v44  ;;  %3414 = vmatmul.mubr.bf16.gmra.mrb[88].mxu0 %v12300_v55  ;;  %6894 = vmatprep.subr.bf16.mxu1 %v11834_v2  ;;  %v4077_v33 = vmax.f32 %v10540_v57, 0.0  ;;  %v12301_v20 = vld [vmem:[%s12488_s28 + $0xec] ss:$16 sps:$4 sm:$0xff]   ;;  %v4079_v21 = vmax.f32 %v10604_v18, 0.0 }
 0x202   : > { %v4086_v36 = vmax.f32 %v10605_v0, 0.0  ;;  %v4085_v13 = vmax.f32 %v10542_v3, 0.0  ;;  %3800 = vmatmul.mubr.bf16.gmra.mrb[88].mxu1 %v12300_v55  ;;  %3423 = vmatprep.mubr.bf16.mxu0 %v12301_v20  ;;  %v11820_v2 = vld [vmem:[%s15662_s3 + $0x1a0] ss:$16 sps:$4 sm:$0xff]   ;;  %v11831_v5 = vld [vmem:[%s15662_s3 + $0x1c4] ss:$16 sps:$4 sm:$0xff]  }
 0x203   : > { %v13702_v61 = vpack.c.bf16 %v4084_v26, %v4076_v62  ;;  %v4087_v24 = vmax.f32 %v10606_v50, 0.0  ;;  %3809 = vmatprep.mubr.bf16.mxu1 %v12301_v20  ;;  %6123 = vmatpush1.bf16.msra.mxu0 %v11811_v22  ;;  %v11835_v57 = vld [vmem:[%s15662_s3 + $0x1a8] ss:$16 sps:$4 sm:$0xff]  }
 0x204   : > { %v13707_v12 = vpack.c.bf16 %v4085_v13, %v4077_v33  ;;  %v2703_v4 = vpop.f32.mrb[48].mxu0  ;;  %6124 = vmatprep.subr.bf16.mxu0 %v11822_v43  ;;  %6895 = vmatpush1.bf16.msra.mxu1 %v11832_v37  ;;  %v13715_v18 = vpack.c.bf16 %v4086_v36, %v4078_v29  ;;  %v11843_v13 = vld [vmem:[%s15662_s3 + $0x1cc] ss:$16 sps:$4 sm:$0xff]  }
 0x205   : > { %v10543_v22 = vadd.f32 %v2703_v4, %v13324_v40  ;;  %v3089_v0 = vpop.f32.mrb[48].mxu1  ;;  %v2705_v3 = vpop.f32.mrb[49].mxu0  ;;  %6896 = vmatprep.subr.bf16.mxu1 %v11837_v54  ;;  %v13721_v43 = vpack.c.bf16 %v4087_v24, %v4079_v21  ;;  %v11829_v54 = vld [vmem:[%s15662_s3 + $0x1c0] ss:$16 sps:$4 sm:$0xff]   ;;  %v11840_v4 = vld [vmem:[%s15662_s3 + $0x1e4] ss:$16 sps:$4 sm:$0xff]  }
 0x206   : > { %15736 = vst [vmem:[#allocation21_spill] sm:$0xff] %v13715_v18  ;;  %v10607_v62 = vadd.f32 %v3089_v0, %v13328_v41  ;;  %v10544_v37 = vadd.f32 %v2705_v3, %v13331_v42  ;;  %v3091_v26 = vpop.f32.mrb[49].mxu1  ;;  %v2707_v50 = vpop.f32.mrb[50].mxu0 }
 0x207   : > { %15737 = vst [vmem:[#allocation22_spill] sm:$0xff] %v13721_v43  ;;  %v10608_v36 = vadd.f32 %v3091_v26, %v13336_v44  ;;  %v10545_v55 = vadd.f32 %v2707_v50, %v13324_v40  ;;  %v3093_v29 = vpop.f32.mrb[50].mxu1  ;;  %v2709_v33 = vpop.f32.mrb[51].mxu0  ;;  %6125 = vmatpush1.bf16.msra.mxu0 %v11820_v2  ;;  %v11841_v2 = vld [vmem:[%s15662_s3 + $0x1c8] ss:$16 sps:$4 sm:$0xff]   ;;  %v4092_v0 = vmax.f32 %v10543_v22, 0.0 }
 0x208   : > { %v10609_v21 = vadd.f32 %v3093_v29, %v13328_v41  ;;  %v10546_v20 = vadd.f32 %v2709_v33, %v13331_v42  ;;  %v3095_v24 = vpop.f32.mrb[51].mxu1  ;;  %6126 = vmatprep.subr.bf16.mxu0 %v11831_v5  ;;  %6897 = vmatpush1.bf16.msra.mxu1 %v11835_v57  ;;  %v12302_v50 = vld [vmem:[%s12488_s28 + $0xe8] ss:$16 sps:$4 sm:$0xff]   ;;  %v11846_v5 = vld [vmem:[%s15662_s3 + $0x1ec] ss:$16 sps:$4 sm:$0xff]   ;;  %v4094_v57 = vmax.f32 %v10607_v62, 0.0 }
 0x209   : > { %v4100_v3 = vmax.f32 %v10545_v55, 0.0  ;;  %v10610_v26 = vadd.f32 %v3095_v24, %v13336_v44  ;;  %3424 = vmatmul.mubr.bf16.gmra.mrb[92].mxu0 %v12302_v50  ;;  %6898 = vmatprep.subr.bf16.mxu1 %v11843_v13  ;;  %v4093_v29 = vmax.f32 %v10544_v37, 0.0  ;;  %v12303_v43 = vld [vmem:[%s12488_s28 + $0x10c] ss:$16 sps:$4 sm:$0xff]   ;;  %v4095_v28 = vmax.f32 %v10608_v36, 0.0 }
 0x20a   : > { %v4102_v33 = vmax.f32 %v10609_v21, 0.0  ;;  %v4101_v18 = vmax.f32 %v10546_v20, 0.0  ;;  %3810 = vmatmul.mubr.bf16.gmra.mrb[92].mxu1 %v12302_v50  ;;  %3433 = vmatprep.mubr.bf16.mxu0 %v12303_v43  ;;  %v11838_v13 = vld [vmem:[%s15662_s3 + $0x1e0] ss:$16 sps:$4 sm:$0xff]   ;;  %v11844_v37 = vld [vmem:[%s15662_s3 + $0x1e8] ss:$16 sps:$4 sm:$0xff]  }
 0x20b   : > { %v13744_v48 = vpack.c.bf16 %v4100_v3, %v4092_v0  ;;  %v4103_v22 = vmax.f32 %v10610_v26, 0.0  ;;  %3819 = vmatprep.mubr.bf16.mxu1 %v12303_v43  ;;  %6127 = vmatpush1.bf16.msra.mxu0 %v11829_v54  ;;  %v11849_v43 = vld [vmem:[%s15662_s3 + $0x204] ss:$16 sps:$4 sm:$0xff]  }
 0x20c   : > { %v13749_v55 = vpack.c.bf16 %v4102_v33, %v4094_v57  ;;  %v13751_v24 = vpack.c.bf16 %v4101_v18, %v4093_v29  ;;  %v2713_v62 = vpop.f32.mrb[52].mxu0  ;;  %6128 = vmatprep.subr.bf16.mxu0 %v11840_v4  ;;  %6899 = vmatpush1.bf16.msra.mxu1 %v11841_v2  ;;  %v11876_v33 = vld [vmem:[%s15662_s3 + $0x20c] ss:$16 sps:$4 sm:$0xff]  }
 0x20d   : > { %v13759_v36 = vpack.c.bf16 %v4103_v22, %v4095_v28  ;;  %v10547_v54 = vadd.f32 %v2713_v62, %v13324_v40  ;;  %v3099_v21 = vpop.f32.mrb[52].mxu1  ;;  %v2715_v20 = vpop.f32.mrb[53].mxu0  ;;  %6900 = vmatprep.subr.bf16.mxu1 %v11846_v5 }
 0x20e   : > { %15738 = vst [vmem:[#allocation23_spill] sm:$0xff] %v13749_v55  ;;  %v10611_v18 = vadd.f32 %v3099_v21, %v13328_v41  ;;  %v10548_v4 = vadd.f32 %v2715_v20, %v13331_v42  ;;  %v3101_v2 = vpop.f32.mrb[53].mxu1  ;;  %v2717_v0 = vpop.f32.mrb[54].mxu0  ;;  %v12304_v20 = vld [vmem:[%s12488_s28 + $0x108] ss:$16 sps:$4 sm:$0xff]  }
 0x20f   : > { %15739 = vst [vmem:[#allocation24_spill] sm:$0xff] %v13759_v36  ;;  %v10612_v3 = vadd.f32 %v3101_v2, %v13336_v44  ;;  %v10549_v26 = vadd.f32 %v2717_v0, %v13324_v40  ;;  %v3103_v50 = vpop.f32.mrb[54].mxu1  ;;  %v2719_v57 = vpop.f32.mrb[55].mxu0  ;;  %6129 = vmatpush1.bf16.msra.mxu0 %v11838_v13  ;;  %v4108_v22 = vmax.f32 %v10547_v54, 0.0  ;;  %v12305_v55 = vld [vmem:[%s12488_s28 + $0x12c] ss:$16 sps:$4 sm:$0xff]  }
 0x210   : > { %v10613_v28 = vadd.f32 %v3103_v50, %v13328_v41  ;;  %v10550_v29 = vadd.f32 %v2719_v57, %v13331_v42  ;;  %v3105_v5 = vpop.f32.mrb[55].mxu1  ;;  %6901 = vmatpush1.bf16.msra.mxu1 %v11844_v37  ;;  %6291 = vmatprep.subr.bf16.mxu0 %v11849_v43  ;;  %v4110_v2 = vmax.f32 %v10611_v18, 0.0  ;;  %v4109_v13 = vmax.f32 %v10548_v4, 0.0 }
 0x211   : > { %v4116_v62 = vmax.f32 %v10549_v26, 0.0  ;;  %v10614_v21 = vadd.f32 %v3105_v5, %v13336_v44  ;;  %3434 = vmatmul.mubr.bf16.gmra.mrb[96].mxu0 %v12304_v20  ;;  %v4111_v57 = vmax.f32 %v10612_v3, 0.0  ;;  %7063 = vmatprep.subr.bf16.mxu1 %v11876_v33 }
 0x212   : > { %v4118_v0 = vmax.f32 %v10613_v28, 0.0  ;;  %v4117_v50 = vmax.f32 %v10550_v29, 0.0  ;;  %3820 = vmatmul.mubr.bf16.gmra.mrb[96].mxu1 %v12304_v20  ;;  %3443 = vmatprep.mubr.bf16.mxu0 %v12305_v55 }
 0x213   : > { %v13774_v37 = vpack.c.bf16 %v4116_v62, %v4108_v22  ;;  %v4119_v43 = vmax.f32 %v10614_v21, 0.0  ;;  %3829 = vmatprep.mubr.bf16.mxu1 %v12305_v55 }
 0x214   : > { %v13776_v36 = vpack.c.bf16 %v4118_v0, %v4110_v2  ;;  %v13778_v54 = vpack.c.bf16 %v4117_v50, %v4109_v13  ;;  %v2723_v26 = vpop.f32.mrb[56].mxu0 }
 0x215   : > { %v13780_v5 = vpack.c.bf16 %v4119_v43, %v4111_v57  ;;  %v10551_v18 = vadd.f32 %v2723_v26, %v13324_v40  ;;  %v3109_v4 = vpop.f32.mrb[56].mxu1  ;;  %v2725_v28 = vpop.f32.mrb[57].mxu0  ;;  %v12306_v26 = vld [vmem:[%s12488_s28 + $0x128] ss:$16 sps:$4 sm:$0xff]  }
 0x216   : > { %15740 = vst [vmem:[#allocation25_spill] sm:$0xff] %v13776_v36  ;;  %v10615_v29 = vadd.f32 %v3109_v4, %v13328_v41  ;;  %v10552_v3 = vadd.f32 %v2725_v28, %v13331_v42  ;;  %v3111_v22 = vpop.f32.mrb[57].mxu1  ;;  %v2727_v62 = vpop.f32.mrb[58].mxu0 }
 0x217   : > { %15741 = vst [vmem:[#allocation26_spill] sm:$0xff] %v13780_v5  ;;  %v10616_v55 = vadd.f32 %v3111_v22, %v13336_v44  ;;  %v10553_v33 = vadd.f32 %v2727_v62, %v13324_v40  ;;  %v3113_v21 = vpop.f32.mrb[58].mxu1  ;;  %v2729_v20 = vpop.f32.mrb[59].mxu0  ;;  %v4124_v50 = vmax.f32 %v10551_v18, 0.0  ;;  %v12307_v62 = vld [vmem:[%s12488_s28 + $0x14c] ss:$16 sps:$4 sm:$0xff]  }
 0x218   : > { %v10617_v2 = vadd.f32 %v3113_v21, %v13328_v41  ;;  %v10554_v13 = vadd.f32 %v2729_v20, %v13331_v42  ;;  %v3115_v0 = vpop.f32.mrb[59].mxu1  ;;  %v4126_v4 = vmax.f32 %v10615_v29, 0.0  ;;  %v4125_v28 = vmax.f32 %v10552_v3, 0.0 }
 0x219   : > { %v4132_v57 = vmax.f32 %v10553_v33, 0.0  ;;  %v10618_v43 = vadd.f32 %v3115_v0, %v13336_v44  ;;  %3444 = vmatmul.mubr.bf16.gmra.mrb[100].mxu0 %v12306_v26  ;;  %v4127_v5 = vmax.f32 %v10616_v55, 0.0 }
 0x21a   : > { %v4134_v36 = vmax.f32 %v10617_v2, 0.0  ;;  %v4133_v22 = vmax.f32 %v10554_v13, 0.0  ;;  %3830 = vmatmul.mubr.bf16.gmra.mrb[100].mxu1 %v12306_v26  ;;  %3453 = vmatprep.mubr.bf16.mxu0 %v12307_v62 }
 0x21b   : > { %v13792_v56 = vpack.c.bf16 %v4132_v57, %v4124_v50  ;;  %v4135_v21 = vmax.f32 %v10618_v43, 0.0  ;;  %3839 = vmatprep.mubr.bf16.mxu1 %v12307_v62 }
 0x21c   : > { %v13794_v20 = vpack.c.bf16 %v4134_v36, %v4126_v4  ;;  %v13796_v18 = vpack.c.bf16 %v4133_v22, %v4125_v28  ;;  %v2733_v33 = vpop.f32.mrb[60].mxu0 }
 0x21d   : > { %v13798_v0 = vpack.c.bf16 %v4135_v21, %v4127_v5  ;;  %v10555_v29 = vadd.f32 %v2733_v33, %v13324_v40  ;;  %v3119_v3 = vpop.f32.mrb[60].mxu1  ;;  %v2735_v2 = vpop.f32.mrb[61].mxu0 }
 0x21e   : > { %15742 = vst [vmem:[#allocation27_spill] sm:$0xff] %v13794_v20  ;;  %v10619_v13 = vadd.f32 %v3119_v3, %v13328_v41  ;;  %v10556_v55 = vadd.f32 %v2735_v2, %v13331_v42  ;;  %v3121_v50 = vpop.f32.mrb[61].mxu1  ;;  %v2737_v57 = vpop.f32.mrb[62].mxu0  ;;  %v12308_v3 = vld [vmem:[%s12488_s28 + $0x148] ss:$16 sps:$4 sm:$0xff]  }
 0x21f   : > { %v10620_v43 = vadd.f32 %v3121_v50, %v13336_v44  ;;  %v10557_v36 = vadd.f32 %v2737_v57, %v13324_v40  ;;  %v3123_v26 = vpop.f32.mrb[62].mxu1  ;;  %v2739_v4 = vpop.f32.mrb[63].mxu0  ;;  %v4140_v62 = vmax.f32 %v10555_v29, 0.0  ;;  %v12309_v57 = vld [vmem:[%s12488_s28 + $0x16c] ss:$16 sps:$4 sm:$0xff]  }
 0x220   : > { %v10621_v5 = vadd.f32 %v3123_v26, %v13328_v41  ;;  %v10558_v28 = vadd.f32 %v2739_v4, %v13331_v42  ;;  %v3125_v22 = vpop.f32.mrb[63].mxu1  ;;  %v4142_v2 = vmax.f32 %v10619_v13, 0.0  ;;  %v4141_v20 = vmax.f32 %v10556_v55, 0.0  ;;  %v12310_v55 = vld [vmem:[%s12488_s28 + $0x168] ss:$16 sps:$4 sm:$0xff]  }
 0x221   : > { %v4148_v21 = vmax.f32 %v10557_v36, 0.0  ;;  %v10622_v33 = vadd.f32 %v3125_v22, %v13336_v44  ;;  %3454 = vmatmul.mubr.bf16.gmra.mrb[104].mxu0 %v12308_v3  ;;  %v4143_v41 = vmax.f32 %v10620_v43, 0.0  ;;  %v12311_v26 = vld [vmem:[%s12488_s28 + $0x18c] ss:$16 sps:$4 sm:$0xff]   ;;  %v12312_v43 = vld [vmem:[%s12488_s28 + $0x188] ss:$16 sps:$4 sm:$0xff]  }
 0x222   : > { %v4150_v50 = vmax.f32 %v10621_v5, 0.0  ;;  %v4149_v40 = vmax.f32 %v10558_v28, 0.0  ;;  %3840 = vmatmul.mubr.bf16.gmra.mrb[104].mxu1 %v12308_v3  ;;  %3463 = vmatprep.mubr.bf16.mxu0 %v12309_v57  ;;  %v12313_v4 = vld [vmem:[%s12488_s28 + $0x1ac] ss:$16 sps:$4 sm:$0xff]   ;;  %v12316_v28 = vld [vmem:[%s12488_s28 + $0x1c8] ss:$16 sps:$4 sm:$0xff]  }
 0x223   : > { %v13810_v42 = vpack.c.bf16 %v4148_v21, %v4140_v62  ;;  %v4151_v29 = vmax.f32 %v10622_v33, 0.0  ;;  %3849 = vmatprep.mubr.bf16.mxu1 %v12309_v57  ;;  %v12315_v5 = vld [vmem:[%s12488_s28 + $0x1cc] ss:$16 sps:$4 sm:$0xff]   ;;  %v12318_v62 = vld [vmem:[%s12488_s28 + $0x1e8] ss:$16 sps:$4 sm:$0xff]  }
 0x224   : > { %v13812_v44 = vpack.c.bf16 %v4150_v50, %v4142_v2  ;;  %v13814_v36 = vpack.c.bf16 %v4149_v40, %v4141_v20  ;;  %v12314_v20 = vld [vmem:[%s12488_s28 + $0x1a8] ss:$16 sps:$4 sm:$0xff]   ;;  %v12317_v22 = vld [vmem:[%s12488_s28 + $0x1ec] ss:$16 sps:$4 sm:$0xff]   ;;  %v11847_v21 = vld [vmem:[%s15662_s3 + $0x200] ss:$16 sps:$4 sm:$0xff]  }
 0x225   : > { %v13816_v13 = vpack.c.bf16 %v4151_v29, %v4143_v41  ;;  %v11852_v33 = vld [vmem:[%s15662_s3 + $0x224] ss:$16 sps:$4 sm:$0xff]   ;;  %v11874_v3 = vld [vmem:[%s15662_s3 + $0x208] ss:$16 sps:$4 sm:$0xff]   ;;  %v11879_v2 = vld [vmem:[%s15662_s3 + $0x22c] ss:$16 sps:$4 sm:$0xff]  }
 0x226   : > { %v11855_v50 = vld [vmem:[%s15662_s3 + $0x244] ss:$16 sps:$4 sm:$0xff]   ;;  %v11877_v40 = vld [vmem:[%s15662_s3 + $0x228] ss:$16 sps:$4 sm:$0xff]   ;;  %v11888_v29 = vld [vmem:[%s15662_s3 + $0x26c] ss:$16 sps:$4 sm:$0xff]  }
 0x227   : > { %v11858_v57 = vld [vmem:[%s15662_s3 + $0x264] ss:$16 sps:$4 sm:$0xff]   ;;  %v11883_v41 = vld [vmem:[%s15662_s3 + $0x248] ss:$16 sps:$4 sm:$0xff]  }
 0x229   : > { %3464 = vmatmul.mubr.bf16.gmra.mrb[108].mxu0 %v12310_v55 }
 0x22a   : > { %3850 = vmatmul.mubr.bf16.gmra.mrb[108].mxu1 %v12310_v55  ;;  %3473 = vmatprep.mubr.bf16.mxu0 %v12311_v26  ;;  %v11856_v55 = vld [vmem:[%s15662_s3 + $0x260] ss:$16 sps:$4 sm:$0xff]  }
 0x22b   : > { %3859 = vmatprep.mubr.bf16.mxu1 %v12311_v26  ;;  %v11861_v26 = vld [vmem:[%s15662_s3 + $0x284] ss:$16 sps:$4 sm:$0xff]  }
 0x231   : > { %3474 = vmatmul.mubr.bf16.gmra.mrb[112].mxu0 %v12312_v43 }
 0x232   : > { %3860 = vmatmul.mubr.bf16.gmra.mrb[112].mxu1 %v12312_v43  ;;  %3483 = vmatprep.mubr.bf16.mxu0 %v12313_v4  ;;  %v11886_v43 = vld [vmem:[%s15662_s3 + $0x268] ss:$16 sps:$4 sm:$0xff]  }
 0x233   : > { %3869 = vmatprep.mubr.bf16.mxu1 %v12313_v4  ;;  %v11864_v4 = vld [vmem:[%s15662_s3 + $0x2a4] ss:$16 sps:$4 sm:$0xff]  }
 0x239   : > { %3484 = vmatmul.mubr.bf16.gmra.mrb[116].mxu0 %v12314_v20 }
 0x23a   : > { %3870 = vmatmul.mubr.bf16.gmra.mrb[116].mxu1 %v12314_v20  ;;  %3493 = vmatprep.mubr.bf16.mxu0 %v12315_v5  ;;  %v11892_v20 = vld [vmem:[%s15662_s3 + $0x288] ss:$16 sps:$4 sm:$0xff]  }
 0x23b   : > { %3879 = vmatprep.mubr.bf16.mxu1 %v12315_v5  ;;  %v11897_v5 = vld [vmem:[%s15662_s3 + $0x2ac] ss:$16 sps:$4 sm:$0xff]  }
 0x241   : > { %3494 = vmatmul.mubr.bf16.gmra.mrb[120].mxu0 %v12316_v28 }
 0x242   : > { %3880 = vmatmul.mubr.bf16.gmra.mrb[120].mxu1 %v12316_v28  ;;  %3503 = vmatprep.mubr.bf16.mxu0 %v12317_v22  ;;  %v11862_v28 = vld [vmem:[%s15662_s3 + $0x2a0] ss:$16 sps:$4 sm:$0xff]  }
 0x243   : > { %3889 = vmatprep.mubr.bf16.mxu1 %v12317_v22  ;;  %v11867_v22 = vld [vmem:[%s15662_s3 + $0x2c4] ss:$16 sps:$4 sm:$0xff]  }
 0x249   : > { %3504 = vmatmul.mubr.bf16.gmra.mrb[124].mxu0 %v12318_v62 }
 0x24a   : > { %3890 = vmatmul.mubr.bf16.gmra.mrb[124].mxu1 %v12318_v62  ;;  %6130 = vmatprep.mubr.bf16.mxu0 %v13352_v9  ;;  %v11895_v62 = vld [vmem:[%s15662_s3 + $0x2a8] ss:$16 sps:$4 sm:$0xff]  }
 0x24b   : > { %6902 = vmatprep.mubr.bf16.mxu1 %v13352_v9  ;;  %v11850_v9 = vld [vmem:[%s15662_s3 + $0x220] ss:$16 sps:$4 sm:$0xff]  }
 0x251   : > { %6131 = vmatmul.mubr.bf16.vlgmr.msra.gmra.mrb[128].mxu0 %v13348_v6 }
 0x252   : > { %6903 = vmatmul.mubr.bf16.vlgmr.msra.gmra.mrb[128].mxu1 %v13348_v6  ;;  %6140 = vmatprep.mubr.bf16.mxu0 %v13368_v47  ;;  %v11885_v6 = vld [vmem:[%s15662_s3 + $0x24c] ss:$16 sps:$4 sm:$0xff]  }
 0x253   : > { %6292 = vmatpush1.bf16.msra.mxu0 %v11847_v21  ;;  %6912 = vmatprep.mubr.bf16.mxu1 %v13368_v47  ;;  %v11853_v47 = vld [vmem:[%s15662_s3 + $0x240] ss:$16 sps:$4 sm:$0xff]   ;;  %v11870_v21 = vld [vmem:[%s15662_s3 + $0x2e4] ss:$16 sps:$4 sm:$0xff]  }
 0x254   : > { %6293 = vmatprep.subr.bf16.mxu0 %v11852_v33  ;;  %7064 = vmatpush1.bf16.msra.mxu1 %v11874_v3  ;;  %v11901_v33 = vld [vmem:[%s15662_s3 + $0x2c8] ss:$16 sps:$4 sm:$0xff]   ;;  %v11906_v3 = vld [vmem:[%s15662_s3 + $0x2ec] ss:$16 sps:$4 sm:$0xff]  }
 0x255   : > { %7065 = vmatprep.subr.bf16.mxu1 %v11879_v2  ;;  %v11868_v2 = vld [vmem:[%s15662_s3 + $0x2e0] ss:$16 sps:$4 sm:$0xff]  }
 0x257   : > { %6294 = vmatpush1.bf16.msra.mxu0 %v11850_v9  ;;  %v11873_v9 = vld [vmem:[%s15662_s3 + $0x304] ss:$16 sps:$4 sm:$0xff]  }
 0x258   : > { %6295 = vmatprep.subr.bf16.mxu0 %v11855_v50  ;;  %7066 = vmatpush1.bf16.msra.mxu1 %v11877_v40  ;;  %v11904_v50 = vld [vmem:[%s15662_s3 + $0x2e8] ss:$16 sps:$4 sm:$0xff]   ;;  %v11882_v40 = vld [vmem:[%s15662_s3 + $0x324] ss:$16 sps:$4 sm:$0xff]  }
 0x259   : > { %6141 = vmatmul.mubr.bf16.gmra.mrb[132].mxu0 %v13366_v45  ;;  %7067 = vmatprep.subr.bf16.mxu1 %v11885_v6  ;;  %v11910_v6 = vld [vmem:[%s15662_s3 + $0x308] ss:$16 sps:$4 sm:$0xff]  }
 0x25a   : > { %6913 = vmatmul.mubr.bf16.gmra.mrb[132].mxu1 %v13366_v45  ;;  %6150 = vmatprep.mubr.bf16.mxu0 %v13386_v17  ;;  %v11894_v45 = vld [vmem:[%s15662_s3 + $0x28c] ss:$16 sps:$4 sm:$0xff]  }
 0x25b   : > { %6922 = vmatprep.mubr.bf16.mxu1 %v13386_v17  ;;  %6296 = vmatpush1.bf16.msra.mxu0 %v11853_v47  ;;  %v11859_v17 = vld [vmem:[%s15662_s3 + $0x280] ss:$16 sps:$4 sm:$0xff]   ;;  %v11915_v47 = vld [vmem:[%s15662_s3 + $0x32c] ss:$16 sps:$4 sm:$0xff]  }
 0x25c   : > { %6297 = vmatprep.subr.bf16.mxu0 %v11858_v57  ;;  %7068 = vmatpush1.bf16.msra.mxu1 %v11883_v41  ;;  %v11880_v57 = vld [vmem:[%s15662_s3 + $0x320] ss:$16 sps:$4 sm:$0xff]   ;;  %v11891_v41 = vld [vmem:[%s15662_s3 + $0x344] ss:$16 sps:$4 sm:$0xff]  }
 0x25d   : > { %7069 = vmatprep.subr.bf16.mxu1 %v11888_v29  ;;  %v11913_v29 = vld [vmem:[%s15662_s3 + $0x328] ss:$16 sps:$4 sm:$0xff]  }
 0x25f   : > { %6298 = vmatpush1.bf16.msra.mxu0 %v11856_v55  ;;  %v11900_v55 = vld [vmem:[%s15662_s3 + $0x364] ss:$16 sps:$4 sm:$0xff]  }
 0x260   : > { %6299 = vmatprep.subr.bf16.mxu0 %v11861_v26  ;;  %7070 = vmatpush1.bf16.msra.mxu1 %v11886_v43  ;;  %v11919_v26 = vld [vmem:[%s15662_s3 + $0x348] ss:$16 sps:$4 sm:$0xff]   ;;  %v11924_v43 = vld [vmem:[%s15662_s3 + $0x36c] ss:$16 sps:$4 sm:$0xff]  }
 0x261   : > { %6151 = vmatmul.mubr.bf16.gmra.mrb[136].mxu0 %v13384_v15  ;;  %7071 = vmatprep.subr.bf16.mxu1 %v11894_v45  ;;  %v11898_v45 = vld [vmem:[%s15662_s3 + $0x360] ss:$16 sps:$4 sm:$0xff]  }
 0x262   : > { %6923 = vmatmul.mubr.bf16.gmra.mrb[136].mxu1 %v13384_v15  ;;  %6160 = vmatprep.mubr.bf16.mxu0 %v13404_v63  ;;  %v11903_v15 = vld [vmem:[%s15662_s3 + $0x2cc] ss:$16 sps:$4 sm:$0xff]  }
 0x263   : > { %6932 = vmatprep.mubr.bf16.mxu1 %v13404_v63  ;;  %6300 = vmatpush1.bf16.msra.mxu0 %v11859_v17  ;;  %v11865_v63 = vld [vmem:[%s15662_s3 + $0x2c0] ss:$16 sps:$4 sm:$0xff]   ;;  %v11909_v17 = vld [vmem:[%s15662_s3 + $0x384] ss:$16 sps:$4 sm:$0xff]  }
 0x264   : > { %6301 = vmatprep.subr.bf16.mxu0 %v11864_v4  ;;  %7072 = vmatpush1.bf16.msra.mxu1 %v11892_v20  ;;  %v11922_v4 = vld [vmem:[%s15662_s3 + $0x368] ss:$16 sps:$4 sm:$0xff]   ;;  %v11918_v20 = vld [vmem:[%s15662_s3 + $0x3a4] ss:$16 sps:$4 sm:$0xff]  }
 0x265   : > { %7073 = vmatprep.subr.bf16.mxu1 %v11897_v5  ;;  %v11928_v5 = vld [vmem:[%s15662_s3 + $0x388] ss:$16 sps:$4 sm:$0xff]  }
 0x267   : > { %6302 = vmatpush1.bf16.msra.mxu0 %v11862_v28  ;;  %v11933_v28 = vld [vmem:[%s15662_s3 + $0x3ac] ss:$16 sps:$4 sm:$0xff]  }
 0x268   : > { %6303 = vmatprep.subr.bf16.mxu0 %v11867_v22  ;;  %7074 = vmatpush1.bf16.msra.mxu1 %v11895_v62  ;;  %v11916_v22 = vld [vmem:[%s15662_s3 + $0x3a0] ss:$16 sps:$4 sm:$0xff]   ;;  %v11927_v62 = vld [vmem:[%s15662_s3 + $0x3c4] ss:$16 sps:$4 sm:$0xff]  }
 0x269   : > { %6161 = vmatmul.mubr.bf16.gmra.mrb[140].mxu0 %v13402_v58  ;;  %7075 = vmatprep.subr.bf16.mxu1 %v11903_v15  ;;  %v11931_v15 = vld [vmem:[%s15662_s3 + $0x3a8] ss:$16 sps:$4 sm:$0xff]  }
 0x26a   : > { %6933 = vmatmul.mubr.bf16.gmra.mrb[140].mxu1 %v13402_v58  ;;  %6170 = vmatprep.mubr.bf16.mxu0 %v13422_v39  ;;  %v11912_v58 = vld [vmem:[%s15662_s3 + $0x30c] ss:$16 sps:$4 sm:$0xff]  }
 0x26b   : > { %6942 = vmatprep.mubr.bf16.mxu1 %v13422_v39  ;;  %6304 = vmatpush1.bf16.msra.mxu0 %v11865_v63  ;;  %v11871_v39 = vld [vmem:[%s15662_s3 + $0x300] ss:$16 sps:$4 sm:$0xff]   ;;  %v11936_v63 = vld [vmem:[%s15662_s3 + $0x3e4] ss:$16 sps:$4 sm:$0xff]  }
 0x26c   : > { %6305 = vmatprep.subr.bf16.mxu0 %v11870_v21  ;;  %7076 = vmatpush1.bf16.msra.mxu1 %v11901_v33  ;;  %v11937_v21 = vld [vmem:[%s15662_s3 + $0x3c8] ss:$16 sps:$4 sm:$0xff]   ;;  %v11942_v33 = vld [vmem:[%s15662_s3 + $0x3ec] ss:$16 sps:$4 sm:$0xff]  }
 0x26d   : > { %7077 = vmatprep.subr.bf16.mxu1 %v11906_v3  ;;  %v11934_v3 = vld [vmem:[%s15662_s3 + $0x3e0] ss:$16 sps:$4 sm:$0xff]  }
 0x26f   : > { %6306 = vmatpush1.bf16.msra.mxu0 %v11868_v2  ;;  %v11940_v2 = vld [vmem:[%s15662_s3 + $0x3e8] ss:$16 sps:$4 sm:$0xff]  }
 0x270   : > { %6307 = vmatprep.subr.bf16.mxu0 %v11873_v9  ;;  %7078 = vmatpush1.bf16.msra.mxu1 %v11904_v50  ;;  %v11945_v9 = vld [vmem:[%s15662_s3 + $0x404] ss:$16 sps:$4 sm:$0xff]   ;;  %v742_v50 = vsub.s32 6, %v13308_v59 }
 0x271   : > { %6171 = vmatmul.mubr.bf16.gmra.mrb[144].mxu0 %v13420_v60  ;;  %7079 = vmatprep.subr.bf16.mxu1 %v11912_v58  ;;  %v738_v58 = vsub.s32 5, %v13308_v59 }
 0x272   : > { %6943 = vmatmul.mubr.bf16.gmra.mrb[144].mxu1 %v13420_v60  ;;  %6180 = vmatprep.mubr.bf16.mxu0 %v13458_v34  ;;  %v11921_v60 = vld [vmem:[%s15662_s3 + $0x34c] ss:$16 sps:$4 sm:$0xff]  }
 0x273   : > { %6952 = vmatprep.mubr.bf16.mxu1 %v13458_v34  ;;  %6308 = vmatpush1.bf16.msra.mxu0 %v11871_v39  ;;  %v11889_v34 = vld [vmem:[%s15662_s3 + $0x340] ss:$16 sps:$4 sm:$0xff]  }
 0x274   : > { %6309 = vmatprep.subr.bf16.mxu0 %v11882_v40  ;;  %7080 = vmatpush1.bf16.msra.mxu1 %v11910_v6 }
 0x275   : > { %7081 = vmatprep.subr.bf16.mxu1 %v11915_v47 }
 0x277   : > { %6310 = vmatpush1.bf16.msra.mxu0 %v11880_v57 }
 0x278   : > { %6311 = vmatprep.subr.bf16.mxu0 %v11891_v41  ;;  %7082 = vmatpush1.bf16.msra.mxu1 %v11913_v29 }
 0x279   : > { %6181 = vmatmul.mubr.bf16.gmra.mrb[148].mxu0 %v13452_v30  ;;  %7083 = vmatprep.subr.bf16.mxu1 %v11921_v60 }
 0x27a   : > { %6953 = vmatmul.mubr.bf16.gmra.mrb[148].mxu1 %v13452_v30  ;;  %6190 = vmatprep.mubr.bf16.mxu0 %v13497_v51  ;;  %v11930_v30 = vld [vmem:[%s15662_s3 + $0x38c] ss:$16 sps:$4 sm:$0xff]  }
 0x27b   : > { %6962 = vmatprep.mubr.bf16.mxu1 %v13497_v51  ;;  %6312 = vmatpush1.bf16.msra.mxu0 %v11889_v34  ;;  %v11907_v51 = vld [vmem:[%s15662_s3 + $0x380] ss:$16 sps:$4 sm:$0xff]  }
 0x27c   : > { %6313 = vmatprep.subr.bf16.mxu0 %v11900_v55  ;;  %7084 = vmatpush1.bf16.msra.mxu1 %v11919_v26 }
 0x27d   : > { %7085 = vmatprep.subr.bf16.mxu1 %v11924_v43 }
 0x27f   : > { %6314 = vmatpush1.bf16.msra.mxu0 %v11898_v45 }
 0x280   : > { %6315 = vmatprep.subr.bf16.mxu0 %v11909_v17  ;;  %7086 = vmatpush1.bf16.msra.mxu1 %v11922_v4 }
 0x281   : > { %6191 = vmatmul.mubr.bf16.gmra.mrb[152].mxu0 %v13492_v35  ;;  %7087 = vmatprep.subr.bf16.mxu1 %v11930_v30 }
 0x282   : > { %6963 = vmatmul.mubr.bf16.gmra.mrb[152].mxu1 %v13492_v35  ;;  %6200 = vmatprep.mubr.bf16.mxu0 %v13539_v10  ;;  %v11939_v35 = vld [vmem:[%s15662_s3 + $0x3cc] ss:$16 sps:$4 sm:$0xff]  }
 0x283   : > { %6972 = vmatprep.mubr.bf16.mxu1 %v13539_v10  ;;  %6316 = vmatpush1.bf16.msra.mxu0 %v11907_v51  ;;  %v11925_v10 = vld [vmem:[%s15662_s3 + $0x3c0] ss:$16 sps:$4 sm:$0xff]  }
 0x284   : > { %6317 = vmatprep.subr.bf16.mxu0 %v11918_v20  ;;  %7088 = vmatpush1.bf16.msra.mxu1 %v11928_v5 }
 0x285   : > { %7089 = vmatprep.subr.bf16.mxu1 %v11933_v28 }
 0x287   : > { %6318 = vmatpush1.bf16.msra.mxu0 %v11916_v22 }
 0x288   : > { %6319 = vmatprep.subr.bf16.mxu0 %v11927_v62  ;;  %7090 = vmatpush1.bf16.msra.mxu1 %v11931_v15 }
 0x289   : > { %6201 = vmatmul.mubr.bf16.gmra.mrb[156].mxu0 %v13534_v7  ;;  %7091 = vmatprep.subr.bf16.mxu1 %v11939_v35 }
 0x28a   : > { %6973 = vmatmul.mubr.bf16.gmra.mrb[156].mxu1 %v13534_v7  ;;  %6210 = vmatprep.mubr.bf16.mxu0 %v13581_v32  ;;  %v11972_v7 = vld [vmem:[%s15662_s3 + $0x40c] ss:$16 sps:$4 sm:$0xff]  }
 0x28b   : > { %6982 = vmatprep.mubr.bf16.mxu1 %v13581_v32  ;;  %6320 = vmatpush1.bf16.msra.mxu0 %v11925_v10  ;;  %v734_v32 = vsub.s32 4, %v13308_v59 }
 0x28c   : > { %6321 = vmatprep.subr.bf16.mxu0 %v11936_v63  ;;  %7092 = vmatpush1.bf16.msra.mxu1 %v11937_v21 }
 0x28d   : > { %7093 = vmatprep.subr.bf16.mxu1 %v11942_v33 }
 0x28f   : > { %6322 = vmatpush1.bf16.msra.mxu0 %v11934_v3 }
 0x290   : > { %7094 = vmatpush1.bf16.msra.mxu1 %v11940_v2  ;;  %6484 = vmatprep.subr.bf16.mxu0 %v11945_v9 }
 0x291   : > { %6211 = vmatmul.mubr.bf16.gmra.mrb[160].mxu0 %v13576_v38  ;;  %7256 = vmatprep.subr.bf16.mxu1 %v11972_v7 }
 0x292   : > { %6983 = vmatmul.mubr.bf16.gmra.mrb[160].mxu1 %v13576_v38  ;;  %6220 = vmatprep.mubr.bf16.mxu0 %v13623_v27  ;;  %v746_v38 = vsub.s32 7, %v13308_v59 }
 0x293   : > { %6992 = vmatprep.mubr.bf16.mxu1 %v13623_v27  ;;  %v12319_v27 = vld [vmem:[%s15661_s2] sm:$0xff] }
 0x294   : > { %v14069_v39 = vrot.slane %v12319_v27, %v734_v32  ;;  %v14078_v40 = vrot.slane %v12319_v27, %v746_v38 }
 0x299   : > { %6221 = vmatmul.mubr.bf16.gmra.mrb[164].mxu0 %v13618_v31 }
 0x29a   : > { %6993 = vmatmul.mubr.bf16.gmra.mrb[164].mxu1 %v13618_v31  ;;  %6230 = vmatprep.mubr.bf16.mxu0 %v13665_v16  ;;  %v14073_v31 = vrot.slane %v12319_v27, %v742_v50 }
 0x29b   : > { %7002 = vmatprep.mubr.bf16.mxu1 %v13665_v16  ;;  %v14075_v16 = vrot.slane %v12319_v27, %v738_v58 }
 0x2a1   : > { %6231 = vmatmul.mubr.bf16.gmra.mrb[168].mxu0 %v13660_v11 }
 0x2a2   : > { %7003 = vmatmul.mubr.bf16.gmra.mrb[168].mxu1 %v13660_v11  ;;  %6240 = vmatprep.mubr.bf16.mxu0 %v13707_v12 }
 0x2a3   : > { %7012 = vmatprep.mubr.bf16.mxu1 %v13707_v12 }
 0x2a4   : > { %v3355_v6 = vpop.f32.mrb[64].mxu0 }
 0x2a5   : > { %v10623_v47 = vadd.f32 %v3355_v6, %v14069_v39  ;;  %v3741_v57 = vpop.f32.mrb[64].mxu1  ;;  %v3357_v41 = vpop.f32.mrb[65].mxu0 }
 0x2a6   : > { %v10687_v29 = vadd.f32 %v3741_v57, %v14073_v31  ;;  %v10624_v60 = vadd.f32 %v3357_v41, %v14075_v16  ;;  %v3743_v11 = vpop.f32.mrb[65].mxu1  ;;  %v3359_v34 = vpop.f32.mrb[66].mxu0 }
 0x2a7   : > { %v10688_v55 = vadd.f32 %v3743_v11, %v14078_v40  ;;  %v10625_v26 = vadd.f32 %v3359_v34, %v14069_v39  ;;  %v3745_v43 = vpop.f32.mrb[66].mxu1  ;;  %v3361_v45 = vpop.f32.mrb[67].mxu0  ;;  %v3904_v30 = vmax.f32 %v10623_v47, 0.0 }
 0x2a8   : > { %v10689_v12 = vadd.f32 %v3745_v43, %v14073_v31  ;;  %v10626_v17 = vadd.f32 %v3361_v45, %v14075_v16  ;;  %v3747_v4 = vpop.f32.mrb[67].mxu1  ;;  %v3906_v5 = vmax.f32 %v10687_v29, 0.0  ;;  %v3905_v28 = vmax.f32 %v10624_v60, 0.0 }
 0x2a9   : > { %v3912_v51 = vmax.f32 %v10625_v26, 0.0  ;;  %v10690_v20 = vadd.f32 %v3747_v4, %v14078_v40  ;;  %6241 = vmatmul.mubr.bf16.gmra.mrb[172].mxu0 %v13702_v61  ;;  %v3907_v15 = vmax.f32 %v10688_v55, 0.0 }
 0x2aa   : > { %v3914_v22 = vmax.f32 %v10689_v12, 0.0  ;;  %v3913_v62 = vmax.f32 %v10626_v17, 0.0  ;;  %7013 = vmatmul.mubr.bf16.gmra.mrb[172].mxu1 %v13702_v61  ;;  %6250 = vmatprep.mubr.bf16.mxu0 %v13751_v24 }
 0x2ab   : > { %v14091_v35 = vpack.c.bf16 %v3912_v51, %v3904_v30  ;;  %v3915_v10 = vmax.f32 %v10690_v20, 0.0  ;;  %7022 = vmatprep.mubr.bf16.mxu1 %v13751_v24 }
 0x2ac   : > { %v14094_v63 = vpack.c.bf16 %v3914_v22, %v3906_v5  ;;  %v14096_v21 = vpack.c.bf16 %v3913_v62, %v3905_v28  ;;  %v3365_v33 = vpop.f32.mrb[68].mxu0 }
 0x2ad   : > { %v14098_v3 = vpack.c.bf16 %v3915_v10, %v3907_v15  ;;  %v10627_v2 = vadd.f32 %v3365_v33, %v14069_v39  ;;  %v3751_v9 = vpop.f32.mrb[68].mxu1  ;;  %v3367_v7 = vpop.f32.mrb[69].mxu0 }
 0x2ae   : > { %v10691_v61 = vadd.f32 %v3751_v9, %v14073_v31  ;;  %v10628_v32 = vadd.f32 %v3367_v7, %v14075_v16  ;;  %v3753_v50 = vpop.f32.mrb[69].mxu1  ;;  %v3369_v58 = vpop.f32.mrb[70].mxu0 }
 0x2af   : > { %v10692_v38 = vadd.f32 %v3753_v50, %v14078_v40  ;;  %v10629_v24 = vadd.f32 %v3369_v58, %v14069_v39  ;;  %v3755_v27 = vpop.f32.mrb[70].mxu1  ;;  %v3371_v6 = vpop.f32.mrb[71].mxu0  ;;  %v3920_v29 = vmax.f32 %v10627_v2, 0.0 }
 0x2b0   : > { %v10693_v47 = vadd.f32 %v3755_v27, %v14073_v31  ;;  %v10630_v57 = vadd.f32 %v3371_v6, %v14075_v16  ;;  %v3757_v41 = vpop.f32.mrb[71].mxu1  ;;  %v3922_v34 = vmax.f32 %v10691_v61, 0.0  ;;  %v3921_v55 = vmax.f32 %v10628_v32, 0.0 }
 0x2b1   : > { %v3928_v60 = vmax.f32 %v10629_v24, 0.0  ;;  %v10694_v11 = vadd.f32 %v3757_v41, %v14078_v40  ;;  %6251 = vmatmul.mubr.bf16.gmra.mrb[176].mxu0 %v13744_v48  ;;  %v3923_v45 = vmax.f32 %v10692_v38, 0.0 }
 0x2b2   : > { %v3930_v26 = vmax.f32 %v10693_v47, 0.0  ;;  %v3929_v43 = vmax.f32 %v10630_v57, 0.0  ;;  %7023 = vmatmul.mubr.bf16.gmra.mrb[176].mxu1 %v13744_v48  ;;  %6260 = vmatprep.mubr.bf16.mxu0 %v13778_v54 }
 0x2b3   : > { %v14111_v12 = vpack.c.bf16 %v3928_v60, %v3920_v29  ;;  %v3931_v17 = vmax.f32 %v10694_v11, 0.0  ;;  %7032 = vmatprep.mubr.bf16.mxu1 %v13778_v54 }
 0x2b4   : > { %v14114_v4 = vpack.c.bf16 %v3930_v26, %v3922_v34  ;;  %v14116_v30 = vpack.c.bf16 %v3929_v43, %v3921_v55  ;;  %v3375_v51 = vpop.f32.mrb[72].mxu0 }
 0x2b5   : > { %v14118_v20 = vpack.c.bf16 %v3931_v17, %v3923_v45  ;;  %v10631_v5 = vadd.f32 %v3375_v51, %v14069_v39  ;;  %v3761_v28 = vpop.f32.mrb[72].mxu1  ;;  %v3377_v22 = vpop.f32.mrb[73].mxu0 }
 0x2b6   : > { %v10695_v48 = vadd.f32 %v3761_v28, %v14073_v31  ;;  %v10632_v62 = vadd.f32 %v3377_v22, %v14075_v16  ;;  %v3763_v15 = vpop.f32.mrb[73].mxu1  ;;  %v3379_v10 = vpop.f32.mrb[74].mxu0 }
 0x2b7   : > { %v10696_v33 = vadd.f32 %v3763_v15, %v14078_v40  ;;  %v10633_v54 = vadd.f32 %v3379_v10, %v14069_v39  ;;  %v3765_v2 = vpop.f32.mrb[74].mxu1  ;;  %v3381_v9 = vpop.f32.mrb[75].mxu0  ;;  %v3936_v50 = vmax.f32 %v10631_v5, 0.0 }
 0x2b8   : > { %v10697_v7 = vadd.f32 %v3765_v2, %v14073_v31  ;;  %v10634_v61 = vadd.f32 %v3381_v9, %v14075_v16  ;;  %v3767_v32 = vpop.f32.mrb[75].mxu1  ;;  %v3938_v24 = vmax.f32 %v10695_v48, 0.0  ;;  %v3937_v27 = vmax.f32 %v10632_v62, 0.0 }
 0x2b9   : > { %v3944_v58 = vmax.f32 %v10633_v54, 0.0  ;;  %v10698_v38 = vadd.f32 %v3767_v32, %v14078_v40  ;;  %6261 = vmatmul.mubr.bf16.gmra.mrb[180].mxu0 %v13774_v37  ;;  %v3939_v57 = vmax.f32 %v10696_v33, 0.0 }
 0x2ba   : > { %v3946_v6 = vmax.f32 %v10697_v7, 0.0  ;;  %v3945_v47 = vmax.f32 %v10634_v61, 0.0  ;;  %7033 = vmatmul.mubr.bf16.gmra.mrb[180].mxu1 %v13774_v37  ;;  %6270 = vmatprep.mubr.bf16.mxu0 %v13796_v18 }
 0x2bb   : > { %v14131_v41 = vpack.c.bf16 %v3944_v58, %v3936_v50  ;;  %v3947_v29 = vmax.f32 %v10698_v38, 0.0  ;;  %7042 = vmatprep.mubr.bf16.mxu1 %v13796_v18 }
 0x2bc   : > { %v14134_v60 = vpack.c.bf16 %v3946_v6, %v3938_v24  ;;  %v14136_v11 = vpack.c.bf16 %v3945_v47, %v3937_v27  ;;  %v3385_v34 = vpop.f32.mrb[76].mxu0 }
 0x2bd   : > { %v14138_v55 = vpack.c.bf16 %v3947_v29, %v3939_v57  ;;  %v10635_v26 = vadd.f32 %v3385_v34, %v14069_v39  ;;  %v3771_v43 = vpop.f32.mrb[76].mxu1  ;;  %v3387_v45 = vpop.f32.mrb[77].mxu0 }
 0x2be   : > { %v10699_v37 = vadd.f32 %v3771_v43, %v14073_v31  ;;  %v10636_v17 = vadd.f32 %v3387_v45, %v14075_v16  ;;  %v3773_v51 = vpop.f32.mrb[77].mxu1  ;;  %v3389_v5 = vpop.f32.mrb[78].mxu0 }
 0x2bf   : > { %v10700_v28 = vadd.f32 %v3773_v51, %v14078_v40  ;;  %v10637_v18 = vadd.f32 %v3389_v5, %v14069_v39  ;;  %v3775_v22 = vpop.f32.mrb[78].mxu1  ;;  %v3391_v48 = vpop.f32.mrb[79].mxu0  ;;  %v3952_v33 = vmax.f32 %v10635_v26, 0.0 }
 0x2c0   : > { %v10701_v62 = vadd.f32 %v3775_v22, %v14073_v31  ;;  %v10638_v15 = vadd.f32 %v3391_v48, %v14075_v16  ;;  %v3777_v10 = vpop.f32.mrb[79].mxu1  ;;  %v3954_v9 = vmax.f32 %v10699_v37, 0.0  ;;  %v3953_v7 = vmax.f32 %v10636_v17, 0.0 }
 0x2c1   : > { %v3960_v54 = vmax.f32 %v10637_v18, 0.0  ;;  %v10702_v2 = vadd.f32 %v3777_v10, %v14078_v40  ;;  %6271 = vmatmul.mubr.bf16.gmra.mrb[184].mxu0 %v13792_v56  ;;  %v3955_v50 = vmax.f32 %v10700_v28, 0.0 }
 0x2c2   : > { %v3962_v61 = vmax.f32 %v10701_v62, 0.0  ;;  %v3961_v32 = vmax.f32 %v10638_v15, 0.0  ;;  %7043 = vmatmul.mubr.bf16.gmra.mrb[184].mxu1 %v13792_v56  ;;  %6280 = vmatprep.mubr.bf16.mxu0 %v13814_v36 }
 0x2c3   : > { %v14151_v58 = vpack.c.bf16 %v3960_v54, %v3952_v33  ;;  %v3963_v38 = vmax.f32 %v10702_v2, 0.0  ;;  %7052 = vmatprep.mubr.bf16.mxu1 %v13814_v36 }
 0x2c4   : > { %v14154_v24 = vpack.c.bf16 %v3962_v61, %v3954_v9  ;;  %v14156_v27 = vpack.c.bf16 %v3961_v32, %v3953_v7  ;;  %v3395_v6 = vpop.f32.mrb[80].mxu0 }
 0x2c5   : > { %v14158_v47 = vpack.c.bf16 %v3963_v38, %v3955_v50  ;;  %v10639_v57 = vadd.f32 %v3395_v6, %v14069_v39  ;;  %v3781_v29 = vpop.f32.mrb[80].mxu1  ;;  %v3397_v34 = vpop.f32.mrb[81].mxu0 }
 0x2c6   : > { %15743 = vst [vmem:[#allocation28_spill] sm:$0xff] %v14154_v24  ;;  %v10703_v56 = vadd.f32 %v3781_v29, %v14073_v31  ;;  %v10640_v26 = vadd.f32 %v3397_v34, %v14075_v16  ;;  %v3783_v43 = vpop.f32.mrb[81].mxu1  ;;  %v3399_v45 = vpop.f32.mrb[82].mxu0 }
 0x2c7   : > { %v10704_v37 = vadd.f32 %v3783_v43, %v14078_v40  ;;  %v10641_v36 = vadd.f32 %v3399_v45, %v14069_v39  ;;  %v3785_v17 = vpop.f32.mrb[82].mxu1  ;;  %v3401_v51 = vpop.f32.mrb[83].mxu0  ;;  %v3968_v22 = vmax.f32 %v10639_v57, 0.0 }
 0x2c8   : > { %v10705_v5 = vadd.f32 %v3785_v17, %v14073_v31  ;;  %v10642_v28 = vadd.f32 %v3401_v51, %v14075_v16  ;;  %v3787_v18 = vpop.f32.mrb[83].mxu1  ;;  %v3970_v15 = vmax.f32 %v10703_v56, 0.0  ;;  %v3969_v10 = vmax.f32 %v10640_v26, 0.0 }
 0x2c9   : > { %v3976_v48 = vmax.f32 %v10641_v36, 0.0  ;;  %v10706_v62 = vadd.f32 %v3787_v18, %v14078_v40  ;;  %6281 = vmatmul.mubr.bf16.gmra.mrb[188].mxu0 %v13810_v42  ;;  %v3971_v2 = vmax.f32 %v10704_v37, 0.0  ;;  %v11943_v36 = vld [vmem:[%s15662_s3 + $0x400] ss:$16 sps:$4 sm:$0xff]   ;;  %v11970_v18 = vld [vmem:[%s15662_s3 + $0x408] ss:$16 sps:$4 sm:$0xff]  }
 0x2ca   : > { %v3978_v33 = vmax.f32 %v10705_v5, 0.0  ;;  %v3977_v54 = vmax.f32 %v10642_v28, 0.0  ;;  %7053 = vmatmul.mubr.bf16.gmra.mrb[188].mxu1 %v13810_v42  ;;  %6323 = vmatprep.mubr.bf16.mxu0 %v13355_v14  ;;  %v11948_v28 = vld [vmem:[%s15662_s3 + $0x424] ss:$16 sps:$4 sm:$0xff]  }
 0x2cb   : > { %v14171_v9 = vpack.c.bf16 %v3976_v48, %v3968_v22  ;;  %v3979_v7 = vmax.f32 %v10706_v62, 0.0  ;;  %7095 = vmatprep.mubr.bf16.mxu1 %v13355_v14 }
 0x2cc   : > { %v14174_v61 = vpack.c.bf16 %v3978_v33, %v3970_v15  ;;  %v14176_v32 = vpack.c.bf16 %v3977_v54, %v3969_v10  ;;  %v3405_v50 = vpop.f32.mrb[84].mxu0  ;;  %v11975_v15 = vld [vmem:[%s15662_s3 + $0x42c] ss:$16 sps:$4 sm:$0xff]  }
 0x2cd   : > { %v14178_v38 = vpack.c.bf16 %v3979_v7, %v3971_v2  ;;  %v10643_v6 = vadd.f32 %v3405_v50, %v14069_v39  ;;  %v3791_v57 = vpop.f32.mrb[84].mxu1  ;;  %v3407_v29 = vpop.f32.mrb[85].mxu0 }
 0x2ce   : > { %15744 = vst [vmem:[#allocation29_spill] sm:$0xff] %v14174_v61  ;;  %v10707_v42 = vadd.f32 %v3791_v57, %v14073_v31  ;;  %v10644_v34 = vadd.f32 %v3407_v29, %v14075_v16  ;;  %v3793_v56 = vpop.f32.mrb[85].mxu1  ;;  %v3409_v26 = vpop.f32.mrb[86].mxu0  ;;  %v11946_v57 = vld [vmem:[%s15662_s3 + $0x420] ss:$16 sps:$4 sm:$0xff]  }
 0x2cf   : > { %15745 = vst [vmem:[#allocation30_spill] sm:$0xff] %v14178_v38  ;;  %v10708_v43 = vadd.f32 %v3793_v56, %v14078_v40  ;;  %v10645_v14 = vadd.f32 %v3409_v26, %v14069_v39  ;;  %v3795_v45 = vpop.f32.mrb[86].mxu1  ;;  %v3411_v37 = vpop.f32.mrb[87].mxu0  ;;  %v3984_v22 = vmax.f32 %v10643_v6, 0.0  ;;  %v11973_v56 = vld [vmem:[%s15662_s3 + $0x428] ss:$16 sps:$4 sm:$0xff]  }
 0x2d0   : > { %v10709_v17 = vadd.f32 %v3795_v45, %v14073_v31  ;;  %v10646_v51 = vadd.f32 %v3411_v37, %v14075_v16  ;;  %v3797_v5 = vpop.f32.mrb[87].mxu1  ;;  %v3986_v10 = vmax.f32 %v10707_v42, 0.0  ;;  %v3985_v33 = vmax.f32 %v10644_v34, 0.0  ;;  %v11981_v45 = vld [vmem:[%s15662_s3 + $0x44c] ss:$16 sps:$4 sm:$0xff]  }
 0x2d1   : > { %v3992_v48 = vmax.f32 %v10645_v14, 0.0  ;;  %v10710_v62 = vadd.f32 %v3797_v5, %v14078_v40  ;;  %6324 = vmatmul.mubr.bf16.vlgmr.msra.gmra.mrb[128].mxu0 %v13350_v8  ;;  %v3987_v7 = vmax.f32 %v10708_v43, 0.0 }
 0x2d2   : > { %v3994_v54 = vmax.f32 %v10709_v17, 0.0  ;;  %v3993_v2 = vmax.f32 %v10646_v51, 0.0  ;;  %7096 = vmatmul.mubr.bf16.vlgmr.msra.gmra.mrb[128].mxu1 %v13350_v8  ;;  %6333 = vmatprep.mubr.bf16.mxu0 %v13373_v53  ;;  %v11951_v8 = vld [vmem:[%s15662_s3 + $0x444] ss:$16 sps:$4 sm:$0xff]  }
 0x2d3   : > { %v14203_v50 = vpack.c.bf16 %v3992_v48, %v3984_v22  ;;  %v3995_v6 = vmax.f32 %v10710_v62, 0.0  ;;  %6485 = vmatpush1.bf16.msra.mxu0 %v11943_v36  ;;  %7105 = vmatprep.mubr.bf16.mxu1 %v13373_v53  ;;  %v11949_v48 = vld [vmem:[%s15662_s3 + $0x440] ss:$16 sps:$4 sm:$0xff]  }
 0x2d4   : > { %v14209_v29 = vpack.c.bf16 %v3994_v54, %v3986_v10  ;;  %v14211_v42 = vpack.c.bf16 %v3993_v2, %v3985_v33  ;;  %v3415_v34 = vpop.f32.mrb[88].mxu0  ;;  %6486 = vmatprep.subr.bf16.mxu0 %v11948_v28  ;;  %7257 = vmatpush1.bf16.msra.mxu1 %v11970_v18  ;;  %v11954_v33 = vld [vmem:[%s15662_s3 + $0x464] ss:$16 sps:$4 sm:$0xff]   ;;  %v11979_v54 = vld [vmem:[%s15662_s3 + $0x448] ss:$16 sps:$4 sm:$0xff]  }
 0x2d5   : > { %v14219_v53 = vpack.c.bf16 %v3995_v6, %v3987_v7  ;;  %v10647_v26 = vadd.f32 %v3415_v34, %v14069_v39  ;;  %v3801_v43 = vpop.f32.mrb[88].mxu1  ;;  %v3417_v14 = vpop.f32.mrb[89].mxu0  ;;  %7258 = vmatprep.subr.bf16.mxu1 %v11975_v15 }
 0x2d6   : > { %15746 = vst [vmem:[#allocation31_spill] sm:$0xff] %v14209_v29  ;;  %v10711_v37 = vadd.f32 %v3801_v43, %v14073_v31  ;;  %v10648_v36 = vadd.f32 %v3417_v14, %v14075_v16  ;;  %v3803_v17 = vpop.f32.mrb[89].mxu1  ;;  %v3419_v51 = vpop.f32.mrb[90].mxu0  ;;  %v15766_v29 = vld [vmem:[#allocation16_spill] sm:$0xff] }
 0x2d7   : > { %15747 = vst [vmem:[#allocation32_spill] sm:$0xff] %v14219_v53  ;;  %v10712_v5 = vadd.f32 %v3803_v17, %v14078_v40  ;;  %v10649_v28 = vadd.f32 %v3419_v51, %v14069_v39  ;;  %v3805_v18 = vpop.f32.mrb[90].mxu1  ;;  %v3421_v22 = vpop.f32.mrb[91].mxu0  ;;  %6487 = vmatpush1.bf16.msra.mxu0 %v11946_v57  ;;  %v4000_v2 = vmax.f32 %v10647_v26, 0.0  ;;  %v11984_v57 = vld [vmem:[%s15662_s3 + $0x46c] ss:$16 sps:$4 sm:$0xff]  }
 0x2d8   : > { %v10713_v62 = vadd.f32 %v3805_v18, %v14073_v31  ;;  %v10650_v15 = vadd.f32 %v3421_v22, %v14075_v16  ;;  %v3807_v10 = vpop.f32.mrb[91].mxu1  ;;  %6488 = vmatprep.subr.bf16.mxu0 %v11951_v8  ;;  %7259 = vmatpush1.bf16.msra.mxu1 %v11973_v56  ;;  %v4002_v34 = vmax.f32 %v10711_v37, 0.0  ;;  %v4001_v8 = vmax.f32 %v10648_v36, 0.0 }
 0x2d9   : > { %v4008_v7 = vmax.f32 %v10649_v28, 0.0  ;;  %v10714_v6 = vadd.f32 %v3807_v10, %v14078_v40  ;;  %6334 = vmatmul.mubr.bf16.gmra.mrb[132].mxu0 %v13370_v49  ;;  %7260 = vmatprep.subr.bf16.mxu1 %v11981_v45  ;;  %v4003_v56 = vmax.f32 %v10712_v5, 0.0  ;;  %v11952_v45 = vld [vmem:[%s15662_s3 + $0x460] ss:$16 sps:$4 sm:$0xff]  }
 0x2da   : > { %v4010_v43 = vmax.f32 %v10713_v62, 0.0  ;;  %v4009_v14 = vmax.f32 %v10650_v15, 0.0  ;;  %7106 = vmatmul.mubr.bf16.gmra.mrb[132].mxu1 %v13370_v49  ;;  %6343 = vmatprep.mubr.bf16.mxu0 %v13391_v25  ;;  %v11957_v49 = vld [vmem:[%s15662_s3 + $0x484] ss:$16 sps:$4 sm:$0xff]  }
 0x2db   : > { %v14247_v26 = vpack.c.bf16 %v4008_v7, %v4000_v2  ;;  %v4011_v17 = vmax.f32 %v10714_v6, 0.0  ;;  %7115 = vmatprep.mubr.bf16.mxu1 %v13391_v25  ;;  %6489 = vmatpush1.bf16.msra.mxu0 %v11949_v48  ;;  %v11982_v25 = vld [vmem:[%s15662_s3 + $0x468] ss:$16 sps:$4 sm:$0xff]   ;;  %v11990_v48 = vld [vmem:[%s15662_s3 + $0x48c] ss:$16 sps:$4 sm:$0xff]  }
 0x2dc   : > { %v14253_v51 = vpack.c.bf16 %v4010_v43, %v4002_v34  ;;  %v14255_v37 = vpack.c.bf16 %v4009_v14, %v4001_v8  ;;  %v3425_v36 = vpop.f32.mrb[92].mxu0  ;;  %6490 = vmatprep.subr.bf16.mxu0 %v11954_v33  ;;  %7261 = vmatpush1.bf16.msra.mxu1 %v11979_v54  ;;  %v11960_v14 = vld [vmem:[%s15662_s3 + $0x4a4] ss:$16 sps:$4 sm:$0xff]  }
 0x2dd   : > { %v14263_v5 = vpack.c.bf16 %v4011_v17, %v4003_v56  ;;  %v10651_v28 = vadd.f32 %v3425_v36, %v14069_v39  ;;  %v3811_v18 = vpop.f32.mrb[92].mxu1  ;;  %v3427_v22 = vpop.f32.mrb[93].mxu0  ;;  %7262 = vmatprep.subr.bf16.mxu1 %v11984_v57  ;;  %v11955_v57 = vld [vmem:[%s15662_s3 + $0x480] ss:$16 sps:$4 sm:$0xff]   ;;  %v11988_v56 = vld [vmem:[%s15662_s3 + $0x488] ss:$16 sps:$4 sm:$0xff]  }
 0x2de   : > { %15748 = vst [vmem:[#allocation33_spill] sm:$0xff] %v14253_v51  ;;  %v10715_v62 = vadd.f32 %v3811_v18, %v14073_v31  ;;  %v10652_v15 = vadd.f32 %v3427_v22, %v14075_v16  ;;  %v3813_v10 = vpop.f32.mrb[93].mxu1  ;;  %v3429_v33 = vpop.f32.mrb[94].mxu0 }
 0x2df   : > { %15749 = vst [vmem:[#allocation34_spill] sm:$0xff] %v14263_v5  ;;  %v10716_v54 = vadd.f32 %v3813_v10, %v14078_v40  ;;  %v10653_v2 = vadd.f32 %v3429_v33, %v14069_v39  ;;  %v3815_v7 = vpop.f32.mrb[94].mxu1  ;;  %v3431_v6 = vpop.f32.mrb[95].mxu0  ;;  %6491 = vmatpush1.bf16.msra.mxu0 %v11952_v45  ;;  %v4016_v17 = vmax.f32 %v10651_v28, 0.0 }
 0x2e0   : > { %v10717_v34 = vadd.f32 %v3815_v7, %v14073_v31  ;;  %v10654_v8 = vadd.f32 %v3431_v6, %v14075_v16  ;;  %v3817_v43 = vpop.f32.mrb[95].mxu1  ;;  %6492 = vmatprep.subr.bf16.mxu0 %v11957_v49  ;;  %7263 = vmatpush1.bf16.msra.mxu1 %v11982_v25  ;;  %v11993_v49 = vld [vmem:[%s15662_s3 + $0x4ac] ss:$16 sps:$4 sm:$0xff]   ;;  %v4018_v18 = vmax.f32 %v10715_v62, 0.0  ;;  %v4017_v22 = vmax.f32 %v10652_v15, 0.0 }
 0x2e1   : > { %v4024_v45 = vmax.f32 %v10653_v2, 0.0  ;;  %v10718_v36 = vadd.f32 %v3817_v43, %v14078_v40  ;;  %6344 = vmatmul.mubr.bf16.gmra.mrb[136].mxu0 %v13388_v19  ;;  %7264 = vmatprep.subr.bf16.mxu1 %v11990_v48  ;;  %v4019_v25 = vmax.f32 %v10716_v54, 0.0  ;;  %v11958_v48 = vld [vmem:[%s15662_s3 + $0x4a0] ss:$16 sps:$4 sm:$0xff]  }
 0x2e2   : > { %v4026_v10 = vmax.f32 %v10717_v34, 0.0  ;;  %v4025_v33 = vmax.f32 %v10654_v8, 0.0  ;;  %7116 = vmatmul.mubr.bf16.gmra.mrb[136].mxu1 %v13388_v19  ;;  %6353 = vmatprep.mubr.bf16.mxu0 %v13409_v23  ;;  %v11963_v19 = vld [vmem:[%s15662_s3 + $0x4c4] ss:$16 sps:$4 sm:$0xff]   ;;  %v11999_v8 = vld [vmem:[%s15662_s3 + $0x4cc] ss:$16 sps:$4 sm:$0xff]  }
 0x2e3   : > { %v14291_v28 = vpack.c.bf16 %v4024_v45, %v4016_v17  ;;  %v4027_v2 = vmax.f32 %v10718_v36, 0.0  ;;  %7125 = vmatprep.mubr.bf16.mxu1 %v13409_v23  ;;  %6493 = vmatpush1.bf16.msra.mxu0 %v11955_v57  ;;  %v11991_v23 = vld [vmem:[%s15662_s3 + $0x4a8] ss:$16 sps:$4 sm:$0xff]  }
 0x2e4   : > { %v14297_v7 = vpack.c.bf16 %v4026_v10, %v4018_v18  ;;  %v14299_v62 = vpack.c.bf16 %v4025_v33, %v4017_v22  ;;  %v3435_v15 = vpop.f32.mrb[96].mxu0  ;;  %6494 = vmatprep.subr.bf16.mxu0 %v11960_v14  ;;  %7265 = vmatpush1.bf16.msra.mxu1 %v11988_v56 }
 0x2e5   : > { %v14307_v54 = vpack.c.bf16 %v4027_v2, %v4019_v25  ;;  %v10655_v6 = vadd.f32 %v3435_v15, %v14069_v39  ;;  %v3821_v57 = vpop.f32.mrb[96].mxu1  ;;  %v3437_v34 = vpop.f32.mrb[97].mxu0  ;;  %7266 = vmatprep.subr.bf16.mxu1 %v11993_v49  ;;  %v11961_v49 = vld [vmem:[%s15662_s3 + $0x4c0] ss:$16 sps:$4 sm:$0xff]   ;;  %v11966_v2 = vld [vmem:[%s15662_s3 + $0x4e4] ss:$16 sps:$4 sm:$0xff]  }
 0x2e6   : > { %15750 = vst [vmem:[#allocation35_spill] sm:$0xff] %v14297_v7  ;;  %v10719_v43 = vadd.f32 %v3821_v57, %v14073_v31  ;;  %v10656_v14 = vadd.f32 %v3437_v34, %v14075_v16  ;;  %v3823_v56 = vpop.f32.mrb[97].mxu1  ;;  %v3439_v17 = vpop.f32.mrb[98].mxu0  ;;  %v11997_v15 = vld [vmem:[%s15662_s3 + $0x4c8] ss:$16 sps:$4 sm:$0xff]  }
 0x2e7   : > { %15751 = vst [vmem:[#allocation36_spill] sm:$0xff] %v14307_v54  ;;  %v10720_v45 = vadd.f32 %v3823_v56, %v14078_v40  ;;  %v10657_v36 = vadd.f32 %v3439_v17, %v14069_v39  ;;  %v3825_v18 = vpop.f32.mrb[98].mxu1  ;;  %v3441_v22 = vpop.f32.mrb[99].mxu0  ;;  %6495 = vmatpush1.bf16.msra.mxu0 %v11958_v48  ;;  %v4032_v48 = vmax.f32 %v10655_v6, 0.0 }
 0x2e8   : > { %v10721_v10 = vadd.f32 %v3825_v18, %v14073_v31  ;;  %v10658_v33 = vadd.f32 %v3441_v22, %v14075_v16  ;;  %v3827_v25 = vpop.f32.mrb[99].mxu1  ;;  %6496 = vmatprep.subr.bf16.mxu0 %v11963_v19  ;;  %7267 = vmatpush1.bf16.msra.mxu1 %v11991_v23  ;;  %v12002_v19 = vld [vmem:[%s15662_s3 + $0x4ec] ss:$16 sps:$4 sm:$0xff]   ;;  %v4034_v56 = vmax.f32 %v10719_v43, 0.0  ;;  %v4033_v17 = vmax.f32 %v10656_v14, 0.0 }
 0x2e9   : > { %v4040_v57 = vmax.f32 %v10657_v36, 0.0  ;;  %v10722_v34 = vadd.f32 %v3827_v25, %v14078_v40  ;;  %6354 = vmatmul.mubr.bf16.gmra.mrb[140].mxu0 %v13406_v1  ;;  %7268 = vmatprep.subr.bf16.mxu1 %v11999_v8  ;;  %v4035_v23 = vmax.f32 %v10720_v45, 0.0  ;;  %v11964_v8 = vld [vmem:[%s15662_s3 + $0x4e0] ss:$16 sps:$4 sm:$0xff]  }
 0x2ea   : > { %v4042_v18 = vmax.f32 %v10721_v10, 0.0  ;;  %v4041_v22 = vmax.f32 %v10658_v33, 0.0  ;;  %7126 = vmatmul.mubr.bf16.gmra.mrb[140].mxu1 %v13406_v1  ;;  %6363 = vmatprep.mubr.bf16.mxu0 %v13427_v52  ;;  %v11969_v1 = vld [vmem:[%s15662_s3 + $0x504] ss:$16 sps:$4 sm:$0xff]  }
 0x2eb   : > { %v14335_v6 = vpack.c.bf16 %v4040_v57, %v4032_v48  ;;  %v4043_v36 = vmax.f32 %v10722_v34, 0.0  ;;  %7135 = vmatprep.mubr.bf16.mxu1 %v13427_v52  ;;  %6497 = vmatpush1.bf16.msra.mxu0 %v11961_v49  ;;  %v12000_v52 = vld [vmem:[%s15662_s3 + $0x4e8] ss:$16 sps:$4 sm:$0xff]  }
 0x2ec   : > { %v14341_v25 = vpack.c.bf16 %v4042_v18, %v4034_v56  ;;  %v14343_v43 = vpack.c.bf16 %v4041_v22, %v4033_v17  ;;  %v3445_v14 = vpop.f32.mrb[100].mxu0  ;;  %6498 = vmatprep.subr.bf16.mxu0 %v11966_v2  ;;  %7269 = vmatpush1.bf16.msra.mxu1 %v11997_v15  ;;  %v12008_v2 = vld [vmem:[%s15662_s3 + $0x50c] ss:$16 sps:$4 sm:$0xff]  }
 0x2ed   : > { %v14351_v45 = vpack.c.bf16 %v4043_v36, %v4035_v23  ;;  %v10659_v49 = vadd.f32 %v3445_v14, %v14069_v39  ;;  %v3831_v10 = vpop.f32.mrb[100].mxu1  ;;  %v3447_v33 = vpop.f32.mrb[101].mxu0  ;;  %7270 = vmatprep.subr.bf16.mxu1 %v12002_v19  ;;  %v11967_v19 = vld [vmem:[%s15662_s3 + $0x500] ss:$16 sps:$4 sm:$0xff]  }
 0x2ee   : > { %15752 = vst [vmem:[#allocation37_spill] sm:$0xff] %v14341_v25  ;;  %v10723_v48 = vadd.f32 %v3831_v10, %v14073_v31  ;;  %v10660_v57 = vadd.f32 %v3447_v33, %v14075_v16  ;;  %v3833_v15 = vpop.f32.mrb[101].mxu1  ;;  %v3449_v34 = vpop.f32.mrb[102].mxu0  ;;  %v11978_v10 = vld [vmem:[%s15662_s3 + $0x524] ss:$16 sps:$4 sm:$0xff]  }
 0x2ef   : > { %15753 = vst [vmem:[#allocation38_spill] sm:$0xff] %v14351_v45  ;;  %v10724_v56 = vadd.f32 %v3833_v15, %v14078_v40  ;;  %v10661_v17 = vadd.f32 %v3449_v34, %v14069_v39  ;;  %v3835_v18 = vpop.f32.mrb[102].mxu1  ;;  %v3451_v22 = vpop.f32.mrb[103].mxu0  ;;  %6499 = vmatpush1.bf16.msra.mxu0 %v11964_v8  ;;  %v12006_v33 = vld [vmem:[%s15662_s3 + $0x508] ss:$16 sps:$4 sm:$0xff]   ;;  %v4048_v8 = vmax.f32 %v10659_v49, 0.0 }
 0x2f0   : > { %v10725_v23 = vadd.f32 %v3835_v18, %v14073_v31  ;;  %v10662_v36 = vadd.f32 %v3451_v22, %v14075_v16  ;;  %v3837_v14 = vpop.f32.mrb[103].mxu1  ;;  %6500 = vmatprep.subr.bf16.mxu0 %v11969_v1  ;;  %7271 = vmatpush1.bf16.msra.mxu1 %v12000_v52  ;;  %v12011_v1 = vld [vmem:[%s15662_s3 + $0x52c] ss:$16 sps:$4 sm:$0xff]   ;;  %v4050_v18 = vmax.f32 %v10723_v48, 0.0  ;;  %v4049_v22 = vmax.f32 %v10660_v57, 0.0  ;;  %v15754_v52 = vld [vmem:[#allocation10_spill] sm:$0xff] }
 0x2f1   : > { %v4056_v15 = vmax.f32 %v10661_v17, 0.0  ;;  %v10726_v34 = vadd.f32 %v3837_v14, %v14078_v40  ;;  %6364 = vmatmul.mubr.bf16.gmra.mrb[144].mxu0 %v13424_v46  ;;  %7272 = vmatprep.subr.bf16.mxu1 %v12008_v2  ;;  %v4051_v45 = vmax.f32 %v10724_v56, 0.0  ;;  %v11976_v2 = vld [vmem:[%s15662_s3 + $0x520] ss:$16 sps:$4 sm:$0xff]   ;;  %v12009_v56 = vld [vmem:[%s15662_s3 + $0x528] ss:$16 sps:$4 sm:$0xff]  }
 0x2f2   : > { %v4058_v59 = vmax.f32 %v10725_v23, 0.0  ;;  %v4057_v25 = vmax.f32 %v10662_v36, 0.0  ;;  %7136 = vmatmul.mubr.bf16.gmra.mrb[144].mxu1 %v13424_v46  ;;  %6373 = vmatprep.mubr.bf16.mxu0 %v15754_v52  ;;  %v11987_v46 = vld [vmem:[%s15662_s3 + $0x544] ss:$16 sps:$4 sm:$0xff]  }
 0x2f3   : > { %v14379_v49 = vpack.c.bf16 %v4056_v15, %v4048_v8  ;;  %v4059_v17 = vmax.f32 %v10726_v34, 0.0  ;;  %7145 = vmatprep.mubr.bf16.mxu1 %v15754_v52  ;;  %6501 = vmatpush1.bf16.msra.mxu0 %v11967_v19 }
 0x2f4   : > { %v14385_v14 = vpack.c.bf16 %v4058_v59, %v4050_v18  ;;  %v14387_v48 = vpack.c.bf16 %v4057_v25, %v4049_v22  ;;  %v3455_v57 = vpop.f32.mrb[104].mxu0  ;;  %6502 = vmatprep.subr.bf16.mxu0 %v11978_v10  ;;  %7273 = vmatpush1.bf16.msra.mxu1 %v12006_v33  ;;  %v12017_v25 = vld [vmem:[%s15662_s3 + $0x54c] ss:$16 sps:$4 sm:$0xff]  }
 0x2f5   : > { %v14395_v19 = vpack.c.bf16 %v4059_v17, %v4051_v45  ;;  %v10663_v23 = vadd.f32 %v3455_v57, %v14069_v39  ;;  %v3841_v36 = vpop.f32.mrb[104].mxu1  ;;  %v3457_v59 = vpop.f32.mrb[105].mxu0  ;;  %7274 = vmatprep.subr.bf16.mxu1 %v12011_v1  ;;  %v11985_v1 = vld [vmem:[%s15662_s3 + $0x540] ss:$16 sps:$4 sm:$0xff]  }
 0x2f6   : > { %15755 = vst [vmem:[#allocation10_spill] sm:$0xff] %v14385_v14  ;;  %v10727_v10 = vadd.f32 %v3841_v36, %v14073_v31  ;;  %v10664_v8 = vadd.f32 %v3457_v59, %v14075_v16  ;;  %v3843_v33 = vpop.f32.mrb[105].mxu1  ;;  %v3459_v15 = vpop.f32.mrb[106].mxu0  ;;  %v11996_v36 = vld [vmem:[%s15662_s3 + $0x564] ss:$16 sps:$4 sm:$0xff]   ;;  %v15757_v14 = vld [vmem:[#allocation9_spill] sm:$0xff] }
 0x2f7   : > { %15756 = vst [vmem:[#allocation39_spill] sm:$0xff] %v14395_v19  ;;  %v10728_v34 = vadd.f32 %v3843_v33, %v14078_v40  ;;  %v10665_v45 = vadd.f32 %v3459_v15, %v14069_v39  ;;  %v3845_v18 = vpop.f32.mrb[106].mxu1  ;;  %v3461_v22 = vpop.f32.mrb[107].mxu0  ;;  %6503 = vmatpush1.bf16.msra.mxu0 %v11976_v2  ;;  %v12015_v59 = vld [vmem:[%s15662_s3 + $0x548] ss:$16 sps:$4 sm:$0xff]   ;;  %v4064_v2 = vmax.f32 %v10663_v23, 0.0 }
 0x2f8   : > { %v10729_v52 = vadd.f32 %v3845_v18, %v14073_v31  ;;  %v10666_v17 = vadd.f32 %v3461_v22, %v14075_v16  ;;  %v3847_v57 = vpop.f32.mrb[107].mxu1  ;;  %6504 = vmatprep.subr.bf16.mxu0 %v11987_v46  ;;  %7275 = vmatpush1.bf16.msra.mxu1 %v12009_v56  ;;  %v12020_v46 = vld [vmem:[%s15662_s3 + $0x56c] ss:$16 sps:$4 sm:$0xff]   ;;  %v4066_v18 = vmax.f32 %v10727_v10, 0.0  ;;  %v4065_v22 = vmax.f32 %v10664_v8, 0.0  ;;  %v15758_v56 = vld [vmem:[#allocation12_spill] sm:$0xff] }
 0x2f9   : > { %v4072_v33 = vmax.f32 %v10665_v45, 0.0  ;;  %v10730_v15 = vadd.f32 %v3847_v57, %v14078_v40  ;;  %6374 = vmatmul.mubr.bf16.gmra.mrb[148].mxu0 %v15757_v14  ;;  %7276 = vmatprep.subr.bf16.mxu1 %v12017_v25  ;;  %v4067_v54 = vmax.f32 %v10728_v34, 0.0  ;;  %v11994_v25 = vld [vmem:[%s15662_s3 + $0x560] ss:$16 sps:$4 sm:$0xff]   ;;  %v12018_v34 = vld [vmem:[%s15662_s3 + $0x568] ss:$16 sps:$4 sm:$0xff]  }
 0x2fa   : > { %v4074_v19 = vmax.f32 %v10729_v52, 0.0  ;;  %v4073_v7 = vmax.f32 %v10666_v17, 0.0  ;;  %7146 = vmatmul.mubr.bf16.gmra.mrb[148].mxu1 %v15757_v14  ;;  %6383 = vmatprep.mubr.bf16.mxu0 %v15758_v56  ;;  %v12005_v14 = vld [vmem:[%s15662_s3 + $0x584] ss:$16 sps:$4 sm:$0xff]  }
 0x2fb   : > { %v14423_v23 = vpack.c.bf16 %v4072_v33, %v4064_v2  ;;  %v4075_v45 = vmax.f32 %v10730_v15, 0.0  ;;  %7155 = vmatprep.mubr.bf16.mxu1 %v15758_v56  ;;  %6505 = vmatpush1.bf16.msra.mxu0 %v11985_v1 }
 0x2fc   : > { %v14429_v57 = vpack.c.bf16 %v4074_v19, %v4066_v18  ;;  %v14431_v10 = vpack.c.bf16 %v4073_v7, %v4065_v22  ;;  %v3465_v8 = vpop.f32.mrb[108].mxu0  ;;  %6506 = vmatprep.subr.bf16.mxu0 %v11996_v36  ;;  %7277 = vmatpush1.bf16.msra.mxu1 %v12015_v59  ;;  %v12026_v7 = vld [vmem:[%s15662_s3 + $0x58c] ss:$16 sps:$4 sm:$0xff]  }
 0x2fd   : > { %v14439_v1 = vpack.c.bf16 %v4075_v45, %v4067_v54  ;;  %v10667_v52 = vadd.f32 %v3465_v8, %v14069_v39  ;;  %v3851_v17 = vpop.f32.mrb[108].mxu1  ;;  %v3467_v19 = vpop.f32.mrb[109].mxu0  ;;  %7278 = vmatprep.subr.bf16.mxu1 %v12020_v46  ;;  %v12003_v46 = vld [vmem:[%s15662_s3 + $0x580] ss:$16 sps:$4 sm:$0xff]  }
 0x2fe   : > { %15759 = vst [vmem:[#allocation9_spill] sm:$0xff] %v14429_v57  ;;  %v10731_v36 = vadd.f32 %v3851_v17, %v14073_v31  ;;  %v10668_v2 = vadd.f32 %v3467_v19, %v14075_v16  ;;  %v3853_v59 = vpop.f32.mrb[109].mxu1  ;;  %v3469_v33 = vpop.f32.mrb[110].mxu0  ;;  %v12014_v17 = vld [vmem:[%s15662_s3 + $0x5a4] ss:$16 sps:$4 sm:$0xff]   ;;  %v15761_v57 = vld [vmem:[#allocation11_spill] sm:$0xff] }
 0x2ff   : > { %15760 = vst [vmem:[#allocation12_spill] sm:$0xff] %v14439_v1  ;;  %v10732_v15 = vadd.f32 %v3853_v59, %v14078_v40  ;;  %v10669_v54 = vadd.f32 %v3469_v33, %v14069_v39  ;;  %v3855_v18 = vpop.f32.mrb[110].mxu1  ;;  %v3471_v22 = vpop.f32.mrb[111].mxu0  ;;  %6507 = vmatpush1.bf16.msra.mxu0 %v11994_v25  ;;  %v12024_v19 = vld [vmem:[%s15662_s3 + $0x588] ss:$16 sps:$4 sm:$0xff]   ;;  %v4080_v25 = vmax.f32 %v10667_v52, 0.0 }
 0x300   : > { %v10733_v56 = vadd.f32 %v3855_v18, %v14073_v31  ;;  %v10670_v45 = vadd.f32 %v3471_v22, %v14075_v16  ;;  %v3857_v8 = vpop.f32.mrb[111].mxu1  ;;  %6508 = vmatprep.subr.bf16.mxu0 %v12005_v14  ;;  %7279 = vmatpush1.bf16.msra.mxu1 %v12018_v34  ;;  %v12029_v14 = vld [vmem:[%s15662_s3 + $0x5ac] ss:$16 sps:$4 sm:$0xff]   ;;  %v4082_v18 = vmax.f32 %v10731_v36, 0.0  ;;  %v4081_v22 = vmax.f32 %v10668_v2, 0.0  ;;  %v15762_v34 = vld [vmem:[#allocation14_spill] sm:$0xff] }
 0x301   : > { %v4088_v59 = vmax.f32 %v10669_v54, 0.0  ;;  %v10734_v33 = vadd.f32 %v3857_v8, %v14078_v40  ;;  %6384 = vmatmul.mubr.bf16.gmra.mrb[152].mxu0 %v15761_v57  ;;  %7280 = vmatprep.subr.bf16.mxu1 %v12026_v7  ;;  %v4083_v5 = vmax.f32 %v10732_v15, 0.0  ;;  %v12012_v7 = vld [vmem:[%s15662_s3 + $0x5a0] ss:$16 sps:$4 sm:$0xff]   ;;  %v12027_v15 = vld [vmem:[%s15662_s3 + $0x5a8] ss:$16 sps:$4 sm:$0xff]  }
 0x302   : > { %v4090_v1 = vmax.f32 %v10733_v56, 0.0  ;;  %v4089_v51 = vmax.f32 %v10670_v45, 0.0  ;;  %7156 = vmatmul.mubr.bf16.gmra.mrb[152].mxu1 %v15761_v57  ;;  %6393 = vmatprep.mubr.bf16.mxu0 %v15762_v34  ;;  %v12023_v57 = vld [vmem:[%s15662_s3 + $0x5c4] ss:$16 sps:$4 sm:$0xff]  }
 0x303   : > { %v14467_v52 = vpack.c.bf16 %v4088_v59, %v4080_v25  ;;  %v4091_v54 = vmax.f32 %v10734_v33, 0.0  ;;  %7165 = vmatprep.mubr.bf16.mxu1 %v15762_v34  ;;  %6509 = vmatpush1.bf16.msra.mxu0 %v12003_v46 }
 0x304   : > { %v14473_v8 = vpack.c.bf16 %v4090_v1, %v4082_v18  ;;  %v14475_v36 = vpack.c.bf16 %v4089_v51, %v4081_v22  ;;  %v3475_v2 = vpop.f32.mrb[112].mxu0  ;;  %6510 = vmatprep.subr.bf16.mxu0 %v12014_v17  ;;  %7281 = vmatpush1.bf16.msra.mxu1 %v12024_v19  ;;  %v12035_v51 = vld [vmem:[%s15662_s3 + $0x5cc] ss:$16 sps:$4 sm:$0xff]  }
 0x305   : > { %v14483_v46 = vpack.c.bf16 %v4091_v54, %v4083_v5  ;;  %v10671_v56 = vadd.f32 %v3475_v2, %v14069_v39  ;;  %v3861_v45 = vpop.f32.mrb[112].mxu1  ;;  %v3477_v1 = vpop.f32.mrb[113].mxu0  ;;  %7282 = vmatprep.subr.bf16.mxu1 %v12029_v14  ;;  %v12021_v14 = vld [vmem:[%s15662_s3 + $0x5c0] ss:$16 sps:$4 sm:$0xff]  }
 0x306   : > { %15763 = vst [vmem:[#allocation11_spill] sm:$0xff] %v14473_v8  ;;  %v10735_v17 = vadd.f32 %v3861_v45, %v14073_v31  ;;  %v10672_v25 = vadd.f32 %v3477_v1, %v14075_v16  ;;  %v3863_v19 = vpop.f32.mrb[113].mxu1  ;;  %v3479_v59 = vpop.f32.mrb[114].mxu0  ;;  %v12032_v45 = vld [vmem:[%s15662_s3 + $0x5e4] ss:$16 sps:$4 sm:$0xff]   ;;  %v15765_v8 = vld [vmem:[#allocation13_spill] sm:$0xff] }
 0x307   : > { %15764 = vst [vmem:[#allocation14_spill] sm:$0xff] %v14483_v46  ;;  %v10736_v33 = vadd.f32 %v3863_v19, %v14078_v40  ;;  %v10673_v5 = vadd.f32 %v3479_v59, %v14069_v39  ;;  %v3865_v18 = vpop.f32.mrb[114].mxu1  ;;  %v3481_v22 = vpop.f32.mrb[115].mxu0  ;;  %6511 = vmatpush1.bf16.msra.mxu0 %v12012_v7  ;;  %v12033_v1 = vld [vmem:[%s15662_s3 + $0x5c8] ss:$16 sps:$4 sm:$0xff]   ;;  %v4096_v7 = vmax.f32 %v10671_v56, 0.0 }
 0x308   : > { %v10737_v34 = vadd.f32 %v3865_v18, %v14073_v31  ;;  %v10674_v54 = vadd.f32 %v3481_v22, %v14075_v16  ;;  %v3867_v2 = vpop.f32.mrb[115].mxu1  ;;  %6512 = vmatprep.subr.bf16.mxu0 %v12023_v57  ;;  %7283 = vmatpush1.bf16.msra.mxu1 %v12027_v15  ;;  %v12038_v57 = vld [vmem:[%s15662_s3 + $0x5ec] ss:$16 sps:$4 sm:$0xff]   ;;  %v4098_v15 = vmax.f32 %v10735_v17, 0.0  ;;  %v4097_v18 = vmax.f32 %v10672_v25, 0.0 }
 0x309   : > { %v4104_v19 = vmax.f32 %v10673_v5, 0.0  ;;  %v10738_v59 = vadd.f32 %v3867_v2, %v14078_v40  ;;  %6394 = vmatmul.mubr.bf16.gmra.mrb[156].mxu0 %v15765_v8  ;;  %7284 = vmatprep.subr.bf16.mxu1 %v12035_v51  ;;  %v4099_v53 = vmax.f32 %v10736_v33, 0.0  ;;  %v12030_v51 = vld [vmem:[%s15662_s3 + $0x5e0] ss:$16 sps:$4 sm:$0xff]  }
 0x30a   : > { %v4106_v22 = vmax.f32 %v10737_v34, 0.0  ;;  %v4105_v46 = vmax.f32 %v10674_v54, 0.0  ;;  %7166 = vmatmul.mubr.bf16.gmra.mrb[156].mxu1 %v15765_v8  ;;  %6403 = vmatprep.mubr.bf16.mxu0 %v15766_v29  ;;  %v12036_v8 = vld [vmem:[%s15662_s3 + $0x5e8] ss:$16 sps:$4 sm:$0xff]  }
 0x30b   : > { %v14511_v56 = vpack.c.bf16 %v4104_v19, %v4096_v7  ;;  %v4107_v5 = vmax.f32 %v10738_v59, 0.0  ;;  %7175 = vmatprep.mubr.bf16.mxu1 %v15766_v29  ;;  %6513 = vmatpush1.bf16.msra.mxu0 %v12021_v14  ;;  %v12041_v29 = vld [vmem:[%s15662_s3 + $0x604] ss:$16 sps:$4 sm:$0xff]  }
 0x30c   : > { %v14517_v2 = vpack.c.bf16 %v4106_v22, %v4098_v15  ;;  %v14519_v17 = vpack.c.bf16 %v4105_v46, %v4097_v18  ;;  %v3485_v25 = vpop.f32.mrb[116].mxu0  ;;  %6514 = vmatprep.subr.bf16.mxu0 %v12032_v45  ;;  %7285 = vmatpush1.bf16.msra.mxu1 %v12033_v1 }
 0x30d   : > { %v14527_v33 = vpack.c.bf16 %v4107_v5, %v4099_v53  ;;  %v10675_v14 = vadd.f32 %v3485_v25, %v14069_v39  ;;  %v3871_v34 = vpop.f32.mrb[116].mxu1  ;;  %v3487_v54 = vpop.f32.mrb[117].mxu0  ;;  %7286 = vmatprep.subr.bf16.mxu1 %v12038_v57  ;;  %v12068_v57 = vld [vmem:[%s15662_s3 + $0x60c] ss:$16 sps:$4 sm:$0xff]  }
 0x30e   : > { %15767 = vst [vmem:[#allocation13_spill] sm:$0xff] %v14517_v2  ;;  %v10739_v46 = vadd.f32 %v3871_v34, %v14073_v31  ;;  %v10676_v45 = vadd.f32 %v3487_v54, %v14075_v16  ;;  %v3873_v1 = vpop.f32.mrb[117].mxu1  ;;  %v3489_v7 = vpop.f32.mrb[118].mxu0 }
 0x30f   : > { %15768 = vst [vmem:[#allocation16_spill] sm:$0xff] %v14527_v33  ;;  %v10740_v19 = vadd.f32 %v3873_v1, %v14078_v40  ;;  %v10677_v59 = vadd.f32 %v3489_v7, %v14069_v39  ;;  %v3875_v15 = vpop.f32.mrb[118].mxu1  ;;  %v3491_v18 = vpop.f32.mrb[119].mxu0  ;;  %6515 = vmatpush1.bf16.msra.mxu0 %v12030_v51  ;;  %v4112_v25 = vmax.f32 %v10675_v14, 0.0  ;;  %v15769_v1 = vld [vmem:[#allocation15_spill] sm:$0xff] }
 0x310   : > { %v10741_v53 = vadd.f32 %v3875_v15, %v14073_v31  ;;  %v10678_v22 = vadd.f32 %v3491_v18, %v14075_v16  ;;  %v3877_v5 = vpop.f32.mrb[119].mxu1  ;;  %7287 = vmatpush1.bf16.msra.mxu1 %v12036_v8  ;;  %6677 = vmatprep.subr.bf16.mxu0 %v12041_v29  ;;  %v4114_v7 = vmax.f32 %v10739_v46, 0.0  ;;  %v4113_v2 = vmax.f32 %v10676_v45, 0.0  ;;  %v15770_v15 = vld [vmem:[#allocation18_spill] sm:$0xff] }
 0x311   : > { %v4120_v34 = vmax.f32 %v10677_v59, 0.0  ;;  %v10742_v54 = vadd.f32 %v3877_v5, %v14078_v40  ;;  %6404 = vmatmul.mubr.bf16.gmra.mrb[160].mxu0 %v15769_v1  ;;  %v4115_v8 = vmax.f32 %v10740_v19, 0.0  ;;  %7449 = vmatprep.subr.bf16.mxu1 %v12068_v57 }
 0x312   : > { %v4122_v51 = vmax.f32 %v10741_v53, 0.0  ;;  %v4121_v33 = vmax.f32 %v10678_v22, 0.0  ;;  %7176 = vmatmul.mubr.bf16.gmra.mrb[160].mxu1 %v15769_v1  ;;  %6413 = vmatprep.mubr.bf16.mxu0 %v15770_v15 }
 0x313   : > { %v14543_v29 = vpack.c.bf16 %v4120_v34, %v4112_v25  ;;  %v4123_v18 = vmax.f32 %v10742_v54, 0.0  ;;  %7185 = vmatprep.mubr.bf16.mxu1 %v15770_v15 }
 0x314   : > { %v14546_v14 = vpack.c.bf16 %v4122_v51, %v4114_v7  ;;  %v14548_v59 = vpack.c.bf16 %v4121_v33, %v4113_v2  ;;  %v3495_v5 = vpop.f32.mrb[120].mxu0 }
 0x315   : > { %v14550_v46 = vpack.c.bf16 %v4123_v18, %v4115_v8  ;;  %v10679_v45 = vadd.f32 %v3495_v5, %v14069_v39  ;;  %v3881_v53 = vpop.f32.mrb[120].mxu1  ;;  %v3497_v22 = vpop.f32.mrb[121].mxu0 }
 0x316   : > { %15771 = vst [vmem:[#allocation15_spill] sm:$0xff] %v14546_v14  ;;  %v10743_v1 = vadd.f32 %v3881_v53, %v14073_v31  ;;  %v10680_v19 = vadd.f32 %v3497_v22, %v14075_v16  ;;  %v3883_v25 = vpop.f32.mrb[121].mxu1  ;;  %v3499_v34 = vpop.f32.mrb[122].mxu0  ;;  %v15773_v53 = vld [vmem:[#allocation17_spill] sm:$0xff] }
 0x317   : > { %15772 = vst [vmem:[#allocation18_spill] sm:$0xff] %v14550_v46  ;;  %v10744_v54 = vadd.f32 %v3883_v25, %v14078_v40  ;;  %v10681_v57 = vadd.f32 %v3499_v34, %v14069_v39  ;;  %v3885_v7 = vpop.f32.mrb[122].mxu1  ;;  %v3501_v2 = vpop.f32.mrb[123].mxu0  ;;  %v4128_v8 = vmax.f32 %v10679_v45, 0.0  ;;  %v15774_v25 = vld [vmem:[#allocation20_spill] sm:$0xff] }
 0x318   : > { %v10745_v33 = vadd.f32 %v3885_v7, %v14073_v31  ;;  %v10682_v51 = vadd.f32 %v3501_v2, %v14075_v16  ;;  %v3887_v15 = vpop.f32.mrb[123].mxu1  ;;  %v4130_v22 = vmax.f32 %v10743_v1, 0.0  ;;  %v4129_v14 = vmax.f32 %v10680_v19, 0.0 }
 0x319   : > { %v4136_v18 = vmax.f32 %v10681_v57, 0.0  ;;  %v10746_v5 = vadd.f32 %v3887_v15, %v14078_v40  ;;  %6414 = vmatmul.mubr.bf16.gmra.mrb[164].mxu0 %v15773_v53  ;;  %v4131_v34 = vmax.f32 %v10744_v54, 0.0 }
 0x31a   : > { %v4138_v46 = vmax.f32 %v10745_v33, 0.0  ;;  %v4137_v61 = vmax.f32 %v10682_v51, 0.0  ;;  %7186 = vmatmul.mubr.bf16.gmra.mrb[164].mxu1 %v15773_v53  ;;  %6423 = vmatprep.mubr.bf16.mxu0 %v15774_v25 }
 0x31b   : > { %v14563_v38 = vpack.c.bf16 %v4136_v18, %v4128_v8  ;;  %v4139_v7 = vmax.f32 %v10746_v5, 0.0  ;;  %7195 = vmatprep.mubr.bf16.mxu1 %v15774_v25 }
 0x31c   : > { %v14566_v45 = vpack.c.bf16 %v4138_v46, %v4130_v22  ;;  %v14568_v57 = vpack.c.bf16 %v4137_v61, %v4129_v14  ;;  %v3505_v2 = vpop.f32.mrb[124].mxu0 }
 0x31d   : > { %v14570_v15 = vpack.c.bf16 %v4139_v7, %v4131_v34  ;;  %v10683_v1 = vadd.f32 %v3505_v2, %v14069_v39  ;;  %v3891_v19 = vpop.f32.mrb[124].mxu1  ;;  %v3507_v33 = vpop.f32.mrb[125].mxu0 }
 0x31e   : > { %15775 = vst [vmem:[#allocation17_spill] sm:$0xff] %v14566_v45  ;;  %v10747_v51 = vadd.f32 %v3891_v19, %v14073_v31  ;;  %v10684_v54 = vadd.f32 %v3507_v33, %v14075_v16  ;;  %v3893_v8 = vpop.f32.mrb[125].mxu1  ;;  %v3509_v18 = vpop.f32.mrb[126].mxu0  ;;  %v15777_v19 = vld [vmem:[#allocation19_spill] sm:$0xff] }
 0x31f   : > { %15776 = vst [vmem:[#allocation20_spill] sm:$0xff] %v14570_v15  ;;  %v10748_v5 = vadd.f32 %v3893_v8, %v14078_v40  ;;  %v10685_v46 = vadd.f32 %v3509_v18, %v14069_v39  ;;  %v3895_v53 = vpop.f32.mrb[126].mxu1  ;;  %v3511_v61 = vpop.f32.mrb[127].mxu0  ;;  %v4144_v34 = vmax.f32 %v10683_v1, 0.0  ;;  %v15778_v39 = vld [vmem:[#allocation22_spill] sm:$0xff] }
 0x320   : > { %v10749_v14 = vadd.f32 %v3895_v53, %v14073_v31  ;;  %v10686_v22 = vadd.f32 %v3511_v61, %v14075_v16  ;;  %v3897_v25 = vpop.f32.mrb[127].mxu1  ;;  %v4146_v33 = vmax.f32 %v10747_v51, 0.0  ;;  %v4145_v45 = vmax.f32 %v10684_v54, 0.0  ;;  %v15779_v51 = vld [vmem:[#allocation21_spill] sm:$0xff]  ;;  %v15780_v54 = vld [vmem:[#allocation24_spill] sm:$0xff] }
 0x321   : > { %v4152_v7 = vmax.f32 %v10685_v46, 0.0  ;;  %v10750_v2 = vadd.f32 %v3897_v25, %v14078_v40  ;;  %6424 = vmatmul.mubr.bf16.gmra.mrb[168].mxu0 %v15777_v19  ;;  %v4147_v8 = vmax.f32 %v10748_v5, 0.0  ;;  %v15781_v5 = vld [vmem:[#allocation23_spill] sm:$0xff]  ;;  %v15782_v46 = vld [vmem:[#allocation26_spill] sm:$0xff] }
 0x322   : > { %v4154_v15 = vmax.f32 %v10749_v14, 0.0  ;;  %v4153_v24 = vmax.f32 %v10686_v22, 0.0  ;;  %7196 = vmatmul.mubr.bf16.gmra.mrb[168].mxu1 %v15777_v19  ;;  %6433 = vmatprep.mubr.bf16.mxu0 %v15778_v39  ;;  %v12047_v53 = vld [vmem:[%s15662_s3 + $0x644] ss:$16 sps:$4 sm:$0xff]   ;;  %v12069_v61 = vld [vmem:[%s15662_s3 + $0x628] ss:$16 sps:$4 sm:$0xff]  }
 0x323   : > { %v14583_v18 = vpack.c.bf16 %v4152_v7, %v4144_v34  ;;  %v4155_v31 = vmax.f32 %v10750_v2, 0.0  ;;  %7205 = vmatprep.mubr.bf16.mxu1 %v15778_v39  ;;  %v12050_v14 = vld [vmem:[%s15662_s3 + $0x664] ss:$16 sps:$4 sm:$0xff]   ;;  %v12075_v22 = vld [vmem:[%s15662_s3 + $0x648] ss:$16 sps:$4 sm:$0xff]  }
 0x324   : > { %v14586_v16 = vpack.c.bf16 %v4154_v15, %v4146_v33  ;;  %v14588_v1 = vpack.c.bf16 %v4153_v24, %v4145_v45  ;;  %v15783_v24 = vld [vmem:[#allocation25_spill] sm:$0xff]  ;;  %v15784_v45 = vld [vmem:[#allocation27_spill] sm:$0xff]  ;;  %v12044_v15 = vld [vmem:[%s15662_s3 + $0x624] ss:$16 sps:$4 sm:$0xff]  }
 0x325   : > { %v14590_v40 = vpack.c.bf16 %v4155_v31, %v4147_v8  ;;  %v12080_v25 = vld [vmem:[%s15662_s3 + $0x66c] ss:$16 sps:$4 sm:$0xff]   ;;  %v12048_v34 = vld [vmem:[%s15662_s3 + $0x660] ss:$16 sps:$4 sm:$0xff]   ;;  %v12053_v7 = vld [vmem:[%s15662_s3 + $0x684] ss:$16 sps:$4 sm:$0xff]  }
 0x326   : > { %v12078_v2 = vld [vmem:[%s15662_s3 + $0x668] ss:$16 sps:$4 sm:$0xff]   ;;  %v12056_v19 = vld [vmem:[%s15662_s3 + $0x6a4] ss:$16 sps:$4 sm:$0xff]   ;;  %v12089_v39 = vld [vmem:[%s15662_s3 + $0x6ac] ss:$16 sps:$4 sm:$0xff]  }
 0x327   : > { %v12084_v33 = vld [vmem:[%s15662_s3 + $0x688] ss:$16 sps:$4 sm:$0xff]   ;;  %v12054_v8 = vld [vmem:[%s15662_s3 + $0x6a0] ss:$16 sps:$4 sm:$0xff]   ;;  %v12059_v31 = vld [vmem:[%s15662_s3 + $0x6c4] ss:$16 sps:$4 sm:$0xff]  }
 0x329   : > { %6434 = vmatmul.mubr.bf16.gmra.mrb[172].mxu0 %v15779_v51 }
 0x32a   : > { %7206 = vmatmul.mubr.bf16.gmra.mrb[172].mxu1 %v15779_v51  ;;  %6443 = vmatprep.mubr.bf16.mxu0 %v15780_v54  ;;  %v12087_v51 = vld [vmem:[%s15662_s3 + $0x6a8] ss:$16 sps:$4 sm:$0xff]  }
 0x32b   : > { %7215 = vmatprep.mubr.bf16.mxu1 %v15780_v54  ;;  %v12062_v54 = vld [vmem:[%s15662_s3 + $0x6e4] ss:$16 sps:$4 sm:$0xff]  }
 0x331   : > { %6444 = vmatmul.mubr.bf16.gmra.mrb[176].mxu0 %v15781_v5 }
 0x332   : > { %7216 = vmatmul.mubr.bf16.gmra.mrb[176].mxu1 %v15781_v5  ;;  %6453 = vmatprep.mubr.bf16.mxu0 %v15782_v46  ;;  %v12093_v5 = vld [vmem:[%s15662_s3 + $0x6c8] ss:$16 sps:$4 sm:$0xff]  }
 0x333   : > { %7225 = vmatprep.mubr.bf16.mxu1 %v15782_v46  ;;  %v12098_v46 = vld [vmem:[%s15662_s3 + $0x6ec] ss:$16 sps:$4 sm:$0xff]  }
 0x339   : > { %6454 = vmatmul.mubr.bf16.gmra.mrb[180].mxu0 %v15783_v24 }
 0x33a   : > { %7226 = vmatmul.mubr.bf16.gmra.mrb[180].mxu1 %v15783_v24  ;;  %6463 = vmatprep.mubr.bf16.mxu0 %v13798_v0  ;;  %v12060_v24 = vld [vmem:[%s15662_s3 + $0x6e0] ss:$16 sps:$4 sm:$0xff]  }
 0x33b   : > { %7235 = vmatprep.mubr.bf16.mxu1 %v13798_v0  ;;  %v12039_v0 = vld [vmem:[%s15662_s3 + $0x600] ss:$16 sps:$4 sm:$0xff]  }
 0x341   : > { %6464 = vmatmul.mubr.bf16.gmra.mrb[184].mxu0 %v15784_v45 }
 0x342   : > { %7236 = vmatmul.mubr.bf16.gmra.mrb[184].mxu1 %v15784_v45  ;;  %6473 = vmatprep.mubr.bf16.mxu0 %v13816_v13  ;;  %v12065_v45 = vld [vmem:[%s15662_s3 + $0x704] ss:$16 sps:$4 sm:$0xff]  }
 0x343   : > { %7245 = vmatprep.mubr.bf16.mxu1 %v13816_v13  ;;  %v12066_v13 = vld [vmem:[%s15662_s3 + $0x608] ss:$16 sps:$4 sm:$0xff]  }
 0x349   : > { %6474 = vmatmul.mubr.bf16.gmra.mrb[188].mxu0 %v13812_v44 }
 0x34a   : > { %7246 = vmatmul.mubr.bf16.gmra.mrb[188].mxu1 %v13812_v44  ;;  %6516 = vmatprep.mubr.bf16.mxu0 %v14096_v21  ;;  %v12071_v44 = vld [vmem:[%s15662_s3 + $0x62c] ss:$16 sps:$4 sm:$0xff]  }
 0x34b   : > { %7288 = vmatprep.mubr.bf16.mxu1 %v14096_v21  ;;  %v12042_v21 = vld [vmem:[%s15662_s3 + $0x620] ss:$16 sps:$4 sm:$0xff]  }
 0x351   : > { %6517 = vmatmul.mubr.bf16.vlgmr.msra.gmra.mrb[128].mxu0 %v14091_v35 }
 0x352   : > { %7289 = vmatmul.mubr.bf16.vlgmr.msra.gmra.mrb[128].mxu1 %v14091_v35  ;;  %6526 = vmatprep.mubr.bf16.mxu0 %v14116_v30  ;;  %v12077_v35 = vld [vmem:[%s15662_s3 + $0x64c] ss:$16 sps:$4 sm:$0xff]  }
 0x353   : > { %6678 = vmatpush1.bf16.msra.mxu0 %v12039_v0  ;;  %7298 = vmatprep.mubr.bf16.mxu1 %v14116_v30  ;;  %v12045_v30 = vld [vmem:[%s15662_s3 + $0x640] ss:$16 sps:$4 sm:$0xff]   ;;  %v12096_v0 = vld [vmem:[%s15662_s3 + $0x6e8] ss:$16 sps:$4 sm:$0xff]  }
 0x354   : > { %6679 = vmatprep.subr.bf16.mxu0 %v12044_v15  ;;  %7450 = vmatpush1.bf16.msra.mxu1 %v12066_v13  ;;  %v12074_v15 = vld [vmem:[%s15662_s3 + $0x724] ss:$16 sps:$4 sm:$0xff]   ;;  %v12102_v13 = vld [vmem:[%s15662_s3 + $0x708] ss:$16 sps:$4 sm:$0xff]  }
 0x355   : > { %7451 = vmatprep.subr.bf16.mxu1 %v12071_v44  ;;  %v12107_v44 = vld [vmem:[%s15662_s3 + $0x72c] ss:$16 sps:$4 sm:$0xff]  }
 0x357   : > { %6680 = vmatpush1.bf16.msra.mxu0 %v12042_v21  ;;  %v12072_v21 = vld [vmem:[%s15662_s3 + $0x720] ss:$16 sps:$4 sm:$0xff]  }
 0x358   : > { %6681 = vmatprep.subr.bf16.mxu0 %v12047_v53  ;;  %7452 = vmatpush1.bf16.msra.mxu1 %v12069_v61  ;;  %v12083_v53 = vld [vmem:[%s15662_s3 + $0x744] ss:$16 sps:$4 sm:$0xff]   ;;  %v12105_v61 = vld [vmem:[%s15662_s3 + $0x728] ss:$16 sps:$4 sm:$0xff]  }
 0x359   : > { %6527 = vmatmul.mubr.bf16.gmra.mrb[132].mxu0 %v14111_v12  ;;  %7453 = vmatprep.subr.bf16.mxu1 %v12077_v35  ;;  %v12092_v35 = vld [vmem:[%s15662_s3 + $0x764] ss:$16 sps:$4 sm:$0xff]  }
 0x35a   : > { %7299 = vmatmul.mubr.bf16.gmra.mrb[132].mxu1 %v14111_v12  ;;  %6536 = vmatprep.mubr.bf16.mxu0 %v14136_v11  ;;  %v12086_v12 = vld [vmem:[%s15662_s3 + $0x68c] ss:$16 sps:$4 sm:$0xff]  }
 0x35b   : > { %7308 = vmatprep.mubr.bf16.mxu1 %v14136_v11  ;;  %6682 = vmatpush1.bf16.msra.mxu0 %v12045_v30  ;;  %v12051_v11 = vld [vmem:[%s15662_s3 + $0x680] ss:$16 sps:$4 sm:$0xff]   ;;  %v12111_v30 = vld [vmem:[%s15662_s3 + $0x748] ss:$16 sps:$4 sm:$0xff]  }
 0x35c   : > { %6683 = vmatprep.subr.bf16.mxu0 %v12050_v14  ;;  %7454 = vmatpush1.bf16.msra.mxu1 %v12075_v22  ;;  %v12116_v14 = vld [vmem:[%s15662_s3 + $0x76c] ss:$16 sps:$4 sm:$0xff]   ;;  %v12090_v22 = vld [vmem:[%s15662_s3 + $0x760] ss:$16 sps:$4 sm:$0xff]  }
 0x35d   : > { %7455 = vmatprep.subr.bf16.mxu1 %v12080_v25  ;;  %v12101_v25 = vld [vmem:[%s15662_s3 + $0x784] ss:$16 sps:$4 sm:$0xff]  }
 0x35f   : > { %6684 = vmatpush1.bf16.msra.mxu0 %v12048_v34  ;;  %v12114_v34 = vld [vmem:[%s15662_s3 + $0x768] ss:$16 sps:$4 sm:$0xff]  }
 0x360   : > { %6685 = vmatprep.subr.bf16.mxu0 %v12053_v7  ;;  %7456 = vmatpush1.bf16.msra.mxu1 %v12078_v2  ;;  %v12110_v7 = vld [vmem:[%s15662_s3 + $0x7a4] ss:$16 sps:$4 sm:$0xff]   ;;  %v12120_v2 = vld [vmem:[%s15662_s3 + $0x788] ss:$16 sps:$4 sm:$0xff]  }
 0x361   : > { %6537 = vmatmul.mubr.bf16.gmra.mrb[136].mxu0 %v14131_v41  ;;  %7457 = vmatprep.subr.bf16.mxu1 %v12086_v12  ;;  %v12125_v12 = vld [vmem:[%s15662_s3 + $0x7ac] ss:$16 sps:$4 sm:$0xff]  }
 0x362   : > { %7309 = vmatmul.mubr.bf16.gmra.mrb[136].mxu1 %v14131_v41  ;;  %6546 = vmatprep.mubr.bf16.mxu0 %v14156_v27  ;;  %v12095_v41 = vld [vmem:[%s15662_s3 + $0x6cc] ss:$16 sps:$4 sm:$0xff]  }
 0x363   : > { %7318 = vmatprep.mubr.bf16.mxu1 %v14156_v27  ;;  %6686 = vmatpush1.bf16.msra.mxu0 %v12051_v11  ;;  %v12057_v27 = vld [vmem:[%s15662_s3 + $0x6c0] ss:$16 sps:$4 sm:$0xff]  }
 0x364   : > { %6687 = vmatprep.subr.bf16.mxu0 %v12056_v19  ;;  %7458 = vmatpush1.bf16.msra.mxu1 %v12084_v33  ;;  %v12108_v11 = vld [vmem:[%s15662_s3 + $0x7a0] ss:$16 sps:$4 sm:$0xff]   ;;  %v12119_v19 = vld [vmem:[%s15662_s3 + $0x7c4] ss:$16 sps:$4 sm:$0xff]   ;;  %v12123_v33 = vld [vmem:[%s15662_s3 + $0x7a8] ss:$16 sps:$4 sm:$0xff]  }
 0x365   : > { %7459 = vmatprep.subr.bf16.mxu1 %v12089_v39  ;;  %v12128_v39 = vld [vmem:[%s15662_s3 + $0x7e4] ss:$16 sps:$4 sm:$0xff]  }
 0x367   : > { %6688 = vmatpush1.bf16.msra.mxu0 %v12054_v8  ;;  %v12129_v8 = vld [vmem:[%s15662_s3 + $0x7c8] ss:$16 sps:$4 sm:$0xff]  }
 0x368   : > { %6689 = vmatprep.subr.bf16.mxu0 %v12059_v31  ;;  %7460 = vmatpush1.bf16.msra.mxu1 %v12087_v51  ;;  %v12134_v31 = vld [vmem:[%s15662_s3 + $0x7ec] ss:$16 sps:$4 sm:$0xff]   ;;  %v12126_v51 = vld [vmem:[%s15662_s3 + $0x7e0] ss:$16 sps:$4 sm:$0xff]  }
 0x369   : > { %6547 = vmatmul.mubr.bf16.gmra.mrb[140].mxu0 %v14151_v58  ;;  %7461 = vmatprep.subr.bf16.mxu1 %v12095_v41  ;;  %v12132_v41 = vld [vmem:[%s15662_s3 + $0x7e8] ss:$16 sps:$4 sm:$0xff]  }
 0x36a   : > { %7319 = vmatmul.mubr.bf16.gmra.mrb[140].mxu1 %v14151_v58  ;;  %6556 = vmatprep.mubr.bf16.mxu0 %v14176_v32  ;;  %v12104_v58 = vld [vmem:[%s15662_s3 + $0x70c] ss:$16 sps:$4 sm:$0xff]  }
 0x36b   : > { %7328 = vmatprep.mubr.bf16.mxu1 %v14176_v32  ;;  %6690 = vmatpush1.bf16.msra.mxu0 %v12057_v27  ;;  %v12063_v32 = vld [vmem:[%s15662_s3 + $0x700] ss:$16 sps:$4 sm:$0xff]   ;;  %v12167_v27 = vld [vmem:[%s15664_s5 + $0xa4] ss:$8 sps:$4 sm:$0xff]  }
 0x36c   : > { %6691 = vmatprep.subr.bf16.mxu0 %v12062_v54  ;;  %7462 = vmatpush1.bf16.msra.mxu1 %v12093_v5  ;;  %v12165_v54 = vld [vmem:[%s15664_s5 + $0xa0] ss:$8 sps:$4 sm:$0xff]   ;;  %v12170_v5 = vld [vmem:[%s15664_s5 + $0xb4] ss:$8 sps:$4 sm:$0xff]  }
 0x36d   : > { %7463 = vmatprep.subr.bf16.mxu1 %v12098_v46  ;;  %v15789_v46 = vld [vmem:[#allocation31_spill] sm:$0xff] }
 0x36f   : > { %6692 = vmatpush1.bf16.msra.mxu0 %v12060_v24  ;;  %v15790_v24 = vld [vmem:[#allocation34_spill] sm:$0xff] }
 0x370   : > { %6693 = vmatprep.subr.bf16.mxu0 %v12065_v45  ;;  %7464 = vmatpush1.bf16.msra.mxu1 %v12096_v0  ;;  %v12168_v45 = vld [vmem:[%s15664_s5 + $0xb0] ss:$8 sps:$4 sm:$0xff]   ;;  %v12173_v0 = vld [vmem:[%s15664_s5 + $0xc4] ss:$8 sps:$4 sm:$0xff]  }
 0x371   : > { %6557 = vmatmul.mubr.bf16.gmra.mrb[144].mxu0 %v14171_v9  ;;  %7465 = vmatprep.subr.bf16.mxu1 %v12104_v58  ;;  %v12171_v58 = vld [vmem:[%s15664_s5 + $0xc0] ss:$8 sps:$4 sm:$0xff]  }
 0x372   : > { %7329 = vmatmul.mubr.bf16.gmra.mrb[144].mxu1 %v14171_v9  ;;  %6566 = vmatprep.mubr.bf16.mxu0 %v14211_v42  ;;  %v12113_v9 = vld [vmem:[%s15662_s3 + $0x74c] ss:$16 sps:$4 sm:$0xff]  }
 0x373   : > { %7338 = vmatprep.mubr.bf16.mxu1 %v14211_v42  ;;  %6694 = vmatpush1.bf16.msra.mxu0 %v12063_v32  ;;  %v12081_v42 = vld [vmem:[%s15662_s3 + $0x740] ss:$16 sps:$4 sm:$0xff]   ;;  %v12176_v32 = vld [vmem:[%s15664_s5 + $0xd4] ss:$8 sps:$4 sm:$0xff]  }
 0x374   : > { %6695 = vmatprep.subr.bf16.mxu0 %v12074_v15  ;;  %7466 = vmatpush1.bf16.msra.mxu1 %v12102_v13  ;;  %v15791_v15 = vld [vmem:[#allocation33_spill] sm:$0xff]  ;;  %v15792_v13 = vld [vmem:[#allocation36_spill] sm:$0xff] }
 0x375   : > { %7467 = vmatprep.subr.bf16.mxu1 %v12107_v44  ;;  %v12174_v44 = vld [vmem:[%s15664_s5 + $0xd0] ss:$8 sps:$4 sm:$0xff]  }
 0x377   : > { %6696 = vmatpush1.bf16.msra.mxu0 %v12072_v21  ;;  %v12179_v21 = vld [vmem:[%s15664_s5 + $0xe4] ss:$8 sps:$4 sm:$0xff]  }
 0x378   : > { %6697 = vmatprep.subr.bf16.mxu0 %v12083_v53  ;;  %7468 = vmatpush1.bf16.msra.mxu1 %v12105_v61  ;;  %v12177_v53 = vld [vmem:[%s15664_s5 + $0xe0] ss:$8 sps:$4 sm:$0xff]  }
 0x379   : > { %6567 = vmatmul.mubr.bf16.gmra.mrb[148].mxu0 %v14203_v50  ;;  %7469 = vmatprep.subr.bf16.mxu1 %v12113_v9  ;;  %v15793_v61 = vld [vmem:[#allocation35_spill] sm:$0xff]  ;;  %v15794_v9 = vld [vmem:[#allocation38_spill] sm:$0xff] }
 0x37a   : > { %7339 = vmatmul.mubr.bf16.gmra.mrb[148].mxu1 %v14203_v50  ;;  %6576 = vmatprep.mubr.bf16.mxu0 %v14255_v37  ;;  %v12122_v50 = vld [vmem:[%s15662_s3 + $0x78c] ss:$16 sps:$4 sm:$0xff]  }
 0x37b   : > { %7348 = vmatprep.mubr.bf16.mxu1 %v14255_v37  ;;  %6698 = vmatpush1.bf16.msra.mxu0 %v12081_v42  ;;  %v12099_v37 = vld [vmem:[%s15662_s3 + $0x780] ss:$16 sps:$4 sm:$0xff]   ;;  %v15795_v42 = vld [vmem:[#allocation37_spill] sm:$0xff] }
 0x37c   : > { %6699 = vmatprep.subr.bf16.mxu0 %v12092_v35  ;;  %7470 = vmatpush1.bf16.msra.mxu1 %v12111_v30  ;;  %v15796_v35 = vld [vmem:[#allocation39_spill] sm:$0xff]  ;;  %v15797_v30 = vld [vmem:[#allocation10_spill] sm:$0xff] }
 0x37d   : > { %7471 = vmatprep.subr.bf16.mxu1 %v12116_v14  ;;  %v15798_v14 = vld [vmem:[#allocation12_spill] sm:$0xff] }
 0x37f   : > { %6700 = vmatpush1.bf16.msra.mxu0 %v12090_v22  ;;  %v15799_v22 = vld [vmem:[#allocation9_spill] sm:$0xff] }
 0x380   : > { %6701 = vmatprep.subr.bf16.mxu0 %v12101_v25  ;;  %7472 = vmatpush1.bf16.msra.mxu1 %v12114_v34  ;;  %v15800_v25 = vld [vmem:[#allocation14_spill] sm:$0xff]  ;;  %v15801_v34 = vld [vmem:[#allocation11_spill] sm:$0xff] }
 0x381   : > { %6577 = vmatmul.mubr.bf16.gmra.mrb[152].mxu0 %v14247_v26  ;;  %7473 = vmatprep.subr.bf16.mxu1 %v12122_v50  ;;  %v15802_v50 = vld [vmem:[#allocation16_spill] sm:$0xff] }
 0x382   : > { %7349 = vmatmul.mubr.bf16.gmra.mrb[152].mxu1 %v14247_v26  ;;  %6586 = vmatprep.mubr.bf16.mxu0 %v14299_v62  ;;  %v12131_v26 = vld [vmem:[%s15662_s3 + $0x7cc] ss:$16 sps:$4 sm:$0xff]  }
 0x383   : > { %7358 = vmatprep.mubr.bf16.mxu1 %v14299_v62  ;;  %6702 = vmatpush1.bf16.msra.mxu0 %v12099_v37  ;;  %v12117_v62 = vld [vmem:[%s15662_s3 + $0x7c0] ss:$16 sps:$4 sm:$0xff]   ;;  %v12182_v37 = vld [vmem:[%s15664_s5 + $0xf4] ss:$8 sps:$4 sm:$0xff]  }
 0x384   : > { %6703 = vmatprep.subr.bf16.mxu0 %v12110_v7  ;;  %7474 = vmatpush1.bf16.msra.mxu1 %v12120_v2  ;;  %v12180_v7 = vld [vmem:[%s15664_s5 + $0xf0] ss:$8 sps:$4 sm:$0xff]  }
 0x385   : > { %7475 = vmatprep.subr.bf16.mxu1 %v12125_v12  ;;  %v15803_v2 = vld [vmem:[#allocation13_spill] sm:$0xff]  ;;  %v15804_v12 = vld [vmem:[#allocation18_spill] sm:$0xff] }
 0x387   : > { %6704 = vmatpush1.bf16.msra.mxu0 %v12108_v11  ;;  %v12185_v11 = vld [vmem:[%s15664_s5 + $0x104] ss:$8 sps:$4 sm:$0xff]  }
 0x388   : > { %6705 = vmatprep.subr.bf16.mxu0 %v12119_v19  ;;  %7476 = vmatpush1.bf16.msra.mxu1 %v12123_v33  ;;  %v15805_v19 = vld [vmem:[#allocation15_spill] sm:$0xff]  ;;  %v15806_v33 = vld [vmem:[#allocation20_spill] sm:$0xff] }
 0x389   : > { %6587 = vmatmul.mubr.bf16.gmra.mrb[156].mxu0 %v14291_v28  ;;  %7477 = vmatprep.subr.bf16.mxu1 %v12131_v26  ;;  %v15807_v26 = vld [vmem:[#allocation17_spill] sm:$0xff] }
 0x38a   : > { %7359 = vmatmul.mubr.bf16.gmra.mrb[156].mxu1 %v14291_v28  ;;  %6596 = vmatprep.mubr.bf16.mxu0 %v14343_v43  ;;  %v12137_v28 = vld [vmem:[%s15664_s5 + $0x4] ss:$8 sps:$4 sm:$0xff]  }
 0x38b   : > { %7368 = vmatprep.mubr.bf16.mxu1 %v14343_v43  ;;  %6706 = vmatpush1.bf16.msra.mxu0 %v12117_v62  ;;  %v12143_v43 = vld [vmem:[%s15664_s5 + $0x24] ss:$8 sps:$4 sm:$0xff]   ;;  %v4796_v62 = vld [vmem:[%s15663_s4] sm:$0xf] }
 0x38c   : > { %6707 = vmatprep.subr.bf16.mxu0 %v12128_v39  ;;  %7478 = vmatpush1.bf16.msra.mxu1 %v12129_v8  ;;  %v15808_v39 = vld [vmem:[#allocation7_spill] sm:$0xff] }
 0x38d   : > { %7479 = vmatprep.subr.bf16.mxu1 %v12134_v31  ;;  %v15027_v8 = vrot.slane %v4796_v62, %v15808_v39  ;;  %v15809_v31 = vld [vmem:[#allocation6_spill] sm:$0xff] }
 0x38f   : > { %6708 = vmatpush1.bf16.msra.mxu0 %v12126_v51  ;;  %v15810_v51 = vsub.s32 2, %v15809_v31 }
 0x390   : > { %7480 = vmatpush1.bf16.msra.mxu1 %v12132_v41  ;;  %8358 = vmatprep.subr.bf16.mxu0 %v12137_v28 }
 0x391   : > { %6597 = vmatmul.mubr.bf16.gmra.mrb[160].mxu0 %v14335_v6  ;;  %10463 = vmatprep.subr.bf16.mxu1 %v12137_v28  ;;  %v15031_v41 = vrot.slane %v4796_v62, %v15810_v51  ;;  %v15811_v28 = vld [vmem:[#allocation8_spill] sm:$0xff] }
 0x392   : > { %7369 = vmatmul.mubr.bf16.gmra.mrb[160].mxu1 %v14335_v6  ;;  %6606 = vmatprep.mubr.bf16.mxu0 %v14387_v48  ;;  %v12135_v6 = vld [vmem:[%s15664_s5] ss:$8 sps:$4 sm:$0xff]  }
 0x393   : > { %7378 = vmatprep.mubr.bf16.mxu1 %v14387_v48  ;;  %v12149_v48 = vld [vmem:[%s15664_s5 + $0x44] ss:$8 sps:$4 sm:$0xff]  }
 0x399   : > { %6607 = vmatmul.mubr.bf16.gmra.mrb[164].mxu0 %v14379_v49 }
 0x39a   : > { %7379 = vmatmul.mubr.bf16.gmra.mrb[164].mxu1 %v14379_v49  ;;  %6616 = vmatprep.mubr.bf16.mxu0 %v14431_v10  ;;  %v12144_v49 = vld [vmem:[%s15664_s5 + $0x30] ss:$8 sps:$4 sm:$0xff]  }
 0x39b   : > { %7388 = vmatprep.mubr.bf16.mxu1 %v14431_v10  ;;  %v12155_v10 = vld [vmem:[%s15664_s5 + $0x64] ss:$8 sps:$4 sm:$0xff]  }
 0x3a1   : > { %6617 = vmatmul.mubr.bf16.gmra.mrb[168].mxu0 %v14423_v23 }
 0x3a2   : > { %7389 = vmatmul.mubr.bf16.gmra.mrb[168].mxu1 %v14423_v23  ;;  %6626 = vmatprep.mubr.bf16.mxu0 %v14475_v36  ;;  %v12150_v23 = vld [vmem:[%s15664_s5 + $0x50] ss:$8 sps:$4 sm:$0xff]  }
 0x3a3   : > { %7398 = vmatprep.mubr.bf16.mxu1 %v14475_v36  ;;  %v15786_v36 = vld [vmem:[#allocation30_spill] sm:$0xff] }
 0x3a9   : > { %6627 = vmatmul.mubr.bf16.gmra.mrb[172].mxu0 %v14467_v52 }
 0x3aa   : > { %7399 = vmatmul.mubr.bf16.gmra.mrb[172].mxu1 %v14467_v52  ;;  %6636 = vmatprep.mubr.bf16.mxu0 %v14519_v17  ;;  %v15785_v52 = vld [vmem:[#allocation28_spill] sm:$0xff] }
 0x3ab   : > { %7408 = vmatprep.mubr.bf16.mxu1 %v14519_v17  ;;  %v12161_v17 = vld [vmem:[%s15664_s5 + $0x84] ss:$8 sps:$4 sm:$0xff]  }
 0x3b1   : > { %6637 = vmatmul.mubr.bf16.gmra.mrb[176].mxu0 %v14511_v56 }
 0x3b2   : > { %7409 = vmatmul.mubr.bf16.gmra.mrb[176].mxu1 %v14511_v56  ;;  %6646 = vmatprep.mubr.bf16.mxu0 %v14548_v59  ;;  %v12156_v56 = vld [vmem:[%s15664_s5 + $0x70] ss:$8 sps:$4 sm:$0xff]  }
 0x3b3   : > { %7418 = vmatprep.mubr.bf16.mxu1 %v14548_v59  ;;  %v12164_v59 = vld [vmem:[%s15664_s5 + $0x94] ss:$8 sps:$4 sm:$0xff]  }
 0x3b9   : > { %6647 = vmatmul.mubr.bf16.gmra.mrb[180].mxu0 %v14543_v29 }
 0x3ba   : > { %7419 = vmatmul.mubr.bf16.gmra.mrb[180].mxu1 %v14543_v29  ;;  %6656 = vmatprep.mubr.bf16.mxu0 %v14568_v57  ;;  %v12159_v29 = vld [vmem:[%s15664_s5 + $0x80] ss:$8 sps:$4 sm:$0xff]  }
 0x3bb   : > { %7428 = vmatprep.mubr.bf16.mxu1 %v14568_v57  ;;  %v15787_v57 = vld [vmem:[#allocation29_spill] sm:$0xff] }
 0x3c1   : > { %6657 = vmatmul.mubr.bf16.gmra.mrb[184].mxu0 %v14563_v38 }
 0x3c2   : > { %7429 = vmatmul.mubr.bf16.gmra.mrb[184].mxu1 %v14563_v38  ;;  %6666 = vmatprep.mubr.bf16.mxu0 %v14588_v1  ;;  %v12140_v38 = vld [vmem:[%s15664_s5 + $0x14] ss:$8 sps:$4 sm:$0xff]  }
 0x3c3   : > { %7438 = vmatprep.mubr.bf16.mxu1 %v14588_v1  ;;  %v12162_v1 = vld [vmem:[%s15664_s5 + $0x90] ss:$8 sps:$4 sm:$0xff]  }
 0x3c9   : > { %6667 = vmatmul.mubr.bf16.gmra.mrb[188].mxu0 %v14583_v18 }
 0x3ca   : > { %7439 = vmatmul.mubr.bf16.gmra.mrb[188].mxu1 %v14583_v18  ;;  %6709 = vmatprep.mubr.bf16.mxu0 %v14098_v3  ;;  %v15788_v18 = vld [vmem:[#allocation32_spill] sm:$0xff] }
 0x3cb   : > { %7481 = vmatprep.mubr.bf16.mxu1 %v14098_v3  ;;  %v12138_v3 = vld [vmem:[%s15664_s5 + $0x10] ss:$8 sps:$4 sm:$0xff]  }
 0x3d1   : > { %6710 = vmatmul.mubr.bf16.vlgmr.msra.gmra.mrb[128].mxu0 %v14094_v63 }
 0x3d2   : > { %7482 = vmatmul.mubr.bf16.vlgmr.msra.gmra.mrb[128].mxu1 %v14094_v63  ;;  %6719 = vmatprep.mubr.bf16.mxu0 %v14118_v20  ;;  %v12141_v63 = vld [vmem:[%s15664_s5 + $0x20] ss:$8 sps:$4 sm:$0xff]  }
 0x3d3   : > { %7491 = vmatprep.mubr.bf16.mxu1 %v14118_v20  ;;  %8359 = vmatpush1.bf16.msra.mxu0 %v12135_v6  ;;  %v12146_v20 = vld [vmem:[%s15664_s5 + $0x34] ss:$8 sps:$4 sm:$0xff]  }
 0x3d4   : > { %8360 = vmatprep.subr.bf16.mxu0 %v12140_v38  ;;  %10479 = vmatpush1.bf16.msra.mxu1 %v12135_v6  ;;  %v15034_v6 = vrot.slane %v4796_v62, %v15811_v28 }
 0x3d5   : > { %10464 = vmatprep.subr.bf16.mxu1 %v12140_v38 }
 0x3d7   : > { %8361 = vmatpush1.bf16.msra.mxu0 %v12138_v3 }
 0x3d8   : > { %8362 = vmatprep.subr.bf16.mxu0 %v12143_v43  ;;  %10480 = vmatpush1.bf16.msra.mxu1 %v12138_v3 }
 0x3d9   : > { %6720 = vmatmul.mubr.bf16.gmra.mrb[132].mxu0 %v14114_v4  ;;  %10465 = vmatprep.subr.bf16.mxu1 %v12143_v43 }
 0x3da   : > { %7492 = vmatmul.mubr.bf16.gmra.mrb[132].mxu1 %v14114_v4  ;;  %6729 = vmatprep.mubr.bf16.mxu0 %v14138_v55  ;;  %v12147_v4 = vld [vmem:[%s15664_s5 + $0x40] ss:$8 sps:$4 sm:$0xff]  }
 0x3db   : > { %7501 = vmatprep.mubr.bf16.mxu1 %v14138_v55  ;;  %8363 = vmatpush1.bf16.msra.mxu0 %v12141_v63  ;;  %v12152_v55 = vld [vmem:[%s15664_s5 + $0x54] ss:$8 sps:$4 sm:$0xff]  }
 0x3dc   : > { %8364 = vmatprep.subr.bf16.mxu0 %v12146_v20  ;;  %10481 = vmatpush1.bf16.msra.mxu1 %v12141_v63 }
 0x3dd   : > { %10466 = vmatprep.subr.bf16.mxu1 %v12146_v20 }
 0x3df   : > { %8365 = vmatpush1.bf16.msra.mxu0 %v12144_v49 }
 0x3e0   : > { %8366 = vmatprep.subr.bf16.mxu0 %v12149_v48  ;;  %10482 = vmatpush1.bf16.msra.mxu1 %v12144_v49 }
 0x3e1   : > { %6730 = vmatmul.mubr.bf16.gmra.mrb[136].mxu0 %v14134_v60  ;;  %10467 = vmatprep.subr.bf16.mxu1 %v12149_v48 }
 0x3e2   : > { %7502 = vmatmul.mubr.bf16.gmra.mrb[136].mxu1 %v14134_v60  ;;  %6739 = vmatprep.mubr.bf16.mxu0 %v14158_v47  ;;  %v12153_v60 = vld [vmem:[%s15664_s5 + $0x60] ss:$8 sps:$4 sm:$0xff]  }
 0x3e3   : > { %7511 = vmatprep.mubr.bf16.mxu1 %v14158_v47  ;;  %8367 = vmatpush1.bf16.msra.mxu0 %v12147_v4  ;;  %v12158_v47 = vld [vmem:[%s15664_s5 + $0x74] ss:$8 sps:$4 sm:$0xff]  }
 0x3e4   : > { %8368 = vmatprep.subr.bf16.mxu0 %v12152_v55  ;;  %10483 = vmatpush1.bf16.msra.mxu1 %v12147_v4 }
 0x3e5   : > { %10468 = vmatprep.subr.bf16.mxu1 %v12152_v55 }
 0x3e7   : > { %8369 = vmatpush1.bf16.msra.mxu0 %v12150_v23 }
 0x3e8   : > { %8370 = vmatprep.subr.bf16.mxu0 %v12155_v10  ;;  %10484 = vmatpush1.bf16.msra.mxu1 %v12150_v23 }
 0x3e9   : > { %6740 = vmatmul.mubr.bf16.gmra.mrb[140].mxu0 %v15785_v52  ;;  %10469 = vmatprep.subr.bf16.mxu1 %v12155_v10 }
 0x3ea   : > { %7512 = vmatmul.mubr.bf16.gmra.mrb[140].mxu1 %v15785_v52  ;;  %6749 = vmatprep.mubr.bf16.mxu0 %v15786_v36 }
 0x3eb   : > { %7521 = vmatprep.mubr.bf16.mxu1 %v15786_v36  ;;  %8371 = vmatpush1.bf16.msra.mxu0 %v12153_v60 }
 0x3ec   : > { %8372 = vmatprep.subr.bf16.mxu0 %v12158_v47  ;;  %10485 = vmatpush1.bf16.msra.mxu1 %v12153_v60 }
 0x3ed   : > { %10470 = vmatprep.subr.bf16.mxu1 %v12158_v47 }
 0x3ef   : > { %8373 = vmatpush1.bf16.msra.mxu0 %v12156_v56 }
 0x3f0   : > { %8374 = vmatprep.subr.bf16.mxu0 %v12161_v17  ;;  %10486 = vmatpush1.bf16.msra.mxu1 %v12156_v56 }
 0x3f1   : > { %6750 = vmatmul.mubr.bf16.gmra.mrb[144].mxu0 %v15787_v57  ;;  %10471 = vmatprep.subr.bf16.mxu1 %v12161_v17 }
 0x3f2   : > { %7522 = vmatmul.mubr.bf16.gmra.mrb[144].mxu1 %v15787_v57  ;;  %6759 = vmatprep.mubr.bf16.mxu0 %v15788_v18 }
 0x3f3   : > { %7531 = vmatprep.mubr.bf16.mxu1 %v15788_v18  ;;  %8375 = vmatpush1.bf16.msra.mxu0 %v12159_v29 }
 0x3f4   : > { %8376 = vmatprep.subr.bf16.mxu0 %v12164_v59  ;;  %10487 = vmatpush1.bf16.msra.mxu1 %v12159_v29 }
 0x3f5   : > { %10472 = vmatprep.subr.bf16.mxu1 %v12164_v59 }
 0x3f7   : > { %8377 = vmatpush1.bf16.msra.mxu0 %v12162_v1 }
 0x3f8   : > { %8378 = vmatprep.subr.bf16.mxu0 %v12167_v27  ;;  %10488 = vmatpush1.bf16.msra.mxu1 %v12162_v1 }
 0x3f9   : > { %6760 = vmatmul.mubr.bf16.gmra.mrb[148].mxu0 %v15789_v46  ;;  %10473 = vmatprep.subr.bf16.mxu1 %v12167_v27 }
 0x3fa   : > { %7532 = vmatmul.mubr.bf16.gmra.mrb[148].mxu1 %v15789_v46  ;;  %6769 = vmatprep.mubr.bf16.mxu0 %v15790_v24 }
 0x3fb   : > { %7541 = vmatprep.mubr.bf16.mxu1 %v15790_v24  ;;  %8379 = vmatpush1.bf16.msra.mxu0 %v12165_v54 }
 0x3fc   : > { %8380 = vmatprep.subr.bf16.mxu0 %v12170_v5  ;;  %10489 = vmatpush1.bf16.msra.mxu1 %v12165_v54 }
 0x3fd   : > { %10474 = vmatprep.subr.bf16.mxu1 %v12170_v5 }
 0x3ff   : > { %8381 = vmatpush1.bf16.msra.mxu0 %v12168_v45 }
 0x400   : > { %8382 = vmatprep.subr.bf16.mxu0 %v12173_v0  ;;  %10490 = vmatpush1.bf16.msra.mxu1 %v12168_v45 }
 0x401   : > { %6770 = vmatmul.mubr.bf16.gmra.mrb[152].mxu0 %v15791_v15  ;;  %10475 = vmatprep.subr.bf16.mxu1 %v12173_v0  ;;  %v12183_v0 = vld [vmem:[%s15664_s5 + $0x100] ss:$8 sps:$4 sm:$0xff]  }
 0x402   : > { %7542 = vmatmul.mubr.bf16.gmra.mrb[152].mxu1 %v15791_v15  ;;  %6779 = vmatprep.mubr.bf16.mxu0 %v15792_v13 }
 0x403   : > { %7551 = vmatprep.mubr.bf16.mxu1 %v15792_v13  ;;  %8383 = vmatpush1.bf16.msra.mxu0 %v12171_v58 }
 0x404   : > { %8384 = vmatprep.subr.bf16.mxu0 %v12176_v32  ;;  %10491 = vmatpush1.bf16.msra.mxu1 %v12171_v58 }
 0x405   : > { %10476 = vmatprep.subr.bf16.mxu1 %v12176_v32 }
 0x407   : > { %8385 = vmatpush1.bf16.msra.mxu0 %v12174_v44 }
 0x408   : > { %8386 = vmatprep.subr.bf16.mxu0 %v12179_v21  ;;  %10492 = vmatpush1.bf16.msra.mxu1 %v12174_v44  ;;  %v12188_v44 = vld [vmem:[%s15664_s5 + $0x114] ss:$8 sps:$4 sm:$0xff]  }
 0x409   : > { %6780 = vmatmul.mubr.bf16.gmra.mrb[156].mxu0 %v15793_v61  ;;  %10477 = vmatprep.subr.bf16.mxu1 %v12179_v21 }
 0x40a   : > { %7552 = vmatmul.mubr.bf16.gmra.mrb[156].mxu1 %v15793_v61  ;;  %6789 = vmatprep.mubr.bf16.mxu0 %v15794_v9 }
 0x40b   : > { %7561 = vmatprep.mubr.bf16.mxu1 %v15794_v9  ;;  %8387 = vmatpush1.bf16.msra.mxu0 %v12177_v53 }
 0x40c   : > { %10493 = vmatpush1.bf16.msra.mxu1 %v12177_v53  ;;  %8388 = vmatprep.subr.bf16.mxu0 %v12182_v37 }
 0x40d   : > { %10478 = vmatprep.subr.bf16.mxu1 %v12182_v37 }
 0x40f   : > { %8389 = vmatpush1.bf16.msra.mxu0 %v12180_v7 }
 0x410   : > { %10494 = vmatpush1.bf16.msra.mxu1 %v12180_v7  ;;  %8551 = vmatprep.subr.bf16.mxu0 %v12185_v11 }
 0x411   : > { %6790 = vmatmul.mubr.bf16.gmra.mrb[160].mxu0 %v15795_v42 }
 0x412   : > { %7562 = vmatmul.mubr.bf16.gmra.mrb[160].mxu1 %v15795_v42  ;;  %6799 = vmatprep.mubr.bf16.mxu0 %v15796_v35 }
 0x413   : > { %7571 = vmatprep.mubr.bf16.mxu1 %v15796_v35 }
 0x419   : > { %6800 = vmatmul.mubr.bf16.gmra.mrb[164].mxu0 %v15797_v30 }
 0x41a   : > { %7572 = vmatmul.mubr.bf16.gmra.mrb[164].mxu1 %v15797_v30  ;;  %6809 = vmatprep.mubr.bf16.mxu0 %v15798_v14 }
 0x41b   : > { %7581 = vmatprep.mubr.bf16.mxu1 %v15798_v14 }
 0x421   : > { %6810 = vmatmul.mubr.bf16.gmra.mrb[168].mxu0 %v15799_v22 }
 0x422   : > { %7582 = vmatmul.mubr.bf16.gmra.mrb[168].mxu1 %v15799_v22  ;;  %6819 = vmatprep.mubr.bf16.mxu0 %v15800_v25 }
 0x423   : > { %7591 = vmatprep.mubr.bf16.mxu1 %v15800_v25 }
 0x429   : > { %6820 = vmatmul.mubr.bf16.gmra.mrb[172].mxu0 %v15801_v34 }
 0x42a   : > { %7592 = vmatmul.mubr.bf16.gmra.mrb[172].mxu1 %v15801_v34  ;;  %6829 = vmatprep.mubr.bf16.mxu0 %v15802_v50 }
 0x42b   : > { %7601 = vmatprep.mubr.bf16.mxu1 %v15802_v50  ;;  %v12186_v50 = vld [vmem:[%s15664_s5 + $0x110] ss:$8 sps:$4 sm:$0xff]  }
 0x431   : > { %6830 = vmatmul.mubr.bf16.gmra.mrb[176].mxu0 %v15803_v2 }
 0x432   : > { %7602 = vmatmul.mubr.bf16.gmra.mrb[176].mxu1 %v15803_v2  ;;  %6839 = vmatprep.mubr.bf16.mxu0 %v15804_v12 }
 0x433   : > { %7611 = vmatprep.mubr.bf16.mxu1 %v15804_v12  ;;  %v12191_v12 = vld [vmem:[%s15664_s5 + $0x124] ss:$8 sps:$4 sm:$0xff]  }
 0x439   : > { %6840 = vmatmul.mubr.bf16.gmra.mrb[180].mxu0 %v15805_v19 }
 0x43a   : > { %7612 = vmatmul.mubr.bf16.gmra.mrb[180].mxu1 %v15805_v19  ;;  %6849 = vmatprep.mubr.bf16.mxu0 %v15806_v33 }
 0x43b   : > { %7621 = vmatprep.mubr.bf16.mxu1 %v15806_v33 }
 0x441   : > { %6850 = vmatmul.mubr.bf16.gmra.mrb[184].mxu0 %v15807_v26 }
 0x442   : > { %7622 = vmatmul.mubr.bf16.gmra.mrb[184].mxu1 %v15807_v26  ;;  %6859 = vmatprep.mubr.bf16.mxu0 %v14590_v40 }
 0x443   : > { %7631 = vmatprep.mubr.bf16.mxu1 %v14590_v40  ;;  %v15812_v40 = vsub.s32 3, %v15809_v31 }
 0x445   : > { %v15038_v38 = vrot.slane %v4796_v62, %v15812_v40 }
 0x449   : > { %6860 = vmatmul.mubr.bf16.gmra.mrb[188].mxu0 %v14586_v16 }
 0x44a   : > { %7632 = vmatmul.mubr.bf16.gmra.mrb[188].mxu1 %v14586_v16 }
 0x4a4   : > { %v6711_v3 = vpop.f32.mrb[128].mxu0 }
 0x4a5   : > { %v10751_v16 = vadd.f32 %v6711_v3, %v15027_v8  ;;  %v7483_v43 = vpop.f32.mrb[128].mxu1  ;;  %v6713_v63 = vpop.f32.mrb[129].mxu0 }
 0x4a6   : > { %v10815_v20 = vadd.f32 %v7483_v43, %v15031_v41  ;;  %v10752_v49 = vadd.f32 %v6713_v63, %v15034_v6  ;;  %v7485_v48 = vpop.f32.mrb[129].mxu1  ;;  %v6715_v4 = vpop.f32.mrb[130].mxu0  ;;  %v12189_v43 = vld [vmem:[%s15664_s5 + $0x120] ss:$8 sps:$4 sm:$0xff]  }
 0x4a7   : > { %v10816_v55 = vadd.f32 %v7485_v48, %v15038_v38  ;;  %v10753_v23 = vadd.f32 %v6715_v4, %v15027_v8  ;;  %v7487_v10 = vpop.f32.mrb[130].mxu1  ;;  %v6717_v60 = vpop.f32.mrb[131].mxu0  ;;  %v7642_v56 = vmax.f32 %v10751_v16, 0.0  ;;  %v12194_v4 = vld [vmem:[%s15664_s5 + $0x134] ss:$8 sps:$4 sm:$0xff]  }
 0x4a8   : > { %v10817_v47 = vadd.f32 %v7487_v10, %v15031_v41  ;;  %v10754_v52 = vadd.f32 %v6717_v60, %v15034_v6  ;;  %v7489_v36 = vpop.f32.mrb[131].mxu1  ;;  %v7644_v59 = vmax.f32 %v10815_v20, 0.0  ;;  %v7643_v57 = vmax.f32 %v10752_v49, 0.0 }
 0x4a9   : > { %v7646_v17 = vmax.f32 %v10753_v23, 0.0  ;;  %v10818_v29 = vadd.f32 %v7489_v36, %v15038_v38  ;;  %v7645_v27 = vmax.f32 %v10816_v55, 0.0 }
 0x4aa   : > { %v7648_v18 = vmax.f32 %v10817_v47, 0.0  ;;  %v7647_v1 = vmax.f32 %v10754_v52, 0.0 }
 0x4ab   : > { %v7770_v54 = vpack.c.bf16 %v7646_v17, %v7642_v56  ;;  %v7649_v5 = vmax.f32 %v10818_v29, 0.0 }
 0x4ac   : > { %v15048_v46 = vpack.c.bf16 %v7648_v18, %v7644_v59  ;;  %v7771_v24 = vpack.c.bf16 %v7647_v1, %v7643_v57  ;;  %v6721_v45 = vpop.f32.mrb[132].mxu0  ;;  %v12192_v57 = vld [vmem:[%s15664_s5 + $0x130] ss:$8 sps:$4 sm:$0xff]  }
 0x4ad   : > { %v15053_v58 = vpack.c.bf16 %v7649_v5, %v7645_v27  ;;  %v10755_v32 = vadd.f32 %v6721_v45, %v15027_v8  ;;  %v7493_v15 = vpop.f32.mrb[132].mxu1  ;;  %v6723_v13 = vpop.f32.mrb[133].mxu0 }
 0x4ae   : > { %v10819_v21 = vadd.f32 %v7493_v15, %v15031_v41  ;;  %v10756_v53 = vadd.f32 %v6723_v13, %v15034_v6  ;;  %v7495_v61 = vpop.f32.mrb[133].mxu1  ;;  %v6725_v9 = vpop.f32.mrb[134].mxu0  ;;  %8390 = vmatprep.mubr.bf16.mxu0 %v7771_v24 }
 0x4af   : > { %v10820_v42 = vadd.f32 %v7495_v61, %v15038_v38  ;;  %v10757_v35 = vadd.f32 %v6725_v9, %v15027_v8  ;;  %v7497_v30 = vpop.f32.mrb[134].mxu1  ;;  %v6727_v14 = vpop.f32.mrb[135].mxu0  ;;  %8391 = vmatmul.mubr.bf16.vlgmr.msra.gmra.mrb[192].mxu0 %v7770_v54  ;;  %v7650_v37 = vmax.f32 %v10755_v32, 0.0  ;;  %v12197_v54 = vld [vmem:[%s15664_s5 + $0x144] ss:$8 sps:$4 sm:$0xff]  }
 0x4b0   : > { %v10821_v22 = vadd.f32 %v7497_v30, %v15031_v41  ;;  %v10758_v25 = vadd.f32 %v6727_v14, %v15034_v6  ;;  %v7499_v34 = vpop.f32.mrb[135].mxu1  ;;  %8552 = vmatpush1.bf16.msra.mxu0 %v12183_v0  ;;  %v7652_v11 = vmax.f32 %v10819_v21, 0.0  ;;  %v7651_v19 = vmax.f32 %v10756_v53, 0.0  ;;  %v12195_v61 = vld [vmem:[%s15664_s5 + $0x140] ss:$8 sps:$4 sm:$0xff]  }
 0x4b1   : > { %v7654_v7 = vmax.f32 %v10757_v35, 0.0  ;;  %v10822_v2 = vadd.f32 %v7499_v34, %v15038_v38  ;;  %8553 = vmatprep.subr.bf16.mxu0 %v12188_v44  ;;  %v7653_v62 = vmax.f32 %v10820_v42, 0.0  ;;  %v12200_v14 = vld [vmem:[%s15664_s5 + $0x154] ss:$8 sps:$4 sm:$0xff]  }
 0x4b2   : > { %v7656_v33 = vmax.f32 %v10821_v22, 0.0  ;;  %v7655_v26 = vmax.f32 %v10758_v25, 0.0 }
 0x4b3   : > { %v7774_v31 = vpack.c.bf16 %v7654_v7, %v7650_v37  ;;  %v7657_v51 = vmax.f32 %v10822_v2, 0.0 }
 0x4b4   : > { %v15072_v40 = vpack.c.bf16 %v7656_v33, %v7652_v11  ;;  %v7775_v3 = vpack.c.bf16 %v7655_v26, %v7651_v19  ;;  %v6731_v16 = vpop.f32.mrb[136].mxu0  ;;  %8554 = vmatpush1.bf16.msra.mxu0 %v12186_v50  ;;  %v12198_v26 = vld [vmem:[%s15664_s5 + $0x150] ss:$8 sps:$4 sm:$0xff]  }
 0x4b5   : > { %v15077_v63 = vpack.c.bf16 %v7657_v51, %v7653_v62  ;;  %v10759_v20 = vadd.f32 %v6731_v16, %v15027_v8  ;;  %v7503_v49 = vpop.f32.mrb[136].mxu1  ;;  %v6733_v48 = vpop.f32.mrb[137].mxu0  ;;  %8555 = vmatprep.subr.bf16.mxu0 %v12191_v12 }
 0x4b6   : > { %v10823_v55 = vadd.f32 %v7503_v49, %v15031_v41  ;;  %v10760_v23 = vadd.f32 %v6733_v48, %v15034_v6  ;;  %v7505_v10 = vpop.f32.mrb[137].mxu1  ;;  %v6735_v60 = vpop.f32.mrb[138].mxu0  ;;  %8400 = vmatprep.mubr.bf16.mxu0 %v7775_v3  ;;  %v12203_v3 = vld [vmem:[%s15664_s5 + $0x164] ss:$8 sps:$4 sm:$0xff]  }
 0x4b7   : > { %v10824_v47 = vadd.f32 %v7505_v10, %v15038_v38  ;;  %v10761_v52 = vadd.f32 %v6735_v60, %v15027_v8  ;;  %v7507_v36 = vpop.f32.mrb[138].mxu1  ;;  %v6737_v56 = vpop.f32.mrb[139].mxu0  ;;  %8401 = vmatmul.mubr.bf16.gmra.mrb[196].mxu0 %v7774_v31  ;;  %v7658_v18 = vmax.f32 %v10759_v20, 0.0 }
 0x4b8   : > { %v10825_v17 = vadd.f32 %v7507_v36, %v15031_v41  ;;  %v10762_v29 = vadd.f32 %v6737_v56, %v15034_v6  ;;  %v7509_v59 = vpop.f32.mrb[139].mxu1  ;;  %8556 = vmatpush1.bf16.msra.mxu0 %v12189_v43  ;;  %v7660_v5 = vmax.f32 %v10823_v55, 0.0  ;;  %v7659_v24 = vmax.f32 %v10760_v23, 0.0 }
 0x4b9   : > { %v7662_v1 = vmax.f32 %v10761_v52, 0.0  ;;  %v10826_v27 = vadd.f32 %v7509_v59, %v15038_v38  ;;  %8557 = vmatprep.subr.bf16.mxu0 %v12194_v4  ;;  %v7661_v32 = vmax.f32 %v10824_v47, 0.0  ;;  %v12201_v47 = vld [vmem:[%s15664_s5 + $0x160] ss:$8 sps:$4 sm:$0xff]  }
 0x4ba   : > { %v7664_v45 = vmax.f32 %v10825_v17, 0.0  ;;  %v7663_v0 = vmax.f32 %v10762_v29, 0.0  ;;  %v12206_v29 = vld [vmem:[%s15664_s5 + $0x174] ss:$8 sps:$4 sm:$0xff]  }
 0x4bb   : > { %v7778_v15 = vpack.c.bf16 %v7662_v1, %v7658_v18  ;;  %v7665_v13 = vmax.f32 %v10826_v27, 0.0 }
 0x4bc   : > { %v15096_v44 = vpack.c.bf16 %v7664_v45, %v7660_v5  ;;  %v7779_v21 = vpack.c.bf16 %v7663_v0, %v7659_v24  ;;  %v6741_v53 = vpop.f32.mrb[140].mxu0  ;;  %8558 = vmatpush1.bf16.msra.mxu0 %v12192_v57 }
 0x4bd   : > { %v15101_v9 = vpack.c.bf16 %v7665_v13, %v7661_v32  ;;  %v10763_v42 = vadd.f32 %v6741_v53, %v15027_v8  ;;  %v7513_v35 = vpop.f32.mrb[140].mxu1  ;;  %v6743_v30 = vpop.f32.mrb[141].mxu0  ;;  %8559 = vmatprep.subr.bf16.mxu0 %v12197_v54 }
 0x4be   : > { %v10827_v22 = vadd.f32 %v7513_v35, %v15031_v41  ;;  %v10764_v25 = vadd.f32 %v6743_v30, %v15034_v6  ;;  %v7515_v34 = vpop.f32.mrb[141].mxu1  ;;  %v6745_v50 = vpop.f32.mrb[142].mxu0  ;;  %8410 = vmatprep.mubr.bf16.mxu0 %v7779_v21 }
 0x4bf   : > { %v10828_v37 = vadd.f32 %v7515_v34, %v15038_v38  ;;  %v10765_v7 = vadd.f32 %v6745_v50, %v15027_v8  ;;  %v7517_v2 = vpop.f32.mrb[142].mxu1  ;;  %v6747_v12 = vpop.f32.mrb[143].mxu0  ;;  %8411 = vmatmul.mubr.bf16.gmra.mrb[200].mxu0 %v7778_v15  ;;  %v7666_v62 = vmax.f32 %v10763_v42, 0.0  ;;  %v12204_v15 = vld [vmem:[%s15664_s5 + $0x170] ss:$8 sps:$4 sm:$0xff]  }
 0x4c0   : > { %v10829_v11 = vadd.f32 %v7517_v2, %v15031_v41  ;;  %v10766_v19 = vadd.f32 %v6747_v12, %v15034_v6  ;;  %v7519_v33 = vpop.f32.mrb[143].mxu1  ;;  %8560 = vmatpush1.bf16.msra.mxu0 %v12195_v61  ;;  %v7668_v16 = vmax.f32 %v10827_v22, 0.0  ;;  %v7667_v43 = vmax.f32 %v10764_v25, 0.0  ;;  %v12209_v61 = vld [vmem:[%s15664_s5 + $0x184] ss:$8 sps:$4 sm:$0xff]  }
 0x4c1   : > { %v7670_v31 = vmax.f32 %v10765_v7, 0.0  ;;  %v10830_v51 = vadd.f32 %v7519_v33, %v15038_v38  ;;  %8561 = vmatprep.subr.bf16.mxu0 %v12200_v14  ;;  %v7669_v48 = vmax.f32 %v10828_v37, 0.0  ;;  %v12207_v2 = vld [vmem:[%s15664_s5 + $0x180] ss:$8 sps:$4 sm:$0xff]  }
 0x4c2   : > { %v7672_v20 = vmax.f32 %v10829_v11, 0.0  ;;  %v7671_v49 = vmax.f32 %v10766_v19, 0.0 }
 0x4c3   : > { %v7782_v4 = vpack.c.bf16 %v7670_v31, %v7666_v62  ;;  %v7673_v55 = vmax.f32 %v10830_v51, 0.0 }
 0x4c4   : > { %v15120_v23 = vpack.c.bf16 %v7672_v20, %v7668_v16  ;;  %v7783_v10 = vpack.c.bf16 %v7671_v49, %v7667_v43  ;;  %v6751_v60 = vpop.f32.mrb[144].mxu0  ;;  %8562 = vmatpush1.bf16.msra.mxu0 %v12198_v26  ;;  %v12212_v26 = vld [vmem:[%s15664_s5 + $0x194] ss:$8 sps:$4 sm:$0xff]  }
 0x4c5   : > { %v15125_v52 = vpack.c.bf16 %v7673_v55, %v7669_v48  ;;  %v10767_v36 = vadd.f32 %v6751_v60, %v15027_v8  ;;  %v7523_v56 = vpop.f32.mrb[144].mxu1  ;;  %v6753_v17 = vpop.f32.mrb[145].mxu0  ;;  %8563 = vmatprep.subr.bf16.mxu0 %v12203_v3 }
 0x4c6   : > { %v10831_v59 = vadd.f32 %v7523_v56, %v15031_v41  ;;  %v10768_v57 = vadd.f32 %v6753_v17, %v15034_v6  ;;  %v7525_v18 = vpop.f32.mrb[145].mxu1  ;;  %v6755_v1 = vpop.f32.mrb[146].mxu0  ;;  %8420 = vmatprep.mubr.bf16.mxu0 %v7783_v10  ;;  %v12210_v10 = vld [vmem:[%s15664_s5 + $0x190] ss:$8 sps:$4 sm:$0xff]   ;;  %v12215_v56 = vld [vmem:[%s15664_s5 + $0x1a4] ss:$8 sps:$4 sm:$0xff]  }
 0x4c7   : > { %v10832_v27 = vadd.f32 %v7525_v18, %v15038_v38  ;;  %v10769_v54 = vadd.f32 %v6755_v1, %v15027_v8  ;;  %v7527_v5 = vpop.f32.mrb[146].mxu1  ;;  %v6757_v24 = vpop.f32.mrb[147].mxu0  ;;  %8421 = vmatmul.mubr.bf16.gmra.mrb[204].mxu0 %v7782_v4  ;;  %v7674_v13 = vmax.f32 %v10767_v36, 0.0 }
 0x4c8   : > { %v10833_v45 = vadd.f32 %v7527_v5, %v15031_v41  ;;  %v10770_v0 = vadd.f32 %v6757_v24, %v15034_v6  ;;  %v7529_v32 = vpop.f32.mrb[147].mxu1  ;;  %8564 = vmatpush1.bf16.msra.mxu0 %v12201_v47  ;;  %v7676_v42 = vmax.f32 %v10831_v59, 0.0  ;;  %v7675_v35 = vmax.f32 %v10768_v57, 0.0 }
 0x4c9   : > { %v7678_v21 = vmax.f32 %v10769_v54, 0.0  ;;  %v10834_v53 = vadd.f32 %v7529_v32, %v15038_v38  ;;  %8565 = vmatprep.subr.bf16.mxu0 %v12206_v29  ;;  %v7677_v22 = vmax.f32 %v10832_v27, 0.0 }
 0x4ca   : > { %v7680_v30 = vmax.f32 %v10833_v45, 0.0  ;;  %v7679_v14 = vmax.f32 %v10770_v0, 0.0  ;;  %v12213_v45 = vld [vmem:[%s15664_s5 + $0x1a0] ss:$8 sps:$4 sm:$0xff]  }
 0x4cb   : > { %v7786_v25 = vpack.c.bf16 %v7678_v21, %v7674_v13  ;;  %v7681_v34 = vmax.f32 %v10834_v53, 0.0  ;;  %v12218_v21 = vld [vmem:[%s15664_s5 + $0x1b4] ss:$8 sps:$4 sm:$0xff]  }
 0x4cc   : > { %v15144_v50 = vpack.c.bf16 %v7680_v30, %v7676_v42  ;;  %v7787_v37 = vpack.c.bf16 %v7679_v14, %v7675_v35  ;;  %v6761_v7 = vpop.f32.mrb[148].mxu0  ;;  %8566 = vmatpush1.bf16.msra.mxu0 %v12204_v15 }
 0x4cd   : > { %v15149_v12 = vpack.c.bf16 %v7681_v34, %v7677_v22  ;;  %v10771_v11 = vadd.f32 %v6761_v7, %v15027_v8  ;;  %v7533_v19 = vpop.f32.mrb[148].mxu1  ;;  %v6763_v33 = vpop.f32.mrb[149].mxu0  ;;  %8567 = vmatprep.subr.bf16.mxu0 %v12209_v61 }
 0x4ce   : > { %v10835_v62 = vadd.f32 %v7533_v19, %v15031_v41  ;;  %v10772_v31 = vadd.f32 %v6763_v33, %v15034_v6  ;;  %v7535_v51 = vpop.f32.mrb[149].mxu1  ;;  %v6765_v3 = vpop.f32.mrb[150].mxu0  ;;  %8430 = vmatprep.mubr.bf16.mxu0 %v7787_v37 }
 0x4cf   : > { %v10836_v16 = vadd.f32 %v7535_v51, %v15038_v38  ;;  %v10773_v43 = vadd.f32 %v6765_v3, %v15027_v8  ;;  %v7537_v20 = vpop.f32.mrb[150].mxu1  ;;  %v6767_v49 = vpop.f32.mrb[151].mxu0  ;;  %8431 = vmatmul.mubr.bf16.gmra.mrb[208].mxu0 %v7786_v25  ;;  %v7682_v60 = vmax.f32 %v10771_v11, 0.0 }
 0x4d0   : > { %v10837_v48 = vadd.f32 %v7537_v20, %v15031_v41  ;;  %v10774_v4 = vadd.f32 %v6767_v49, %v15034_v6  ;;  %v7539_v55 = vpop.f32.mrb[151].mxu1  ;;  %8568 = vmatpush1.bf16.msra.mxu0 %v12207_v2  ;;  %v7684_v17 = vmax.f32 %v10835_v62, 0.0  ;;  %v7683_v29 = vmax.f32 %v10772_v31, 0.0  ;;  %v12216_v2 = vld [vmem:[%s15664_s5 + $0x1b0] ss:$8 sps:$4 sm:$0xff]  }
 0x4d1   : > { %v7686_v47 = vmax.f32 %v10773_v43, 0.0  ;;  %v10838_v36 = vadd.f32 %v7539_v55, %v15038_v38  ;;  %8569 = vmatprep.subr.bf16.mxu0 %v12212_v26  ;;  %v7685_v18 = vmax.f32 %v10836_v16, 0.0  ;;  %v12221_v26 = vld [vmem:[%s15664_s5 + $0x1c4] ss:$8 sps:$4 sm:$0xff]   ;;  %v12219_v55 = vld [vmem:[%s15664_s5 + $0x1c0] ss:$8 sps:$4 sm:$0xff]  }
 0x4d2   : > { %v7688_v59 = vmax.f32 %v10837_v48, 0.0  ;;  %v7687_v57 = vmax.f32 %v10774_v4, 0.0 }
 0x4d3   : > { %v7790_v1 = vpack.c.bf16 %v7686_v47, %v7682_v60  ;;  %v7689_v27 = vmax.f32 %v10838_v36, 0.0 }
 0x4d4   : > { %v15168_v54 = vpack.c.bf16 %v7688_v59, %v7684_v17  ;;  %v7791_v5 = vpack.c.bf16 %v7687_v57, %v7683_v29  ;;  %v6771_v24 = vpop.f32.mrb[152].mxu0  ;;  %8570 = vmatpush1.bf16.msra.mxu0 %v12210_v10 }
 0x4d5   : > { %v15173_v0 = vpack.c.bf16 %v7689_v27, %v7685_v18  ;;  %v10775_v32 = vadd.f32 %v6771_v24, %v15027_v8  ;;  %v7543_v15 = vpop.f32.mrb[152].mxu1  ;;  %v6773_v13 = vpop.f32.mrb[153].mxu0  ;;  %8571 = vmatprep.subr.bf16.mxu0 %v12215_v56  ;;  %v12224_v56 = vld [vmem:[%s15664_s5 + $0x1d4] ss:$8 sps:$4 sm:$0xff]  }
 0x4d6   : > { %v10839_v53 = vadd.f32 %v7543_v15, %v15031_v41  ;;  %v10776_v61 = vadd.f32 %v6773_v13, %v15034_v6  ;;  %v7545_v42 = vpop.f32.mrb[153].mxu1  ;;  %v6775_v35 = vpop.f32.mrb[154].mxu0  ;;  %8440 = vmatprep.mubr.bf16.mxu0 %v7791_v5  ;;  %v12222_v15 = vld [vmem:[%s15664_s5 + $0x1d0] ss:$8 sps:$4 sm:$0xff]  }
 0x4d7   : > { %v10840_v30 = vadd.f32 %v7545_v42, %v15038_v38  ;;  %v10777_v14 = vadd.f32 %v6775_v35, %v15027_v8  ;;  %v7547_v22 = vpop.f32.mrb[154].mxu1  ;;  %v6777_v25 = vpop.f32.mrb[155].mxu0  ;;  %8441 = vmatmul.mubr.bf16.gmra.mrb[212].mxu0 %v7790_v1  ;;  %v7690_v11 = vmax.f32 %v10775_v32, 0.0 }
 0x4d8   : > { %v10841_v34 = vadd.f32 %v7547_v22, %v15031_v41  ;;  %v10778_v37 = vadd.f32 %v6777_v25, %v15034_v6  ;;  %v7549_v7 = vpop.f32.mrb[155].mxu1  ;;  %8572 = vmatpush1.bf16.msra.mxu0 %v12213_v45  ;;  %v7692_v62 = vmax.f32 %v10839_v53, 0.0  ;;  %v7691_v31 = vmax.f32 %v10776_v61, 0.0  ;;  %v12227_v61 = vld [vmem:[%s15664_s5 + $0x1e4] ss:$8 sps:$4 sm:$0xff]  }
 0x4d9   : > { %v7694_v19 = vmax.f32 %v10777_v14, 0.0  ;;  %v10842_v33 = vadd.f32 %v7549_v7, %v15038_v38  ;;  %8573 = vmatprep.subr.bf16.mxu0 %v12218_v21  ;;  %v7693_v16 = vmax.f32 %v10840_v30, 0.0 }
 0x4da   : > { %v7696_v51 = vmax.f32 %v10841_v34, 0.0  ;;  %v7695_v3 = vmax.f32 %v10778_v37, 0.0 }
 0x4db   : > { %v7794_v43 = vpack.c.bf16 %v7694_v19, %v7690_v11  ;;  %v7697_v20 = vmax.f32 %v10842_v33, 0.0  ;;  %v12225_v11 = vld [vmem:[%s15664_s5 + $0x1e0] ss:$8 sps:$4 sm:$0xff]  }
 0x4dc   : > { %v15192_v49 = vpack.c.bf16 %v7696_v51, %v7692_v62  ;;  %v7795_v48 = vpack.c.bf16 %v7695_v3, %v7691_v31  ;;  %v6781_v4 = vpop.f32.mrb[156].mxu0  ;;  %8574 = vmatpush1.bf16.msra.mxu0 %v12216_v2  ;;  %v12230_v31 = vld [vmem:[%s15664_s5 + $0x1f4] ss:$8 sps:$4 sm:$0xff]  }
 0x4dd   : > { %v15197_v10 = vpack.c.bf16 %v7697_v20, %v7693_v16  ;;  %v10779_v60 = vadd.f32 %v6781_v4, %v15027_v8  ;;  %v7553_v47 = vpop.f32.mrb[156].mxu1  ;;  %v6783_v36 = vpop.f32.mrb[157].mxu0  ;;  %8575 = vmatprep.subr.bf16.mxu0 %v12221_v26 }
 0x4de   : > { %v10843_v17 = vadd.f32 %v7553_v47, %v15031_v41  ;;  %v10780_v29 = vadd.f32 %v6783_v36, %v15034_v6  ;;  %v7555_v59 = vpop.f32.mrb[157].mxu1  ;;  %v6785_v57 = vpop.f32.mrb[158].mxu0  ;;  %8450 = vmatprep.mubr.bf16.mxu0 %v7795_v48 }
 0x4df   : > { %v10844_v18 = vadd.f32 %v7555_v59, %v15038_v38  ;;  %v10781_v1 = vadd.f32 %v6785_v57, %v15027_v8  ;;  %v7557_v27 = vpop.f32.mrb[158].mxu1  ;;  %v6787_v5 = vpop.f32.mrb[159].mxu0  ;;  %8451 = vmatmul.mubr.bf16.gmra.mrb[216].mxu0 %v7794_v43  ;;  %v7698_v13 = vmax.f32 %v10779_v60, 0.0 }
 0x4e0   : > { %v10845_v24 = vadd.f32 %v7557_v27, %v15031_v41  ;;  %v10782_v45 = vadd.f32 %v6787_v5, %v15034_v6  ;;  %v7559_v32 = vpop.f32.mrb[159].mxu1  ;;  %8576 = vmatpush1.bf16.msra.mxu0 %v12219_v55  ;;  %v7700_v42 = vmax.f32 %v10843_v17, 0.0  ;;  %v7699_v35 = vmax.f32 %v10780_v29, 0.0 }
 0x4e1   : > { %v7702_v21 = vmax.f32 %v10781_v1, 0.0  ;;  %v10846_v53 = vadd.f32 %v7559_v32, %v15038_v38  ;;  %8577 = vmatprep.subr.bf16.mxu0 %v12224_v56  ;;  %v7701_v22 = vmax.f32 %v10844_v18, 0.0  ;;  %v12228_v56 = vld [vmem:[%s15664_s5 + $0x1f0] ss:$8 sps:$4 sm:$0xff]  }
 0x4e2   : > { %v7704_v30 = vmax.f32 %v10845_v24, 0.0  ;;  %v7703_v14 = vmax.f32 %v10782_v45, 0.0 }
 0x4e3   : > { %v7798_v25 = vpack.c.bf16 %v7702_v21, %v7698_v13  ;;  %v7705_v34 = vmax.f32 %v10846_v53, 0.0 }
 0x4e4   : > { %v15216_v37 = vpack.c.bf16 %v7704_v30, %v7700_v42  ;;  %v7799_v7 = vpack.c.bf16 %v7703_v14, %v7699_v35  ;;  %v6791_v2 = vpop.f32.mrb[160].mxu0  ;;  %8578 = vmatpush1.bf16.msra.mxu0 %v12222_v15 }
 0x4e5   : > { %v15221_v19 = vpack.c.bf16 %v7705_v34, %v7701_v22  ;;  %v10783_v33 = vadd.f32 %v6791_v2, %v15027_v8  ;;  %v7563_v26 = vpop.f32.mrb[160].mxu1  ;;  %v6793_v62 = vpop.f32.mrb[161].mxu0  ;;  %8579 = vmatprep.subr.bf16.mxu0 %v12227_v61 }
 0x4e6   : > { %v10847_v51 = vadd.f32 %v7563_v26, %v15031_v41  ;;  %v10784_v3 = vadd.f32 %v6793_v62, %v15034_v6  ;;  %v7565_v16 = vpop.f32.mrb[161].mxu1  ;;  %v6795_v43 = vpop.f32.mrb[162].mxu0  ;;  %8460 = vmatprep.mubr.bf16.mxu0 %v7799_v7 }
 0x4e7   : > { %v10848_v20 = vadd.f32 %v7565_v16, %v15038_v38  ;;  %v10785_v48 = vadd.f32 %v6795_v43, %v15027_v8  ;;  %v7567_v4 = vpop.f32.mrb[162].mxu1  ;;  %v6797_v55 = vpop.f32.mrb[163].mxu0  ;;  %8461 = vmatmul.mubr.bf16.gmra.mrb[220].mxu0 %v7798_v25  ;;  %v7706_v17 = vmax.f32 %v10783_v33, 0.0 }
 0x4e8   : > { %v10849_v60 = vadd.f32 %v7567_v4, %v15031_v41  ;;  %v10786_v47 = vadd.f32 %v6797_v55, %v15034_v6  ;;  %v7569_v36 = vpop.f32.mrb[163].mxu1  ;;  %8580 = vmatpush1.bf16.msra.mxu0 %v12225_v11  ;;  %v7708_v57 = vmax.f32 %v10847_v51, 0.0  ;;  %v7707_v18 = vmax.f32 %v10784_v3, 0.0 }
 0x4e9   : > { %v7710_v29 = vmax.f32 %v10785_v48, 0.0  ;;  %v10850_v59 = vadd.f32 %v7569_v36, %v15038_v38  ;;  %8581 = vmatprep.subr.bf16.mxu0 %v12230_v31  ;;  %v7709_v5 = vmax.f32 %v10848_v20, 0.0 }
 0x4ea   : > { %v7712_v1 = vmax.f32 %v10849_v60, 0.0  ;;  %v7711_v27 = vmax.f32 %v10786_v47, 0.0 }
 0x4eb   : > { %v7802_v24 = vpack.c.bf16 %v7710_v29, %v7706_v17  ;;  %v7713_v45 = vmax.f32 %v10850_v59, 0.0 }
 0x4ec   : > { %v15237_v32 = vpack.c.bf16 %v7712_v1, %v7708_v57  ;;  %v7803_v15 = vpack.c.bf16 %v7711_v27, %v7707_v18  ;;  %v6801_v13 = vpop.f32.mrb[164].mxu0  ;;  %8582 = vmatpush1.bf16.msra.mxu0 %v12228_v56 }
 0x4ed   : > { %v15239_v21 = vpack.c.bf16 %v7713_v45, %v7709_v5  ;;  %v10787_v53 = vadd.f32 %v6801_v13, %v15027_v8  ;;  %v7573_v61 = vpop.f32.mrb[164].mxu1  ;;  %v6803_v42 = vpop.f32.mrb[165].mxu0 }
 0x4ee   : > { %v10851_v35 = vadd.f32 %v7573_v61, %v15031_v41  ;;  %v10788_v30 = vadd.f32 %v6803_v42, %v15034_v6  ;;  %v7575_v14 = vpop.f32.mrb[165].mxu1  ;;  %v6805_v22 = vpop.f32.mrb[166].mxu0  ;;  %8470 = vmatprep.mubr.bf16.mxu0 %v7803_v15 }
 0x4ef   : > { %v10852_v25 = vadd.f32 %v7575_v14, %v15038_v38  ;;  %v10789_v34 = vadd.f32 %v6805_v22, %v15027_v8  ;;  %v7577_v7 = vpop.f32.mrb[166].mxu1  ;;  %v6807_v2 = vpop.f32.mrb[167].mxu0  ;;  %8471 = vmatmul.mubr.bf16.gmra.mrb[224].mxu0 %v7802_v24  ;;  %v7714_v62 = vmax.f32 %v10787_v53, 0.0 }
 0x4f0   : > { %v10853_v11 = vadd.f32 %v7577_v7, %v15031_v41  ;;  %v10790_v33 = vadd.f32 %v6807_v2, %v15034_v6  ;;  %v7579_v26 = vpop.f32.mrb[167].mxu1  ;;  %v7716_v3 = vmax.f32 %v10851_v35, 0.0  ;;  %v7715_v16 = vmax.f32 %v10788_v30, 0.0 }
 0x4f1   : > { %v7718_v31 = vmax.f32 %v10789_v34, 0.0  ;;  %v10854_v51 = vadd.f32 %v7579_v26, %v15038_v38  ;;  %v7717_v48 = vmax.f32 %v10852_v25, 0.0 }
 0x4f2   : > { %v7720_v43 = vmax.f32 %v10853_v11, 0.0  ;;  %v7719_v20 = vmax.f32 %v10790_v33, 0.0 }
 0x4f3   : > { %v7806_v4 = vpack.c.bf16 %v7718_v31, %v7714_v62  ;;  %v7721_v55 = vmax.f32 %v10854_v51, 0.0 }
 0x4f4   : > { %v15249_v60 = vpack.c.bf16 %v7720_v43, %v7716_v3  ;;  %v7807_v47 = vpack.c.bf16 %v7719_v20, %v7715_v16  ;;  %v6811_v36 = vpop.f32.mrb[168].mxu0 }
 0x4f5   : > { %v15251_v56 = vpack.c.bf16 %v7721_v55, %v7717_v48  ;;  %v10791_v17 = vadd.f32 %v6811_v36, %v15027_v8  ;;  %v7583_v29 = vpop.f32.mrb[168].mxu1  ;;  %v6813_v59 = vpop.f32.mrb[169].mxu0 }
 0x4f6   : > { %v10855_v57 = vadd.f32 %v7583_v29, %v15031_v41  ;;  %v10792_v18 = vadd.f32 %v6813_v59, %v15034_v6  ;;  %v7585_v1 = vpop.f32.mrb[169].mxu1  ;;  %v6815_v27 = vpop.f32.mrb[170].mxu0  ;;  %8480 = vmatprep.mubr.bf16.mxu0 %v7807_v47 }
 0x4f7   : > { %v10856_v5 = vadd.f32 %v7585_v1, %v15038_v38  ;;  %v10793_v24 = vadd.f32 %v6815_v27, %v15027_v8  ;;  %v7587_v45 = vpop.f32.mrb[170].mxu1  ;;  %v6817_v15 = vpop.f32.mrb[171].mxu0  ;;  %8481 = vmatmul.mubr.bf16.gmra.mrb[228].mxu0 %v7806_v4  ;;  %v7722_v42 = vmax.f32 %v10791_v17, 0.0 }
 0x4f8   : > { %v10857_v13 = vadd.f32 %v7587_v45, %v15031_v41  ;;  %v10794_v53 = vadd.f32 %v6817_v15, %v15034_v6  ;;  %v7589_v61 = vpop.f32.mrb[171].mxu1  ;;  %v7724_v14 = vmax.f32 %v10855_v57, 0.0  ;;  %v7723_v22 = vmax.f32 %v10792_v18, 0.0 }
 0x4f9   : > { %v7726_v35 = vmax.f32 %v10793_v24, 0.0  ;;  %v10858_v30 = vadd.f32 %v7589_v61, %v15038_v38  ;;  %v7725_v7 = vmax.f32 %v10856_v5, 0.0 }
 0x4fa   : > { %v7728_v25 = vmax.f32 %v10857_v13, 0.0  ;;  %v7727_v34 = vmax.f32 %v10794_v53, 0.0 }
 0x4fb   : > { %v7810_v2 = vpack.c.bf16 %v7726_v35, %v7722_v42  ;;  %v7729_v11 = vmax.f32 %v10858_v30, 0.0 }
 0x4fc   : > { %v15261_v33 = vpack.c.bf16 %v7728_v25, %v7724_v14  ;;  %v7811_v26 = vpack.c.bf16 %v7727_v34, %v7723_v22  ;;  %v6821_v62 = vpop.f32.mrb[172].mxu0 }
 0x4fd   : > { %v15263_v31 = vpack.c.bf16 %v7729_v11, %v7725_v7  ;;  %v10795_v51 = vadd.f32 %v6821_v62, %v15027_v8  ;;  %v7593_v3 = vpop.f32.mrb[172].mxu1  ;;  %v6823_v16 = vpop.f32.mrb[173].mxu0 }
 0x4fe   : > { %v10859_v43 = vadd.f32 %v7593_v3, %v15031_v41  ;;  %v10796_v20 = vadd.f32 %v6823_v16, %v15034_v6  ;;  %v7595_v48 = vpop.f32.mrb[173].mxu1  ;;  %v6825_v4 = vpop.f32.mrb[174].mxu0  ;;  %8490 = vmatprep.mubr.bf16.mxu0 %v7811_v26 }
 0x4ff   : > { %v10860_v55 = vadd.f32 %v7595_v48, %v15038_v38  ;;  %v10797_v47 = vadd.f32 %v6825_v4, %v15027_v8  ;;  %v7597_v36 = vpop.f32.mrb[174].mxu1  ;;  %v6827_v17 = vpop.f32.mrb[175].mxu0  ;;  %8491 = vmatmul.mubr.bf16.gmra.mrb[232].mxu0 %v7810_v2  ;;  %v7730_v18 = vmax.f32 %v10795_v51, 0.0 }
 0x500   : > { %v10861_v29 = vadd.f32 %v7597_v36, %v15031_v41  ;;  %v10798_v59 = vadd.f32 %v6827_v17, %v15034_v6  ;;  %v7599_v57 = vpop.f32.mrb[175].mxu1  ;;  %v7732_v5 = vmax.f32 %v10859_v43, 0.0  ;;  %v7731_v24 = vmax.f32 %v10796_v20, 0.0  ;;  %v12231_v43 = vld [vmem:[%s15666_s7 + $0x40] sm:$0xff]  }
 0x501   : > { %v7734_v1 = vmax.f32 %v10797_v47, 0.0  ;;  %v10862_v27 = vadd.f32 %v7599_v57, %v15038_v38  ;;  %v7733_v13 = vmax.f32 %v10860_v55, 0.0  ;;  %10279 = vmatprep.subr.bf16.mxu1 %v12231_v43 }
 0x502   : > { %v7736_v45 = vmax.f32 %v10861_v29, 0.0  ;;  %v7735_v15 = vmax.f32 %v10798_v59, 0.0 }
 0x503   : > { %v7814_v53 = vpack.c.bf16 %v7734_v1, %v7730_v18  ;;  %v7737_v61 = vmax.f32 %v10862_v27, 0.0 }
 0x504   : > { %v15273_v42 = vpack.c.bf16 %v7736_v45, %v7732_v5  ;;  %v7815_v35 = vpack.c.bf16 %v7735_v15, %v7731_v24  ;;  %v6831_v30 = vpop.f32.mrb[176].mxu0 }
 0x505   : > { %v15275_v14 = vpack.c.bf16 %v7737_v61, %v7733_v13  ;;  %v10799_v22 = vadd.f32 %v6831_v30, %v15027_v8  ;;  %v7603_v25 = vpop.f32.mrb[176].mxu1  ;;  %v6833_v34 = vpop.f32.mrb[177].mxu0 }
 0x506   : > { %v10863_v7 = vadd.f32 %v7603_v25, %v15031_v41  ;;  %v10800_v2 = vadd.f32 %v6833_v34, %v15034_v6  ;;  %v7605_v11 = vpop.f32.mrb[177].mxu1  ;;  %v6835_v26 = vpop.f32.mrb[178].mxu0  ;;  %8500 = vmatprep.mubr.bf16.mxu0 %v7815_v35  ;;  %v12233_v35 = vld [vmem:[%s15666_s7 + $0x48] sm:$0xff]  }
 0x507   : > { %v10864_v62 = vadd.f32 %v7605_v11, %v15038_v38  ;;  %v10801_v51 = vadd.f32 %v6835_v26, %v15027_v8  ;;  %v7607_v3 = vpop.f32.mrb[178].mxu1  ;;  %v6837_v16 = vpop.f32.mrb[179].mxu0  ;;  %8501 = vmatmul.mubr.bf16.gmra.mrb[236].mxu0 %v7814_v53  ;;  %v7738_v55 = vmax.f32 %v10799_v22, 0.0 }
 0x508   : > { %v10865_v20 = vadd.f32 %v7607_v3, %v15031_v41  ;;  %v10802_v48 = vadd.f32 %v6837_v16, %v15034_v6  ;;  %v7609_v4 = vpop.f32.mrb[179].mxu1  ;;  %8583 = vmatprep.mubr.bf16.mxu0 %v15053_v58  ;;  %v7740_v17 = vmax.f32 %v10863_v7, 0.0  ;;  %v7739_v29 = vmax.f32 %v10800_v2, 0.0  ;;  %v12232_v58 = vld [vmem:[%s15666_s7] sm:$0xff]   ;;  %v12234_v16 = vld [vmem:[%s15666_s7 + $0x8] sm:$0xff]  }
 0x509   : > { %v7742_v47 = vmax.f32 %v10801_v51, 0.0  ;;  %v10866_v36 = vadd.f32 %v7609_v4, %v15038_v38  ;;  %v7741_v18 = vmax.f32 %v10864_v62, 0.0 }
 0x50a   : > { %v7744_v59 = vmax.f32 %v10865_v20, 0.0  ;;  %v7743_v57 = vmax.f32 %v10802_v48, 0.0 }
 0x50b   : > { %v7818_v1 = vpack.c.bf16 %v7742_v47, %v7738_v55  ;;  %v7745_v27 = vmax.f32 %v10866_v36, 0.0 }
 0x50c   : > { %v15289_v5 = vpack.c.bf16 %v7744_v59, %v7740_v17  ;;  %v7819_v24 = vpack.c.bf16 %v7743_v57, %v7739_v29  ;;  %v6841_v45 = vpop.f32.mrb[180].mxu0 }
 0x50d   : > { %v15294_v15 = vpack.c.bf16 %v7745_v27, %v7741_v18  ;;  %v10803_v13 = vadd.f32 %v6841_v45, %v15027_v8  ;;  %v7613_v53 = vpop.f32.mrb[180].mxu1  ;;  %v6843_v61 = vpop.f32.mrb[181].mxu0 }
 0x50e   : > { %v10867_v30 = vadd.f32 %v7613_v53, %v15031_v41  ;;  %v10804_v22 = vadd.f32 %v6843_v61, %v15034_v6  ;;  %v7615_v25 = vpop.f32.mrb[181].mxu1  ;;  %v6845_v34 = vpop.f32.mrb[182].mxu0  ;;  %8510 = vmatprep.mubr.bf16.mxu1 %v7819_v24 }
 0x50f   : > { %v10868_v7 = vadd.f32 %v7615_v25, %v15038_v38  ;;  %v10805_v2 = vadd.f32 %v6845_v34, %v15027_v8  ;;  %v7617_v11 = vpop.f32.mrb[182].mxu1  ;;  %v6847_v26 = vpop.f32.mrb[183].mxu0  ;;  %8511 = vmatmul.mubr.bf16.vlgmr.msra.gmra.mrb[192].mxu1 %v7818_v1  ;;  %8584 = vmatmul.mubr.bf16.vlgmr.msra.gmra.mrb[192].mxu0 %v15048_v46  ;;  %v7746_v43 = vmax.f32 %v10803_v13, 0.0  ;;  %v12235_v46 = vld [vmem:[%s15666_s7 + $0x50] sm:$0xff]   ;;  %v12237_v13 = vld [vmem:[%s15666_s7 + $0x58] sm:$0xff]  }
 0x510   : > { %v10869_v62 = vadd.f32 %v7617_v11, %v15031_v41  ;;  %v10806_v51 = vadd.f32 %v6847_v26, %v15034_v6  ;;  %v7619_v3 = vpop.f32.mrb[183].mxu1  ;;  %8593 = vmatprep.mubr.bf16.mxu0 %v15077_v63  ;;  %10280 = vmatpush3.bf16.msra.mxu1 %v12232_v58  ;;  %v7748_v4 = vmax.f32 %v10867_v30, 0.0  ;;  %v7747_v55 = vmax.f32 %v10804_v22, 0.0  ;;  %v12236_v1 = vld [vmem:[%s15666_s7 + $0x10] sm:$0xff]  }
 0x511   : > { %v7750_v20 = vmax.f32 %v10805_v2, 0.0  ;;  %v10870_v48 = vadd.f32 %v7619_v3, %v15038_v38  ;;  %10281 = vmatprep.subr.bf16.mxu1 %v12233_v35  ;;  %v7749_v17 = vmax.f32 %v10868_v7, 0.0 }
 0x512   : > { %v7752_v47 = vmax.f32 %v10869_v62, 0.0  ;;  %v7751_v36 = vmax.f32 %v10806_v51, 0.0  ;;  %v12238_v62 = vld [vmem:[%s15666_s7 + $0x18] sm:$0xff]  }
 0x513   : > { %v7822_v63 = vpack.c.bf16 %v7750_v20, %v7746_v43  ;;  %v7753_v29 = vmax.f32 %v10870_v48, 0.0 }
 0x514   : > { %v15315_v59 = vpack.c.bf16 %v7752_v47, %v7748_v4  ;;  %v7823_v57 = vpack.c.bf16 %v7751_v36, %v7747_v55  ;;  %v6851_v18 = vpop.f32.mrb[184].mxu0  ;;  %10282 = vmatpush3.bf16.msra.mxu1 %v12234_v16 }
 0x515   : > { %v15320_v27 = vpack.c.bf16 %v7753_v29, %v7749_v17  ;;  %v10807_v24 = vadd.f32 %v6851_v18, %v15027_v8  ;;  %v7623_v45 = vpop.f32.mrb[184].mxu1  ;;  %v6853_v58 = vpop.f32.mrb[185].mxu0  ;;  %10283 = vmatprep.subr.bf16.mxu1 %v12235_v46 }
 0x516   : > { %v10871_v53 = vadd.f32 %v7623_v45, %v15031_v41  ;;  %v10808_v61 = vadd.f32 %v6853_v58, %v15034_v6  ;;  %v7625_v35 = vpop.f32.mrb[185].mxu1  ;;  %v6855_v30 = vpop.f32.mrb[186].mxu0  ;;  %8520 = vmatprep.mubr.bf16.mxu1 %v7823_v57 }
 0x517   : > { %v10872_v22 = vadd.f32 %v7625_v35, %v15038_v38  ;;  %v10809_v25 = vadd.f32 %v6855_v30, %v15027_v8  ;;  %v7627_v34 = vpop.f32.mrb[186].mxu1  ;;  %v6857_v7 = vpop.f32.mrb[187].mxu0  ;;  %8521 = vmatmul.mubr.bf16.gmra.mrb[196].mxu1 %v7822_v63  ;;  %8594 = vmatmul.mubr.bf16.gmra.mrb[196].mxu0 %v15072_v40  ;;  %v7754_v51 = vmax.f32 %v10807_v24, 0.0  ;;  %v12239_v40 = vld [vmem:[%s15666_s7 + $0x60] sm:$0xff]   ;;  %v12241_v24 = vld [vmem:[%s15666_s7 + $0x68] sm:$0xff]  }
 0x518   : > { %v10873_v2 = vadd.f32 %v7627_v34, %v15031_v41  ;;  %v10810_v11 = vadd.f32 %v6857_v7, %v15034_v6  ;;  %v7629_v26 = vpop.f32.mrb[187].mxu1  ;;  %8603 = vmatprep.mubr.bf16.mxu0 %v15101_v9  ;;  %10284 = vmatpush3.bf16.msra.mxu1 %v12236_v1  ;;  %v7756_v43 = vmax.f32 %v10871_v53, 0.0  ;;  %v7755_v20 = vmax.f32 %v10808_v61, 0.0  ;;  %v12240_v63 = vld [vmem:[%s15666_s7 + $0x20] sm:$0xff]  }
 0x519   : > { %v7758_v3 = vmax.f32 %v10809_v25, 0.0  ;;  %v10874_v16 = vadd.f32 %v7629_v26, %v15038_v38  ;;  %10285 = vmatprep.subr.bf16.mxu1 %v12237_v13  ;;  %v7757_v4 = vmax.f32 %v10872_v22, 0.0 }
 0x51a   : > { %v7760_v48 = vmax.f32 %v10873_v2, 0.0  ;;  %v7759_v46 = vmax.f32 %v10810_v11, 0.0 }
 0x51b   : > { %v7826_v9 = vpack.c.bf16 %v7758_v3, %v7754_v51  ;;  %v7761_v55 = vmax.f32 %v10874_v16, 0.0 }
 0x51c   : > { %v15341_v47 = vpack.c.bf16 %v7760_v48, %v7756_v43  ;;  %v7827_v36 = vpack.c.bf16 %v7759_v46, %v7755_v20  ;;  %v6861_v17 = vpop.f32.mrb[188].mxu0  ;;  %10286 = vmatpush3.bf16.msra.mxu1 %v12238_v62 }
 0x51d   : > { %v15346_v29 = vpack.c.bf16 %v7761_v55, %v7757_v4  ;;  %v10811_v57 = vadd.f32 %v6861_v17, %v15027_v8  ;;  %v7633_v18 = vpop.f32.mrb[188].mxu1  ;;  %v6863_v1 = vpop.f32.mrb[189].mxu0  ;;  %10287 = vmatprep.subr.bf16.mxu1 %v12239_v40 }
 0x51e   : > { %v10875_v45 = vadd.f32 %v7633_v18, %v15031_v41  ;;  %v10812_v58 = vadd.f32 %v6863_v1, %v15034_v6  ;;  %v7635_v13 = vpop.f32.mrb[189].mxu1  ;;  %v6865_v53 = vpop.f32.mrb[190].mxu0  ;;  %8530 = vmatprep.mubr.bf16.mxu1 %v7827_v36  ;;  %v12248_v36 = vld [vmem:[%s15668_s9 + $0x8] sm:$0xff]  }
 0x51f   : > { %v10876_v61 = vadd.f32 %v7635_v13, %v15038_v38  ;;  %v10813_v35 = vadd.f32 %v6865_v53, %v15027_v8  ;;  %v7637_v30 = vpop.f32.mrb[190].mxu1  ;;  %v6867_v22 = vpop.f32.mrb[191].mxu0  ;;  %8531 = vmatmul.mubr.bf16.gmra.mrb[200].mxu1 %v7826_v9  ;;  %8604 = vmatmul.mubr.bf16.gmra.mrb[200].mxu0 %v15096_v44  ;;  %v7762_v2 = vmax.f32 %v10811_v57, 0.0  ;;  %v12249_v13 = vld [vmem:[%s15668_s9 + $0x10] sm:$0xff]  }
 0x520   : > { %v10877_v25 = vadd.f32 %v7637_v30, %v15031_v41  ;;  %v10814_v34 = vadd.f32 %v6867_v22, %v15034_v6  ;;  %v7639_v7 = vpop.f32.mrb[191].mxu1  ;;  %8613 = vmatprep.mubr.bf16.mxu0 %v15125_v52  ;;  %10288 = vmatpush3.bf16.msra.mxu1 %v12240_v63  ;;  %v7764_v62 = vmax.f32 %v10875_v45, 0.0  ;;  %v7763_v8 = vmax.f32 %v10812_v58, 0.0  ;;  %v12242_v6 = vld [vmem:[%s15666_s7 + $0x28] sm:$0xff]   ;;  %v12245_v52 = vld [vmem:[%s15666_s7 + $0x78] sm:$0xff]  }
 0x521   : > { %v7766_v11 = vmax.f32 %v10813_v35, 0.0  ;;  %v10878_v26 = vadd.f32 %v7639_v7, %v15038_v38  ;;  %10289 = vmatprep.subr.bf16.mxu1 %v12241_v24  ;;  %v7765_v16 = vmax.f32 %v10876_v61, 0.0  ;;  %v12243_v38 = vld [vmem:[%s15666_s7 + $0x70] sm:$0xff]  }
 0x522   : > { %v7768_v51 = vmax.f32 %v10877_v25, 0.0  ;;  %v7767_v3 = vmax.f32 %v10814_v34, 0.0 }
 0x523   : > { %v7830_v40 = vpack.c.bf16 %v7766_v11, %v7762_v2  ;;  %v7769_v44 = vmax.f32 %v10878_v26, 0.0  ;;  %v12250_v11 = vld [vmem:[%s15668_s9 + $0x18] sm:$0xff]  }
 0x524   : > { %v7832_v43 = vpack.c.bf16 %v7768_v51, %v7764_v62  ;;  %v7831_v41 = vpack.c.bf16 %v7767_v3, %v7763_v8  ;;  %10290 = vmatpush3.bf16.msra.mxu1 %v12242_v6 }
 0x525   : > { %v7833_v20 = vpack.c.bf16 %v7769_v44, %v7765_v16  ;;  %10291 = vmatprep.subr.bf16.mxu1 %v12243_v38 }
 0x526   : > { %8540 = vmatprep.mubr.bf16.mxu1 %v7831_v41 }
 0x527   : > { %8541 = vmatmul.mubr.bf16.gmra.mrb[204].mxu1 %v7830_v40  ;;  %8614 = vmatmul.mubr.bf16.gmra.mrb[204].mxu0 %v15120_v23  ;;  %v12244_v23 = vld [vmem:[%s15666_s7 + $0x30] sm:$0xff]  }
 0x528   : > { %8623 = vmatprep.mubr.bf16.mxu0 %v15149_v12  ;;  %10292 = vmatpush3.bf16.msra.mxu1 %v12244_v23  ;;  %v8026_v12 = vld [vmem:[%s15665_s6] sm:$0x3] }
 0x529   : > { %10293 = vmatprep.subr.bf16.mxu1 %v12245_v52 }
 0x52f   : > { %8624 = vmatmul.mubr.bf16.gmra.mrb[208].mxu0 %v15144_v50  ;;  %v12246_v50 = vld [vmem:[%s15666_s7 + $0x38] sm:$0xff]  }
 0x530   : > { %8633 = vmatprep.mubr.bf16.mxu0 %v15173_v0  ;;  %10294 = vmatpush3.bf16.msra.mxu1 %v12246_v50  ;;  %v15406_v0 = vrot.slane %v8026_v12, %v15811_v28  ;;  %v12247_v28 = vld [vmem:[%s15668_s9] sm:$0xff]  }
 0x531   : > { %10415 = vmatprep.subr.bf16.mxu1 %v12247_v28 }
 0x537   : > { %8634 = vmatmul.mubr.bf16.gmra.mrb[212].mxu0 %v15168_v54  ;;  %v15403_v54 = vrot.slane %v8026_v12, %v15808_v39 }
 0x538   : > { %8643 = vmatprep.mubr.bf16.mxu0 %v15197_v10 }
 0x53f   : > { %8644 = vmatmul.mubr.bf16.gmra.mrb[216].mxu0 %v15192_v49 }
 0x540   : > { %8653 = vmatprep.mubr.bf16.mxu0 %v15221_v19 }
 0x547   : > { %8654 = vmatmul.mubr.bf16.gmra.mrb[220].mxu0 %v15216_v37 }
 0x548   : > { %8663 = vmatprep.mubr.bf16.mxu0 %v15239_v21 }
 0x54f   : > { %8664 = vmatmul.mubr.bf16.gmra.mrb[224].mxu0 %v15237_v32 }
 0x550   : > { %8673 = vmatprep.mubr.bf16.mxu0 %v15251_v56 }
 0x557   : > { %8674 = vmatmul.mubr.bf16.gmra.mrb[228].mxu0 %v15249_v60 }
 0x558   : > { %8683 = vmatprep.mubr.bf16.mxu0 %v15263_v31 }
 0x55f   : > { %8684 = vmatmul.mubr.bf16.gmra.mrb[232].mxu0 %v15261_v33 }
 0x560   : > { %8693 = vmatprep.mubr.bf16.mxu0 %v15275_v14 }
 0x567   : > { %8694 = vmatmul.mubr.bf16.gmra.mrb[236].mxu0 %v15273_v42 }
 0x568   : > { %8703 = vmatprep.mubr.bf16.mxu0 %v15294_v15 }
 0x56f   : > { %8704 = vmatmul.mubr.bf16.gmra.mrb[240].mxu0 %v15289_v5 }
 0x570   : > { %8713 = vmatprep.mubr.bf16.mxu0 %v15320_v27 }
 0x577   : > { %8714 = vmatmul.mubr.bf16.gmra.mrb[244].mxu0 %v15315_v59 }
 0x578   : > { %8723 = vmatprep.mubr.bf16.mxu0 %v15346_v29 }
 0x57f   : > { %8724 = vmatmul.mubr.bf16.gmra.mrb[248].mxu0 %v15341_v47 }
 0x580   : > { %8733 = vmatprep.mubr.bf16.mxu0 %v7833_v20 }
 0x587   : > { %8734 = vmatmul.mubr.bf16.gmra.mrb[252].mxu0 %v7832_v43 }
 0x5e2   : > { %v15408_v49 = vpop.f32.mrb[192].mxu1  ;;  %v8585_v10 = vpop.f32.mrb[192].mxu0 }
 0x5e3   : > { %v10879_v37 = vadd.f32 %v8585_v10, %v15403_v54  ;;  %v15411_v19 = vpop.f32.mrb[193].mxu1  ;;  %v8587_v32 = vpop.f32.mrb[193].mxu0 }
 0x5e4   : > { %v10880_v21 = vadd.f32 %v8587_v32, %v15406_v0  ;;  %v15414_v60 = vpop.f32.mrb[194].mxu1  ;;  %v8589_v56 = vpop.f32.mrb[194].mxu0 }
 0x5e5   : > { %v10881_v33 = vadd.f32 %v8589_v56, %v15403_v54  ;;  %v15417_v39 = vpop.f32.mrb[195].mxu1  ;;  %v8591_v31 = vpop.f32.mrb[195].mxu0  ;;  %v8744_v14 = vmax.f32 %v10879_v37, 0.0 }
 0x5e6   : > { %v10882_v42 = vadd.f32 %v8591_v31, %v15406_v0  ;;  %v8745_v15 = vmax.f32 %v10880_v21, 0.0 }
 0x5e7   : > { %v8746_v5 = vmax.f32 %v10881_v33, 0.0 }
 0x5e8   : > { %v8747_v59 = vmax.f32 %v10882_v42, 0.0 }
 0x5e9   : > { %v8808_v27 = vpack.c.bf16 %v8746_v5, %v8744_v14 }
 0x5ea   : > { %v8809_v48 = vpack.c.bf16 %v8747_v59, %v8745_v15  ;;  %v15423_v46 = vpop.f32.mrb[196].mxu1  ;;  %v8595_v4 = vpop.f32.mrb[196].mxu0 }
 0x5eb   : > { %v10883_v9 = vadd.f32 %v8595_v4, %v15403_v54  ;;  %v15426_v55 = vpop.f32.mrb[197].mxu1  ;;  %v8597_v47 = vpop.f32.mrb[197].mxu0 }
 0x5ec   : > { %v10884_v17 = vadd.f32 %v8597_v47, %v15406_v0  ;;  %v15432_v63 = vpop.f32.mrb[198].mxu1  ;;  %v8599_v29 = vpop.f32.mrb[198].mxu0  ;;  %9071 = vmatprep.mubr.bf16.mxu1 %v8809_v48 }
 0x5ed   : > { %v10885_v57 = vadd.f32 %v8599_v29, %v15403_v54  ;;  %v15435_v18 = vpop.f32.mrb[199].mxu1  ;;  %v8601_v1 = vpop.f32.mrb[199].mxu0  ;;  %9072 = vmatmul.mubr.bf16.vlgmr.msra.gmra.mrb[208].mxu1 %v8808_v27  ;;  %v8748_v45 = vmax.f32 %v10883_v9, 0.0 }
 0x5ee   : > { %v10886_v24 = vadd.f32 %v8601_v1, %v15406_v0  ;;  %10416 = vmatpush3.bf16.msra.mxu1 %v12247_v28  ;;  %v8749_v53 = vmax.f32 %v10884_v17, 0.0 }
 0x5ef   : > { %v8750_v58 = vmax.f32 %v10885_v57, 0.0  ;;  %10417 = vmatprep.subr.bf16.mxu1 %v12248_v36 }
 0x5f0   : > { %v8751_v61 = vmax.f32 %v10886_v24, 0.0 }
 0x5f1   : > { %v8810_v35 = vpack.c.bf16 %v8750_v58, %v8748_v45 }
 0x5f2   : > { %v8811_v30 = vpack.c.bf16 %v8751_v61, %v8749_v53  ;;  %v15441_v22 = vpop.f32.mrb[200].mxu1  ;;  %v8605_v25 = vpop.f32.mrb[200].mxu0  ;;  %10418 = vmatpush3.bf16.msra.mxu1 %v12248_v36 }
 0x5f3   : > { %v10887_v34 = vadd.f32 %v8605_v25, %v15403_v54  ;;  %v15444_v7 = vpop.f32.mrb[201].mxu1  ;;  %v8607_v2 = vpop.f32.mrb[201].mxu0  ;;  %10419 = vmatprep.subr.bf16.mxu1 %v12249_v13 }
 0x5f4   : > { %v10888_v26 = vadd.f32 %v8607_v2, %v15406_v0  ;;  %v15450_v62 = vpop.f32.mrb[202].mxu1  ;;  %v8609_v8 = vpop.f32.mrb[202].mxu0  ;;  %9079 = vmatprep.mubr.bf16.mxu1 %v8811_v30 }
 0x5f5   : > { %v10889_v51 = vadd.f32 %v8609_v8, %v15403_v54  ;;  %v15453_v3 = vpop.f32.mrb[203].mxu1  ;;  %v8611_v16 = vpop.f32.mrb[203].mxu0  ;;  %9080 = vmatmul.mubr.bf16.gmra.mrb[212].mxu1 %v8810_v35  ;;  %v8752_v44 = vmax.f32 %v10887_v34, 0.0 }
 0x5f6   : > { %v10890_v40 = vadd.f32 %v8611_v16, %v15406_v0  ;;  %10420 = vmatpush3.bf16.msra.mxu1 %v12249_v13  ;;  %v8753_v41 = vmax.f32 %v10888_v26, 0.0 }
 0x5f7   : > { %v8754_v43 = vmax.f32 %v10889_v51, 0.0  ;;  %10421 = vmatprep.subr.bf16.mxu1 %v12250_v11 }
 0x5f8   : > { %v8755_v20 = vmax.f32 %v10890_v40, 0.0 }
 0x5f9   : > { %v8812_v6 = vpack.c.bf16 %v8754_v43, %v8752_v44 }
 0x5fa   : > { %v8813_v38 = vpack.c.bf16 %v8755_v20, %v8753_v41  ;;  %v15456_v23 = vpop.f32.mrb[204].mxu1  ;;  %v8615_v52 = vpop.f32.mrb[204].mxu0  ;;  %10422 = vmatpush3.bf16.msra.mxu1 %v12250_v11 }
 0x5fb   : > { %v10891_v50 = vadd.f32 %v8615_v52, %v15403_v54  ;;  %v15459_v12 = vpop.f32.mrb[205].mxu1  ;;  %v8617_v10 = vpop.f32.mrb[205].mxu0 }
 0x5fc   : > { %v10892_v37 = vadd.f32 %v8617_v10, %v15406_v0  ;;  %v15462_v32 = vpop.f32.mrb[206].mxu1  ;;  %v8619_v21 = vpop.f32.mrb[206].mxu0  ;;  %9087 = vmatprep.mubr.bf16.mxu1 %v8813_v38 }
 0x5fd   : > { %v10893_v56 = vadd.f32 %v8619_v21, %v15403_v54  ;;  %v15465_v33 = vpop.f32.mrb[207].mxu1  ;;  %v8621_v31 = vpop.f32.mrb[207].mxu0  ;;  %9088 = vmatmul.mubr.bf16.gmra.mrb[216].mxu1 %v8812_v6  ;;  %v8756_v42 = vmax.f32 %v10891_v50, 0.0 }
 0x5fe   : > { %v10894_v28 = vadd.f32 %v8621_v31, %v15406_v0  ;;  %v8757_v5 = vmax.f32 %v10892_v37, 0.0 }
 0x5ff   : > { %v8758_v14 = vmax.f32 %v10893_v56, 0.0 }
 0x600   : > { %v8759_v15 = vmax.f32 %v10894_v28, 0.0 }
 0x601   : > { %v8814_v59 = vpack.c.bf16 %v8758_v14, %v8756_v42 }
 0x602   : > { %v8815_v27 = vpack.c.bf16 %v8759_v15, %v8757_v5  ;;  %v8625_v48 = vpop.f32.mrb[208].mxu0 }
 0x603   : > { %v10895_v4 = vadd.f32 %v8625_v48, %v15403_v54  ;;  %v8627_v9 = vpop.f32.mrb[209].mxu0 }
 0x604   : > { %v10896_v47 = vadd.f32 %v8627_v9, %v15406_v0  ;;  %v8629_v36 = vpop.f32.mrb[210].mxu0  ;;  %9095 = vmatprep.mubr.bf16.mxu1 %v8815_v27 }
 0x605   : > { %v10897_v17 = vadd.f32 %v8629_v36, %v15403_v54  ;;  %v8631_v29 = vpop.f32.mrb[211].mxu0  ;;  %9096 = vmatmul.mubr.bf16.gmra.mrb[220].mxu1 %v8814_v59  ;;  %v8760_v1 = vmax.f32 %v10895_v4, 0.0 }
 0x606   : > { %v10898_v57 = vadd.f32 %v8631_v29, %v15406_v0  ;;  %v8761_v45 = vmax.f32 %v10896_v47, 0.0 }
 0x607   : > { %v8762_v24 = vmax.f32 %v10897_v17, 0.0 }
 0x608   : > { %v8763_v58 = vmax.f32 %v10898_v57, 0.0 }
 0x609   : > { %v8816_v13 = vpack.c.bf16 %v8762_v24, %v8760_v1 }
 0x60a   : > { %v8817_v53 = vpack.c.bf16 %v8763_v58, %v8761_v45  ;;  %v8635_v61 = vpop.f32.mrb[212].mxu0 }
 0x60b   : > { %v10899_v35 = vadd.f32 %v8635_v61, %v15403_v54  ;;  %v8637_v30 = vpop.f32.mrb[213].mxu0 }
 0x60c   : > { %v10900_v25 = vadd.f32 %v8637_v30, %v15406_v0  ;;  %v8639_v34 = vpop.f32.mrb[214].mxu0  ;;  %9103 = vmatprep.mubr.bf16.mxu1 %v8817_v53 }
 0x60d   : > { %v10901_v2 = vadd.f32 %v8639_v34, %v15403_v54  ;;  %v8641_v11 = vpop.f32.mrb[215].mxu0  ;;  %9104 = vmatmul.mubr.bf16.gmra.mrb[224].mxu1 %v8816_v13  ;;  %v8764_v8 = vmax.f32 %v10899_v35, 0.0 }
 0x60e   : > { %v10902_v26 = vadd.f32 %v8641_v11, %v15406_v0  ;;  %v8765_v16 = vmax.f32 %v10900_v25, 0.0 }
 0x60f   : > { %v8766_v51 = vmax.f32 %v10901_v2, 0.0 }
 0x610   : > { %v8767_v40 = vmax.f32 %v10902_v26, 0.0 }
 0x611   : > { %v8818_v44 = vpack.c.bf16 %v8766_v51, %v8764_v8 }
 0x612   : > { %v8819_v43 = vpack.c.bf16 %v8767_v40, %v8765_v16  ;;  %v8645_v41 = vpop.f32.mrb[216].mxu0 }
 0x613   : > { %v10903_v20 = vadd.f32 %v8645_v41, %v15403_v54  ;;  %v8647_v6 = vpop.f32.mrb[217].mxu0 }
 0x614   : > { %v10904_v38 = vadd.f32 %v8647_v6, %v15406_v0  ;;  %v8649_v52 = vpop.f32.mrb[218].mxu0  ;;  %9111 = vmatprep.mubr.bf16.mxu1 %v8819_v43 }
 0x615   : > { %v10905_v50 = vadd.f32 %v8649_v52, %v15403_v54  ;;  %v8651_v10 = vpop.f32.mrb[219].mxu0  ;;  %9112 = vmatmul.mubr.bf16.gmra.mrb[228].mxu1 %v8818_v44  ;;  %v8768_v21 = vmax.f32 %v10903_v20, 0.0 }
 0x616   : > { %v10906_v37 = vadd.f32 %v8651_v10, %v15406_v0  ;;  %v8769_v31 = vmax.f32 %v10904_v38, 0.0 }
 0x617   : > { %v8770_v56 = vmax.f32 %v10905_v50, 0.0 }
 0x618   : > { %v8771_v28 = vmax.f32 %v10906_v37, 0.0 }
 0x619   : > { %v8820_v42 = vpack.c.bf16 %v8770_v56, %v8768_v21 }
 0x61a   : > { %v8821_v14 = vpack.c.bf16 %v8771_v28, %v8769_v31  ;;  %v8655_v5 = vpop.f32.mrb[220].mxu0 }
 0x61b   : > { %v10907_v15 = vadd.f32 %v8655_v5, %v15403_v54  ;;  %v8657_v59 = vpop.f32.mrb[221].mxu0 }
 0x61c   : > { %v10908_v27 = vadd.f32 %v8657_v59, %v15406_v0  ;;  %v8659_v48 = vpop.f32.mrb[222].mxu0  ;;  %9119 = vmatprep.mubr.bf16.mxu1 %v8821_v14 }
 0x61d   : > { %v10909_v4 = vadd.f32 %v8659_v48, %v15403_v54  ;;  %v8661_v9 = vpop.f32.mrb[223].mxu0  ;;  %9120 = vmatmul.mubr.bf16.gmra.mrb[232].mxu1 %v8820_v42  ;;  %v8772_v36 = vmax.f32 %v10907_v15, 0.0 }
 0x61e   : > { %v10910_v47 = vadd.f32 %v8661_v9, %v15406_v0  ;;  %v8773_v29 = vmax.f32 %v10908_v27, 0.0 }
 0x61f   : > { %v8774_v17 = vmax.f32 %v10909_v4, 0.0 }
 0x620   : > { %v8775_v57 = vmax.f32 %v10910_v47, 0.0 }
 0x621   : > { %v8822_v1 = vpack.c.bf16 %v8774_v17, %v8772_v36 }
 0x622   : > { %v8823_v24 = vpack.c.bf16 %v8775_v57, %v8773_v29  ;;  %v8665_v45 = vpop.f32.mrb[224].mxu0 }
 0x623   : > { %v10911_v58 = vadd.f32 %v8665_v45, %v15403_v54  ;;  %v8667_v13 = vpop.f32.mrb[225].mxu0 }
 0x624   : > { %v10912_v53 = vadd.f32 %v8667_v13, %v15406_v0  ;;  %v8669_v61 = vpop.f32.mrb[226].mxu0  ;;  %9127 = vmatprep.mubr.bf16.mxu1 %v8823_v24 }
 0x625   : > { %v10913_v35 = vadd.f32 %v8669_v61, %v15403_v54  ;;  %v8671_v30 = vpop.f32.mrb[227].mxu0  ;;  %9128 = vmatmul.mubr.bf16.gmra.mrb[236].mxu1 %v8822_v1  ;;  %v8776_v34 = vmax.f32 %v10911_v58, 0.0 }
 0x626   : > { %v10914_v25 = vadd.f32 %v8671_v30, %v15406_v0  ;;  %v8777_v11 = vmax.f32 %v10912_v53, 0.0 }
 0x627   : > { %v8778_v2 = vmax.f32 %v10913_v35, 0.0 }
 0x628   : > { %v8779_v26 = vmax.f32 %v10914_v25, 0.0 }
 0x629   : > { %v8824_v8 = vpack.c.bf16 %v8778_v2, %v8776_v34  ;;  %v8513_v34 = vadd.f32 %v15408_v49, %v15403_v54 }
 0x62a   : > { %v8825_v51 = vpack.c.bf16 %v8779_v26, %v8777_v11  ;;  %v8675_v16 = vpop.f32.mrb[228].mxu0  ;;  %v8515_v11 = vadd.f32 %v15411_v19, %v15406_v0 }
 0x62b   : > { %v10915_v40 = vadd.f32 %v8675_v16, %v15403_v54  ;;  %v8677_v44 = vpop.f32.mrb[229].mxu0 }
 0x62c   : > { %v10916_v43 = vadd.f32 %v8677_v44, %v15406_v0  ;;  %v8679_v41 = vpop.f32.mrb[230].mxu0  ;;  %9135 = vmatprep.mubr.bf16.mxu1 %v8825_v51  ;;  %v8517_v51 = vadd.f32 %v15414_v60, %v15403_v54  ;;  %v12251_v44 = vld [vmem:[%s15668_s9 + $0x20] sm:$0xff]  }
 0x62d   : > { %v10917_v20 = vadd.f32 %v8679_v41, %v15403_v54  ;;  %v8681_v6 = vpop.f32.mrb[231].mxu0  ;;  %9136 = vmatmul.mubr.bf16.gmra.mrb[240].mxu1 %v8824_v8  ;;  %v8780_v52 = vmax.f32 %v10915_v40, 0.0  ;;  %10423 = vmatprep.subr.bf16.mxu1 %v12251_v44 }
 0x62e   : > { %v10918_v38 = vadd.f32 %v8681_v6, %v15406_v0  ;;  %v8781_v10 = vmax.f32 %v10916_v43, 0.0  ;;  %v8519_v43 = vadd.f32 %v15417_v39, %v15406_v0  ;;  %10424 = vmatpush3.bf16.msra.mxu1 %v12251_v44  ;;  %v8523_v39 = vadd.f32 %v15423_v46, %v15403_v54 }
 0x62f   : > { %v8782_v50 = vmax.f32 %v10917_v20, 0.0  ;;  %v8529_v46 = vadd.f32 %v15435_v18, %v15406_v0  ;;  %v8533_v18 = vadd.f32 %v15441_v22, %v15403_v54  ;;  %v8549_v44 = vadd.f32 %v15465_v33, %v15406_v0 }
 0x630   : > { %v8783_v37 = vmax.f32 %v10918_v38, 0.0 }
 0x631   : > { %v8826_v21 = vpack.c.bf16 %v8782_v50, %v8780_v52  ;;  %v12252_v52 = vld [vmem:[%s15668_s9 + $0x28] sm:$0xff]  }
 0x632   : > { %v8827_v56 = vpack.c.bf16 %v8783_v37, %v8781_v10  ;;  %v8685_v31 = vpop.f32.mrb[232].mxu0  ;;  %10425 = vmatprep.subr.bf16.mxu1 %v12252_v52 }
 0x633   : > { %v10919_v28 = vadd.f32 %v8685_v31, %v15403_v54  ;;  %v8687_v42 = vpop.f32.mrb[233].mxu0  ;;  %10426 = vmatpush3.bf16.msra.mxu1 %v12252_v52 }
 0x634   : > { %v10920_v14 = vadd.f32 %v8687_v42, %v15406_v0  ;;  %v8689_v5 = vpop.f32.mrb[234].mxu0  ;;  %9143 = vmatprep.mubr.bf16.mxu1 %v8827_v56 }
 0x635   : > { %v10921_v15 = vadd.f32 %v8689_v5, %v15403_v54  ;;  %v8691_v59 = vpop.f32.mrb[235].mxu0  ;;  %9144 = vmatmul.mubr.bf16.gmra.mrb[244].mxu1 %v8826_v21  ;;  %v8784_v48 = vmax.f32 %v10919_v28, 0.0  ;;  %v8525_v21 = vadd.f32 %v15426_v55, %v15406_v0  ;;  %v8527_v28 = vadd.f32 %v15432_v63, %v15403_v54  ;;  %v12253_v5 = vld [vmem:[%s15668_s9 + $0x30] sm:$0xff]  }
 0x636   : > { %v10922_v27 = vadd.f32 %v8691_v59, %v15406_v0  ;;  %v8785_v9 = vmax.f32 %v10920_v14, 0.0  ;;  %10427 = vmatprep.subr.bf16.mxu1 %v12253_v5 }
 0x637   : > { %v8786_v4 = vmax.f32 %v10921_v15, 0.0  ;;  %10428 = vmatpush3.bf16.msra.mxu1 %v12253_v5 }
 0x638   : > { %v8787_v47 = vmax.f32 %v10922_v27, 0.0 }
 0x639   : > { %v8828_v36 = vpack.c.bf16 %v8786_v4, %v8784_v48 }
 0x63a   : > { %v8829_v17 = vpack.c.bf16 %v8787_v47, %v8785_v9  ;;  %v8695_v29 = vpop.f32.mrb[236].mxu0  ;;  %v12254_v9 = vld [vmem:[%s15668_s9 + $0x38] sm:$0xff]  }
 0x63b   : > { %v10923_v57 = vadd.f32 %v8695_v29, %v15403_v54  ;;  %v8697_v1 = vpop.f32.mrb[237].mxu0  ;;  %10429 = vmatprep.subr.bf16.mxu1 %v12254_v9  ;;  %v8535_v29 = vadd.f32 %v15444_v7, %v15406_v0 }
 0x63c   : > { %v10924_v24 = vadd.f32 %v8697_v1, %v15406_v0  ;;  %v8699_v45 = vpop.f32.mrb[238].mxu0  ;;  %9151 = vmatprep.mubr.bf16.mxu1 %v8829_v17  ;;  %10430 = vmatpush3.bf16.msra.mxu1 %v12254_v9 }
 0x63d   : > { %v10925_v58 = vadd.f32 %v8699_v45, %v15403_v54  ;;  %v8701_v13 = vpop.f32.mrb[239].mxu0  ;;  %9152 = vmatmul.mubr.bf16.gmra.mrb[248].mxu1 %v8828_v36  ;;  %v8788_v61 = vmax.f32 %v10923_v57, 0.0 }
 0x63e   : > { %v10926_v53 = vadd.f32 %v8701_v13, %v15406_v0  ;;  %v8789_v30 = vmax.f32 %v10924_v24, 0.0  ;;  %v8537_v24 = vadd.f32 %v15450_v62, %v15403_v54  ;;  %v8539_v13 = vadd.f32 %v15453_v3, %v15406_v0 }
 0x63f   : > { %v8790_v35 = vmax.f32 %v10925_v58, 0.0 }
 0x640   : > { %v8791_v25 = vmax.f32 %v10926_v53, 0.0 }
 0x641   : > { %v8830_v2 = vpack.c.bf16 %v8790_v35, %v8788_v61 }
 0x642   : > { %v8831_v26 = vpack.c.bf16 %v8791_v25, %v8789_v30  ;;  %v8705_v8 = vpop.f32.mrb[240].mxu0 }
 0x643   : > { %v8706_v16 = vadd.f32 %v8705_v8, %v8513_v34  ;;  %v8707_v40 = vpop.f32.mrb[241].mxu0 }
 0x644   : > { %v8708_v41 = vadd.f32 %v8707_v40, %v8515_v11  ;;  %v8709_v49 = vpop.f32.mrb[242].mxu0  ;;  %9159 = vmatprep.mubr.bf16.mxu1 %v8831_v26  ;;  %v8543_v11 = vadd.f32 %v15456_v23, %v15403_v54  ;;  %v8545_v26 = vadd.f32 %v15459_v12, %v15406_v0  ;;  %v15547_v0 = vld [vmem:[%s15667_s8] ss:$0 sm:$0xff] }
 0x645   : > { %v8710_v20 = vadd.f32 %v8709_v49, %v8517_v51  ;;  %v8711_v6 = vpop.f32.mrb[243].mxu0  ;;  %9160 = vmatmul.mubr.bf16.gmra.mrb[252].mxu1 %v8830_v2  ;;  %v8792_v38 = vmax.f32 %v8706_v16, 0.0  ;;  %v8547_v51 = vadd.f32 %v15462_v32, %v15403_v54 }
 0x646   : > { %v8712_v19 = vadd.f32 %v8711_v6, %v8519_v43  ;;  %v8793_v50 = vmax.f32 %v8708_v41, 0.0 }
 0x647   : > { %v8794_v60 = vmax.f32 %v8710_v20, 0.0 }
 0x648   : > { %v8795_v10 = vmax.f32 %v8712_v19, 0.0 }
 0x649   : > { %v8832_v37 = vpack.c.bf16 %v8794_v60, %v8792_v38 }
 0x64a   : > { %v8833_v56 = vpack.c.bf16 %v8795_v10, %v8793_v50  ;;  %v8715_v31 = vpop.f32.mrb[244].mxu0 }
 0x64b   : > { %v8716_v42 = vadd.f32 %v8715_v31, %v8523_v39  ;;  %v8717_v14 = vpop.f32.mrb[245].mxu0 }
 0x64c   : > { %v8718_v15 = vadd.f32 %v8717_v14, %v8525_v21  ;;  %v8719_v59 = vpop.f32.mrb[246].mxu0  ;;  %9167 = vmatprep.mubr.bf16.mxu1 %v8833_v56 }
 0x64d   : > { %v8720_v27 = vadd.f32 %v8719_v59, %v8527_v28  ;;  %v8721_v55 = vpop.f32.mrb[247].mxu0  ;;  %9168 = vmatmul.mubr.bf16.gmra.mrb[0].mxu1 %v8832_v37  ;;  %v8796_v4 = vmax.f32 %v8716_v42, 0.0 }
 0x64e   : > { %v8722_v48 = vadd.f32 %v8721_v55, %v8529_v46  ;;  %v8797_v47 = vmax.f32 %v8718_v15, 0.0 }
 0x64f   : > { %v8798_v63 = vmax.f32 %v8720_v27, 0.0 }
 0x650   : > { %v8799_v36 = vmax.f32 %v8722_v48, 0.0 }
 0x651   : > { %v8834_v17 = vpack.c.bf16 %v8798_v63, %v8796_v4 }
 0x652   : > { %v8835_v57 = vpack.c.bf16 %v8799_v36, %v8797_v47  ;;  %v8725_v1 = vpop.f32.mrb[248].mxu0 }
 0x653   : > { %v8726_v45 = vadd.f32 %v8725_v1, %v8533_v18  ;;  %v8727_v58 = vpop.f32.mrb[249].mxu0 }
 0x654   : > { %v8728_v53 = vadd.f32 %v8727_v58, %v8535_v29  ;;  %v8729_v61 = vpop.f32.mrb[250].mxu0  ;;  %9175 = vmatprep.mubr.bf16.mxu1 %v8835_v57 }
 0x655   : > { %v8730_v22 = vadd.f32 %v8729_v61, %v8537_v24  ;;  %v8731_v35 = vpop.f32.mrb[251].mxu0  ;;  %9176 = vmatmul.mubr.bf16.gmra.mrb[4].mxu1 %v8834_v17  ;;  %v8800_v25 = vmax.f32 %v8726_v45, 0.0 }
 0x656   : > { %v8732_v30 = vadd.f32 %v8731_v35, %v8539_v13  ;;  %v8801_v34 = vmax.f32 %v8728_v53, 0.0 }
 0x657   : > { %v8802_v7 = vmax.f32 %v8730_v22, 0.0 }
 0x658   : > { %v8803_v2 = vmax.f32 %v8732_v30, 0.0 }
 0x659   : > { %v8836_v62 = vpack.c.bf16 %v8802_v7, %v8800_v25 }
 0x65a   : > { %v8837_v8 = vpack.c.bf16 %v8803_v2, %v8801_v34  ;;  %v8735_v3 = vpop.f32.mrb[252].mxu0 }
 0x65b   : > { %v8736_v16 = vadd.f32 %v8735_v3, %v8543_v11  ;;  %v8737_v40 = vpop.f32.mrb[253].mxu0 }
 0x65c   : > { %v8738_v43 = vadd.f32 %v8737_v40, %v8545_v26  ;;  %v8739_v41 = vpop.f32.mrb[254].mxu0  ;;  %9183 = vmatprep.mubr.bf16.mxu1 %v8837_v8 }
 0x65d   : > { %v8740_v49 = vadd.f32 %v8739_v41, %v8547_v51  ;;  %v8741_v20 = vpop.f32.mrb[255].mxu0  ;;  %9184 = vmatmul.mubr.bf16.gmra.mrb[8].mxu1 %v8836_v62  ;;  %v8804_v6 = vmax.f32 %v8736_v16, 0.0 }
 0x65e   : > { %v8742_v23 = vadd.f32 %v8741_v20, %v8549_v44  ;;  %v8805_v12 = vmax.f32 %v8738_v43, 0.0 }
 0x65f   : > { %v8806_v19 = vmax.f32 %v8740_v49, 0.0 }
 0x660   : > { %v8807_v38 = vmax.f32 %v8742_v23, 0.0 }
 0x661   : > { %v8838_v60 = vpack.c.bf16 %v8806_v19, %v8804_v6 }
 0x662   : > { %v8839_v52 = vpack.c.bf16 %v8807_v38, %v8805_v12 }
 0x664   : > { %9191 = vmatprep.mubr.bf16.mxu1 %v8839_v52 }
 0x665   : > { %9192 = vmatmul.mubr.bf16.gmra.mrb[12].mxu1 %v8838_v60 }
 0x6c0   : > { %v10295_v54 = vpop.f32.mrb[208].mxu1 }
 0x6c1   : > { %v10296_v32 = vpop.f32.mrb[209].mxu1 }
 0x6c2   : > { %v10297_v33 = vadd.f32 %v10296_v32, %v10295_v54  ;;  %v10298_v50 = vpop.f32.mrb[210].mxu1 }
 0x6c3   : > { %v10299_v10 = vpop.f32.mrb[211].mxu1 }
 0x6c4   : > { %v9074_v39 = vadd.f32 %v10297_v33, %v15547_v0  ;;  %v10300_v37 = vadd.f32 %v10299_v10, %v10298_v50 }
 0x6c6   : > { %v9077_v21 = vadd.f32 %v10300_v37, %v15547_v0  ;;  %v9200_v56 = vmax.f32 %v9074_v39, 0.0 }
 0x6c8   : > { %v9201_v31 = vmax.f32 %v9077_v21, 0.0  ;;  %v10301_v28 = vpop.f32.mrb[212].mxu1 }
 0x6c9   : > { %v10302_v42 = vpop.f32.mrb[213].mxu1 }
 0x6ca   : > { %v10303_v14 = vadd.f32 %v10302_v42, %v10301_v28  ;;  %v10304_v5 = vpop.f32.mrb[214].mxu1  ;;  %v9232_v46 = vpack.c.bf16 %v9201_v31, %v9200_v56 }
 0x6cb   : > { %v10305_v15 = vpop.f32.mrb[215].mxu1 }
 0x6cc   : > { %v9082_v59 = vadd.f32 %v10303_v14, %v15547_v0  ;;  %v10306_v27 = vadd.f32 %v10305_v15, %v10304_v5  ;;  %10431 = vmatprep.mubr.bf16.mxu1 %v9232_v46 }
 0x6ce   : > { %v9085_v55 = vadd.f32 %v10306_v27, %v15547_v0  ;;  %v9202_v48 = vmax.f32 %v9082_v59, 0.0 }
 0x6d0   : > { %v9203_v4 = vmax.f32 %v9085_v55, 0.0  ;;  %v10307_v63 = vpop.f32.mrb[216].mxu1 }
 0x6d1   : > { %v10308_v9 = vpop.f32.mrb[217].mxu1 }
 0x6d2   : > { %v9233_v47 = vpack.c.bf16 %v9203_v4, %v9202_v48  ;;  %v10309_v36 = vadd.f32 %v10308_v9, %v10307_v63  ;;  %v10310_v18 = vpop.f32.mrb[218].mxu1 }
 0x6d3   : > { %v10311_v17 = vpop.f32.mrb[219].mxu1 }
 0x6d4   : > { %v9090_v29 = vadd.f32 %v10309_v36, %v15547_v0  ;;  %v10312_v57 = vadd.f32 %v10311_v17, %v10310_v18  ;;  %10432 = vmatmul.mubr.bf16.vlgmr.msra.gmra.mrb[16].mxu1 %v9233_v47 }
 0x6d6   : > { %v9093_v1 = vadd.f32 %v10312_v57, %v15547_v0  ;;  %v9204_v24 = vmax.f32 %v9090_v29, 0.0 }
 0x6d8   : > { %v9205_v45 = vmax.f32 %v9093_v1, 0.0  ;;  %v10313_v58 = vpop.f32.mrb[220].mxu1 }
 0x6d9   : > { %v10314_v13 = vpop.f32.mrb[221].mxu1 }
 0x6da   : > { %v10315_v53 = vadd.f32 %v10314_v13, %v10313_v58  ;;  %v10316_v61 = vpop.f32.mrb[222].mxu1  ;;  %v9234_v22 = vpack.c.bf16 %v9205_v45, %v9204_v24 }
 0x6db   : > { %v10317_v35 = vpop.f32.mrb[223].mxu1 }
 0x6dc   : > { %v9098_v30 = vadd.f32 %v10315_v53, %v15547_v0  ;;  %v10318_v25 = vadd.f32 %v10317_v35, %v10316_v61  ;;  %10435 = vmatprep.mubr.bf16.mxu1 %v9234_v22 }
 0x6de   : > { %v9101_v7 = vadd.f32 %v10318_v25, %v15547_v0  ;;  %v9206_v34 = vmax.f32 %v9098_v30, 0.0 }
 0x6e0   : > { %v9207_v2 = vmax.f32 %v9101_v7, 0.0  ;;  %v10319_v11 = vpop.f32.mrb[224].mxu1 }
 0x6e1   : > { %v10320_v62 = vpop.f32.mrb[225].mxu1 }
 0x6e2   : > { %v9235_v26 = vpack.c.bf16 %v9207_v2, %v9206_v34  ;;  %v10321_v8 = vadd.f32 %v10320_v62, %v10319_v11  ;;  %v10322_v3 = vpop.f32.mrb[226].mxu1 }
 0x6e3   : > { %v10323_v51 = vpop.f32.mrb[227].mxu1 }
 0x6e4   : > { %v9106_v16 = vadd.f32 %v10321_v8, %v15547_v0  ;;  %v10324_v40 = vadd.f32 %v10323_v51, %v10322_v3  ;;  %10436 = vmatmul.mubr.bf16.gmra.mrb[20].mxu1 %v9235_v26 }
 0x6e6   : > { %v9109_v44 = vadd.f32 %v10324_v40, %v15547_v0  ;;  %v9208_v43 = vmax.f32 %v9106_v16, 0.0 }
 0x6e8   : > { %v9209_v41 = vmax.f32 %v9109_v44, 0.0  ;;  %v10325_v49 = vpop.f32.mrb[228].mxu1 }
 0x6e9   : > { %v10326_v20 = vpop.f32.mrb[229].mxu1 }
 0x6ea   : > { %v10327_v23 = vadd.f32 %v10326_v20, %v10325_v49  ;;  %v10328_v6 = vpop.f32.mrb[230].mxu1  ;;  %v9236_v19 = vpack.c.bf16 %v9209_v41, %v9208_v43 }
 0x6eb   : > { %v10329_v12 = vpop.f32.mrb[231].mxu1 }
 0x6ec   : > { %v9114_v38 = vadd.f32 %v10327_v23, %v15547_v0  ;;  %v10330_v60 = vadd.f32 %v10329_v12, %v10328_v6  ;;  %10439 = vmatprep.mubr.bf16.mxu1 %v9236_v19 }
 0x6ee   : > { %v9117_v52 = vadd.f32 %v10330_v60, %v15547_v0  ;;  %v9210_v54 = vmax.f32 %v9114_v38, 0.0 }
 0x6f0   : > { %v9211_v32 = vmax.f32 %v9117_v52, 0.0  ;;  %v10331_v33 = vpop.f32.mrb[232].mxu1 }
 0x6f1   : > { %v10332_v50 = vpop.f32.mrb[233].mxu1 }
 0x6f2   : > { %v9237_v10 = vpack.c.bf16 %v9211_v32, %v9210_v54  ;;  %v10333_v39 = vadd.f32 %v10332_v50, %v10331_v33  ;;  %v10334_v37 = vpop.f32.mrb[234].mxu1 }
 0x6f3   : > { %v10335_v21 = vpop.f32.mrb[235].mxu1 }
 0x6f4   : > { %v9122_v56 = vadd.f32 %v10333_v39, %v15547_v0  ;;  %v10336_v31 = vadd.f32 %v10335_v21, %v10334_v37  ;;  %10440 = vmatmul.mubr.bf16.gmra.mrb[24].mxu1 %v9237_v10 }
 0x6f6   : > { %v9125_v28 = vadd.f32 %v10336_v31, %v15547_v0  ;;  %v9212_v42 = vmax.f32 %v9122_v56, 0.0 }
 0x6f8   : > { %v9213_v14 = vmax.f32 %v9125_v28, 0.0  ;;  %v10337_v5 = vpop.f32.mrb[236].mxu1 }
 0x6f9   : > { %v10338_v46 = vpop.f32.mrb[237].mxu1 }
 0x6fa   : > { %v10339_v15 = vadd.f32 %v10338_v46, %v10337_v5  ;;  %v10340_v59 = vpop.f32.mrb[238].mxu1  ;;  %v9238_v27 = vpack.c.bf16 %v9213_v14, %v9212_v42 }
 0x6fb   : > { %v10341_v55 = vpop.f32.mrb[239].mxu1 }
 0x6fc   : > { %v9130_v48 = vadd.f32 %v10339_v15, %v15547_v0  ;;  %v10342_v4 = vadd.f32 %v10341_v55, %v10340_v59  ;;  %10443 = vmatprep.mubr.bf16.mxu1 %v9238_v27 }
 0x6fe   : > { %v9133_v63 = vadd.f32 %v10342_v4, %v15547_v0  ;;  %v9214_v9 = vmax.f32 %v9130_v48, 0.0 }
 0x700   : > { %v9215_v47 = vmax.f32 %v9133_v63, 0.0  ;;  %v10343_v36 = vpop.f32.mrb[240].mxu1 }
 0x701   : > { %v10344_v18 = vpop.f32.mrb[241].mxu1 }
 0x702   : > { %v9239_v17 = vpack.c.bf16 %v9215_v47, %v9214_v9  ;;  %v10345_v29 = vadd.f32 %v10344_v18, %v10343_v36  ;;  %v10346_v57 = vpop.f32.mrb[242].mxu1 }
 0x703   : > { %v10347_v1 = vpop.f32.mrb[243].mxu1 }
 0x704   : > { %v9138_v24 = vadd.f32 %v10345_v29, %v15547_v0  ;;  %v10348_v45 = vadd.f32 %v10347_v1, %v10346_v57  ;;  %10444 = vmatmul.mubr.bf16.gmra.mrb[28].mxu1 %v9239_v17 }
 0x706   : > { %v9141_v58 = vadd.f32 %v10348_v45, %v15547_v0  ;;  %v9216_v13 = vmax.f32 %v9138_v24, 0.0 }
 0x708   : > { %v9217_v53 = vmax.f32 %v9141_v58, 0.0  ;;  %v10349_v61 = vpop.f32.mrb[244].mxu1 }
 0x709   : > { %v10350_v22 = vpop.f32.mrb[245].mxu1 }
 0x70a   : > { %v10351_v35 = vadd.f32 %v10350_v22, %v10349_v61  ;;  %v10352_v30 = vpop.f32.mrb[246].mxu1  ;;  %v9240_v25 = vpack.c.bf16 %v9217_v53, %v9216_v13 }
 0x70b   : > { %v10353_v7 = vpop.f32.mrb[247].mxu1 }
 0x70c   : > { %v9146_v34 = vadd.f32 %v10351_v35, %v15547_v0  ;;  %v10354_v2 = vadd.f32 %v10353_v7, %v10352_v30  ;;  %10447 = vmatprep.mubr.bf16.mxu1 %v9240_v25 }
 0x70e   : > { %v9149_v11 = vadd.f32 %v10354_v2, %v15547_v0  ;;  %v9218_v62 = vmax.f32 %v9146_v34, 0.0 }
 0x710   : > { %v9219_v26 = vmax.f32 %v9149_v11, 0.0  ;;  %v10355_v8 = vpop.f32.mrb[248].mxu1 }
 0x711   : > { %v10356_v3 = vpop.f32.mrb[249].mxu1 }
 0x712   : > { %v9241_v51 = vpack.c.bf16 %v9219_v26, %v9218_v62  ;;  %v10357_v16 = vadd.f32 %v10356_v3, %v10355_v8  ;;  %v10358_v40 = vpop.f32.mrb[250].mxu1 }
 0x713   : > { %v10359_v44 = vpop.f32.mrb[251].mxu1 }
 0x714   : > { %v9154_v43 = vadd.f32 %v10357_v16, %v15547_v0  ;;  %v10360_v41 = vadd.f32 %v10359_v44, %v10358_v40  ;;  %10448 = vmatmul.mubr.bf16.gmra.mrb[32].mxu1 %v9241_v51  ;;  %v15585_v40 = vld [vmem:[%s15669_s10] ss:$0 sm:$0xff] }
 0x716   : > { %v9157_v49 = vadd.f32 %v10360_v41, %v15547_v0  ;;  %v9220_v20 = vmax.f32 %v9154_v43, 0.0 }
 0x718   : > { %v9221_v23 = vmax.f32 %v9157_v49, 0.0  ;;  %v10361_v6 = vpop.f32.mrb[252].mxu1 }
 0x719   : > { %v10362_v19 = vpop.f32.mrb[253].mxu1 }
 0x71a   : > { %v10363_v12 = vadd.f32 %v10362_v19, %v10361_v6  ;;  %v10364_v38 = vpop.f32.mrb[254].mxu1  ;;  %v9242_v60 = vpack.c.bf16 %v9221_v23, %v9220_v20 }
 0x71b   : > { %v10365_v52 = vpop.f32.mrb[255].mxu1 }
 0x71c   : > { %v9162_v54 = vadd.f32 %v10363_v12, %v15547_v0  ;;  %v10366_v32 = vadd.f32 %v10365_v52, %v10364_v38  ;;  %10451 = vmatprep.mubr.bf16.mxu1 %v9242_v60 }
 0x71e   : > { %v9165_v33 = vadd.f32 %v10366_v32, %v15547_v0  ;;  %v9222_v50 = vmax.f32 %v9162_v54, 0.0 }
 0x720   : > { %v9223_v10 = vmax.f32 %v9165_v33, 0.0  ;;  %v10367_v39 = vpop.f32.mrb[0].mxu1 }
 0x721   : > { %v10368_v37 = vpop.f32.mrb[1].mxu1 }
 0x722   : > { %v9243_v21 = vpack.c.bf16 %v9223_v10, %v9222_v50  ;;  %v10369_v56 = vadd.f32 %v10368_v37, %v10367_v39  ;;  %v10370_v31 = vpop.f32.mrb[2].mxu1 }
 0x723   : > { %v10371_v28 = vpop.f32.mrb[3].mxu1 }
 0x724   : > { %v9170_v42 = vadd.f32 %v10369_v56, %v15547_v0  ;;  %v10372_v14 = vadd.f32 %v10371_v28, %v10370_v31  ;;  %10452 = vmatmul.mubr.bf16.gmra.mrb[36].mxu1 %v9243_v21 }
 0x726   : > { %v9173_v5 = vadd.f32 %v10372_v14, %v15547_v0  ;;  %v9224_v46 = vmax.f32 %v9170_v42, 0.0 }
 0x728   : > { %v9225_v15 = vmax.f32 %v9173_v5, 0.0  ;;  %v10373_v59 = vpop.f32.mrb[4].mxu1 }
 0x729   : > { %v10374_v27 = vpop.f32.mrb[5].mxu1 }
 0x72a   : > { %v10375_v55 = vadd.f32 %v10374_v27, %v10373_v59  ;;  %v10376_v48 = vpop.f32.mrb[6].mxu1  ;;  %v9244_v4 = vpack.c.bf16 %v9225_v15, %v9224_v46 }
 0x72b   : > { %v10377_v63 = vpop.f32.mrb[7].mxu1 }
 0x72c   : > { %v9178_v9 = vadd.f32 %v10375_v55, %v15547_v0  ;;  %v10378_v47 = vadd.f32 %v10377_v63, %v10376_v48  ;;  %10455 = vmatprep.mubr.bf16.mxu1 %v9244_v4 }
 0x72e   : > { %v9181_v36 = vadd.f32 %v10378_v47, %v15547_v0  ;;  %v9226_v18 = vmax.f32 %v9178_v9, 0.0 }
 0x730   : > { %v9227_v17 = vmax.f32 %v9181_v36, 0.0  ;;  %v10379_v29 = vpop.f32.mrb[8].mxu1 }
 0x731   : > { %v10380_v57 = vpop.f32.mrb[9].mxu1 }
 0x732   : > { %v9245_v1 = vpack.c.bf16 %v9227_v17, %v9226_v18  ;;  %v10381_v24 = vadd.f32 %v10380_v57, %v10379_v29  ;;  %v10382_v45 = vpop.f32.mrb[10].mxu1 }
 0x733   : > { %v10383_v58 = vpop.f32.mrb[11].mxu1 }
 0x734   : > { %v9186_v13 = vadd.f32 %v10381_v24, %v15547_v0  ;;  %v10384_v53 = vadd.f32 %v10383_v58, %v10382_v45  ;;  %10456 = vmatmul.mubr.bf16.gmra.mrb[40].mxu1 %v9245_v1 }
 0x736   : > { %v9189_v61 = vadd.f32 %v10384_v53, %v15547_v0  ;;  %v9228_v22 = vmax.f32 %v9186_v13, 0.0 }
 0x738   : > { %v9229_v35 = vmax.f32 %v9189_v61, 0.0  ;;  %v10385_v30 = vpop.f32.mrb[12].mxu1 }
 0x739   : > { %v10386_v25 = vpop.f32.mrb[13].mxu1 }
 0x73a   : > { %v10387_v7 = vadd.f32 %v10386_v25, %v10385_v30  ;;  %v10388_v34 = vpop.f32.mrb[14].mxu1  ;;  %v9246_v2 = vpack.c.bf16 %v9229_v35, %v9228_v22 }
 0x73b   : > { %v10389_v11 = vpop.f32.mrb[15].mxu1 }
 0x73c   : > { %v9194_v62 = vadd.f32 %v10387_v7, %v15547_v0  ;;  %v10390_v26 = vadd.f32 %v10389_v11, %v10388_v34  ;;  %10459 = vmatprep.mubr.bf16.mxu1 %v9246_v2 }
 0x73e   : > { %v9197_v8 = vadd.f32 %v10390_v26, %v15547_v0  ;;  %v9230_v3 = vmax.f32 %v9194_v62, 0.0 }
 0x740   : > { %v9231_v51 = vmax.f32 %v9197_v8, 0.0 }
 0x742   : > { %v9247_v16 = vpack.c.bf16 %v9231_v51, %v9230_v3 }
 0x744   : > { %10460 = vmatmul.mubr.bf16.gmra.mrb[44].mxu1 %v9247_v16 }
 0x7a7   : > { %v10433_v0 = vpop.f32.mrb[16].mxu1 }
 0x7a8   : > { %v9394_v44 = vadd.f32 %v10433_v0, %v15585_v40  ;;  %v9385_v43 = vpop.f32.mrb[17].mxu1 }
 0x7a9   : > { %v9386_v41 = vadd.f32 %v15585_v40, %v9385_v43  ;;  %v10434_v49 = vpop.f32.mrb[18].mxu1 }
 0x7aa   : > { %9514 = vst [vmem:[%s15590_s15 + $0x10] sm:$0xff] %v9394_v44  ;;  %v9397_v20 = vadd.f32 %v10434_v49, %v15585_v40  ;;  %v9388_v23 = vpop.f32.mrb[19].mxu1 }
 0x7ab   : > { %9512 = vst [vmem:[%s15590_s15] sm:$0xff] %v9386_v41  ;;  %v9389_v6 = vadd.f32 %v15585_v40, %v9388_v23 }
 0x7ac   : > { %9515 = vst [vmem:[%s15590_s15 + $0x18] sm:$0xff] %v9397_v20 }
 0x7ad   : > { %9513 = vst [vmem:[%s15590_s15 + $0x8] sm:$0xff] %v9389_v6 }
 0x7b7   : > { %v10437_v19 = vpop.f32.mrb[20].mxu1 }
 0x7b8   : > { %v9410_v12 = vadd.f32 %v10437_v19, %v15585_v40  ;;  %v9401_v38 = vpop.f32.mrb[21].mxu1 }
 0x7b9   : > { %v9402_v60 = vadd.f32 %v15585_v40, %v9401_v38  ;;  %v10438_v52 = vpop.f32.mrb[22].mxu1 }
 0x7ba   : > { %9518 = vst [vmem:[%s15590_s15 + $0x30] sm:$0xff] %v9410_v12  ;;  %v9413_v54 = vadd.f32 %v10438_v52, %v15585_v40  ;;  %v9404_v32 = vpop.f32.mrb[23].mxu1 }
 0x7bb   : > { %9516 = vst [vmem:[%s15590_s15 + $0x20] sm:$0xff] %v9402_v60  ;;  %v9405_v33 = vadd.f32 %v15585_v40, %v9404_v32 }
 0x7bc   : > { %9519 = vst [vmem:[%s15590_s15 + $0x38] sm:$0xff] %v9413_v54 }
 0x7bd   : > { %9517 = vst [vmem:[%s15590_s15 + $0x28] sm:$0xff] %v9405_v33 }
 0x7c7   : > { %v10441_v50 = vpop.f32.mrb[24].mxu1 }
 0x7c8   : > { %v9426_v10 = vadd.f32 %v10441_v50, %v15585_v40  ;;  %v9417_v39 = vpop.f32.mrb[25].mxu1 }
 0x7c9   : > { %v9418_v37 = vadd.f32 %v15585_v40, %v9417_v39  ;;  %v10442_v21 = vpop.f32.mrb[26].mxu1 }
 0x7ca   : > { %9522 = vst [vmem:[%s15590_s15 + $0x50] sm:$0xff] %v9426_v10  ;;  %v9429_v56 = vadd.f32 %v10442_v21, %v15585_v40  ;;  %v9420_v31 = vpop.f32.mrb[27].mxu1 }
 0x7cb   : > { %9520 = vst [vmem:[%s15590_s15 + $0x40] sm:$0xff] %v9418_v37  ;;  %v9421_v28 = vadd.f32 %v15585_v40, %v9420_v31 }
 0x7cc   : > { %9523 = vst [vmem:[%s15590_s15 + $0x58] sm:$0xff] %v9429_v56 }
 0x7cd   : > { %9521 = vst [vmem:[%s15590_s15 + $0x48] sm:$0xff] %v9421_v28 }
 0x7d7   : > { %v10445_v42 = vpop.f32.mrb[28].mxu1 }
 0x7d8   : > { %v9442_v14 = vadd.f32 %v10445_v42, %v15585_v40  ;;  %v9433_v5 = vpop.f32.mrb[29].mxu1 }
 0x7d9   : > { %v9434_v46 = vadd.f32 %v15585_v40, %v9433_v5  ;;  %v10446_v15 = vpop.f32.mrb[30].mxu1 }
 0x7da   : > { %9526 = vst [vmem:[%s15590_s15 + $0x70] sm:$0xff] %v9442_v14  ;;  %v9445_v59 = vadd.f32 %v10446_v15, %v15585_v40  ;;  %v9436_v27 = vpop.f32.mrb[31].mxu1 }
 0x7db   : > { %9524 = vst [vmem:[%s15590_s15 + $0x60] sm:$0xff] %v9434_v46  ;;  %v9437_v55 = vadd.f32 %v15585_v40, %v9436_v27 }
 0x7dc   : > { %9527 = vst [vmem:[%s15590_s15 + $0x78] sm:$0xff] %v9445_v59 }
 0x7dd   : > { %9525 = vst [vmem:[%s15590_s15 + $0x68] sm:$0xff] %v9437_v55 }
 0x7e7   : > { %v10449_v48 = vpop.f32.mrb[32].mxu1 }
 0x7e8   : > { %v9458_v4 = vadd.f32 %v10449_v48, %v15585_v40  ;;  %v9449_v63 = vpop.f32.mrb[33].mxu1 }
 0x7e9   : > { %v9450_v9 = vadd.f32 %v15585_v40, %v9449_v63  ;;  %v10450_v47 = vpop.f32.mrb[34].mxu1 }
 0x7ea   : > { %9530 = vst [vmem:[%s15590_s15 + $0x90] sm:$0xff] %v9458_v4  ;;  %v9461_v36 = vadd.f32 %v10450_v47, %v15585_v40  ;;  %v9452_v18 = vpop.f32.mrb[35].mxu1 }
 0x7eb   : > { %9528 = vst [vmem:[%s15590_s15 + $0x80] sm:$0xff] %v9450_v9  ;;  %v9453_v17 = vadd.f32 %v15585_v40, %v9452_v18 }
 0x7ec   : > { %9531 = vst [vmem:[%s15590_s15 + $0x98] sm:$0xff] %v9461_v36 }
 0x7ed   : > { %9529 = vst [vmem:[%s15590_s15 + $0x88] sm:$0xff] %v9453_v17 }
 0x7f7   : > { %v10453_v29 = vpop.f32.mrb[36].mxu1 }
 0x7f8   : > { %v9474_v57 = vadd.f32 %v10453_v29, %v15585_v40  ;;  %v9465_v1 = vpop.f32.mrb[37].mxu1 }
 0x7f9   : > { %v9466_v24 = vadd.f32 %v15585_v40, %v9465_v1  ;;  %v10454_v45 = vpop.f32.mrb[38].mxu1 }
 0x7fa   : > { %9534 = vst [vmem:[%s15590_s15 + $0xb0] sm:$0xff] %v9474_v57  ;;  %v9477_v58 = vadd.f32 %v10454_v45, %v15585_v40  ;;  %v9468_v13 = vpop.f32.mrb[39].mxu1 }
 0x7fb   : > { %9532 = vst [vmem:[%s15590_s15 + $0xa0] sm:$0xff] %v9466_v24  ;;  %v9469_v53 = vadd.f32 %v15585_v40, %v9468_v13 }
 0x7fc   : > { %9535 = vst [vmem:[%s15590_s15 + $0xb8] sm:$0xff] %v9477_v58 }
 0x7fd   : > { %9533 = vst [vmem:[%s15590_s15 + $0xa8] sm:$0xff] %v9469_v53 }
 0x807   : > { %v10457_v61 = vpop.f32.mrb[40].mxu1 }
 0x808   : > { %v9490_v22 = vadd.f32 %v10457_v61, %v15585_v40  ;;  %v9481_v35 = vpop.f32.mrb[41].mxu1 }
 0x809   : > { %v9482_v30 = vadd.f32 %v15585_v40, %v9481_v35  ;;  %v10458_v25 = vpop.f32.mrb[42].mxu1 }
 0x80a   : > { %9538 = vst [vmem:[%s15590_s15 + $0xd0] sm:$0xff] %v9490_v22  ;;  %v9493_v7 = vadd.f32 %v10458_v25, %v15585_v40  ;;  %v9484_v34 = vpop.f32.mrb[43].mxu1 }
 0x80b   : > { %9536 = vst [vmem:[%s15590_s15 + $0xc0] sm:$0xff] %v9482_v30  ;;  %v9485_v2 = vadd.f32 %v15585_v40, %v9484_v34 }
 0x80c   : > { %9539 = vst [vmem:[%s15590_s15 + $0xd8] sm:$0xff] %v9493_v7 }
 0x80d   : > { %9537 = vst [vmem:[%s15590_s15 + $0xc8] sm:$0xff] %v9485_v2 }
 0x817   : > { %v10461_v11 = vpop.f32.mrb[44].mxu1 }
 0x818   : > { %v9506_v62 = vadd.f32 %v10461_v11, %v15585_v40  ;;  %v9497_v26 = vpop.f32.mrb[45].mxu1 }
 0x819   : > { %v9498_v8 = vadd.f32 %v15585_v40, %v9497_v26  ;;  %v10462_v3 = vpop.f32.mrb[46].mxu1 }
 0x81a   : > { %9542 = vst [vmem:[%s15590_s15 + $0xf0] sm:$0xff] %v9506_v62  ;;  %v9509_v51 = vadd.f32 %v10462_v3, %v15585_v40  ;;  %v9500_v16 = vpop.f32.mrb[47].mxu1 }
 0x81b   : > { %9540 = vst [vmem:[%s15590_s15 + $0xe0] sm:$0xff] %v9498_v8  ;;  %v9501_v0 = vadd.f32 %v15585_v40, %v9500_v16 }
 0x81c   : > { %9543 = vst [vmem:[%s15590_s15 + $0xf8] sm:$0xff] %v9509_v51 }
 0x81d   : > { %9541 = vst [vmem:[%s15590_s15 + $0xe8] sm:$0xff] %v9501_v0 }
 0x81e PF: > { %s21_s17 = sadd.s32 1, %s12326_s17  }
 0x81f   : > { %p18_p4 = scmp.ge.s32.totalorder %s21_s17, 4  }
 0x821   :  { %20 = sbr.rel (!%p18_p4) target bundleno = 1 (0x1), region = 94 }

</bundles_post_ra>
